<compile_context>
chip_gen: v6e
topology: v6e:2x2x1
jax: 0.10.0
libtpu: 0.0.40
codegen_flags: <defaults>
</compile_context>

<pallas_src>
import functools
import math
from typing import NamedTuple

import jax
import jax.numpy as jnp
from jax import lax
from jax.experimental import pallas as pl
from jax.experimental.pallas import tpu as pltpu

LANE = 128        # lane width of the fused head output (binary + category pad)
_CH_ALIGN = 16    # stored channel-width granularity for intermediate activations


def _round_up(x, m):
    return ((x + m - 1) // m) * m


def _chip_config():
    """(vmem_limit_bytes or None, K-packing target) per TPU generation."""
    kind = ""
    try:
        kind = jax.devices()[0].device_kind.lower()
    except Exception:
        pass
    if "v7" in kind:
        return 48 * 1024 * 1024, 256     # v7x: 64 MiB physical VMEM, 256-deep MXU
    if "v6" in kind:
        return 96 * 1024 * 1024, 256     # v6e: 128 MiB physical, 256-deep MXU
    if "v5e" in kind or "v5 lite" in kind or "v5lite" in kind:
        return 96 * 1024 * 1024, 128     # v5e: 128-deep MXU, HBM-bound
    if "v5" in kind:
        return 96 * 1024 * 1024, 256
    return None, 256                     # unknown chip: keep compiler defaults


_VMEM_LIMIT, _TARGET_K = _chip_config()


def _mosaic_params(dim_sem):
    kwargs = dict(dimension_semantics=dim_sem)
    if _VMEM_LIMIT is not None:
        kwargs["vmem_limit_bytes"] = _VMEM_LIMIT
    return pltpu.CompilerParams(**kwargs)


class ConvCfg(NamedTuple):
    stride: int
    pad: int
    kw: int
    cin_s: int        # stored input channel width (= prev layer's stored cout)
    cout: int         # true output channels
    cout_s: int       # stored output channel width
    has_bias: bool
    use_bn: bool
    use_act: bool
    groups: tuple     # tuple of groups; each group: tuple of (plane, dh, dw, kh, kw)


# --------------------------- static tap schedule ---------------------------- #

def _make_groups(k, s, cin_s, target_k):
    """Taps grouped by stride-phase plane, then chunked so each group's packed
    matmul K (= taps_in_group * cin_s) is close to target_k."""
    by_plane = {}
    for kh in range(k):
        for kw in range(k):
            p = (kh % s) * s + (kw % s)
            by_plane.setdefault(p, []).append((p, kh // s, kw // s, kh, kw))
    g = max(1, target_k // max(cin_s, 1))
    groups = []
    for p in sorted(by_plane):
        taps = by_plane[p]
        for i in range(0, len(taps), g):
            groups.append(tuple(taps[i:i + g]))
    return tuple(groups)


# ------------------------------ Pallas kernels ------------------------------ #

def _make_conv_kernel(cfg: ConvCfg, n_tile, ho, wo, eps=1e-5, neg_slope=0.2):
    """Fused conv (all planes/taps) + bias + BatchNorm(training) + LeakyReLU."""
    groups = cfg.groups
    cin_s, cout_s = cfg.cin_s, cfg.cout_s
    m = n_tile * ho * wo
    aligned = (cin_s % 128) == 0

    def kernel(x_ref, w_ref, *rest):
        idx = 0
        b_ref = gamma_ref = beta_ref = None
        if cfg.has_bias:
            b_ref = rest[idx]; idx += 1
        if cfg.use_bn:
            gamma_ref, beta_ref = rest[idx], rest[idx + 1]; idx += 2
        o_ref = rest[idx]

        # Register-carried f32 accumulator: every plane / tap group of this
        # layer is reduced inside this one invocation (no per-tap VMEM RMW).
        acc = jnp.zeros((m, cout_s), jnp.float32)
        for gi, group in enumerate(groups):
            wins = []
            for (pp, dh, dw, _, _) in group:                       # static offsets
                wins.append(x_ref[pp, :, dh:dh + ho, dw:dw + wo, :])
            if len(wins) == 1:
                lhs = wins[0].reshape(m, cin_s)
            elif aligned:
                lhs = jnp.concatenate(wins, axis=-1).reshape(m, len(group) * cin_s)
            else:
                # unaligned lane concat done in 32-bit, cast back to bf16 for MXU
                lhs = jnp.concatenate([w_.astype(jnp.float32) for w_ in wins],
                                      axis=-1)
                lhs = lhs.reshape(m, len(group) * cin_s).astype(jnp.bfloat16)
            kg = len(group) * cin_s
            acc = acc + jnp.dot(lhs, w_ref[gi, 0:kg, :],
                                preferred_element_type=jnp.float32)

        y = acc
        if cfg.has_bias:
            y = y + b_ref[...]
        if cfg.use_bn:
            # BatchNorm2d training mode: biased stats over all M = N*Ho*Wo rows
            # (whole batch resident here), folded into one scale + shift.
            mean = jnp.mean(y, axis=0, keepdims=True)
            var = jnp.mean(jnp.square(y - mean), axis=0, keepdims=True)
            scale = gamma_ref[...] * lax.rsqrt(var + eps)
            y = y * scale + (beta_ref[...] - mean * scale)
        if cfg.use_act:
            y = jnp.where(y >= 0.0, y, neg_slope * y)
        o_ref[...] = y.reshape(n_tile, ho, wo, cout_s).astype(o_ref.dtype)

    return kernel


# ------------------------------ layer wrappers ------------------------------ #

def conv_layer(cfg: ConvCfg, arr, x):
    """x: (N, H, W, cin_s) bf16 NHWC -> (N, Ho, Wo, cout_s) bf16."""
    n, h, w, cin_s = x.shape
    assert cin_s == cfg.cin_s
    s, p, k = cfg.stride, cfg.pad, cfg.kw
    ho = (h + 2 * p - k) // s + 1
    wo = (w + 2 * p - k) // s + 1
    hq = ho + (k - 1) // s
    wq = wo + (k - 1) // s
    pad_h_hi = s * hq - h - p
    pad_w_hi = s * wq - w - p
    assert pad_h_hi >= 0 and pad_w_hi >= 0

    # Stride-phase planes: one ~1x-bytes rearrangement (no im2col in HBM).
    xp = jnp.pad(x, ((0, 0), (p, pad_h_hi), (p, pad_w_hi), (0, 0)))
    planes = xp.reshape(n, hq, s, wq, s, cin_s)
    planes = planes.transpose(2, 4, 0, 1, 3, 5).reshape(s * s, n, hq, wq, cin_s)

    # Batch tiling ("parallel"): BN layers keep the whole batch in one step so
    # the training-mode statistics stay exact.
    n_tile = n if cfg.use_bn else 1
    n_tiles = n // n_tile
    cout_s = cfg.cout_s
    w_packed = arr["w"]                              # (n_groups, kmax, cout_s) bf16
    n_groups, kmax, _ = w_packed.shape

    in_specs = [
        pl.BlockSpec((s * s, n_tile, hq, wq, cin_s), lambda i: (0, i, 0, 0, 0)),
        pl.BlockSpec((n_groups, kmax, cout_s), lambda i: (0, 0, 0)),
    ]
    ops = [planes, w_packed]
    if cfg.has_bias:
        ops.append(arr["b"])
        in_specs.append(pl.BlockSpec((1, cout_s), lambda i: (0, 0)))
    if cfg.use_bn:
        ops += [arr["gamma"], arr["beta"]]
        in_specs += [pl.BlockSpec((1, cout_s), lambda i: (0, 0)),
                     pl.BlockSpec((1, cout_s), lambda i: (0, 0))]

    kernel = _make_conv_kernel(cfg, n_tile, ho, wo)
    k_total = sum(len(g) for g in cfg.groups) * cin_s
    flops = int(2 * n * ho * wo * k_total * cout_s)
    bytes_accessed = int(planes.size * 2 + w_packed.size * 2
                         + n * ho * wo * cout_s * 2)

    out = pl.pallas_call(
        kernel,
        out_shape=jax.ShapeDtypeStruct((n, ho, wo, cout_s), jnp.bfloat16),
        grid=(n_tiles,),
        in_specs=in_specs,
        out_specs=pl.BlockSpec((n_tile, ho, wo, cout_s), lambda i: (i, 0, 0, 0)),
        compiler_params=_mosaic_params(("parallel",)),
        cost_estimate=pl.CostEstimate(
            flops=flops,
            transcendentals=cout_s if cfg.use_bn else 0,
            bytes_accessed=bytes_accessed),
    )(*ops)
    return out


def fused_heads(feats, w, b):
    """feats: (N, F_pad) bf16; w: (F_pad, 128) bf16; b: (1, 128) f32 -> (N, 128) f32.

    K-tiled reduction grid (P3 accumulator) so it scales to large F."""
    n, f_pad = feats.shape
    k_tile = f_pad if f_pad <= 4096 else 2048
    assert f_pad % k_tile == 0
    kt = f_pad // k_tile

    def kernel(x_ref, w_ref, b_ref, o_ref, acc_ref):
        ki = pl.program_id(0)

        @pl.when(ki == 0)
        def _init():
            acc_ref[...] = jnp.zeros_like(acc_ref)

        acc_ref[...] += jnp.dot(x_ref[...], w_ref[...],
                                preferred_element_type=jnp.float32)

        @pl.when(ki == pl.num_programs(0) - 1)
        def _finalize():
            o_ref[...] = acc_ref[...] + b_ref[...]

    return pl.pallas_call(
        kernel,
        out_shape=jax.ShapeDtypeStruct((n, LANE), jnp.float32),
        grid=(kt,),
        in_specs=[pl.BlockSpec((n, k_tile), lambda ki: (0, ki)),
                  pl.BlockSpec((k_tile, LANE), lambda ki: (ki, 0)),
                  pl.BlockSpec((1, LANE), lambda ki: (0, 0))],
        out_specs=pl.BlockSpec((n, LANE), lambda ki: (0, 0)),
        scratch_shapes=[pltpu.VMEM((n, LANE), jnp.float32)],
        compiler_params=_mosaic_params(("arbitrary",)),
        cost_estimate=pl.CostEstimate(
            flops=int(2 * n * f_pad * LANE), transcendentals=0,
            bytes_accessed=int(n * f_pad * 2 + f_pad * LANE * 2 + n * LANE * 4)),
    )(feats, w, b)


# --------------------------- model construction ----------------------------- #

def init_torch_params(key, *, input_nc, embedding_num, ndf, image_size,
                      final_channels, sequence_count):
    """Deterministic synthetic params in PyTorch layout (shapes match nn.Module)."""
    kw = 5
    layer_defs = [(input_nc, ndf, 2, True, False, True)]
    nf_mult = 1
    for n in range(1, 3):
        nf_prev, nf_mult = nf_mult, min(2 ** n, 8)
        layer_defs.append((ndf * nf_prev, ndf * nf_mult, 2, False, True, True))
    layer_defs.append((ndf * nf_mult, final_channels, 1, False, True, True))
    fc = final_channels
    if sequence_count > 8:
        layer_defs.append((final_channels, 1, 1, True, False, False))
        fc = 1

    params = {"convs": []}
    for (cin, cout, stride, has_bias, has_bn, has_act) in layer_defs:
        key, k_w, k_b = jax.random.split(key, 3)
        params["convs"].append(dict(
            w=0.1 * jax.random.normal(k_w, (cout, cin, kw, kw), jnp.float32),
            b=(0.01 * jax.random.normal(k_b, (cout,), jnp.float32)
               if has_bias else None),
            gamma=jnp.ones((cout,), jnp.float32) if has_bn else None,
            beta=jnp.zeros((cout,), jnp.float32) if has_bn else None,
            stride=stride, pad=2, kw=kw, cin=cin, cout=cout,
            has_bias=has_bias, use_bn=has_bn, use_act=has_act))

    sp = image_size
    for _ in range(3):
        sp = math.ceil(sp / 2)
    final_features = fc * sp * sp

    key, k1, k2, k3, k4 = jax.random.split(key, 5)
    params["binary_w"] = 0.1 * jax.random.normal(k1, (1, final_features),
                                                 jnp.float32)
    params["binary_b"] = 0.01 * jax.random.normal(k2, (1,), jnp.float32)
    params["catagory_w"] = 0.1 * jax.random.normal(
        k3, (embedding_num, final_features), jnp.float32)
    params["catagory_b"] = 0.01 * jax.random.normal(k4, (embedding_num,),
                                                    jnp.float32)
    params["meta"] = dict(fc=fc, final_spatial=sp, embedding_num=embedding_num,
                          input_nc=input_nc)
    return params


def pack_params(tp, *, target_k=_TARGET_K):
    """PyTorch-layout params -> (static config, packed bf16/f32 arrays)."""
    meta = tp["meta"]
    cfgs, conv_arrays = [], []
    prev_c = meta["input_nc"]           # stored channel width of running activation
    for layer in tp["convs"]:
        cin, cout = layer["cin"], layer["cout"]
        k, s = layer["kw"], layer["stride"]
        cout_s = _round_up(cout, _CH_ALIGN)
        groups = _make_groups(k, s, prev_c, target_k)
        kmax = max(len(g) for g in groups) * prev_c

        # torch (Cout, Cin, KH, KW) -> (KH, KW, cin_s, cout_s), zero-padded.
        wt = jnp.transpose(layer["w"], (2, 3, 1, 0))
        wt = jnp.pad(wt, ((0, 0), (0, 0), (0, prev_c - cin), (0, cout_s - cout)))
        w_groups = []
        for grp in groups:
            rows = jnp.concatenate([wt[kh, kw] for (_, _, _, kh, kw) in grp],
                                   axis=0)
            rows = jnp.pad(rows, ((0, kmax - rows.shape[0]), (0, 0)))
            w_groups.append(rows)
        w_packed = jnp.stack(w_groups, axis=0).astype(jnp.bfloat16)

        arr = dict(w=w_packed)
        if layer["has_bias"]:
            arr["b"] = jnp.pad(layer["b"], (0, cout_s - cout)).reshape(1, cout_s)
        if layer["use_bn"]:
            arr["gamma"] = jnp.pad(layer["gamma"], (0, cout_s - cout),
                                   constant_values=1.0).reshape(1, cout_s)
            arr["beta"] = jnp.pad(layer["beta"],
                                  (0, cout_s - cout)).reshape(1, cout_s)
        conv_arrays.append(arr)
        cfgs.append(ConvCfg(stride=s, pad=layer["pad"], kw=k, cin_s=prev_c,
                            cout=cout, cout_s=cout_s, has_bias=layer["has_bias"],
                            use_bn=layer["use_bn"], use_act=layer["use_act"],
                            groups=groups))
        prev_c = cout_s

    # Fused linear heads: permute torch NCHW-flatten weights to the NHWC-flatten
    # order used here; feature (K) dim zero-padded to a 128-multiple.
    fc, sp, emb = meta["fc"], meta["final_spatial"], meta["embedding_num"]
    f_true = fc * sp * sp
    f_pad = _round_up(max(f_true, 1), 128)
    if f_pad > 4096:
        f_pad = _round_up(f_pad, 2048)
    w_heads = jnp.concatenate([tp["binary_w"], tp["catagory_w"]], axis=0)
    w_heads = w_heads.reshape(1 + emb, fc, sp, sp).transpose(2, 3, 1, 0)
    w_heads = w_heads.reshape(f_true, 1 + emb)
    w_heads = jnp.pad(w_heads, ((0, f_pad - f_true), (0, LANE - 1 - emb)))
    w_heads = w_heads.astype(jnp.bfloat16)
    b_heads = jnp.concatenate([tp["binary_b"], tp["catagory_b"]], axis=0)
    b_heads = jnp.pad(b_heads, (0, LANE - 1 - emb)).reshape(1, LANE)

    static = dict(conv_cfgs=tuple(cfgs), embedding_num=emb, fc=fc)
    arrays = dict(convs=conv_arrays, heads=dict(w=w_heads, b=b_heads))
    return static, arrays


# --------------------------------- forward ----------------------------------- #

def discriminator_forward(static, arrays, x_nchw):
    """x_nchw: (N, C, H, W) float32 -> (binary_logits, catagory_logits)."""
    emb = static["embedding_num"]
    fc = static["fc"]
    x = jnp.transpose(x_nchw, (0, 2, 3, 1)).astype(jnp.bfloat16)   # NCHW -> NHWC
    for cfg, arr in zip(static["conv_cfgs"], arrays["convs"]):
        x = conv_layer(cfg, arr, x)
    n = x.shape[0]
    feats = x[..., :fc].reshape(n, -1)          # NHWC flatten of true channels
    f_pad = arrays["heads"]["w"].shape[0]
    feats = jnp.pad(feats, ((0, 0), (0, f_pad - feats.shape[1])))
    logits = fused_heads(feats, arrays["heads"]["w"], arrays["heads"]["b"])
    binary_logits = logits[:, :1]
    catagory_logits = logits[:, 1:1 + emb]
    return binary_logits, catagory_logits


# ----------------------------------- main ------------------------------------ #

if __name__ == "__main__":
    key = jax.random.PRNGKey(0)
    key, kx = jax.random.split(key)

    # small config consistent with the module's constructor
    N, input_nc, image_size = 2, 4, 16
    ndf, embedding_num = 8, 5
    final_channels, sequence_count = 32, 9

    torch_params = init_torch_params(
        key, input_nc=input_nc, embedding_num=embedding_num, ndf=ndf,
        image_size=image_size, final_channels=final_channels,
        sequence_count=sequence_count)
    static, arrays = pack_params(torch_params)

    x = jax.random.normal(kx, (N, input_nc, image_size, image_size),
                          jnp.float32)

    fwd = jax.jit(functools.partial(discriminator_forward, static))
    binary_logits, catagory_logits = fwd(arrays, x)
    jax.block_until_ready((binary_logits, catagory_logits))

    assert binary_logits.shape == (N, 1)
    assert catagory_logits.shape == (N, embedding_num)
    assert bool(jnp.all(jnp.isfinite(binary_logits)))
    assert bool(jnp.all(jnp.isfinite(catagory_logits)))
    print("KERNEL_OK")
</pallas_src>

<mosaic_0001>
module attributes {stable_mosaic.version = 11 : i64} {
  func.func @kernel(%arg0: i32, %arg1: memref<4x1x10x10x4xbf16, #tpu.memory_space<vmem>>, %arg2: memref<4x36x16xbf16, #tpu.memory_space<vmem>>, %arg3: memref<1x16xf32, #tpu.memory_space<vmem>>, %arg4: memref<1x8x8x16xbf16, #tpu.memory_space<vmem>>) attributes {dimension_semantics = [#tpu.dimension_semantics<parallel>], iteration_bounds = array<i64: 2>, scalar_prefetch = 0 : i64, scratch_operands = 0 : i64, tpu.core_type = #tpu.core_type<tc>, window_params = [{transform_indices = @transform_0, window_bounds = array<i64: 4, 1, 10, 10, 4>}, {pipeline_mode = #tpu.pipeline_mode<synchronous>, transform_indices = @transform_1, window_bounds = array<i64: 4, 36, 16>}, {pipeline_mode = #tpu.pipeline_mode<synchronous>, transform_indices = @transform_2, window_bounds = array<i64: 1, 16>}, {transform_indices = @transform_3, window_bounds = array<i64: 1, 8, 8, 16>}]} {
    %cst = arith.constant 0.000000e+00 : f32
    %0 = vector.broadcast %cst : f32 to vector<64x16xf32>
    %c0 = arith.constant 0 : index
    %c0_0 = arith.constant 0 : index
    %c0_1 = arith.constant 0 : index
    %c0_2 = arith.constant 0 : index
    %c0_3 = arith.constant 0 : index
    %1 = vector.load %arg1[%c0, %c0_0, %c0_1, %c0_2, %c0_3] : memref<4x1x10x10x4xbf16, #tpu.memory_space<vmem>>, vector<1x1x8x8x4xbf16>
    %2 = vector.shape_cast %1 : vector<1x1x8x8x4xbf16> to vector<1x8x8x4xbf16>
    %c0_4 = arith.constant 0 : index
    %c0_5 = arith.constant 0 : index
    %c0_6 = arith.constant 0 : index
    %c1 = arith.constant 1 : index
    %c0_7 = arith.constant 0 : index
    %3 = vector.load %arg1[%c0_4, %c0_5, %c0_6, %c1, %c0_7] : memref<4x1x10x10x4xbf16, #tpu.memory_space<vmem>>, vector<1x1x8x8x4xbf16>
    %4 = vector.shape_cast %3 : vector<1x1x8x8x4xbf16> to vector<1x8x8x4xbf16>
    %c0_8 = arith.constant 0 : index
    %c0_9 = arith.constant 0 : index
    %c0_10 = arith.constant 0 : index
    %c2 = arith.constant 2 : index
    %c0_11 = arith.constant 0 : index
    %5 = vector.load %arg1[%c0_8, %c0_9, %c0_10, %c2, %c0_11] : memref<4x1x10x10x4xbf16, #tpu.memory_space<vmem>>, vector<1x1x8x8x4xbf16>
    %6 = vector.shape_cast %5 : vector<1x1x8x8x4xbf16> to vector<1x8x8x4xbf16>
    %c0_12 = arith.constant 0 : index
    %c0_13 = arith.constant 0 : index
    %c1_14 = arith.constant 1 : index
    %c0_15 = arith.constant 0 : index
    %c0_16 = arith.constant 0 : index
    %7 = vector.load %arg1[%c0_12, %c0_13, %c1_14, %c0_15, %c0_16] : memref<4x1x10x10x4xbf16, #tpu.memory_space<vmem>>, vector<1x1x8x8x4xbf16>
    %8 = vector.shape_cast %7 : vector<1x1x8x8x4xbf16> to vector<1x8x8x4xbf16>
    %c0_17 = arith.constant 0 : index
    %c0_18 = arith.constant 0 : index
    %c1_19 = arith.constant 1 : index
    %c1_20 = arith.constant 1 : index
    %c0_21 = arith.constant 0 : index
    %9 = vector.load %arg1[%c0_17, %c0_18, %c1_19, %c1_20, %c0_21] : memref<4x1x10x10x4xbf16, #tpu.memory_space<vmem>>, vector<1x1x8x8x4xbf16>
    %10 = vector.shape_cast %9 : vector<1x1x8x8x4xbf16> to vector<1x8x8x4xbf16>
    %c0_22 = arith.constant 0 : index
    %c0_23 = arith.constant 0 : index
    %c1_24 = arith.constant 1 : index
    %c2_25 = arith.constant 2 : index
    %c0_26 = arith.constant 0 : index
    %11 = vector.load %arg1[%c0_22, %c0_23, %c1_24, %c2_25, %c0_26] : memref<4x1x10x10x4xbf16, #tpu.memory_space<vmem>>, vector<1x1x8x8x4xbf16>
    %12 = vector.shape_cast %11 : vector<1x1x8x8x4xbf16> to vector<1x8x8x4xbf16>
    %c0_27 = arith.constant 0 : index
    %c0_28 = arith.constant 0 : index
    %c2_29 = arith.constant 2 : index
    %c0_30 = arith.constant 0 : index
    %c0_31 = arith.constant 0 : index
    %13 = vector.load %arg1[%c0_27, %c0_28, %c2_29, %c0_30, %c0_31] : memref<4x1x10x10x4xbf16, #tpu.memory_space<vmem>>, vector<1x1x8x8x4xbf16>
    %14 = vector.shape_cast %13 : vector<1x1x8x8x4xbf16> to vector<1x8x8x4xbf16>
    %c0_32 = arith.constant 0 : index
    %c0_33 = arith.constant 0 : index
    %c2_34 = arith.constant 2 : index
    %c1_35 = arith.constant 1 : index
    %c0_36 = arith.constant 0 : index
    %15 = vector.load %arg1[%c0_32, %c0_33, %c2_34, %c1_35, %c0_36] : memref<4x1x10x10x4xbf16, #tpu.memory_space<vmem>>, vector<1x1x8x8x4xbf16>
    %16 = vector.shape_cast %15 : vector<1x1x8x8x4xbf16> to vector<1x8x8x4xbf16>
    %c0_37 = arith.constant 0 : index
    %c0_38 = arith.constant 0 : index
    %c2_39 = arith.constant 2 : index
    %c2_40 = arith.constant 2 : index
    %c0_41 = arith.constant 0 : index
    %17 = vector.load %arg1[%c0_37, %c0_38, %c2_39, %c2_40, %c0_41] : memref<4x1x10x10x4xbf16, #tpu.memory_space<vmem>>, vector<1x1x8x8x4xbf16>
    %18 = vector.shape_cast %17 : vector<1x1x8x8x4xbf16> to vector<1x8x8x4xbf16>
    %19 = arith.extf %2 : vector<1x8x8x4xbf16> to vector<1x8x8x4xf32>
    %20 = arith.extf %4 : vector<1x8x8x4xbf16> to vector<1x8x8x4xf32>
    %21 = arith.extf %6 : vector<1x8x8x4xbf16> to vector<1x8x8x4xf32>
    %22 = arith.extf %8 : vector<1x8x8x4xbf16> to vector<1x8x8x4xf32>
    %23 = arith.extf %10 : vector<1x8x8x4xbf16> to vector<1x8x8x4xf32>
    %24 = arith.extf %12 : vector<1x8x8x4xbf16> to vector<1x8x8x4xf32>
    %25 = arith.extf %14 : vector<1x8x8x4xbf16> to vector<1x8x8x4xf32>
    %26 = arith.extf %16 : vector<1x8x8x4xbf16> to vector<1x8x8x4xf32>
    %27 = arith.extf %18 : vector<1x8x8x4xbf16> to vector<1x8x8x4xf32>
    %28 = tpu.concatenate %19, %20, %21, %22, %23, %24, %25, %26, %27 in 3 : vector<1x8x8x4xf32>, vector<1x8x8x4xf32>, vector<1x8x8x4xf32>, vector<1x8x8x4xf32>, vector<1x8x8x4xf32>, vector<1x8x8x4xf32>, vector<1x8x8x4xf32>, vector<1x8x8x4xf32>, vector<1x8x8x4xf32> -> vector<1x8x8x36xf32>
    %29 = vector.shape_cast %28 : vector<1x8x8x36xf32> to vector<64x36xf32>
    %30 = arith.truncf %29 : vector<64x36xf32> to vector<64x36xbf16>
    %c0_42 = arith.constant 0 : index
    %c0_43 = arith.constant 0 : index
    %c0_44 = arith.constant 0 : index
    %31 = vector.load %arg2[%c0_42, %c0_43, %c0_44] : memref<4x36x16xbf16, #tpu.memory_space<vmem>>, vector<1x36x16xbf16>
    %32 = vector.shape_cast %31 : vector<1x36x16xbf16> to vector<36x16xbf16>
    %cst_45 = arith.constant dense<0.000000e+00> : vector<64x16xf32>
    %33 = tpu.matmul %30, %32, %cst_45 {dimension_numbers = #tpu.dot_dimension_numbers<[1], [0], [0], [1], [0, 0, 1, 1], [], []>} : vector<64x36xbf16>, vector<36x16xbf16>, vector<64x16xf32> -> vector<64x16xf32>
    %34 = arith.addf %0, %33 : vector<64x16xf32>
    %c1_46 = arith.constant 1 : index
    %c0_47 = arith.constant 0 : index
    %c0_48 = arith.constant 0 : index
    %c0_49 = arith.constant 0 : index
    %c0_50 = arith.constant 0 : index
    %35 = vector.load %arg1[%c1_46, %c0_47, %c0_48, %c0_49, %c0_50] : memref<4x1x10x10x4xbf16, #tpu.memory_space<vmem>>, vector<1x1x8x8x4xbf16>
    %36 = vector.shape_cast %35 : vector<1x1x8x8x4xbf16> to vector<1x8x8x4xbf16>
    %c1_51 = arith.constant 1 : index
    %c0_52 = arith.constant 0 : index
    %c0_53 = arith.constant 0 : index
    %c1_54 = arith.constant 1 : index
    %c0_55 = arith.constant 0 : index
    %37 = vector.load %arg1[%c1_51, %c0_52, %c0_53, %c1_54, %c0_55] : memref<4x1x10x10x4xbf16, #tpu.memory_space<vmem>>, vector<1x1x8x8x4xbf16>
    %38 = vector.shape_cast %37 : vector<1x1x8x8x4xbf16> to vector<1x8x8x4xbf16>
    %c1_56 = arith.constant 1 : index
    %c0_57 = arith.constant 0 : index
    %c1_58 = arith.constant 1 : index
    %c0_59 = arith.constant 0 : index
    %c0_60 = arith.constant 0 : index
    %39 = vector.load %arg1[%c1_56, %c0_57, %c1_58, %c0_59, %c0_60] : memref<4x1x10x10x4xbf16, #tpu.memory_space<vmem>>, vector<1x1x8x8x4xbf16>
    %40 = vector.shape_cast %39 : vector<1x1x8x8x4xbf16> to vector<1x8x8x4xbf16>
    %c1_61 = arith.constant 1 : index
    %c0_62 = arith.constant 0 : index
    %c1_63 = arith.constant 1 : index
    %c1_64 = arith.constant 1 : index
    %c0_65 = arith.constant 0 : index
    %41 = vector.load %arg1[%c1_61, %c0_62, %c1_63, %c1_64, %c0_65] : memref<4x1x10x10x4xbf16, #tpu.memory_space<vmem>>, vector<1x1x8x8x4xbf16>
    %42 = vector.shape_cast %41 : vector<1x1x8x8x4xbf16> to vector<1x8x8x4xbf16>
    %c1_66 = arith.constant 1 : index
    %c0_67 = arith.constant 0 : index
    %c2_68 = arith.constant 2 : index
    %c0_69 = arith.constant 0 : index
    %c0_70 = arith.constant 0 : index
    %43 = vector.load %arg1[%c1_66, %c0_67, %c2_68, %c0_69, %c0_70] : memref<4x1x10x10x4xbf16, #tpu.memory_space<vmem>>, vector<1x1x8x8x4xbf16>
    %44 = vector.shape_cast %43 : vector<1x1x8x8x4xbf16> to vector<1x8x8x4xbf16>
    %c1_71 = arith.constant 1 : index
    %c0_72 = arith.constant 0 : index
    %c2_73 = arith.constant 2 : index
    %c1_74 = arith.constant 1 : index
    %c0_75 = arith.constant 0 : index
    %45 = vector.load %arg1[%c1_71, %c0_72, %c2_73, %c1_74, %c0_75] : memref<4x1x10x10x4xbf16, #tpu.memory_space<vmem>>, vector<1x1x8x8x4xbf16>
    %46 = vector.shape_cast %45 : vector<1x1x8x8x4xbf16> to vector<1x8x8x4xbf16>
    %47 = arith.extf %36 : vector<1x8x8x4xbf16> to vector<1x8x8x4xf32>
    %48 = arith.extf %38 : vector<1x8x8x4xbf16> to vector<1x8x8x4xf32>
    %49 = arith.extf %40 : vector<1x8x8x4xbf16> to vector<1x8x8x4xf32>
    %50 = arith.extf %42 : vector<1x8x8x4xbf16> to vector<1x8x8x4xf32>
    %51 = arith.extf %44 : vector<1x8x8x4xbf16> to vector<1x8x8x4xf32>
    %52 = arith.extf %46 : vector<1x8x8x4xbf16> to vector<1x8x8x4xf32>
    %53 = tpu.concatenate %47, %48, %49, %50, %51, %52 in 3 : vector<1x8x8x4xf32>, vector<1x8x8x4xf32>, vector<1x8x8x4xf32>, vector<1x8x8x4xf32>, vector<1x8x8x4xf32>, vector<1x8x8x4xf32> -> vector<1x8x8x24xf32>
    %54 = vector.shape_cast %53 : vector<1x8x8x24xf32> to vector<64x24xf32>
    %55 = arith.truncf %54 : vector<64x24xf32> to vector<64x24xbf16>
    %c1_76 = arith.constant 1 : index
    %c0_77 = arith.constant 0 : index
    %c0_78 = arith.constant 0 : index
    %56 = vector.load %arg2[%c1_76, %c0_77, %c0_78] : memref<4x36x16xbf16, #tpu.memory_space<vmem>>, vector<1x24x16xbf16>
    %57 = vector.shape_cast %56 : vector<1x24x16xbf16> to vector<24x16xbf16>
    %cst_79 = arith.constant dense<0.000000e+00> : vector<64x16xf32>
    %58 = tpu.matmul %55, %57, %cst_79 {dimension_numbers = #tpu.dot_dimension_numbers<[1], [0], [0], [1], [0, 0, 1, 1], [], []>} : vector<64x24xbf16>, vector<24x16xbf16>, vector<64x16xf32> -> vector<64x16xf32>
    %59 = arith.addf %34, %58 : vector<64x16xf32>
    %c2_80 = arith.constant 2 : index
    %c0_81 = arith.constant 0 : index
    %c0_82 = arith.constant 0 : index
    %c0_83 = arith.constant 0 : index
    %c0_84 = arith.constant 0 : index
    %60 = vector.load %arg1[%c2_80, %c0_81, %c0_82, %c0_83, %c0_84] : memref<4x1x10x10x4xbf16, #tpu.memory_space<vmem>>, vector<1x1x8x8x4xbf16>
    %61 = vector.shape_cast %60 : vector<1x1x8x8x4xbf16> to vector<1x8x8x4xbf16>
    %c2_85 = arith.constant 2 : index
    %c0_86 = arith.constant 0 : index
    %c0_87 = arith.constant 0 : index
    %c1_88 = arith.constant 1 : index
    %c0_89 = arith.constant 0 : index
    %62 = vector.load %arg1[%c2_85, %c0_86, %c0_87, %c1_88, %c0_89] : memref<4x1x10x10x4xbf16, #tpu.memory_space<vmem>>, vector<1x1x8x8x4xbf16>
    %63 = vector.shape_cast %62 : vector<1x1x8x8x4xbf16> to vector<1x8x8x4xbf16>
    %c2_90 = arith.constant 2 : index
    %c0_91 = arith.constant 0 : index
    %c0_92 = arith.constant 0 : index
    %c2_93 = arith.constant 2 : index
    %c0_94 = arith.constant 0 : index
    %64 = vector.load %arg1[%c2_90, %c0_91, %c0_92, %c2_93, %c0_94] : memref<4x1x10x10x4xbf16, #tpu.memory_space<vmem>>, vector<1x1x8x8x4xbf16>
    %65 = vector.shape_cast %64 : vector<1x1x8x8x4xbf16> to vector<1x8x8x4xbf16>
    %c2_95 = arith.constant 2 : index
    %c0_96 = arith.constant 0 : index
    %c1_97 = arith.constant 1 : index
    %c0_98 = arith.constant 0 : index
    %c0_99 = arith.constant 0 : index
    %66 = vector.load %arg1[%c2_95, %c0_96, %c1_97, %c0_98, %c0_99] : memref<4x1x10x10x4xbf16, #tpu.memory_space<vmem>>, vector<1x1x8x8x4xbf16>
    %67 = vector.shape_cast %66 : vector<1x1x8x8x4xbf16> to vector<1x8x8x4xbf16>
    %c2_100 = arith.constant 2 : index
    %c0_101 = arith.constant 0 : index
    %c1_102 = arith.constant 1 : index
    %c1_103 = arith.constant 1 : index
    %c0_104 = arith.constant 0 : index
    %68 = vector.load %arg1[%c2_100, %c0_101, %c1_102, %c1_103, %c0_104] : memref<4x1x10x10x4xbf16, #tpu.memory_space<vmem>>, vector<1x1x8x8x4xbf16>
    %69 = vector.shape_cast %68 : vector<1x1x8x8x4xbf16> to vector<1x8x8x4xbf16>
    %c2_105 = arith.constant 2 : index
    %c0_106 = arith.constant 0 : index
    %c1_107 = arith.constant 1 : index
    %c2_108 = arith.constant 2 : index
    %c0_109 = arith.constant 0 : index
    %70 = vector.load %arg1[%c2_105, %c0_106, %c1_107, %c2_108, %c0_109] : memref<4x1x10x10x4xbf16, #tpu.memory_space<vmem>>, vector<1x1x8x8x4xbf16>
    %71 = vector.shape_cast %70 : vector<1x1x8x8x4xbf16> to vector<1x8x8x4xbf16>
    %72 = arith.extf %61 : vector<1x8x8x4xbf16> to vector<1x8x8x4xf32>
    %73 = arith.extf %63 : vector<1x8x8x4xbf16> to vector<1x8x8x4xf32>
    %74 = arith.extf %65 : vector<1x8x8x4xbf16> to vector<1x8x8x4xf32>
    %75 = arith.extf %67 : vector<1x8x8x4xbf16> to vector<1x8x8x4xf32>
    %76 = arith.extf %69 : vector<1x8x8x4xbf16> to vector<1x8x8x4xf32>
    %77 = arith.extf %71 : vector<1x8x8x4xbf16> to vector<1x8x8x4xf32>
    %78 = tpu.concatenate %72, %73, %74, %75, %76, %77 in 3 : vector<1x8x8x4xf32>, vector<1x8x8x4xf32>, vector<1x8x8x4xf32>, vector<1x8x8x4xf32>, vector<1x8x8x4xf32>, vector<1x8x8x4xf32> -> vector<1x8x8x24xf32>
    %79 = vector.shape_cast %78 : vector<1x8x8x24xf32> to vector<64x24xf32>
    %80 = arith.truncf %79 : vector<64x24xf32> to vector<64x24xbf16>
    %c2_110 = arith.constant 2 : index
    %c0_111 = arith.constant 0 : index
    %c0_112 = arith.constant 0 : index
    %81 = vector.load %arg2[%c2_110, %c0_111, %c0_112] : memref<4x36x16xbf16, #tpu.memory_space<vmem>>, vector<1x24x16xbf16>
    %82 = vector.shape_cast %81 : vector<1x24x16xbf16> to vector<24x16xbf16>
    %cst_113 = arith.constant dense<0.000000e+00> : vector<64x16xf32>
    %83 = tpu.matmul %80, %82, %cst_113 {dimension_numbers = #tpu.dot_dimension_numbers<[1], [0], [0], [1], [0, 0, 1, 1], [], []>} : vector<64x24xbf16>, vector<24x16xbf16>, vector<64x16xf32> -> vector<64x16xf32>
    %84 = arith.addf %59, %83 : vector<64x16xf32>
    %c3 = arith.constant 3 : index
    %c0_114 = arith.constant 0 : index
    %c0_115 = arith.constant 0 : index
    %c0_116 = arith.constant 0 : index
    %c0_117 = arith.constant 0 : index
    %85 = vector.load %arg1[%c3, %c0_114, %c0_115, %c0_116, %c0_117] : memref<4x1x10x10x4xbf16, #tpu.memory_space<vmem>>, vector<1x1x8x8x4xbf16>
    %86 = vector.shape_cast %85 : vector<1x1x8x8x4xbf16> to vector<1x8x8x4xbf16>
    %c3_118 = arith.constant 3 : index
    %c0_119 = arith.constant 0 : index
    %c0_120 = arith.constant 0 : index
    %c1_121 = arith.constant 1 : index
    %c0_122 = arith.constant 0 : index
    %87 = vector.load %arg1[%c3_118, %c0_119, %c0_120, %c1_121, %c0_122] : memref<4x1x10x10x4xbf16, #tpu.memory_space<vmem>>, vector<1x1x8x8x4xbf16>
    %88 = vector.shape_cast %87 : vector<1x1x8x8x4xbf16> to vector<1x8x8x4xbf16>
    %c3_123 = arith.constant 3 : index
    %c0_124 = arith.constant 0 : index
    %c1_125 = arith.constant 1 : index
    %c0_126 = arith.constant 0 : index
    %c0_127 = arith.constant 0 : index
    %89 = vector.load %arg1[%c3_123, %c0_124, %c1_125, %c0_126, %c0_127] : memref<4x1x10x10x4xbf16, #tpu.memory_space<vmem>>, vector<1x1x8x8x4xbf16>
    %90 = vector.shape_cast %89 : vector<1x1x8x8x4xbf16> to vector<1x8x8x4xbf16>
    %c3_128 = arith.constant 3 : index
    %c0_129 = arith.constant 0 : index
    %c1_130 = arith.constant 1 : index
    %c1_131 = arith.constant 1 : index
    %c0_132 = arith.constant 0 : index
    %91 = vector.load %arg1[%c3_128, %c0_129, %c1_130, %c1_131, %c0_132] : memref<4x1x10x10x4xbf16, #tpu.memory_space<vmem>>, vector<1x1x8x8x4xbf16>
    %92 = vector.shape_cast %91 : vector<1x1x8x8x4xbf16> to vector<1x8x8x4xbf16>
    %93 = arith.extf %86 : vector<1x8x8x4xbf16> to vector<1x8x8x4xf32>
    %94 = arith.extf %88 : vector<1x8x8x4xbf16> to vector<1x8x8x4xf32>
    %95 = arith.extf %90 : vector<1x8x8x4xbf16> to vector<1x8x8x4xf32>
    %96 = arith.extf %92 : vector<1x8x8x4xbf16> to vector<1x8x8x4xf32>
    %97 = tpu.concatenate %93, %94, %95, %96 in 3 : vector<1x8x8x4xf32>, vector<1x8x8x4xf32>, vector<1x8x8x4xf32>, vector<1x8x8x4xf32> -> vector<1x8x8x16xf32>
    %98 = vector.shape_cast %97 : vector<1x8x8x16xf32> to vector<64x16xf32>
    %99 = arith.truncf %98 : vector<64x16xf32> to vector<64x16xbf16>
    %c3_133 = arith.constant 3 : index
    %c0_134 = arith.constant 0 : index
    %c0_135 = arith.constant 0 : index
    %100 = vector.load %arg2[%c3_133, %c0_134, %c0_135] : memref<4x36x16xbf16, #tpu.memory_space<vmem>>, vector<1x16x16xbf16>
    %101 = vector.shape_cast %100 : vector<1x16x16xbf16> to vector<16x16xbf16>
    %cst_136 = arith.constant dense<0.000000e+00> : vector<64x16xf32>
    %102 = tpu.matmul %99, %101, %cst_136 {dimension_numbers = #tpu.dot_dimension_numbers<[1], [0], [0], [1], [0, 0, 1, 1], [], []>} : vector<64x16xbf16>, vector<16x16xbf16>, vector<64x16xf32> -> vector<64x16xf32>
    %103 = arith.addf %84, %102 : vector<64x16xf32>
    %c0_137 = arith.constant 0 : index
    %c0_138 = arith.constant 0 : index
    %104 = vector.load %arg3[%c0_137, %c0_138] : memref<1x16xf32, #tpu.memory_space<vmem>>, vector<1x16xf32>
    %105 = vector.broadcast %104 : vector<1x16xf32> to vector<64x16xf32>
    %106 = arith.addf %103, %105 : vector<64x16xf32>
    %cst_139 = arith.constant 0.000000e+00 : f32
    %107 = vector.broadcast %cst_139 : f32 to vector<64x16xf32>
    %108 = arith.cmpf oge, %106, %107 : vector<64x16xf32>
    %cst_140 = arith.constant 2.000000e-01 : f32
    %109 = vector.broadcast %cst_140 : f32 to vector<64x16xf32>
    %110 = arith.mulf %109, %106 : vector<64x16xf32>
    %111 = arith.select %108, %106, %110 : vector<64x16xi1>, vector<64x16xf32>
    %112 = vector.shape_cast %111 : vector<64x16xf32> to vector<1x8x8x16xf32>
    %113 = arith.truncf %112 : vector<1x8x8x16xf32> to vector<1x8x8x16xbf16>
    %c0_141 = arith.constant 0 : index
    %c0_142 = arith.constant 0 : index
    %c0_143 = arith.constant 0 : index
    %c0_144 = arith.constant 0 : index
    %114 = vector.load %arg4[%c0_141, %c0_142, %c0_143, %c0_144] : memref<1x8x8x16xbf16, #tpu.memory_space<vmem>>, vector<1x8x8x16xbf16>
    tpu.vector_store %arg4[%c0_141, %c0_142, %c0_143, %c0_144], %113 {strides = array<i32>} : memref<1x8x8x16xbf16, #tpu.memory_space<vmem>>, vector<1x8x8x16xbf16>,
    return
  }
  func.func @transform_0(%arg0: i32) -> (i32, i32, i32, i32, i32) {
    %c0_i32 = arith.constant 0 : i32
    %c0_i32_0 = arith.constant 0 : i32
    %c0_i32_1 = arith.constant 0 : i32
    %c0_i32_2 = arith.constant 0 : i32
    %c0_i32_3 = arith.constant 0 : i32
    return %c0_i32, %arg0, %c0_i32_0, %c0_i32_1, %c0_i32_2 : i32, i32, i32, i32, i32
  }
  func.func @transform_1(%arg0: i32) -> (i32, i32, i32) {
    %c0_i32 = arith.constant 0 : i32
    %c0_i32_0 = arith.constant 0 : i32
    %c0_i32_1 = arith.constant 0 : i32
    %c0_i32_2 = arith.constant 0 : i32
    return %c0_i32, %c0_i32_0, %c0_i32_1 : i32, i32, i32
  }
  func.func @transform_2(%arg0: i32) -> (i32, i32) {
    %c0_i32 = arith.constant 0 : i32
    %c0_i32_0 = arith.constant 0 : i32
    %c0_i32_1 = arith.constant 0 : i32
    return %c0_i32, %c0_i32_0 : i32, i32
  }
  func.func @transform_3(%arg0: i32) -> (i32, i32, i32, i32) {
    %c0_i32 = arith.constant 0 : i32
    %c0_i32_0 = arith.constant 0 : i32
    %c0_i32_1 = arith.constant 0 : i32
    %c0_i32_2 = arith.constant 0 : i32
    return %arg0, %c0_i32, %c0_i32_0, %c0_i32_1 : i32, i32, i32, i32
  }
}

module attributes {stable_mosaic.version = 11 : i64} {
  func.func @kernel(%arg0: i32, %arg1: memref<4x2x6x6x16xbf16, #tpu.memory_space<vmem>>, %arg2: memref<4x144x16xbf16, #tpu.memory_space<vmem>>, %arg3: memref<1x16xf32, #tpu.memory_space<vmem>>, %arg4: memref<1x16xf32, #tpu.memory_space<vmem>>, %arg5: memref<2x4x4x16xbf16, #tpu.memory_space<vmem>>) attributes {dimension_semantics = [#tpu.dimension_semantics<parallel>], iteration_bounds = array<i64: 1>, scalar_prefetch = 0 : i64, scratch_operands = 0 : i64, tpu.core_type = #tpu.core_type<tc>, window_params = [{transform_indices = @transform_0, window_bounds = array<i64: 4, 2, 6, 6, 16>}, {pipeline_mode = #tpu.pipeline_mode<synchronous>, transform_indices = @transform_1, window_bounds = array<i64: 4, 144, 16>}, {pipeline_mode = #tpu.pipeline_mode<synchronous>, transform_indices = @transform_2, window_bounds = array<i64: 1, 16>}, {pipeline_mode = #tpu.pipeline_mode<synchronous>, transform_indices = @transform_3, window_bounds = array<i64: 1, 16>}, {transform_indices = @transform_4, window_bounds = array<i64: 2, 4, 4, 16>}]} {
    %cst = arith.constant 0.000000e+00 : f32
    %0 = vector.broadcast %cst : f32 to vector<32x16xf32>
    %c0 = arith.constant 0 : index
    %c0_0 = arith.constant 0 : index
    %c0_1 = arith.constant 0 : index
    %c0_2 = arith.constant 0 : index
    %c0_3 = arith.constant 0 : index
    %1 = vector.load %arg1[%c0, %c0_0, %c0_1, %c0_2, %c0_3] : memref<4x2x6x6x16xbf16, #tpu.memory_space<vmem>>, vector<1x2x4x4x16xbf16>
    %2 = vector.shape_cast %1 : vector<1x2x4x4x16xbf16> to vector<2x4x4x16xbf16>
    %c0_4 = arith.constant 0 : index
    %c0_5 = arith.constant 0 : index
    %c0_6 = arith.constant 0 : index
    %c1 = arith.constant 1 : index
    %c0_7 = arith.constant 0 : index
    %3 = vector.load %arg1[%c0_4, %c0_5, %c0_6, %c1, %c0_7] : memref<4x2x6x6x16xbf16, #tpu.memory_space<vmem>>, vector<1x2x4x4x16xbf16>
    %4 = vector.shape_cast %3 : vector<1x2x4x4x16xbf16> to vector<2x4x4x16xbf16>
    %c0_8 = arith.constant 0 : index
    %c0_9 = arith.constant 0 : index
    %c0_10 = arith.constant 0 : index
    %c2 = arith.constant 2 : index
    %c0_11 = arith.constant 0 : index
    %5 = vector.load %arg1[%c0_8, %c0_9, %c0_10, %c2, %c0_11] : memref<4x2x6x6x16xbf16, #tpu.memory_space<vmem>>, vector<1x2x4x4x16xbf16>
    %6 = vector.shape_cast %5 : vector<1x2x4x4x16xbf16> to vector<2x4x4x16xbf16>
    %c0_12 = arith.constant 0 : index
    %c0_13 = arith.constant 0 : index
    %c1_14 = arith.constant 1 : index
    %c0_15 = arith.constant 0 : index
    %c0_16 = arith.constant 0 : index
    %7 = vector.load %arg1[%c0_12, %c0_13, %c1_14, %c0_15, %c0_16] : memref<4x2x6x6x16xbf16, #tpu.memory_space<vmem>>, vector<1x2x4x4x16xbf16>
    %8 = vector.shape_cast %7 : vector<1x2x4x4x16xbf16> to vector<2x4x4x16xbf16>
    %c0_17 = arith.constant 0 : index
    %c0_18 = arith.constant 0 : index
    %c1_19 = arith.constant 1 : index
    %c1_20 = arith.constant 1 : index
    %c0_21 = arith.constant 0 : index
    %9 = vector.load %arg1[%c0_17, %c0_18, %c1_19, %c1_20, %c0_21] : memref<4x2x6x6x16xbf16, #tpu.memory_space<vmem>>, vector<1x2x4x4x16xbf16>
    %10 = vector.shape_cast %9 : vector<1x2x4x4x16xbf16> to vector<2x4x4x16xbf16>
    %c0_22 = arith.constant 0 : index
    %c0_23 = arith.constant 0 : index
    %c1_24 = arith.constant 1 : index
    %c2_25 = arith.constant 2 : index
    %c0_26 = arith.constant 0 : index
    %11 = vector.load %arg1[%c0_22, %c0_23, %c1_24, %c2_25, %c0_26] : memref<4x2x6x6x16xbf16, #tpu.memory_space<vmem>>, vector<1x2x4x4x16xbf16>
    %12 = vector.shape_cast %11 : vector<1x2x4x4x16xbf16> to vector<2x4x4x16xbf16>
    %c0_27 = arith.constant 0 : index
    %c0_28 = arith.constant 0 : index
    %c2_29 = arith.constant 2 : index
    %c0_30 = arith.constant 0 : index
    %c0_31 = arith.constant 0 : index
    %13 = vector.load %arg1[%c0_27, %c0_28, %c2_29, %c0_30, %c0_31] : memref<4x2x6x6x16xbf16, #tpu.memory_space<vmem>>, vector<1x2x4x4x16xbf16>
    %14 = vector.shape_cast %13 : vector<1x2x4x4x16xbf16> to vector<2x4x4x16xbf16>
    %c0_32 = arith.constant 0 : index
    %c0_33 = arith.constant 0 : index
    %c2_34 = arith.constant 2 : index
    %c1_35 = arith.constant 1 : index
    %c0_36 = arith.constant 0 : index
    %15 = vector.load %arg1[%c0_32, %c0_33, %c2_34, %c1_35, %c0_36] : memref<4x2x6x6x16xbf16, #tpu.memory_space<vmem>>, vector<1x2x4x4x16xbf16>
    %16 = vector.shape_cast %15 : vector<1x2x4x4x16xbf16> to vector<2x4x4x16xbf16>
    %c0_37 = arith.constant 0 : index
    %c0_38 = arith.constant 0 : index
    %c2_39 = arith.constant 2 : index
    %c2_40 = arith.constant 2 : index
    %c0_41 = arith.constant 0 : index
    %17 = vector.load %arg1[%c0_37, %c0_38, %c2_39, %c2_40, %c0_41] : memref<4x2x6x6x16xbf16, #tpu.memory_space<vmem>>, vector<1x2x4x4x16xbf16>
    %18 = vector.shape_cast %17 : vector<1x2x4x4x16xbf16> to vector<2x4x4x16xbf16>
    %19 = arith.extf %2 : vector<2x4x4x16xbf16> to vector<2x4x4x16xf32>
    %20 = arith.extf %4 : vector<2x4x4x16xbf16> to vector<2x4x4x16xf32>
    %21 = arith.extf %6 : vector<2x4x4x16xbf16> to vector<2x4x4x16xf32>
    %22 = arith.extf %8 : vector<2x4x4x16xbf16> to vector<2x4x4x16xf32>
    %23 = arith.extf %10 : vector<2x4x4x16xbf16> to vector<2x4x4x16xf32>
    %24 = arith.extf %12 : vector<2x4x4x16xbf16> to vector<2x4x4x16xf32>
    %25 = arith.extf %14 : vector<2x4x4x16xbf16> to vector<2x4x4x16xf32>
    %26 = arith.extf %16 : vector<2x4x4x16xbf16> to vector<2x4x4x16xf32>
    %27 = arith.extf %18 : vector<2x4x4x16xbf16> to vector<2x4x4x16xf32>
    %28 = tpu.concatenate %19, %20, %21, %22, %23, %24, %25, %26, %27 in 3 : vector<2x4x4x16xf32>, vector<2x4x4x16xf32>, vector<2x4x4x16xf32>, vector<2x4x4x16xf32>, vector<2x4x4x16xf32>, vector<2x4x4x16xf32>, vector<2x4x4x16xf32>, vector<2x4x4x16xf32>, vector<2x4x4x16xf32> -> vector<2x4x4x144xf32>
    %29 = vector.shape_cast %28 : vector<2x4x4x144xf32> to vector<32x144xf32>
    %30 = arith.truncf %29 : vector<32x144xf32> to vector<32x144xbf16>
    %c0_42 = arith.constant 0 : index
    %c0_43 = arith.constant 0 : index
    %c0_44 = arith.constant 0 : index
    %31 = vector.load %arg2[%c0_42, %c0_43, %c0_44] : memref<4x144x16xbf16, #tpu.memory_space<vmem>>, vector<1x144x16xbf16>
    %32 = vector.shape_cast %31 : vector<1x144x16xbf16> to vector<144x16xbf16>
    %cst_45 = arith.constant dense<0.000000e+00> : vector<32x16xf32>
    %33 = tpu.matmul %30, %32, %cst_45 {dimension_numbers = #tpu.dot_dimension_numbers<[1], [0], [0], [1], [0, 0, 1, 1], [], []>} : vector<32x144xbf16>, vector<144x16xbf16>, vector<32x16xf32> -> vector<32x16xf32>
    %34 = arith.addf %0, %33 : vector<32x16xf32>
    %c1_46 = arith.constant 1 : index
    %c0_47 = arith.constant 0 : index
    %c0_48 = arith.constant 0 : index
    %c0_49 = arith.constant 0 : index
    %c0_50 = arith.constant 0 : index
    %35 = vector.load %arg1[%c1_46, %c0_47, %c0_48, %c0_49, %c0_50] : memref<4x2x6x6x16xbf16, #tpu.memory_space<vmem>>, vector<1x2x4x4x16xbf16>
    %36 = vector.shape_cast %35 : vector<1x2x4x4x16xbf16> to vector<2x4x4x16xbf16>
    %c1_51 = arith.constant 1 : index
    %c0_52 = arith.constant 0 : index
    %c0_53 = arith.constant 0 : index
    %c1_54 = arith.constant 1 : index
    %c0_55 = arith.constant 0 : index
    %37 = vector.load %arg1[%c1_51, %c0_52, %c0_53, %c1_54, %c0_55] : memref<4x2x6x6x16xbf16, #tpu.memory_space<vmem>>, vector<1x2x4x4x16xbf16>
    %38 = vector.shape_cast %37 : vector<1x2x4x4x16xbf16> to vector<2x4x4x16xbf16>
    %c1_56 = arith.constant 1 : index
    %c0_57 = arith.constant 0 : index
    %c1_58 = arith.constant 1 : index
    %c0_59 = arith.constant 0 : index
    %c0_60 = arith.constant 0 : index
    %39 = vector.load %arg1[%c1_56, %c0_57, %c1_58, %c0_59, %c0_60] : memref<4x2x6x6x16xbf16, #tpu.memory_space<vmem>>, vector<1x2x4x4x16xbf16>
    %40 = vector.shape_cast %39 : vector<1x2x4x4x16xbf16> to vector<2x4x4x16xbf16>
    %c1_61 = arith.constant 1 : index
    %c0_62 = arith.constant 0 : index
    %c1_63 = arith.constant 1 : index
    %c1_64 = arith.constant 1 : index
    %c0_65 = arith.constant 0 : index
    %41 = vector.load %arg1[%c1_61, %c0_62, %c1_63, %c1_64, %c0_65] : memref<4x2x6x6x16xbf16, #tpu.memory_space<vmem>>, vector<1x2x4x4x16xbf16>
    %42 = vector.shape_cast %41 : vector<1x2x4x4x16xbf16> to vector<2x4x4x16xbf16>
    %c1_66 = arith.constant 1 : index
    %c0_67 = arith.constant 0 : index
    %c2_68 = arith.constant 2 : index
    %c0_69 = arith.constant 0 : index
    %c0_70 = arith.constant 0 : index
    %43 = vector.load %arg1[%c1_66, %c0_67, %c2_68, %c0_69, %c0_70] : memref<4x2x6x6x16xbf16, #tpu.memory_space<vmem>>, vector<1x2x4x4x16xbf16>
    %44 = vector.shape_cast %43 : vector<1x2x4x4x16xbf16> to vector<2x4x4x16xbf16>
    %c1_71 = arith.constant 1 : index
    %c0_72 = arith.constant 0 : index
    %c2_73 = arith.constant 2 : index
    %c1_74 = arith.constant 1 : index
    %c0_75 = arith.constant 0 : index
    %45 = vector.load %arg1[%c1_71, %c0_72, %c2_73, %c1_74, %c0_75] : memref<4x2x6x6x16xbf16, #tpu.memory_space<vmem>>, vector<1x2x4x4x16xbf16>
    %46 = vector.shape_cast %45 : vector<1x2x4x4x16xbf16> to vector<2x4x4x16xbf16>
    %47 = arith.extf %36 : vector<2x4x4x16xbf16> to vector<2x4x4x16xf32>
    %48 = arith.extf %38 : vector<2x4x4x16xbf16> to vector<2x4x4x16xf32>
    %49 = arith.extf %40 : vector<2x4x4x16xbf16> to vector<2x4x4x16xf32>
    %50 = arith.extf %42 : vector<2x4x4x16xbf16> to vector<2x4x4x16xf32>
    %51 = arith.extf %44 : vector<2x4x4x16xbf16> to vector<2x4x4x16xf32>
    %52 = arith.extf %46 : vector<2x4x4x16xbf16> to vector<2x4x4x16xf32>
    %53 = tpu.concatenate %47, %48, %49, %50, %51, %52 in 3 : vector<2x4x4x16xf32>, vector<2x4x4x16xf32>, vector<2x4x4x16xf32>, vector<2x4x4x16xf32>, vector<2x4x4x16xf32>, vector<2x4x4x16xf32> -> vector<2x4x4x96xf32>
    %54 = vector.shape_cast %53 : vector<2x4x4x96xf32> to vector<32x96xf32>
    %55 = arith.truncf %54 : vector<32x96xf32> to vector<32x96xbf16>
    %c1_76 = arith.constant 1 : index
    %c0_77 = arith.constant 0 : index
    %c0_78 = arith.constant 0 : index
    %56 = vector.load %arg2[%c1_76, %c0_77, %c0_78] : memref<4x144x16xbf16, #tpu.memory_space<vmem>>, vector<1x96x16xbf16>
    %57 = vector.shape_cast %56 : vector<1x96x16xbf16> to vector<96x16xbf16>
    %cst_79 = arith.constant dense<0.000000e+00> : vector<32x16xf32>
    %58 = tpu.matmul %55, %57, %cst_79 {dimension_numbers = #tpu.dot_dimension_numbers<[1], [0], [0], [1], [0, 0, 1, 1], [], []>} : vector<32x96xbf16>, vector<96x16xbf16>, vector<32x16xf32> -> vector<32x16xf32>
    %59 = arith.addf %34, %58 : vector<32x16xf32>
    %c2_80 = arith.constant 2 : index
    %c0_81 = arith.constant 0 : index
    %c0_82 = arith.constant 0 : index
    %c0_83 = arith.constant 0 : index
    %c0_84 = arith.constant 0 : index
    %60 = vector.load %arg1[%c2_80, %c0_81, %c0_82, %c0_83, %c0_84] : memref<4x2x6x6x16xbf16, #tpu.memory_space<vmem>>, vector<1x2x4x4x16xbf16>
    %61 = vector.shape_cast %60 : vector<1x2x4x4x16xbf16> to vector<2x4x4x16xbf16>
    %c2_85 = arith.constant 2 : index
    %c0_86 = arith.constant 0 : index
    %c0_87 = arith.constant 0 : index
    %c1_88 = arith.constant 1 : index
    %c0_89 = arith.constant 0 : index
    %62 = vector.load %arg1[%c2_85, %c0_86, %c0_87, %c1_88, %c0_89] : memref<4x2x6x6x16xbf16, #tpu.memory_space<vmem>>, vector<1x2x4x4x16xbf16>
    %63 = vector.shape_cast %62 : vector<1x2x4x4x16xbf16> to vector<2x4x4x16xbf16>
    %c2_90 = arith.constant 2 : index
    %c0_91 = arith.constant 0 : index
    %c0_92 = arith.constant 0 : index
    %c2_93 = arith.constant 2 : index
    %c0_94 = arith.constant 0 : index
    %64 = vector.load %arg1[%c2_90, %c0_91, %c0_92, %c2_93, %c0_94] : memref<4x2x6x6x16xbf16, #tpu.memory_space<vmem>>, vector<1x2x4x4x16xbf16>
    %65 = vector.shape_cast %64 : vector<1x2x4x4x16xbf16> to vector<2x4x4x16xbf16>
    %c2_95 = arith.constant 2 : index
    %c0_96 = arith.constant 0 : index
    %c1_97 = arith.constant 1 : index
    %c0_98 = arith.constant 0 : index
    %c0_99 = arith.constant 0 : index
    %66 = vector.load %arg1[%c2_95, %c0_96, %c1_97, %c0_98, %c0_99] : memref<4x2x6x6x16xbf16, #tpu.memory_space<vmem>>, vector<1x2x4x4x16xbf16>
    %67 = vector.shape_cast %66 : vector<1x2x4x4x16xbf16> to vector<2x4x4x16xbf16>
    %c2_100 = arith.constant 2 : index
    %c0_101 = arith.constant 0 : index
    %c1_102 = arith.constant 1 : index
    %c1_103 = arith.constant 1 : index
    %c0_104 = arith.constant 0 : index
    %68 = vector.load %arg1[%c2_100, %c0_101, %c1_102, %c1_103, %c0_104] : memref<4x2x6x6x16xbf16, #tpu.memory_space<vmem>>, vector<1x2x4x4x16xbf16>
    %69 = vector.shape_cast %68 : vector<1x2x4x4x16xbf16> to vector<2x4x4x16xbf16>
    %c2_105 = arith.constant 2 : index
    %c0_106 = arith.constant 0 : index
    %c1_107 = arith.constant 1 : index
    %c2_108 = arith.constant 2 : index
    %c0_109 = arith.constant 0 : index
    %70 = vector.load %arg1[%c2_105, %c0_106, %c1_107, %c2_108, %c0_109] : memref<4x2x6x6x16xbf16, #tpu.memory_space<vmem>>, vector<1x2x4x4x16xbf16>
    %71 = vector.shape_cast %70 : vector<1x2x4x4x16xbf16> to vector<2x4x4x16xbf16>
    %72 = arith.extf %61 : vector<2x4x4x16xbf16> to vector<2x4x4x16xf32>
    %73 = arith.extf %63 : vector<2x4x4x16xbf16> to vector<2x4x4x16xf32>
    %74 = arith.extf %65 : vector<2x4x4x16xbf16> to vector<2x4x4x16xf32>
    %75 = arith.extf %67 : vector<2x4x4x16xbf16> to vector<2x4x4x16xf32>
    %76 = arith.extf %69 : vector<2x4x4x16xbf16> to vector<2x4x4x16xf32>
    %77 = arith.extf %71 : vector<2x4x4x16xbf16> to vector<2x4x4x16xf32>
    %78 = tpu.concatenate %72, %73, %74, %75, %76, %77 in 3 : vector<2x4x4x16xf32>, vector<2x4x4x16xf32>, vector<2x4x4x16xf32>, vector<2x4x4x16xf32>, vector<2x4x4x16xf32>, vector<2x4x4x16xf32> -> vector<2x4x4x96xf32>
    %79 = vector.shape_cast %78 : vector<2x4x4x96xf32> to vector<32x96xf32>
    %80 = arith.truncf %79 : vector<32x96xf32> to vector<32x96xbf16>
    %c2_110 = arith.constant 2 : index
    %c0_111 = arith.constant 0 : index
    %c0_112 = arith.constant 0 : index
    %81 = vector.load %arg2[%c2_110, %c0_111, %c0_112] : memref<4x144x16xbf16, #tpu.memory_space<vmem>>, vector<1x96x16xbf16>
    %82 = vector.shape_cast %81 : vector<1x96x16xbf16> to vector<96x16xbf16>
    %cst_113 = arith.constant dense<0.000000e+00> : vector<32x16xf32>
    %83 = tpu.matmul %80, %82, %cst_113 {dimension_numbers = #tpu.dot_dimension_numbers<[1], [0], [0], [1], [0, 0, 1, 1], [], []>} : vector<32x96xbf16>, vector<96x16xbf16>, vector<32x16xf32> -> vector<32x16xf32>
    %84 = arith.addf %59, %83 : vector<32x16xf32>
    %c3 = arith.constant 3 : index
    %c0_114 = arith.constant 0 : index
    %c0_115 = arith.constant 0 : index
    %c0_116 = arith.constant 0 : index
    %c0_117 = arith.constant 0 : index
    %85 = vector.load %arg1[%c3, %c0_114, %c0_115, %c0_116, %c0_117] : memref<4x2x6x6x16xbf16, #tpu.memory_space<vmem>>, vector<1x2x4x4x16xbf16>
    %86 = vector.shape_cast %85 : vector<1x2x4x4x16xbf16> to vector<2x4x4x16xbf16>
    %c3_118 = arith.constant 3 : index
    %c0_119 = arith.constant 0 : index
    %c0_120 = arith.constant 0 : index
    %c1_121 = arith.constant 1 : index
    %c0_122 = arith.constant 0 : index
    %87 = vector.load %arg1[%c3_118, %c0_119, %c0_120, %c1_121, %c0_122] : memref<4x2x6x6x16xbf16, #tpu.memory_space<vmem>>, vector<1x2x4x4x16xbf16>
    %88 = vector.shape_cast %87 : vector<1x2x4x4x16xbf16> to vector<2x4x4x16xbf16>
    %c3_123 = arith.constant 3 : index
    %c0_124 = arith.constant 0 : index
    %c1_125 = arith.constant 1 : index
    %c0_126 = arith.constant 0 : index
    %c0_127 = arith.constant 0 : index
    %89 = vector.load %arg1[%c3_123, %c0_124, %c1_125, %c0_126, %c0_127] : memref<4x2x6x6x16xbf16, #tpu.memory_space<vmem>>, vector<1x2x4x4x16xbf16>
    %90 = vector.shape_cast %89 : vector<1x2x4x4x16xbf16> to vector<2x4x4x16xbf16>
    %c3_128 = arith.constant 3 : index
    %c0_129 = arith.constant 0 : index
    %c1_130 = arith.constant 1 : index
    %c1_131 = arith.constant 1 : index
    %c0_132 = arith.constant 0 : index
    %91 = vector.load %arg1[%c3_128, %c0_129, %c1_130, %c1_131, %c0_132] : memref<4x2x6x6x16xbf16, #tpu.memory_space<vmem>>, vector<1x2x4x4x16xbf16>
    %92 = vector.shape_cast %91 : vector<1x2x4x4x16xbf16> to vector<2x4x4x16xbf16>
    %93 = arith.extf %86 : vector<2x4x4x16xbf16> to vector<2x4x4x16xf32>
    %94 = arith.extf %88 : vector<2x4x4x16xbf16> to vector<2x4x4x16xf32>
    %95 = arith.extf %90 : vector<2x4x4x16xbf16> to vector<2x4x4x16xf32>
    %96 = arith.extf %92 : vector<2x4x4x16xbf16> to vector<2x4x4x16xf32>
    %97 = tpu.concatenate %93, %94, %95, %96 in 3 : vector<2x4x4x16xf32>, vector<2x4x4x16xf32>, vector<2x4x4x16xf32>, vector<2x4x4x16xf32> -> vector<2x4x4x64xf32>
    %98 = vector.shape_cast %97 : vector<2x4x4x64xf32> to vector<32x64xf32>
    %99 = arith.truncf %98 : vector<32x64xf32> to vector<32x64xbf16>
    %c3_133 = arith.constant 3 : index
    %c0_134 = arith.constant 0 : index
    %c0_135 = arith.constant 0 : index
    %100 = vector.load %arg2[%c3_133, %c0_134, %c0_135] : memref<4x144x16xbf16, #tpu.memory_space<vmem>>, vector<1x64x16xbf16>
    %101 = vector.shape_cast %100 : vector<1x64x16xbf16> to vector<64x16xbf16>
    %cst_136 = arith.constant dense<0.000000e+00> : vector<32x16xf32>
    %102 = tpu.matmul %99, %101, %cst_136 {dimension_numbers = #tpu.dot_dimension_numbers<[1], [0], [0], [1], [0, 0, 1, 1], [], []>} : vector<32x64xbf16>, vector<64x16xbf16>, vector<32x16xf32> -> vector<32x16xf32>
    %103 = arith.addf %84, %102 : vector<32x16xf32>
    %cst_137 = arith.constant dense<0.000000e+00> : vector<16xf32>
    %104 = vector.multi_reduction <add>, %103, %cst_137 [0] : vector<32x16xf32> to vector<16xf32>
    %105 = vector.shape_cast %104 : vector<16xf32> to vector<1x16xf32>
    %cst_138 = arith.constant 3.200000e+01 : f32
    %106 = vector.broadcast %cst_138 : f32 to vector<1x16xf32>
    %107 = arith.divf %105, %106 : vector<1x16xf32>
    %108 = vector.broadcast %107 : vector<1x16xf32> to vector<32x16xf32>
    %109 = arith.subf %103, %108 : vector<32x16xf32>
    %110 = arith.mulf %109, %109 : vector<32x16xf32>
    %cst_139 = arith.constant dense<0.000000e+00> : vector<16xf32>
    %111 = vector.multi_reduction <add>, %110, %cst_139 [0] : vector<32x16xf32> to vector<16xf32>
    %112 = vector.shape_cast %111 : vector<16xf32> to vector<1x16xf32>
    %cst_140 = arith.constant 3.200000e+01 : f32
    %113 = vector.broadcast %cst_140 : f32 to vector<1x16xf32>
    %114 = arith.divf %112, %113 : vector<1x16xf32>
    %c0_141 = arith.constant 0 : index
    %c0_142 = arith.constant 0 : index
    %115 = vector.load %arg3[%c0_141, %c0_142] : memref<1x16xf32, #tpu.memory_space<vmem>>, vector<1x16xf32>
    %cst_143 = arith.constant 9.99999974E-6 : f32
    %116 = vector.broadcast %cst_143 : f32 to vector<1x16xf32>
    %117 = arith.addf %114, %116 : vector<1x16xf32>
    %118 = math.rsqrt %117 : vector<1x16xf32>
    %119 = arith.mulf %115, %118 : vector<1x16xf32>
    %120 = vector.broadcast %119 : vector<1x16xf32> to vector<32x16xf32>
    %121 = arith.mulf %103, %120 : vector<32x16xf32>
    %c0_144 = arith.constant 0 : index
    %c0_145 = arith.constant 0 : index
    %122 = vector.load %arg4[%c0_144, %c0_145] : memref<1x16xf32, #tpu.memory_space<vmem>>, vector<1x16xf32>
    %123 = arith.mulf %107, %119 : vector<1x16xf32>
    %124 = arith.subf %122, %123 : vector<1x16xf32>
    %125 = vector.broadcast %124 : vector<1x16xf32> to vector<32x16xf32>
    %126 = arith.addf %121, %125 : vector<32x16xf32>
    %cst_146 = arith.constant 0.000000e+00 : f32
    %127 = vector.broadcast %cst_146 : f32 to vector<32x16xf32>
    %128 = arith.cmpf oge, %126, %127 : vector<32x16xf32>
    %cst_147 = arith.constant 2.000000e-01 : f32
    %129 = vector.broadcast %cst_147 : f32 to vector<32x16xf32>
    %130 = arith.mulf %129, %126 : vector<32x16xf32>
    %131 = arith.select %128, %126, %130 : vector<32x16xi1>, vector<32x16xf32>
    %132 = vector.shape_cast %131 : vector<32x16xf32> to vector<2x4x4x16xf32>
    %133 = arith.truncf %132 : vector<2x4x4x16xf32> to vector<2x4x4x16xbf16>
    %c0_148 = arith.constant 0 : index
    %c0_149 = arith.constant 0 : index
    %c0_150 = arith.constant 0 : index
    %c0_151 = arith.constant 0 : index
    %134 = vector.load %arg5[%c0_148, %c0_149, %c0_150, %c0_151] : memref<2x4x4x16xbf16, #tpu.memory_space<vmem>>, vector<2x4x4x16xbf16>
    tpu.vector_store %arg5[%c0_148, %c0_149, %c0_150, %c0_151], %133 {strides = array<i32>} : memref<2x4x4x16xbf16, #tpu.memory_space<vmem>>, vector<2x4x4x16xbf16>,
    return
  }
  func.func @transform_0(%arg0: i32) -> (i32, i32, i32, i32, i32) {
    %c0_i32 = arith.constant 0 : i32
    %c0_i32_0 = arith.constant 0 : i32
    %c0_i32_1 = arith.constant 0 : i32
    %c0_i32_2 = arith.constant 0 : i32
    %c0_i32_3 = arith.constant 0 : i32
    return %c0_i32, %arg0, %c0_i32_0, %c0_i32_1, %c0_i32_2 : i32, i32, i32, i32, i32
  }
  func.func @transform_1(%arg0: i32) -> (i32, i32, i32) {
    %c0_i32 = arith.constant 0 : i32
    %c0_i32_0 = arith.constant 0 : i32
    %c0_i32_1 = arith.constant 0 : i32
    %c0_i32_2 = arith.constant 0 : i32
    return %c0_i32, %c0_i32_0, %c0_i32_1 : i32, i32, i32
  }
  func.func @transform_2(%arg0: i32) -> (i32, i32) {
    %c0_i32 = arith.constant 0 : i32
    %c0_i32_0 = arith.constant 0 : i32
    %c0_i32_1 = arith.constant 0 : i32
    return %c0_i32, %c0_i32_0 : i32, i32
  }
  func.func @transform_3(%arg0: i32) -> (i32, i32) {
    %c0_i32 = arith.constant 0 : i32
    %c0_i32_0 = arith.constant 0 : i32
    %c0_i32_1 = arith.constant 0 : i32
    return %c0_i32, %c0_i32_0 : i32, i32
  }
  func.func @transform_4(%arg0: i32) -> (i32, i32, i32, i32) {
    %c0_i32 = arith.constant 0 : i32
    %c0_i32_0 = arith.constant 0 : i32
    %c0_i32_1 = arith.constant 0 : i32
    %c0_i32_2 = arith.constant 0 : i32
    return %arg0, %c0_i32, %c0_i32_0, %c0_i32_1 : i32, i32, i32, i32
  }
}

module attributes {stable_mosaic.version = 11 : i64} {
  func.func @kernel(%arg0: i32, %arg1: memref<4x2x4x4x16xbf16, #tpu.memory_space<vmem>>, %arg2: memref<4x144x32xbf16, #tpu.memory_space<vmem>>, %arg3: memref<1x32xf32, #tpu.memory_space<vmem>>, %arg4: memref<1x32xf32, #tpu.memory_space<vmem>>, %arg5: memref<2x2x2x32xbf16, #tpu.memory_space<vmem>>) attributes {dimension_semantics = [#tpu.dimension_semantics<parallel>], iteration_bounds = array<i64: 1>, scalar_prefetch = 0 : i64, scratch_operands = 0 : i64, tpu.core_type = #tpu.core_type<tc>, window_params = [{transform_indices = @transform_0, window_bounds = array<i64: 4, 2, 4, 4, 16>}, {pipeline_mode = #tpu.pipeline_mode<synchronous>, transform_indices = @transform_1, window_bounds = array<i64: 4, 144, 32>}, {pipeline_mode = #tpu.pipeline_mode<synchronous>, transform_indices = @transform_2, window_bounds = array<i64: 1, 32>}, {pipeline_mode = #tpu.pipeline_mode<synchronous>, transform_indices = @transform_3, window_bounds = array<i64: 1, 32>}, {transform_indices = @transform_4, window_bounds = array<i64: 2, 2, 2, 32>}]} {
    %cst = arith.constant 0.000000e+00 : f32
    %0 = vector.broadcast %cst : f32 to vector<8x32xf32>
    %c0 = arith.constant 0 : index
    %c0_0 = arith.constant 0 : index
    %c0_1 = arith.constant 0 : index
    %c0_2 = arith.constant 0 : index
    %c0_3 = arith.constant 0 : index
    %1 = vector.load %arg1[%c0, %c0_0, %c0_1, %c0_2, %c0_3] : memref<4x2x4x4x16xbf16, #tpu.memory_space<vmem>>, vector<1x2x2x2x16xbf16>
    %2 = vector.shape_cast %1 : vector<1x2x2x2x16xbf16> to vector<2x2x2x16xbf16>
    %c0_4 = arith.constant 0 : index
    %c0_5 = arith.constant 0 : index
    %c0_6 = arith.constant 0 : index
    %c1 = arith.constant 1 : index
    %c0_7 = arith.constant 0 : index
    %3 = vector.load %arg1[%c0_4, %c0_5, %c0_6, %c1, %c0_7] : memref<4x2x4x4x16xbf16, #tpu.memory_space<vmem>>, vector<1x2x2x2x16xbf16>
    %4 = vector.shape_cast %3 : vector<1x2x2x2x16xbf16> to vector<2x2x2x16xbf16>
    %c0_8 = arith.constant 0 : index
    %c0_9 = arith.constant 0 : index
    %c0_10 = arith.constant 0 : index
    %c2 = arith.constant 2 : index
    %c0_11 = arith.constant 0 : index
    %5 = vector.load %arg1[%c0_8, %c0_9, %c0_10, %c2, %c0_11] : memref<4x2x4x4x16xbf16, #tpu.memory_space<vmem>>, vector<1x2x2x2x16xbf16>
    %6 = vector.shape_cast %5 : vector<1x2x2x2x16xbf16> to vector<2x2x2x16xbf16>
    %c0_12 = arith.constant 0 : index
    %c0_13 = arith.constant 0 : index
    %c1_14 = arith.constant 1 : index
    %c0_15 = arith.constant 0 : index
    %c0_16 = arith.constant 0 : index
    %7 = vector.load %arg1[%c0_12, %c0_13, %c1_14, %c0_15, %c0_16] : memref<4x2x4x4x16xbf16, #tpu.memory_space<vmem>>, vector<1x2x2x2x16xbf16>
    %8 = vector.shape_cast %7 : vector<1x2x2x2x16xbf16> to vector<2x2x2x16xbf16>
    %c0_17 = arith.constant 0 : index
    %c0_18 = arith.constant 0 : index
    %c1_19 = arith.constant 1 : index
    %c1_20 = arith.constant 1 : index
    %c0_21 = arith.constant 0 : index
    %9 = vector.load %arg1[%c0_17, %c0_18, %c1_19, %c1_20, %c0_21] : memref<4x2x4x4x16xbf16, #tpu.memory_space<vmem>>, vector<1x2x2x2x16xbf16>
    %10 = vector.shape_cast %9 : vector<1x2x2x2x16xbf16> to vector<2x2x2x16xbf16>
    %c0_22 = arith.constant 0 : index
    %c0_23 = arith.constant 0 : index
    %c1_24 = arith.constant 1 : index
    %c2_25 = arith.constant 2 : index
    %c0_26 = arith.constant 0 : index
    %11 = vector.load %arg1[%c0_22, %c0_23, %c1_24, %c2_25, %c0_26] : memref<4x2x4x4x16xbf16, #tpu.memory_space<vmem>>, vector<1x2x2x2x16xbf16>
    %12 = vector.shape_cast %11 : vector<1x2x2x2x16xbf16> to vector<2x2x2x16xbf16>
    %c0_27 = arith.constant 0 : index
    %c0_28 = arith.constant 0 : index
    %c2_29 = arith.constant 2 : index
    %c0_30 = arith.constant 0 : index
    %c0_31 = arith.constant 0 : index
    %13 = vector.load %arg1[%c0_27, %c0_28, %c2_29, %c0_30, %c0_31] : memref<4x2x4x4x16xbf16, #tpu.memory_space<vmem>>, vector<1x2x2x2x16xbf16>
    %14 = vector.shape_cast %13 : vector<1x2x2x2x16xbf16> to vector<2x2x2x16xbf16>
    %c0_32 = arith.constant 0 : index
    %c0_33 = arith.constant 0 : index
    %c2_34 = arith.constant 2 : index
    %c1_35 = arith.constant 1 : index
    %c0_36 = arith.constant 0 : index
    %15 = vector.load %arg1[%c0_32, %c0_33, %c2_34, %c1_35, %c0_36] : memref<4x2x4x4x16xbf16, #tpu.memory_space<vmem>>, vector<1x2x2x2x16xbf16>
    %16 = vector.shape_cast %15 : vector<1x2x2x2x16xbf16> to vector<2x2x2x16xbf16>
    %c0_37 = arith.constant 0 : index
    %c0_38 = arith.constant 0 : index
    %c2_39 = arith.constant 2 : index
    %c2_40 = arith.constant 2 : index
    %c0_41 = arith.constant 0 : index
    %17 = vector.load %arg1[%c0_37, %c0_38, %c2_39, %c2_40, %c0_41] : memref<4x2x4x4x16xbf16, #tpu.memory_space<vmem>>, vector<1x2x2x2x16xbf16>
    %18 = vector.shape_cast %17 : vector<1x2x2x2x16xbf16> to vector<2x2x2x16xbf16>
    %19 = arith.extf %2 : vector<2x2x2x16xbf16> to vector<2x2x2x16xf32>
    %20 = arith.extf %4 : vector<2x2x2x16xbf16> to vector<2x2x2x16xf32>
    %21 = arith.extf %6 : vector<2x2x2x16xbf16> to vector<2x2x2x16xf32>
    %22 = arith.extf %8 : vector<2x2x2x16xbf16> to vector<2x2x2x16xf32>
    %23 = arith.extf %10 : vector<2x2x2x16xbf16> to vector<2x2x2x16xf32>
    %24 = arith.extf %12 : vector<2x2x2x16xbf16> to vector<2x2x2x16xf32>
    %25 = arith.extf %14 : vector<2x2x2x16xbf16> to vector<2x2x2x16xf32>
    %26 = arith.extf %16 : vector<2x2x2x16xbf16> to vector<2x2x2x16xf32>
    %27 = arith.extf %18 : vector<2x2x2x16xbf16> to vector<2x2x2x16xf32>
    %28 = tpu.concatenate %19, %20, %21, %22, %23, %24, %25, %26, %27 in 3 : vector<2x2x2x16xf32>, vector<2x2x2x16xf32>, vector<2x2x2x16xf32>, vector<2x2x2x16xf32>, vector<2x2x2x16xf32>, vector<2x2x2x16xf32>, vector<2x2x2x16xf32>, vector<2x2x2x16xf32>, vector<2x2x2x16xf32> -> vector<2x2x2x144xf32>
    %29 = vector.shape_cast %28 : vector<2x2x2x144xf32> to vector<8x144xf32>
    %30 = arith.truncf %29 : vector<8x144xf32> to vector<8x144xbf16>
    %c0_42 = arith.constant 0 : index
    %c0_43 = arith.constant 0 : index
    %c0_44 = arith.constant 0 : index
    %31 = vector.load %arg2[%c0_42, %c0_43, %c0_44] : memref<4x144x32xbf16, #tpu.memory_space<vmem>>, vector<1x144x32xbf16>
    %32 = vector.shape_cast %31 : vector<1x144x32xbf16> to vector<144x32xbf16>
    %cst_45 = arith.constant dense<0.000000e+00> : vector<8x32xf32>
    %33 = tpu.matmul %30, %32, %cst_45 {dimension_numbers = #tpu.dot_dimension_numbers<[1], [0], [0], [1], [0, 0, 1, 1], [], []>} : vector<8x144xbf16>, vector<144x32xbf16>, vector<8x32xf32> -> vector<8x32xf32>
    %34 = arith.addf %0, %33 : vector<8x32xf32>
    %c1_46 = arith.constant 1 : index
    %c0_47 = arith.constant 0 : index
    %c0_48 = arith.constant 0 : index
    %c0_49 = arith.constant 0 : index
    %c0_50 = arith.constant 0 : index
    %35 = vector.load %arg1[%c1_46, %c0_47, %c0_48, %c0_49, %c0_50] : memref<4x2x4x4x16xbf16, #tpu.memory_space<vmem>>, vector<1x2x2x2x16xbf16>
    %36 = vector.shape_cast %35 : vector<1x2x2x2x16xbf16> to vector<2x2x2x16xbf16>
    %c1_51 = arith.constant 1 : index
    %c0_52 = arith.constant 0 : index
    %c0_53 = arith.constant 0 : index
    %c1_54 = arith.constant 1 : index
    %c0_55 = arith.constant 0 : index
    %37 = vector.load %arg1[%c1_51, %c0_52, %c0_53, %c1_54, %c0_55] : memref<4x2x4x4x16xbf16, #tpu.memory_space<vmem>>, vector<1x2x2x2x16xbf16>
    %38 = vector.shape_cast %37 : vector<1x2x2x2x16xbf16> to vector<2x2x2x16xbf16>
    %c1_56 = arith.constant 1 : index
    %c0_57 = arith.constant 0 : index
    %c1_58 = arith.constant 1 : index
    %c0_59 = arith.constant 0 : index
    %c0_60 = arith.constant 0 : index
    %39 = vector.load %arg1[%c1_56, %c0_57, %c1_58, %c0_59, %c0_60] : memref<4x2x4x4x16xbf16, #tpu.memory_space<vmem>>, vector<1x2x2x2x16xbf16>
    %40 = vector.shape_cast %39 : vector<1x2x2x2x16xbf16> to vector<2x2x2x16xbf16>
    %c1_61 = arith.constant 1 : index
    %c0_62 = arith.constant 0 : index
    %c1_63 = arith.constant 1 : index
    %c1_64 = arith.constant 1 : index
    %c0_65 = arith.constant 0 : index
    %41 = vector.load %arg1[%c1_61, %c0_62, %c1_63, %c1_64, %c0_65] : memref<4x2x4x4x16xbf16, #tpu.memory_space<vmem>>, vector<1x2x2x2x16xbf16>
    %42 = vector.shape_cast %41 : vector<1x2x2x2x16xbf16> to vector<2x2x2x16xbf16>
    %c1_66 = arith.constant 1 : index
    %c0_67 = arith.constant 0 : index
    %c2_68 = arith.constant 2 : index
    %c0_69 = arith.constant 0 : index
    %c0_70 = arith.constant 0 : index
    %43 = vector.load %arg1[%c1_66, %c0_67, %c2_68, %c0_69, %c0_70] : memref<4x2x4x4x16xbf16, #tpu.memory_space<vmem>>, vector<1x2x2x2x16xbf16>
    %44 = vector.shape_cast %43 : vector<1x2x2x2x16xbf16> to vector<2x2x2x16xbf16>
    %c1_71 = arith.constant 1 : index
    %c0_72 = arith.constant 0 : index
    %c2_73 = arith.constant 2 : index
    %c1_74 = arith.constant 1 : index
    %c0_75 = arith.constant 0 : index
    %45 = vector.load %arg1[%c1_71, %c0_72, %c2_73, %c1_74, %c0_75] : memref<4x2x4x4x16xbf16, #tpu.memory_space<vmem>>, vector<1x2x2x2x16xbf16>
    %46 = vector.shape_cast %45 : vector<1x2x2x2x16xbf16> to vector<2x2x2x16xbf16>
    %47 = arith.extf %36 : vector<2x2x2x16xbf16> to vector<2x2x2x16xf32>
    %48 = arith.extf %38 : vector<2x2x2x16xbf16> to vector<2x2x2x16xf32>
    %49 = arith.extf %40 : vector<2x2x2x16xbf16> to vector<2x2x2x16xf32>
    %50 = arith.extf %42 : vector<2x2x2x16xbf16> to vector<2x2x2x16xf32>
    %51 = arith.extf %44 : vector<2x2x2x16xbf16> to vector<2x2x2x16xf32>
    %52 = arith.extf %46 : vector<2x2x2x16xbf16> to vector<2x2x2x16xf32>
    %53 = tpu.concatenate %47, %48, %49, %50, %51, %52 in 3 : vector<2x2x2x16xf32>, vector<2x2x2x16xf32>, vector<2x2x2x16xf32>, vector<2x2x2x16xf32>, vector<2x2x2x16xf32>, vector<2x2x2x16xf32> -> vector<2x2x2x96xf32>
    %54 = vector.shape_cast %53 : vector<2x2x2x96xf32> to vector<8x96xf32>
    %55 = arith.truncf %54 : vector<8x96xf32> to vector<8x96xbf16>
    %c1_76 = arith.constant 1 : index
    %c0_77 = arith.constant 0 : index
    %c0_78 = arith.constant 0 : index
    %56 = vector.load %arg2[%c1_76, %c0_77, %c0_78] : memref<4x144x32xbf16, #tpu.memory_space<vmem>>, vector<1x96x32xbf16>
    %57 = vector.shape_cast %56 : vector<1x96x32xbf16> to vector<96x32xbf16>
    %cst_79 = arith.constant dense<0.000000e+00> : vector<8x32xf32>
    %58 = tpu.matmul %55, %57, %cst_79 {dimension_numbers = #tpu.dot_dimension_numbers<[1], [0], [0], [1], [0, 0, 1, 1], [], []>} : vector<8x96xbf16>, vector<96x32xbf16>, vector<8x32xf32> -> vector<8x32xf32>
    %59 = arith.addf %34, %58 : vector<8x32xf32>
    %c2_80 = arith.constant 2 : index
    %c0_81 = arith.constant 0 : index
    %c0_82 = arith.constant 0 : index
    %c0_83 = arith.constant 0 : index
    %c0_84 = arith.constant 0 : index
    %60 = vector.load %arg1[%c2_80, %c0_81, %c0_82, %c0_83, %c0_84] : memref<4x2x4x4x16xbf16, #tpu.memory_space<vmem>>, vector<1x2x2x2x16xbf16>
    %61 = vector.shape_cast %60 : vector<1x2x2x2x16xbf16> to vector<2x2x2x16xbf16>
    %c2_85 = arith.constant 2 : index
    %c0_86 = arith.constant 0 : index
    %c0_87 = arith.constant 0 : index
    %c1_88 = arith.constant 1 : index
    %c0_89 = arith.constant 0 : index
    %62 = vector.load %arg1[%c2_85, %c0_86, %c0_87, %c1_88, %c0_89] : memref<4x2x4x4x16xbf16, #tpu.memory_space<vmem>>, vector<1x2x2x2x16xbf16>
    %63 = vector.shape_cast %62 : vector<1x2x2x2x16xbf16> to vector<2x2x2x16xbf16>
    %c2_90 = arith.constant 2 : index
    %c0_91 = arith.constant 0 : index
    %c0_92 = arith.constant 0 : index
    %c2_93 = arith.constant 2 : index
    %c0_94 = arith.constant 0 : index
    %64 = vector.load %arg1[%c2_90, %c0_91, %c0_92, %c2_93, %c0_94] : memref<4x2x4x4x16xbf16, #tpu.memory_space<vmem>>, vector<1x2x2x2x16xbf16>
    %65 = vector.shape_cast %64 : vector<1x2x2x2x16xbf16> to vector<2x2x2x16xbf16>
    %c2_95 = arith.constant 2 : index
    %c0_96 = arith.constant 0 : index
    %c1_97 = arith.constant 1 : index
    %c0_98 = arith.constant 0 : index
    %c0_99 = arith.constant 0 : index
    %66 = vector.load %arg1[%c2_95, %c0_96, %c1_97, %c0_98, %c0_99] : memref<4x2x4x4x16xbf16, #tpu.memory_space<vmem>>, vector<1x2x2x2x16xbf16>
    %67 = vector.shape_cast %66 : vector<1x2x2x2x16xbf16> to vector<2x2x2x16xbf16>
    %c2_100 = arith.constant 2 : index
    %c0_101 = arith.constant 0 : index
    %c1_102 = arith.constant 1 : index
    %c1_103 = arith.constant 1 : index
    %c0_104 = arith.constant 0 : index
    %68 = vector.load %arg1[%c2_100, %c0_101, %c1_102, %c1_103, %c0_104] : memref<4x2x4x4x16xbf16, #tpu.memory_space<vmem>>, vector<1x2x2x2x16xbf16>
    %69 = vector.shape_cast %68 : vector<1x2x2x2x16xbf16> to vector<2x2x2x16xbf16>
    %c2_105 = arith.constant 2 : index
    %c0_106 = arith.constant 0 : index
    %c1_107 = arith.constant 1 : index
    %c2_108 = arith.constant 2 : index
    %c0_109 = arith.constant 0 : index
    %70 = vector.load %arg1[%c2_105, %c0_106, %c1_107, %c2_108, %c0_109] : memref<4x2x4x4x16xbf16, #tpu.memory_space<vmem>>, vector<1x2x2x2x16xbf16>
    %71 = vector.shape_cast %70 : vector<1x2x2x2x16xbf16> to vector<2x2x2x16xbf16>
    %72 = arith.extf %61 : vector<2x2x2x16xbf16> to vector<2x2x2x16xf32>
    %73 = arith.extf %63 : vector<2x2x2x16xbf16> to vector<2x2x2x16xf32>
    %74 = arith.extf %65 : vector<2x2x2x16xbf16> to vector<2x2x2x16xf32>
    %75 = arith.extf %67 : vector<2x2x2x16xbf16> to vector<2x2x2x16xf32>
    %76 = arith.extf %69 : vector<2x2x2x16xbf16> to vector<2x2x2x16xf32>
    %77 = arith.extf %71 : vector<2x2x2x16xbf16> to vector<2x2x2x16xf32>
    %78 = tpu.concatenate %72, %73, %74, %75, %76, %77 in 3 : vector<2x2x2x16xf32>, vector<2x2x2x16xf32>, vector<2x2x2x16xf32>, vector<2x2x2x16xf32>, vector<2x2x2x16xf32>, vector<2x2x2x16xf32> -> vector<2x2x2x96xf32>
    %79 = vector.shape_cast %78 : vector<2x2x2x96xf32> to vector<8x96xf32>
    %80 = arith.truncf %79 : vector<8x96xf32> to vector<8x96xbf16>
    %c2_110 = arith.constant 2 : index
    %c0_111 = arith.constant 0 : index
    %c0_112 = arith.constant 0 : index
    %81 = vector.load %arg2[%c2_110, %c0_111, %c0_112] : memref<4x144x32xbf16, #tpu.memory_space<vmem>>, vector<1x96x32xbf16>
    %82 = vector.shape_cast %81 : vector<1x96x32xbf16> to vector<96x32xbf16>
    %cst_113 = arith.constant dense<0.000000e+00> : vector<8x32xf32>
    %83 = tpu.matmul %80, %82, %cst_113 {dimension_numbers = #tpu.dot_dimension_numbers<[1], [0], [0], [1], [0, 0, 1, 1], [], []>} : vector<8x96xbf16>, vector<96x32xbf16>, vector<8x32xf32> -> vector<8x32xf32>
    %84 = arith.addf %59, %83 : vector<8x32xf32>
    %c3 = arith.constant 3 : index
    %c0_114 = arith.constant 0 : index
    %c0_115 = arith.constant 0 : index
    %c0_116 = arith.constant 0 : index
    %c0_117 = arith.constant 0 : index
    %85 = vector.load %arg1[%c3, %c0_114, %c0_115, %c0_116, %c0_117] : memref<4x2x4x4x16xbf16, #tpu.memory_space<vmem>>, vector<1x2x2x2x16xbf16>
    %86 = vector.shape_cast %85 : vector<1x2x2x2x16xbf16> to vector<2x2x2x16xbf16>
    %c3_118 = arith.constant 3 : index
    %c0_119 = arith.constant 0 : index
    %c0_120 = arith.constant 0 : index
    %c1_121 = arith.constant 1 : index
    %c0_122 = arith.constant 0 : index
    %87 = vector.load %arg1[%c3_118, %c0_119, %c0_120, %c1_121, %c0_122] : memref<4x2x4x4x16xbf16, #tpu.memory_space<vmem>>, vector<1x2x2x2x16xbf16>
    %88 = vector.shape_cast %87 : vector<1x2x2x2x16xbf16> to vector<2x2x2x16xbf16>
    %c3_123 = arith.constant 3 : index
    %c0_124 = arith.constant 0 : index
    %c1_125 = arith.constant 1 : index
    %c0_126 = arith.constant 0 : index
    %c0_127 = arith.constant 0 : index
    %89 = vector.load %arg1[%c3_123, %c0_124, %c1_125, %c0_126, %c0_127] : memref<4x2x4x4x16xbf16, #tpu.memory_space<vmem>>, vector<1x2x2x2x16xbf16>
    %90 = vector.shape_cast %89 : vector<1x2x2x2x16xbf16> to vector<2x2x2x16xbf16>
    %c3_128 = arith.constant 3 : index
    %c0_129 = arith.constant 0 : index
    %c1_130 = arith.constant 1 : index
    %c1_131 = arith.constant 1 : index
    %c0_132 = arith.constant 0 : index
    %91 = vector.load %arg1[%c3_128, %c0_129, %c1_130, %c1_131, %c0_132] : memref<4x2x4x4x16xbf16, #tpu.memory_space<vmem>>, vector<1x2x2x2x16xbf16>
    %92 = vector.shape_cast %91 : vector<1x2x2x2x16xbf16> to vector<2x2x2x16xbf16>
    %93 = arith.extf %86 : vector<2x2x2x16xbf16> to vector<2x2x2x16xf32>
    %94 = arith.extf %88 : vector<2x2x2x16xbf16> to vector<2x2x2x16xf32>
    %95 = arith.extf %90 : vector<2x2x2x16xbf16> to vector<2x2x2x16xf32>
    %96 = arith.extf %92 : vector<2x2x2x16xbf16> to vector<2x2x2x16xf32>
    %97 = tpu.concatenate %93, %94, %95, %96 in 3 : vector<2x2x2x16xf32>, vector<2x2x2x16xf32>, vector<2x2x2x16xf32>, vector<2x2x2x16xf32> -> vector<2x2x2x64xf32>
    %98 = vector.shape_cast %97 : vector<2x2x2x64xf32> to vector<8x64xf32>
    %99 = arith.truncf %98 : vector<8x64xf32> to vector<8x64xbf16>
    %c3_133 = arith.constant 3 : index
    %c0_134 = arith.constant 0 : index
    %c0_135 = arith.constant 0 : index
    %100 = vector.load %arg2[%c3_133, %c0_134, %c0_135] : memref<4x144x32xbf16, #tpu.memory_space<vmem>>, vector<1x64x32xbf16>
    %101 = vector.shape_cast %100 : vector<1x64x32xbf16> to vector<64x32xbf16>
    %cst_136 = arith.constant dense<0.000000e+00> : vector<8x32xf32>
    %102 = tpu.matmul %99, %101, %cst_136 {dimension_numbers = #tpu.dot_dimension_numbers<[1], [0], [0], [1], [0, 0, 1, 1], [], []>} : vector<8x64xbf16>, vector<64x32xbf16>, vector<8x32xf32> -> vector<8x32xf32>
    %103 = arith.addf %84, %102 : vector<8x32xf32>
    %cst_137 = arith.constant dense<0.000000e+00> : vector<32xf32>
    %104 = vector.multi_reduction <add>, %103, %cst_137 [0] : vector<8x32xf32> to vector<32xf32>
    %105 = vector.shape_cast %104 : vector<32xf32> to vector<1x32xf32>
    %cst_138 = arith.constant 8.000000e+00 : f32
    %106 = vector.broadcast %cst_138 : f32 to vector<1x32xf32>
    %107 = arith.divf %105, %106 : vector<1x32xf32>
    %108 = vector.broadcast %107 : vector<1x32xf32> to vector<8x32xf32>
    %109 = arith.subf %103, %108 : vector<8x32xf32>
    %110 = arith.mulf %109, %109 : vector<8x32xf32>
    %cst_139 = arith.constant dense<0.000000e+00> : vector<32xf32>
    %111 = vector.multi_reduction <add>, %110, %cst_139 [0] : vector<8x32xf32> to vector<32xf32>
    %112 = vector.shape_cast %111 : vector<32xf32> to vector<1x32xf32>
    %cst_140 = arith.constant 8.000000e+00 : f32
    %113 = vector.broadcast %cst_140 : f32 to vector<1x32xf32>
    %114 = arith.divf %112, %113 : vector<1x32xf32>
    %c0_141 = arith.constant 0 : index
    %c0_142 = arith.constant 0 : index
    %115 = vector.load %arg3[%c0_141, %c0_142] : memref<1x32xf32, #tpu.memory_space<vmem>>, vector<1x32xf32>
    %cst_143 = arith.constant 9.99999974E-6 : f32
    %116 = vector.broadcast %cst_143 : f32 to vector<1x32xf32>
    %117 = arith.addf %114, %116 : vector<1x32xf32>
    %118 = math.rsqrt %117 : vector<1x32xf32>
    %119 = arith.mulf %115, %118 : vector<1x32xf32>
    %120 = vector.broadcast %119 : vector<1x32xf32> to vector<8x32xf32>
    %121 = arith.mulf %103, %120 : vector<8x32xf32>
    %c0_144 = arith.constant 0 : index
    %c0_145 = arith.constant 0 : index
    %122 = vector.load %arg4[%c0_144, %c0_145] : memref<1x32xf32, #tpu.memory_space<vmem>>, vector<1x32xf32>
    %123 = arith.mulf %107, %119 : vector<1x32xf32>
    %124 = arith.subf %122, %123 : vector<1x32xf32>
    %125 = vector.broadcast %124 : vector<1x32xf32> to vector<8x32xf32>
    %126 = arith.addf %121, %125 : vector<8x32xf32>
    %cst_146 = arith.constant 0.000000e+00 : f32
    %127 = vector.broadcast %cst_146 : f32 to vector<8x32xf32>
    %128 = arith.cmpf oge, %126, %127 : vector<8x32xf32>
    %cst_147 = arith.constant 2.000000e-01 : f32
    %129 = vector.broadcast %cst_147 : f32 to vector<8x32xf32>
    %130 = arith.mulf %129, %126 : vector<8x32xf32>
    %131 = arith.select %128, %126, %130 : vector<8x32xi1>, vector<8x32xf32>
    %132 = vector.shape_cast %131 : vector<8x32xf32> to vector<2x2x2x32xf32>
    %133 = arith.truncf %132 : vector<2x2x2x32xf32> to vector<2x2x2x32xbf16>
    %c0_148 = arith.constant 0 : index
    %c0_149 = arith.constant 0 : index
    %c0_150 = arith.constant 0 : index
    %c0_151 = arith.constant 0 : index
    %134 = vector.load %arg5[%c0_148, %c0_149, %c0_150, %c0_151] : memref<2x2x2x32xbf16, #tpu.memory_space<vmem>>, vector<2x2x2x32xbf16>
    tpu.vector_store %arg5[%c0_148, %c0_149, %c0_150, %c0_151], %133 {strides = array<i32>} : memref<2x2x2x32xbf16, #tpu.memory_space<vmem>>, vector<2x2x2x32xbf16>,
    return
  }
  func.func @transform_0(%arg0: i32) -> (i32, i32, i32, i32, i32) {
    %c0_i32 = arith.constant 0 : i32
    %c0_i32_0 = arith.constant 0 : i32
    %c0_i32_1 = arith.constant 0 : i32
    %c0_i32_2 = arith.constant 0 : i32
    %c0_i32_3 = arith.constant 0 : i32
    return %c0_i32, %arg0, %c0_i32_0, %c0_i32_1, %c0_i32_2 : i32, i32, i32, i32, i32
  }
  func.func @transform_1(%arg0: i32) -> (i32, i32, i32) {
    %c0_i32 = arith.constant 0 : i32
    %c0_i32_0 = arith.constant 0 : i32
    %c0_i32_1 = arith.constant 0 : i32
    %c0_i32_2 = arith.constant 0 : i32
    return %c0_i32, %c0_i32_0, %c0_i32_1 : i32, i32, i32
  }
  func.func @transform_2(%arg0: i32) -> (i32, i32) {
    %c0_i32 = arith.constant 0 : i32
    %c0_i32_0 = arith.constant 0 : i32
    %c0_i32_1 = arith.constant 0 : i32
    return %c0_i32, %c0_i32_0 : i32, i32
  }
  func.func @transform_3(%arg0: i32) -> (i32, i32) {
    %c0_i32 = arith.constant 0 : i32
    %c0_i32_0 = arith.constant 0 : i32
    %c0_i32_1 = arith.constant 0 : i32
    return %c0_i32, %c0_i32_0 : i32, i32
  }
  func.func @transform_4(%arg0: i32) -> (i32, i32, i32, i32) {
    %c0_i32 = arith.constant 0 : i32
    %c0_i32_0 = arith.constant 0 : i32
    %c0_i32_1 = arith.constant 0 : i32
    %c0_i32_2 = arith.constant 0 : i32
    return %arg0, %c0_i32, %c0_i32_0, %c0_i32_1 : i32, i32, i32, i32
  }
}

module attributes {stable_mosaic.version = 11 : i64} {
  func.func @kernel(%arg0: i32, %arg1: memref<1x2x6x6x32xbf16, #tpu.memory_space<vmem>>, %arg2: memref<4x256x32xbf16, #tpu.memory_space<vmem>>, %arg3: memref<1x32xf32, #tpu.memory_space<vmem>>, %arg4: memref<1x32xf32, #tpu.memory_space<vmem>>, %arg5: memref<2x2x2x32xbf16, #tpu.memory_space<vmem>>) attributes {dimension_semantics = [#tpu.dimension_semantics<parallel>], iteration_bounds = array<i64: 1>, scalar_prefetch = 0 : i64, scratch_operands = 0 : i64, tpu.core_type = #tpu.core_type<tc>, window_params = [{transform_indices = @transform_0, window_bounds = array<i64: 1, 2, 6, 6, 32>}, {pipeline_mode = #tpu.pipeline_mode<synchronous>, transform_indices = @transform_1, window_bounds = array<i64: 4, 256, 32>}, {pipeline_mode = #tpu.pipeline_mode<synchronous>, transform_indices = @transform_2, window_bounds = array<i64: 1, 32>}, {pipeline_mode = #tpu.pipeline_mode<synchronous>, transform_indices = @transform_3, window_bounds = array<i64: 1, 32>}, {transform_indices = @transform_4, window_bounds = array<i64: 2, 2, 2, 32>}]} {
    %cst = arith.constant 0.000000e+00 : f32
    %0 = vector.broadcast %cst : f32 to vector<8x32xf32>
    %c0 = arith.constant 0 : index
    %c0_0 = arith.constant 0 : index
    %c0_1 = arith.constant 0 : index
    %c0_2 = arith.constant 0 : index
    %c0_3 = arith.constant 0 : index
    %1 = vector.load %arg1[%c0, %c0_0, %c0_1, %c0_2, %c0_3] : memref<1x2x6x6x32xbf16, #tpu.memory_space<vmem>>, vector<1x2x2x2x32xbf16>
    %2 = vector.shape_cast %1 : vector<1x2x2x2x32xbf16> to vector<2x2x2x32xbf16>
    %c0_4 = arith.constant 0 : index
    %c0_5 = arith.constant 0 : index
    %c0_6 = arith.constant 0 : index
    %c1 = arith.constant 1 : index
    %c0_7 = arith.constant 0 : index
    %3 = vector.load %arg1[%c0_4, %c0_5, %c0_6, %c1, %c0_7] : memref<1x2x6x6x32xbf16, #tpu.memory_space<vmem>>, vector<1x2x2x2x32xbf16>
    %4 = vector.shape_cast %3 : vector<1x2x2x2x32xbf16> to vector<2x2x2x32xbf16>
    %c0_8 = arith.constant 0 : index
    %c0_9 = arith.constant 0 : index
    %c0_10 = arith.constant 0 : index
    %c2 = arith.constant 2 : index
    %c0_11 = arith.constant 0 : index
    %5 = vector.load %arg1[%c0_8, %c0_9, %c0_10, %c2, %c0_11] : memref<1x2x6x6x32xbf16, #tpu.memory_space<vmem>>, vector<1x2x2x2x32xbf16>
    %6 = vector.shape_cast %5 : vector<1x2x2x2x32xbf16> to vector<2x2x2x32xbf16>
    %c0_12 = arith.constant 0 : index
    %c0_13 = arith.constant 0 : index
    %c0_14 = arith.constant 0 : index
    %c3 = arith.constant 3 : index
    %c0_15 = arith.constant 0 : index
    %7 = vector.load %arg1[%c0_12, %c0_13, %c0_14, %c3, %c0_15] : memref<1x2x6x6x32xbf16, #tpu.memory_space<vmem>>, vector<1x2x2x2x32xbf16>
    %8 = vector.shape_cast %7 : vector<1x2x2x2x32xbf16> to vector<2x2x2x32xbf16>
    %c0_16 = arith.constant 0 : index
    %c0_17 = arith.constant 0 : index
    %c0_18 = arith.constant 0 : index
    %c4 = arith.constant 4 : index
    %c0_19 = arith.constant 0 : index
    %9 = vector.load %arg1[%c0_16, %c0_17, %c0_18, %c4, %c0_19] : memref<1x2x6x6x32xbf16, #tpu.memory_space<vmem>>, vector<1x2x2x2x32xbf16>
    %10 = vector.shape_cast %9 : vector<1x2x2x2x32xbf16> to vector<2x2x2x32xbf16>
    %c0_20 = arith.constant 0 : index
    %c0_21 = arith.constant 0 : index
    %c1_22 = arith.constant 1 : index
    %c0_23 = arith.constant 0 : index
    %c0_24 = arith.constant 0 : index
    %11 = vector.load %arg1[%c0_20, %c0_21, %c1_22, %c0_23, %c0_24] : memref<1x2x6x6x32xbf16, #tpu.memory_space<vmem>>, vector<1x2x2x2x32xbf16>
    %12 = vector.shape_cast %11 : vector<1x2x2x2x32xbf16> to vector<2x2x2x32xbf16>
    %c0_25 = arith.constant 0 : index
    %c0_26 = arith.constant 0 : index
    %c1_27 = arith.constant 1 : index
    %c1_28 = arith.constant 1 : index
    %c0_29 = arith.constant 0 : index
    %13 = vector.load %arg1[%c0_25, %c0_26, %c1_27, %c1_28, %c0_29] : memref<1x2x6x6x32xbf16, #tpu.memory_space<vmem>>, vector<1x2x2x2x32xbf16>
    %14 = vector.shape_cast %13 : vector<1x2x2x2x32xbf16> to vector<2x2x2x32xbf16>
    %c0_30 = arith.constant 0 : index
    %c0_31 = arith.constant 0 : index
    %c1_32 = arith.constant 1 : index
    %c2_33 = arith.constant 2 : index
    %c0_34 = arith.constant 0 : index
    %15 = vector.load %arg1[%c0_30, %c0_31, %c1_32, %c2_33, %c0_34] : memref<1x2x6x6x32xbf16, #tpu.memory_space<vmem>>, vector<1x2x2x2x32xbf16>
    %16 = vector.shape_cast %15 : vector<1x2x2x2x32xbf16> to vector<2x2x2x32xbf16>
    %17 = arith.extf %2 : vector<2x2x2x32xbf16> to vector<2x2x2x32xf32>
    %18 = arith.extf %4 : vector<2x2x2x32xbf16> to vector<2x2x2x32xf32>
    %19 = arith.extf %6 : vector<2x2x2x32xbf16> to vector<2x2x2x32xf32>
    %20 = arith.extf %8 : vector<2x2x2x32xbf16> to vector<2x2x2x32xf32>
    %21 = arith.extf %10 : vector<2x2x2x32xbf16> to vector<2x2x2x32xf32>
    %22 = arith.extf %12 : vector<2x2x2x32xbf16> to vector<2x2x2x32xf32>
    %23 = arith.extf %14 : vector<2x2x2x32xbf16> to vector<2x2x2x32xf32>
    %24 = arith.extf %16 : vector<2x2x2x32xbf16> to vector<2x2x2x32xf32>
    %25 = tpu.concatenate %17, %18, %19, %20, %21, %22, %23, %24 in 3 : vector<2x2x2x32xf32>, vector<2x2x2x32xf32>, vector<2x2x2x32xf32>, vector<2x2x2x32xf32>, vector<2x2x2x32xf32>, vector<2x2x2x32xf32>, vector<2x2x2x32xf32>, vector<2x2x2x32xf32> -> vector<2x2x2x256xf32>
    %26 = vector.shape_cast %25 : vector<2x2x2x256xf32> to vector<8x256xf32>
    %27 = arith.truncf %26 : vector<8x256xf32> to vector<8x256xbf16>
    %c0_35 = arith.constant 0 : index
    %c0_36 = arith.constant 0 : index
    %c0_37 = arith.constant 0 : index
    %28 = vector.load %arg2[%c0_35, %c0_36, %c0_37] : memref<4x256x32xbf16, #tpu.memory_space<vmem>>, vector<1x256x32xbf16>
    %29 = vector.shape_cast %28 : vector<1x256x32xbf16> to vector<256x32xbf16>
    %cst_38 = arith.constant dense<0.000000e+00> : vector<8x32xf32>
    %30 = tpu.matmul %27, %29, %cst_38 {dimension_numbers = #tpu.dot_dimension_numbers<[1], [0], [0], [1], [0, 0, 1, 1], [], []>} : vector<8x256xbf16>, vector<256x32xbf16>, vector<8x32xf32> -> vector<8x32xf32>
    %31 = arith.addf %0, %30 : vector<8x32xf32>
    %c0_39 = arith.constant 0 : index
    %c0_40 = arith.constant 0 : index
    %c1_41 = arith.constant 1 : index
    %c3_42 = arith.constant 3 : index
    %c0_43 = arith.constant 0 : index
    %32 = vector.load %arg1[%c0_39, %c0_40, %c1_41, %c3_42, %c0_43] : memref<1x2x6x6x32xbf16, #tpu.memory_space<vmem>>, vector<1x2x2x2x32xbf16>
    %33 = vector.shape_cast %32 : vector<1x2x2x2x32xbf16> to vector<2x2x2x32xbf16>
    %c0_44 = arith.constant 0 : index
    %c0_45 = arith.constant 0 : index
    %c1_46 = arith.constant 1 : index
    %c4_47 = arith.constant 4 : index
    %c0_48 = arith.constant 0 : index
    %34 = vector.load %arg1[%c0_44, %c0_45, %c1_46, %c4_47, %c0_48] : memref<1x2x6x6x32xbf16, #tpu.memory_space<vmem>>, vector<1x2x2x2x32xbf16>
    %35 = vector.shape_cast %34 : vector<1x2x2x2x32xbf16> to vector<2x2x2x32xbf16>
    %c0_49 = arith.constant 0 : index
    %c0_50 = arith.constant 0 : index
    %c2_51 = arith.constant 2 : index
    %c0_52 = arith.constant 0 : index
    %c0_53 = arith.constant 0 : index
    %36 = vector.load %arg1[%c0_49, %c0_50, %c2_51, %c0_52, %c0_53] : memref<1x2x6x6x32xbf16, #tpu.memory_space<vmem>>, vector<1x2x2x2x32xbf16>
    %37 = vector.shape_cast %36 : vector<1x2x2x2x32xbf16> to vector<2x2x2x32xbf16>
    %c0_54 = arith.constant 0 : index
    %c0_55 = arith.constant 0 : index
    %c2_56 = arith.constant 2 : index
    %c1_57 = arith.constant 1 : index
    %c0_58 = arith.constant 0 : index
    %38 = vector.load %arg1[%c0_54, %c0_55, %c2_56, %c1_57, %c0_58] : memref<1x2x6x6x32xbf16, #tpu.memory_space<vmem>>, vector<1x2x2x2x32xbf16>
    %39 = vector.shape_cast %38 : vector<1x2x2x2x32xbf16> to vector<2x2x2x32xbf16>
    %c0_59 = arith.constant 0 : index
    %c0_60 = arith.constant 0 : index
    %c2_61 = arith.constant 2 : index
    %c2_62 = arith.constant 2 : index
    %c0_63 = arith.constant 0 : index
    %40 = vector.load %arg1[%c0_59, %c0_60, %c2_61, %c2_62, %c0_63] : memref<1x2x6x6x32xbf16, #tpu.memory_space<vmem>>, vector<1x2x2x2x32xbf16>
    %41 = vector.shape_cast %40 : vector<1x2x2x2x32xbf16> to vector<2x2x2x32xbf16>
    %c0_64 = arith.constant 0 : index
    %c0_65 = arith.constant 0 : index
    %c2_66 = arith.constant 2 : index
    %c3_67 = arith.constant 3 : index
    %c0_68 = arith.constant 0 : index
    %42 = vector.load %arg1[%c0_64, %c0_65, %c2_66, %c3_67, %c0_68] : memref<1x2x6x6x32xbf16, #tpu.memory_space<vmem>>, vector<1x2x2x2x32xbf16>
    %43 = vector.shape_cast %42 : vector<1x2x2x2x32xbf16> to vector<2x2x2x32xbf16>
    %c0_69 = arith.constant 0 : index
    %c0_70 = arith.constant 0 : index
    %c2_71 = arith.constant 2 : index
    %c4_72 = arith.constant 4 : index
    %c0_73 = arith.constant 0 : index
    %44 = vector.load %arg1[%c0_69, %c0_70, %c2_71, %c4_72, %c0_73] : memref<1x2x6x6x32xbf16, #tpu.memory_space<vmem>>, vector<1x2x2x2x32xbf16>
    %45 = vector.shape_cast %44 : vector<1x2x2x2x32xbf16> to vector<2x2x2x32xbf16>
    %c0_74 = arith.constant 0 : index
    %c0_75 = arith.constant 0 : index
    %c3_76 = arith.constant 3 : index
    %c0_77 = arith.constant 0 : index
    %c0_78 = arith.constant 0 : index
    %46 = vector.load %arg1[%c0_74, %c0_75, %c3_76, %c0_77, %c0_78] : memref<1x2x6x6x32xbf16, #tpu.memory_space<vmem>>, vector<1x2x2x2x32xbf16>
    %47 = vector.shape_cast %46 : vector<1x2x2x2x32xbf16> to vector<2x2x2x32xbf16>
    %48 = arith.extf %33 : vector<2x2x2x32xbf16> to vector<2x2x2x32xf32>
    %49 = arith.extf %35 : vector<2x2x2x32xbf16> to vector<2x2x2x32xf32>
    %50 = arith.extf %37 : vector<2x2x2x32xbf16> to vector<2x2x2x32xf32>
    %51 = arith.extf %39 : vector<2x2x2x32xbf16> to vector<2x2x2x32xf32>
    %52 = arith.extf %41 : vector<2x2x2x32xbf16> to vector<2x2x2x32xf32>
    %53 = arith.extf %43 : vector<2x2x2x32xbf16> to vector<2x2x2x32xf32>
    %54 = arith.extf %45 : vector<2x2x2x32xbf16> to vector<2x2x2x32xf32>
    %55 = arith.extf %47 : vector<2x2x2x32xbf16> to vector<2x2x2x32xf32>
    %56 = tpu.concatenate %48, %49, %50, %51, %52, %53, %54, %55 in 3 : vector<2x2x2x32xf32>, vector<2x2x2x32xf32>, vector<2x2x2x32xf32>, vector<2x2x2x32xf32>, vector<2x2x2x32xf32>, vector<2x2x2x32xf32>, vector<2x2x2x32xf32>, vector<2x2x2x32xf32> -> vector<2x2x2x256xf32>
    %57 = vector.shape_cast %56 : vector<2x2x2x256xf32> to vector<8x256xf32>
    %58 = arith.truncf %57 : vector<8x256xf32> to vector<8x256xbf16>
    %c1_79 = arith.constant 1 : index
    %c0_80 = arith.constant 0 : index
    %c0_81 = arith.constant 0 : index
    %59 = vector.load %arg2[%c1_79, %c0_80, %c0_81] : memref<4x256x32xbf16, #tpu.memory_space<vmem>>, vector<1x256x32xbf16>
    %60 = vector.shape_cast %59 : vector<1x256x32xbf16> to vector<256x32xbf16>
    %cst_82 = arith.constant dense<0.000000e+00> : vector<8x32xf32>
    %61 = tpu.matmul %58, %60, %cst_82 {dimension_numbers = #tpu.dot_dimension_numbers<[1], [0], [0], [1], [0, 0, 1, 1], [], []>} : vector<8x256xbf16>, vector<256x32xbf16>, vector<8x32xf32> -> vector<8x32xf32>
    %62 = arith.addf %31, %61 : vector<8x32xf32>
    %c0_83 = arith.constant 0 : index
    %c0_84 = arith.constant 0 : index
    %c3_85 = arith.constant 3 : index
    %c1_86 = arith.constant 1 : index
    %c0_87 = arith.constant 0 : index
    %63 = vector.load %arg1[%c0_83, %c0_84, %c3_85, %c1_86, %c0_87] : memref<1x2x6x6x32xbf16, #tpu.memory_space<vmem>>, vector<1x2x2x2x32xbf16>
    %64 = vector.shape_cast %63 : vector<1x2x2x2x32xbf16> to vector<2x2x2x32xbf16>
    %c0_88 = arith.constant 0 : index
    %c0_89 = arith.constant 0 : index
    %c3_90 = arith.constant 3 : index
    %c2_91 = arith.constant 2 : index
    %c0_92 = arith.constant 0 : index
    %65 = vector.load %arg1[%c0_88, %c0_89, %c3_90, %c2_91, %c0_92] : memref<1x2x6x6x32xbf16, #tpu.memory_space<vmem>>, vector<1x2x2x2x32xbf16>
    %66 = vector.shape_cast %65 : vector<1x2x2x2x32xbf16> to vector<2x2x2x32xbf16>
    %c0_93 = arith.constant 0 : index
    %c0_94 = arith.constant 0 : index
    %c3_95 = arith.constant 3 : index
    %c3_96 = arith.constant 3 : index
    %c0_97 = arith.constant 0 : index
    %67 = vector.load %arg1[%c0_93, %c0_94, %c3_95, %c3_96, %c0_97] : memref<1x2x6x6x32xbf16, #tpu.memory_space<vmem>>, vector<1x2x2x2x32xbf16>
    %68 = vector.shape_cast %67 : vector<1x2x2x2x32xbf16> to vector<2x2x2x32xbf16>
    %c0_98 = arith.constant 0 : index
    %c0_99 = arith.constant 0 : index
    %c3_100 = arith.constant 3 : index
    %c4_101 = arith.constant 4 : index
    %c0_102 = arith.constant 0 : index
    %69 = vector.load %arg1[%c0_98, %c0_99, %c3_100, %c4_101, %c0_102] : memref<1x2x6x6x32xbf16, #tpu.memory_space<vmem>>, vector<1x2x2x2x32xbf16>
    %70 = vector.shape_cast %69 : vector<1x2x2x2x32xbf16> to vector<2x2x2x32xbf16>
    %c0_103 = arith.constant 0 : index
    %c0_104 = arith.constant 0 : index
    %c4_105 = arith.constant 4 : index
    %c0_106 = arith.constant 0 : index
    %c0_107 = arith.constant 0 : index
    %71 = vector.load %arg1[%c0_103, %c0_104, %c4_105, %c0_106, %c0_107] : memref<1x2x6x6x32xbf16, #tpu.memory_space<vmem>>, vector<1x2x2x2x32xbf16>
    %72 = vector.shape_cast %71 : vector<1x2x2x2x32xbf16> to vector<2x2x2x32xbf16>
    %c0_108 = arith.constant 0 : index
    %c0_109 = arith.constant 0 : index
    %c4_110 = arith.constant 4 : index
    %c1_111 = arith.constant 1 : index
    %c0_112 = arith.constant 0 : index
    %73 = vector.load %arg1[%c0_108, %c0_109, %c4_110, %c1_111, %c0_112] : memref<1x2x6x6x32xbf16, #tpu.memory_space<vmem>>, vector<1x2x2x2x32xbf16>
    %74 = vector.shape_cast %73 : vector<1x2x2x2x32xbf16> to vector<2x2x2x32xbf16>
    %c0_113 = arith.constant 0 : index
    %c0_114 = arith.constant 0 : index
    %c4_115 = arith.constant 4 : index
    %c2_116 = arith.constant 2 : index
    %c0_117 = arith.constant 0 : index
    %75 = vector.load %arg1[%c0_113, %c0_114, %c4_115, %c2_116, %c0_117] : memref<1x2x6x6x32xbf16, #tpu.memory_space<vmem>>, vector<1x2x2x2x32xbf16>
    %76 = vector.shape_cast %75 : vector<1x2x2x2x32xbf16> to vector<2x2x2x32xbf16>
    %c0_118 = arith.constant 0 : index
    %c0_119 = arith.constant 0 : index
    %c4_120 = arith.constant 4 : index
    %c3_121 = arith.constant 3 : index
    %c0_122 = arith.constant 0 : index
    %77 = vector.load %arg1[%c0_118, %c0_119, %c4_120, %c3_121, %c0_122] : memref<1x2x6x6x32xbf16, #tpu.memory_space<vmem>>, vector<1x2x2x2x32xbf16>
    %78 = vector.shape_cast %77 : vector<1x2x2x2x32xbf16> to vector<2x2x2x32xbf16>
    %79 = arith.extf %64 : vector<2x2x2x32xbf16> to vector<2x2x2x32xf32>
    %80 = arith.extf %66 : vector<2x2x2x32xbf16> to vector<2x2x2x32xf32>
    %81 = arith.extf %68 : vector<2x2x2x32xbf16> to vector<2x2x2x32xf32>
    %82 = arith.extf %70 : vector<2x2x2x32xbf16> to vector<2x2x2x32xf32>
    %83 = arith.extf %72 : vector<2x2x2x32xbf16> to vector<2x2x2x32xf32>
    %84 = arith.extf %74 : vector<2x2x2x32xbf16> to vector<2x2x2x32xf32>
    %85 = arith.extf %76 : vector<2x2x2x32xbf16> to vector<2x2x2x32xf32>
    %86 = arith.extf %78 : vector<2x2x2x32xbf16> to vector<2x2x2x32xf32>
    %87 = tpu.concatenate %79, %80, %81, %82, %83, %84, %85, %86 in 3 : vector<2x2x2x32xf32>, vector<2x2x2x32xf32>, vector<2x2x2x32xf32>, vector<2x2x2x32xf32>, vector<2x2x2x32xf32>, vector<2x2x2x32xf32>, vector<2x2x2x32xf32>, vector<2x2x2x32xf32> -> vector<2x2x2x256xf32>
    %88 = vector.shape_cast %87 : vector<2x2x2x256xf32> to vector<8x256xf32>
    %89 = arith.truncf %88 : vector<8x256xf32> to vector<8x256xbf16>
    %c2_123 = arith.constant 2 : index
    %c0_124 = arith.constant 0 : index
    %c0_125 = arith.constant 0 : index
    %90 = vector.load %arg2[%c2_123, %c0_124, %c0_125] : memref<4x256x32xbf16, #tpu.memory_space<vmem>>, vector<1x256x32xbf16>
    %91 = vector.shape_cast %90 : vector<1x256x32xbf16> to vector<256x32xbf16>
    %cst_126 = arith.constant dense<0.000000e+00> : vector<8x32xf32>
    %92 = tpu.matmul %89, %91, %cst_126 {dimension_numbers = #tpu.dot_dimension_numbers<[1], [0], [0], [1], [0, 0, 1, 1], [], []>} : vector<8x256xbf16>, vector<256x32xbf16>, vector<8x32xf32> -> vector<8x32xf32>
    %93 = arith.addf %62, %92 : vector<8x32xf32>
    %c0_127 = arith.constant 0 : index
    %c0_128 = arith.constant 0 : index
    %c4_129 = arith.constant 4 : index
    %c4_130 = arith.constant 4 : index
    %c0_131 = arith.constant 0 : index
    %94 = vector.load %arg1[%c0_127, %c0_128, %c4_129, %c4_130, %c0_131] : memref<1x2x6x6x32xbf16, #tpu.memory_space<vmem>>, vector<1x2x2x2x32xbf16>
    %95 = vector.shape_cast %94 : vector<1x2x2x2x32xbf16> to vector<2x2x2x32xbf16>
    %96 = vector.shape_cast %95 : vector<2x2x2x32xbf16> to vector<8x32xbf16>
    %c3_132 = arith.constant 3 : index
    %c0_133 = arith.constant 0 : index
    %c0_134 = arith.constant 0 : index
    %97 = vector.load %arg2[%c3_132, %c0_133, %c0_134] : memref<4x256x32xbf16, #tpu.memory_space<vmem>>, vector<1x32x32xbf16>
    %98 = vector.shape_cast %97 : vector<1x32x32xbf16> to vector<32x32xbf16>
    %cst_135 = arith.constant dense<0.000000e+00> : vector<8x32xf32>
    %99 = tpu.matmul %96, %98, %cst_135 {dimension_numbers = #tpu.dot_dimension_numbers<[1], [0], [0], [1], [0, 0, 1, 1], [], []>} : vector<8x32xbf16>, vector<32x32xbf16>, vector<8x32xf32> -> vector<8x32xf32>
    %100 = arith.addf %93, %99 : vector<8x32xf32>
    %cst_136 = arith.constant dense<0.000000e+00> : vector<32xf32>
    %101 = vector.multi_reduction <add>, %100, %cst_136 [0] : vector<8x32xf32> to vector<32xf32>
    %102 = vector.shape_cast %101 : vector<32xf32> to vector<1x32xf32>
    %cst_137 = arith.constant 8.000000e+00 : f32
    %103 = vector.broadcast %cst_137 : f32 to vector<1x32xf32>
    %104 = arith.divf %102, %103 : vector<1x32xf32>
    %105 = vector.broadcast %104 : vector<1x32xf32> to vector<8x32xf32>
    %106 = arith.subf %100, %105 : vector<8x32xf32>
    %107 = arith.mulf %106, %106 : vector<8x32xf32>
    %cst_138 = arith.constant dense<0.000000e+00> : vector<32xf32>
    %108 = vector.multi_reduction <add>, %107, %cst_138 [0] : vector<8x32xf32> to vector<32xf32>
    %109 = vector.shape_cast %108 : vector<32xf32> to vector<1x32xf32>
    %cst_139 = arith.constant 8.000000e+00 : f32
    %110 = vector.broadcast %cst_139 : f32 to vector<1x32xf32>
    %111 = arith.divf %109, %110 : vector<1x32xf32>
    %c0_140 = arith.constant 0 : index
    %c0_141 = arith.constant 0 : index
    %112 = vector.load %arg3[%c0_140, %c0_141] : memref<1x32xf32, #tpu.memory_space<vmem>>, vector<1x32xf32>
    %cst_142 = arith.constant 9.99999974E-6 : f32
    %113 = vector.broadcast %cst_142 : f32 to vector<1x32xf32>
    %114 = arith.addf %111, %113 : vector<1x32xf32>
    %115 = math.rsqrt %114 : vector<1x32xf32>
    %116 = arith.mulf %112, %115 : vector<1x32xf32>
    %117 = vector.broadcast %116 : vector<1x32xf32> to vector<8x32xf32>
    %118 = arith.mulf %100, %117 : vector<8x32xf32>
    %c0_143 = arith.constant 0 : index
    %c0_144 = arith.constant 0 : index
    %119 = vector.load %arg4[%c0_143, %c0_144] : memref<1x32xf32, #tpu.memory_space<vmem>>, vector<1x32xf32>
    %120 = arith.mulf %104, %116 : vector<1x32xf32>
    %121 = arith.subf %119, %120 : vector<1x32xf32>
    %122 = vector.broadcast %121 : vector<1x32xf32> to vector<8x32xf32>
    %123 = arith.addf %118, %122 : vector<8x32xf32>
    %cst_145 = arith.constant 0.000000e+00 : f32
    %124 = vector.broadcast %cst_145 : f32 to vector<8x32xf32>
    %125 = arith.cmpf oge, %123, %124 : vector<8x32xf32>
    %cst_146 = arith.constant 2.000000e-01 : f32
    %126 = vector.broadcast %cst_146 : f32 to vector<8x32xf32>
    %127 = arith.mulf %126, %123 : vector<8x32xf32>
    %128 = arith.select %125, %123, %127 : vector<8x32xi1>, vector<8x32xf32>
    %129 = vector.shape_cast %128 : vector<8x32xf32> to vector<2x2x2x32xf32>
    %130 = arith.truncf %129 : vector<2x2x2x32xf32> to vector<2x2x2x32xbf16>
    %c0_147 = arith.constant 0 : index
    %c0_148 = arith.constant 0 : index
    %c0_149 = arith.constant 0 : index
    %c0_150 = arith.constant 0 : index
    %131 = vector.load %arg5[%c0_147, %c0_148, %c0_149, %c0_150] : memref<2x2x2x32xbf16, #tpu.memory_space<vmem>>, vector<2x2x2x32xbf16>
    tpu.vector_store %arg5[%c0_147, %c0_148, %c0_149, %c0_150], %130 {strides = array<i32>} : memref<2x2x2x32xbf16, #tpu.memory_space<vmem>>, vector<2x2x2x32xbf16>,
    return
  }
  func.func @transform_0(%arg0: i32) -> (i32, i32, i32, i32, i32) {
    %c0_i32 = arith.constant 0 : i32
    %c0_i32_0 = arith.constant 0 : i32
    %c0_i32_1 = arith.constant 0 : i32
    %c0_i32_2 = arith.constant 0 : i32
    %c0_i32_3 = arith.constant 0 : i32
    return %c0_i32, %arg0, %c0_i32_0, %c0_i32_1, %c0_i32_2 : i32, i32, i32, i32, i32
  }
  func.func @transform_1(%arg0: i32) -> (i32, i32, i32) {
    %c0_i32 = arith.constant 0 : i32
    %c0_i32_0 = arith.constant 0 : i32
    %c0_i32_1 = arith.constant 0 : i32
    %c0_i32_2 = arith.constant 0 : i32
    return %c0_i32, %c0_i32_0, %c0_i32_1 : i32, i32, i32
  }
  func.func @transform_2(%arg0: i32) -> (i32, i32) {
    %c0_i32 = arith.constant 0 : i32
    %c0_i32_0 = arith.constant 0 : i32
    %c0_i32_1 = arith.constant 0 : i32
    return %c0_i32, %c0_i32_0 : i32, i32
  }
  func.func @transform_3(%arg0: i32) -> (i32, i32) {
    %c0_i32 = arith.constant 0 : i32
    %c0_i32_0 = arith.constant 0 : i32
    %c0_i32_1 = arith.constant 0 : i32
    return %c0_i32, %c0_i32_0 : i32, i32
  }
  func.func @transform_4(%arg0: i32) -> (i32, i32, i32, i32) {
    %c0_i32 = arith.constant 0 : i32
    %c0_i32_0 = arith.constant 0 : i32
    %c0_i32_1 = arith.constant 0 : i32
    %c0_i32_2 = arith.constant 0 : i32
    return %arg0, %c0_i32, %c0_i32_0, %c0_i32_1 : i32, i32, i32, i32
  }
}

module attributes {stable_mosaic.version = 11 : i64} {
  func.func @kernel(%arg0: i32, %arg1: memref<1x1x6x6x32xbf16, #tpu.memory_space<vmem>>, %arg2: memref<4x256x16xbf16, #tpu.memory_space<vmem>>, %arg3: memref<1x16xf32, #tpu.memory_space<vmem>>, %arg4: memref<1x2x2x16xbf16, #tpu.memory_space<vmem>>) attributes {dimension_semantics = [#tpu.dimension_semantics<parallel>], iteration_bounds = array<i64: 2>, scalar_prefetch = 0 : i64, scratch_operands = 0 : i64, tpu.core_type = #tpu.core_type<tc>, window_params = [{transform_indices = @transform_0, window_bounds = array<i64: 1, 1, 6, 6, 32>}, {pipeline_mode = #tpu.pipeline_mode<synchronous>, transform_indices = @transform_1, window_bounds = array<i64: 4, 256, 16>}, {pipeline_mode = #tpu.pipeline_mode<synchronous>, transform_indices = @transform_2, window_bounds = array<i64: 1, 16>}, {transform_indices = @transform_3, window_bounds = array<i64: 1, 2, 2, 16>}]} {
    %cst = arith.constant 0.000000e+00 : f32
    %0 = vector.broadcast %cst : f32 to vector<4x16xf32>
    %c0 = arith.constant 0 : index
    %c0_0 = arith.constant 0 : index
    %c0_1 = arith.constant 0 : index
    %c0_2 = arith.constant 0 : index
    %c0_3 = arith.constant 0 : index
    %1 = vector.load %arg1[%c0, %c0_0, %c0_1, %c0_2, %c0_3] : memref<1x1x6x6x32xbf16, #tpu.memory_space<vmem>>, vector<1x1x2x2x32xbf16>
    %2 = vector.shape_cast %1 : vector<1x1x2x2x32xbf16> to vector<1x2x2x32xbf16>
    %c0_4 = arith.constant 0 : index
    %c0_5 = arith.constant 0 : index
    %c0_6 = arith.constant 0 : index
    %c1 = arith.constant 1 : index
    %c0_7 = arith.constant 0 : index
    %3 = vector.load %arg1[%c0_4, %c0_5, %c0_6, %c1, %c0_7] : memref<1x1x6x6x32xbf16, #tpu.memory_space<vmem>>, vector<1x1x2x2x32xbf16>
    %4 = vector.shape_cast %3 : vector<1x1x2x2x32xbf16> to vector<1x2x2x32xbf16>
    %c0_8 = arith.constant 0 : index
    %c0_9 = arith.constant 0 : index
    %c0_10 = arith.constant 0 : index
    %c2 = arith.constant 2 : index
    %c0_11 = arith.constant 0 : index
    %5 = vector.load %arg1[%c0_8, %c0_9, %c0_10, %c2, %c0_11] : memref<1x1x6x6x32xbf16, #tpu.memory_space<vmem>>, vector<1x1x2x2x32xbf16>
    %6 = vector.shape_cast %5 : vector<1x1x2x2x32xbf16> to vector<1x2x2x32xbf16>
    %c0_12 = arith.constant 0 : index
    %c0_13 = arith.constant 0 : index
    %c0_14 = arith.constant 0 : index
    %c3 = arith.constant 3 : index
    %c0_15 = arith.constant 0 : index
    %7 = vector.load %arg1[%c0_12, %c0_13, %c0_14, %c3, %c0_15] : memref<1x1x6x6x32xbf16, #tpu.memory_space<vmem>>, vector<1x1x2x2x32xbf16>
    %8 = vector.shape_cast %7 : vector<1x1x2x2x32xbf16> to vector<1x2x2x32xbf16>
    %c0_16 = arith.constant 0 : index
    %c0_17 = arith.constant 0 : index
    %c0_18 = arith.constant 0 : index
    %c4 = arith.constant 4 : index
    %c0_19 = arith.constant 0 : index
    %9 = vector.load %arg1[%c0_16, %c0_17, %c0_18, %c4, %c0_19] : memref<1x1x6x6x32xbf16, #tpu.memory_space<vmem>>, vector<1x1x2x2x32xbf16>
    %10 = vector.shape_cast %9 : vector<1x1x2x2x32xbf16> to vector<1x2x2x32xbf16>
    %c0_20 = arith.constant 0 : index
    %c0_21 = arith.constant 0 : index
    %c1_22 = arith.constant 1 : index
    %c0_23 = arith.constant 0 : index
    %c0_24 = arith.constant 0 : index
    %11 = vector.load %arg1[%c0_20, %c0_21, %c1_22, %c0_23, %c0_24] : memref<1x1x6x6x32xbf16, #tpu.memory_space<vmem>>, vector<1x1x2x2x32xbf16>
    %12 = vector.shape_cast %11 : vector<1x1x2x2x32xbf16> to vector<1x2x2x32xbf16>
    %c0_25 = arith.constant 0 : index
    %c0_26 = arith.constant 0 : index
    %c1_27 = arith.constant 1 : index
    %c1_28 = arith.constant 1 : index
    %c0_29 = arith.constant 0 : index
    %13 = vector.load %arg1[%c0_25, %c0_26, %c1_27, %c1_28, %c0_29] : memref<1x1x6x6x32xbf16, #tpu.memory_space<vmem>>, vector<1x1x2x2x32xbf16>
    %14 = vector.shape_cast %13 : vector<1x1x2x2x32xbf16> to vector<1x2x2x32xbf16>
    %c0_30 = arith.constant 0 : index
    %c0_31 = arith.constant 0 : index
    %c1_32 = arith.constant 1 : index
    %c2_33 = arith.constant 2 : index
    %c0_34 = arith.constant 0 : index
    %15 = vector.load %arg1[%c0_30, %c0_31, %c1_32, %c2_33, %c0_34] : memref<1x1x6x6x32xbf16, #tpu.memory_space<vmem>>, vector<1x1x2x2x32xbf16>
    %16 = vector.shape_cast %15 : vector<1x1x2x2x32xbf16> to vector<1x2x2x32xbf16>
    %17 = arith.extf %2 : vector<1x2x2x32xbf16> to vector<1x2x2x32xf32>
    %18 = arith.extf %4 : vector<1x2x2x32xbf16> to vector<1x2x2x32xf32>
    %19 = arith.extf %6 : vector<1x2x2x32xbf16> to vector<1x2x2x32xf32>
    %20 = arith.extf %8 : vector<1x2x2x32xbf16> to vector<1x2x2x32xf32>
    %21 = arith.extf %10 : vector<1x2x2x32xbf16> to vector<1x2x2x32xf32>
    %22 = arith.extf %12 : vector<1x2x2x32xbf16> to vector<1x2x2x32xf32>
    %23 = arith.extf %14 : vector<1x2x2x32xbf16> to vector<1x2x2x32xf32>
    %24 = arith.extf %16 : vector<1x2x2x32xbf16> to vector<1x2x2x32xf32>
    %25 = tpu.concatenate %17, %18, %19, %20, %21, %22, %23, %24 in 3 : vector<1x2x2x32xf32>, vector<1x2x2x32xf32>, vector<1x2x2x32xf32>, vector<1x2x2x32xf32>, vector<1x2x2x32xf32>, vector<1x2x2x32xf32>, vector<1x2x2x32xf32>, vector<1x2x2x32xf32> -> vector<1x2x2x256xf32>
    %26 = vector.shape_cast %25 : vector<1x2x2x256xf32> to vector<4x256xf32>
    %27 = arith.truncf %26 : vector<4x256xf32> to vector<4x256xbf16>
    %c0_35 = arith.constant 0 : index
    %c0_36 = arith.constant 0 : index
    %c0_37 = arith.constant 0 : index
    %28 = vector.load %arg2[%c0_35, %c0_36, %c0_37] : memref<4x256x16xbf16, #tpu.memory_space<vmem>>, vector<1x256x16xbf16>
    %29 = vector.shape_cast %28 : vector<1x256x16xbf16> to vector<256x16xbf16>
    %cst_38 = arith.constant dense<0.000000e+00> : vector<4x16xf32>
    %30 = tpu.matmul %27, %29, %cst_38 {dimension_numbers = #tpu.dot_dimension_numbers<[1], [0], [0], [1], [0, 0, 1, 1], [], []>} : vector<4x256xbf16>, vector<256x16xbf16>, vector<4x16xf32> -> vector<4x16xf32>
    %31 = arith.addf %0, %30 : vector<4x16xf32>
    %c0_39 = arith.constant 0 : index
    %c0_40 = arith.constant 0 : index
    %c1_41 = arith.constant 1 : index
    %c3_42 = arith.constant 3 : index
    %c0_43 = arith.constant 0 : index
    %32 = vector.load %arg1[%c0_39, %c0_40, %c1_41, %c3_42, %c0_43] : memref<1x1x6x6x32xbf16, #tpu.memory_space<vmem>>, vector<1x1x2x2x32xbf16>
    %33 = vector.shape_cast %32 : vector<1x1x2x2x32xbf16> to vector<1x2x2x32xbf16>
    %c0_44 = arith.constant 0 : index
    %c0_45 = arith.constant 0 : index
    %c1_46 = arith.constant 1 : index
    %c4_47 = arith.constant 4 : index
    %c0_48 = arith.constant 0 : index
    %34 = vector.load %arg1[%c0_44, %c0_45, %c1_46, %c4_47, %c0_48] : memref<1x1x6x6x32xbf16, #tpu.memory_space<vmem>>, vector<1x1x2x2x32xbf16>
    %35 = vector.shape_cast %34 : vector<1x1x2x2x32xbf16> to vector<1x2x2x32xbf16>
    %c0_49 = arith.constant 0 : index
    %c0_50 = arith.constant 0 : index
    %c2_51 = arith.constant 2 : index
    %c0_52 = arith.constant 0 : index
    %c0_53 = arith.constant 0 : index
    %36 = vector.load %arg1[%c0_49, %c0_50, %c2_51, %c0_52, %c0_53] : memref<1x1x6x6x32xbf16, #tpu.memory_space<vmem>>, vector<1x1x2x2x32xbf16>
    %37 = vector.shape_cast %36 : vector<1x1x2x2x32xbf16> to vector<1x2x2x32xbf16>
    %c0_54 = arith.constant 0 : index
    %c0_55 = arith.constant 0 : index
    %c2_56 = arith.constant 2 : index
    %c1_57 = arith.constant 1 : index
    %c0_58 = arith.constant 0 : index
    %38 = vector.load %arg1[%c0_54, %c0_55, %c2_56, %c1_57, %c0_58] : memref<1x1x6x6x32xbf16, #tpu.memory_space<vmem>>, vector<1x1x2x2x32xbf16>
    %39 = vector.shape_cast %38 : vector<1x1x2x2x32xbf16> to vector<1x2x2x32xbf16>
    %c0_59 = arith.constant 0 : index
    %c0_60 = arith.constant 0 : index
    %c2_61 = arith.constant 2 : index
    %c2_62 = arith.constant 2 : index
    %c0_63 = arith.constant 0 : index
    %40 = vector.load %arg1[%c0_59, %c0_60, %c2_61, %c2_62, %c0_63] : memref<1x1x6x6x32xbf16, #tpu.memory_space<vmem>>, vector<1x1x2x2x32xbf16>
    %41 = vector.shape_cast %40 : vector<1x1x2x2x32xbf16> to vector<1x2x2x32xbf16>
    %c0_64 = arith.constant 0 : index
    %c0_65 = arith.constant 0 : index
    %c2_66 = arith.constant 2 : index
    %c3_67 = arith.constant 3 : index
    %c0_68 = arith.constant 0 : index
    %42 = vector.load %arg1[%c0_64, %c0_65, %c2_66, %c3_67, %c0_68] : memref<1x1x6x6x32xbf16, #tpu.memory_space<vmem>>, vector<1x1x2x2x32xbf16>
    %43 = vector.shape_cast %42 : vector<1x1x2x2x32xbf16> to vector<1x2x2x32xbf16>
    %c0_69 = arith.constant 0 : index
    %c0_70 = arith.constant 0 : index
    %c2_71 = arith.constant 2 : index
    %c4_72 = arith.constant 4 : index
    %c0_73 = arith.constant 0 : index
    %44 = vector.load %arg1[%c0_69, %c0_70, %c2_71, %c4_72, %c0_73] : memref<1x1x6x6x32xbf16, #tpu.memory_space<vmem>>, vector<1x1x2x2x32xbf16>
    %45 = vector.shape_cast %44 : vector<1x1x2x2x32xbf16> to vector<1x2x2x32xbf16>
    %c0_74 = arith.constant 0 : index
    %c0_75 = arith.constant 0 : index
    %c3_76 = arith.constant 3 : index
    %c0_77 = arith.constant 0 : index
    %c0_78 = arith.constant 0 : index
    %46 = vector.load %arg1[%c0_74, %c0_75, %c3_76, %c0_77, %c0_78] : memref<1x1x6x6x32xbf16, #tpu.memory_space<vmem>>, vector<1x1x2x2x32xbf16>
    %47 = vector.shape_cast %46 : vector<1x1x2x2x32xbf16> to vector<1x2x2x32xbf16>
    %48 = arith.extf %33 : vector<1x2x2x32xbf16> to vector<1x2x2x32xf32>
    %49 = arith.extf %35 : vector<1x2x2x32xbf16> to vector<1x2x2x32xf32>
    %50 = arith.extf %37 : vector<1x2x2x32xbf16> to vector<1x2x2x32xf32>
    %51 = arith.extf %39 : vector<1x2x2x32xbf16> to vector<1x2x2x32xf32>
    %52 = arith.extf %41 : vector<1x2x2x32xbf16> to vector<1x2x2x32xf32>
    %53 = arith.extf %43 : vector<1x2x2x32xbf16> to vector<1x2x2x32xf32>
    %54 = arith.extf %45 : vector<1x2x2x32xbf16> to vector<1x2x2x32xf32>
    %55 = arith.extf %47 : vector<1x2x2x32xbf16> to vector<1x2x2x32xf32>
    %56 = tpu.concatenate %48, %49, %50, %51, %52, %53, %54, %55 in 3 : vector<1x2x2x32xf32>, vector<1x2x2x32xf32>, vector<1x2x2x32xf32>, vector<1x2x2x32xf32>, vector<1x2x2x32xf32>, vector<1x2x2x32xf32>, vector<1x2x2x32xf32>, vector<1x2x2x32xf32> -> vector<1x2x2x256xf32>
    %57 = vector.shape_cast %56 : vector<1x2x2x256xf32> to vector<4x256xf32>
    %58 = arith.truncf %57 : vector<4x256xf32> to vector<4x256xbf16>
    %c1_79 = arith.constant 1 : index
    %c0_80 = arith.constant 0 : index
    %c0_81 = arith.constant 0 : index
    %59 = vector.load %arg2[%c1_79, %c0_80, %c0_81] : memref<4x256x16xbf16, #tpu.memory_space<vmem>>, vector<1x256x16xbf16>
    %60 = vector.shape_cast %59 : vector<1x256x16xbf16> to vector<256x16xbf16>
    %cst_82 = arith.constant dense<0.000000e+00> : vector<4x16xf32>
    %61 = tpu.matmul %58, %60, %cst_82 {dimension_numbers = #tpu.dot_dimension_numbers<[1], [0], [0], [1], [0, 0, 1, 1], [], []>} : vector<4x256xbf16>, vector<256x16xbf16>, vector<4x16xf32> -> vector<4x16xf32>
    %62 = arith.addf %31, %61 : vector<4x16xf32>
    %c0_83 = arith.constant 0 : index
    %c0_84 = arith.constant 0 : index
    %c3_85 = arith.constant 3 : index
    %c1_86 = arith.constant 1 : index
    %c0_87 = arith.constant 0 : index
    %63 = vector.load %arg1[%c0_83, %c0_84, %c3_85, %c1_86, %c0_87] : memref<1x1x6x6x32xbf16, #tpu.memory_space<vmem>>, vector<1x1x2x2x32xbf16>
    %64 = vector.shape_cast %63 : vector<1x1x2x2x32xbf16> to vector<1x2x2x32xbf16>
    %c0_88 = arith.constant 0 : index
    %c0_89 = arith.constant 0 : index
    %c3_90 = arith.constant 3 : index
    %c2_91 = arith.constant 2 : index
    %c0_92 = arith.constant 0 : index
    %65 = vector.load %arg1[%c0_88, %c0_89, %c3_90, %c2_91, %c0_92] : memref<1x1x6x6x32xbf16, #tpu.memory_space<vmem>>, vector<1x1x2x2x32xbf16>
    %66 = vector.shape_cast %65 : vector<1x1x2x2x32xbf16> to vector<1x2x2x32xbf16>
    %c0_93 = arith.constant 0 : index
    %c0_94 = arith.constant 0 : index
    %c3_95 = arith.constant 3 : index
    %c3_96 = arith.constant 3 : index
    %c0_97 = arith.constant 0 : index
    %67 = vector.load %arg1[%c0_93, %c0_94, %c3_95, %c3_96, %c0_97] : memref<1x1x6x6x32xbf16, #tpu.memory_space<vmem>>, vector<1x1x2x2x32xbf16>
    %68 = vector.shape_cast %67 : vector<1x1x2x2x32xbf16> to vector<1x2x2x32xbf16>
    %c0_98 = arith.constant 0 : index
    %c0_99 = arith.constant 0 : index
    %c3_100 = arith.constant 3 : index
    %c4_101 = arith.constant 4 : index
    %c0_102 = arith.constant 0 : index
    %69 = vector.load %arg1[%c0_98, %c0_99, %c3_100, %c4_101, %c0_102] : memref<1x1x6x6x32xbf16, #tpu.memory_space<vmem>>, vector<1x1x2x2x32xbf16>
    %70 = vector.shape_cast %69 : vector<1x1x2x2x32xbf16> to vector<1x2x2x32xbf16>
    %c0_103 = arith.constant 0 : index
    %c0_104 = arith.constant 0 : index
    %c4_105 = arith.constant 4 : index
    %c0_106 = arith.constant 0 : index
    %c0_107 = arith.constant 0 : index
    %71 = vector.load %arg1[%c0_103, %c0_104, %c4_105, %c0_106, %c0_107] : memref<1x1x6x6x32xbf16, #tpu.memory_space<vmem>>, vector<1x1x2x2x32xbf16>
    %72 = vector.shape_cast %71 : vector<1x1x2x2x32xbf16> to vector<1x2x2x32xbf16>
    %c0_108 = arith.constant 0 : index
    %c0_109 = arith.constant 0 : index
    %c4_110 = arith.constant 4 : index
    %c1_111 = arith.constant 1 : index
    %c0_112 = arith.constant 0 : index
    %73 = vector.load %arg1[%c0_108, %c0_109, %c4_110, %c1_111, %c0_112] : memref<1x1x6x6x32xbf16, #tpu.memory_space<vmem>>, vector<1x1x2x2x32xbf16>
    %74 = vector.shape_cast %73 : vector<1x1x2x2x32xbf16> to vector<1x2x2x32xbf16>
    %c0_113 = arith.constant 0 : index
    %c0_114 = arith.constant 0 : index
    %c4_115 = arith.constant 4 : index
    %c2_116 = arith.constant 2 : index
    %c0_117 = arith.constant 0 : index
    %75 = vector.load %arg1[%c0_113, %c0_114, %c4_115, %c2_116, %c0_117] : memref<1x1x6x6x32xbf16, #tpu.memory_space<vmem>>, vector<1x1x2x2x32xbf16>
    %76 = vector.shape_cast %75 : vector<1x1x2x2x32xbf16> to vector<1x2x2x32xbf16>
    %c0_118 = arith.constant 0 : index
    %c0_119 = arith.constant 0 : index
    %c4_120 = arith.constant 4 : index
    %c3_121 = arith.constant 3 : index
    %c0_122 = arith.constant 0 : index
    %77 = vector.load %arg1[%c0_118, %c0_119, %c4_120, %c3_121, %c0_122] : memref<1x1x6x6x32xbf16, #tpu.memory_space<vmem>>, vector<1x1x2x2x32xbf16>
    %78 = vector.shape_cast %77 : vector<1x1x2x2x32xbf16> to vector<1x2x2x32xbf16>
    %79 = arith.extf %64 : vector<1x2x2x32xbf16> to vector<1x2x2x32xf32>
    %80 = arith.extf %66 : vector<1x2x2x32xbf16> to vector<1x2x2x32xf32>
    %81 = arith.extf %68 : vector<1x2x2x32xbf16> to vector<1x2x2x32xf32>
    %82 = arith.extf %70 : vector<1x2x2x32xbf16> to vector<1x2x2x32xf32>
    %83 = arith.extf %72 : vector<1x2x2x32xbf16> to vector<1x2x2x32xf32>
    %84 = arith.extf %74 : vector<1x2x2x32xbf16> to vector<1x2x2x32xf32>
    %85 = arith.extf %76 : vector<1x2x2x32xbf16> to vector<1x2x2x32xf32>
    %86 = arith.extf %78 : vector<1x2x2x32xbf16> to vector<1x2x2x32xf32>
    %87 = tpu.concatenate %79, %80, %81, %82, %83, %84, %85, %86 in 3 : vector<1x2x2x32xf32>, vector<1x2x2x32xf32>, vector<1x2x2x32xf32>, vector<1x2x2x32xf32>, vector<1x2x2x32xf32>, vector<1x2x2x32xf32>, vector<1x2x2x32xf32>, vector<1x2x2x32xf32> -> vector<1x2x2x256xf32>
    %88 = vector.shape_cast %87 : vector<1x2x2x256xf32> to vector<4x256xf32>
    %89 = arith.truncf %88 : vector<4x256xf32> to vector<4x256xbf16>
    %c2_123 = arith.constant 2 : index
    %c0_124 = arith.constant 0 : index
    %c0_125 = arith.constant 0 : index
    %90 = vector.load %arg2[%c2_123, %c0_124, %c0_125] : memref<4x256x16xbf16, #tpu.memory_space<vmem>>, vector<1x256x16xbf16>
    %91 = vector.shape_cast %90 : vector<1x256x16xbf16> to vector<256x16xbf16>
    %cst_126 = arith.constant dense<0.000000e+00> : vector<4x16xf32>
    %92 = tpu.matmul %89, %91, %cst_126 {dimension_numbers = #tpu.dot_dimension_numbers<[1], [0], [0], [1], [0, 0, 1, 1], [], []>} : vector<4x256xbf16>, vector<256x16xbf16>, vector<4x16xf32> -> vector<4x16xf32>
    %93 = arith.addf %62, %92 : vector<4x16xf32>
    %c0_127 = arith.constant 0 : index
    %c0_128 = arith.constant 0 : index
    %c4_129 = arith.constant 4 : index
    %c4_130 = arith.constant 4 : index
    %c0_131 = arith.constant 0 : index
    %94 = vector.load %arg1[%c0_127, %c0_128, %c4_129, %c4_130, %c0_131] : memref<1x1x6x6x32xbf16, #tpu.memory_space<vmem>>, vector<1x1x2x2x32xbf16>
    %95 = vector.shape_cast %94 : vector<1x1x2x2x32xbf16> to vector<1x2x2x32xbf16>
    %96 = vector.shape_cast %95 : vector<1x2x2x32xbf16> to vector<4x32xbf16>
    %c3_132 = arith.constant 3 : index
    %c0_133 = arith.constant 0 : index
    %c0_134 = arith.constant 0 : index
    %97 = vector.load %arg2[%c3_132, %c0_133, %c0_134] : memref<4x256x16xbf16, #tpu.memory_space<vmem>>, vector<1x32x16xbf16>
    %98 = vector.shape_cast %97 : vector<1x32x16xbf16> to vector<32x16xbf16>
    %cst_135 = arith.constant dense<0.000000e+00> : vector<4x16xf32>
    %99 = tpu.matmul %96, %98, %cst_135 {dimension_numbers = #tpu.dot_dimension_numbers<[1], [0], [0], [1], [0, 0, 1, 1], [], []>} : vector<4x32xbf16>, vector<32x16xbf16>, vector<4x16xf32> -> vector<4x16xf32>
    %100 = arith.addf %93, %99 : vector<4x16xf32>
    %c0_136 = arith.constant 0 : index
    %c0_137 = arith.constant 0 : index
    %101 = vector.load %arg3[%c0_136, %c0_137] : memref<1x16xf32, #tpu.memory_space<vmem>>, vector<1x16xf32>
    %102 = vector.broadcast %101 : vector<1x16xf32> to vector<4x16xf32>
    %103 = arith.addf %100, %102 : vector<4x16xf32>
    %104 = vector.shape_cast %103 : vector<4x16xf32> to vector<1x2x2x16xf32>
    %105 = arith.truncf %104 : vector<1x2x2x16xf32> to vector<1x2x2x16xbf16>
    %c0_138 = arith.constant 0 : index
    %c0_139 = arith.constant 0 : index
    %c0_140 = arith.constant 0 : index
    %c0_141 = arith.constant 0 : index
    %106 = vector.load %arg4[%c0_138, %c0_139, %c0_140, %c0_141] : memref<1x2x2x16xbf16, #tpu.memory_space<vmem>>, vector<1x2x2x16xbf16>
    tpu.vector_store %arg4[%c0_138, %c0_139, %c0_140, %c0_141], %105 {strides = array<i32>} : memref<1x2x2x16xbf16, #tpu.memory_space<vmem>>, vector<1x2x2x16xbf16>,
    return
  }
  func.func @transform_0(%arg0: i32) -> (i32, i32, i32, i32, i32) {
    %c0_i32 = arith.constant 0 : i32
    %c0_i32_0 = arith.constant 0 : i32
    %c0_i32_1 = arith.constant 0 : i32
    %c0_i32_2 = arith.constant 0 : i32
    %c0_i32_3 = arith.constant 0 : i32
    return %c0_i32, %arg0, %c0_i32_0, %c0_i32_1, %c0_i32_2 : i32, i32, i32, i32, i32
  }
  func.func @transform_1(%arg0: i32) -> (i32, i32, i32) {
    %c0_i32 = arith.constant 0 : i32
    %c0_i32_0 = arith.constant 0 : i32
    %c0_i32_1 = arith.constant 0 : i32
    %c0_i32_2 = arith.constant 0 : i32
    return %c0_i32, %c0_i32_0, %c0_i32_1 : i32, i32, i32
  }
  func.func @transform_2(%arg0: i32) -> (i32, i32) {
    %c0_i32 = arith.constant 0 : i32
    %c0_i32_0 = arith.constant 0 : i32
    %c0_i32_1 = arith.constant 0 : i32
    return %c0_i32, %c0_i32_0 : i32, i32
  }
  func.func @transform_3(%arg0: i32) -> (i32, i32, i32, i32) {
    %c0_i32 = arith.constant 0 : i32
    %c0_i32_0 = arith.constant 0 : i32
    %c0_i32_1 = arith.constant 0 : i32
    %c0_i32_2 = arith.constant 0 : i32
    return %arg0, %c0_i32, %c0_i32_0, %c0_i32_1 : i32, i32, i32, i32
  }
}

module attributes {stable_mosaic.version = 11 : i64} {
  func.func @kernel(%arg0: i32, %arg1: memref<2x128xbf16, #tpu.memory_space<vmem>>, %arg2: memref<128x128xbf16, #tpu.memory_space<vmem>>, %arg3: memref<1x128xf32, #tpu.memory_space<vmem>>, %arg4: memref<2x128xf32, #tpu.memory_space<vmem>>, %arg5: memref<2x128xf32, #tpu.memory_space<vmem>>) attributes {dimension_semantics = [#tpu.dimension_semantics<arbitrary>], iteration_bounds = array<i64: 1>, scalar_prefetch = 0 : i64, scratch_operands = 1 : i64, tpu.core_type = #tpu.core_type<tc>, window_params = [{transform_indices = @transform_0, window_bounds = array<i64: 2, 128>}, {transform_indices = @transform_1, window_bounds = array<i64: 128, 128>}, {pipeline_mode = #tpu.pipeline_mode<synchronous>, transform_indices = @transform_2, window_bounds = array<i64: 1, 128>}, {pipeline_mode = #tpu.pipeline_mode<synchronous>, transform_indices = @transform_3, window_bounds = array<i64: 2, 128>}]} {
    %c0_i32 = arith.constant 0 : i32
    %0 = arith.cmpi eq, %arg0, %c0_i32 : i32
    %1 = arith.extui %0 : i1 to i32
    %c0_i32_0 = arith.constant 0 : i32
    %2 = arith.cmpi ne, %1, %c0_i32_0 : i32
    scf.if %2 {
      %cst_10 = arith.constant 0.000000e+00 : f32
      %12 = vector.broadcast %cst_10 : f32 to vector<2x128xf32>
      %c0_11 = arith.constant 0 : index
      %c0_12 = arith.constant 0 : index
      %13 = vector.load %arg5[%c0_11, %c0_12] : memref<2x128xf32, #tpu.memory_space<vmem>>, vector<2x128xf32>
      tpu.vector_store %arg5[%c0_11, %c0_12], %12 {strides = array<i32>} : memref<2x128xf32, #tpu.memory_space<vmem>>, vector<2x128xf32>,
    } else {
    }
    %c0 = arith.constant 0 : index
    %c0_1 = arith.constant 0 : index
    %3 = vector.load %arg5[%c0, %c0_1] : memref<2x128xf32, #tpu.memory_space<vmem>>, vector<2x128xf32>
    %c0_2 = arith.constant 0 : index
    %c0_3 = arith.constant 0 : index
    %4 = vector.load %arg1[%c0_2, %c0_3] : memref<2x128xbf16, #tpu.memory_space<vmem>>, vector<2x128xbf16>
    %c0_4 = arith.constant 0 : index
    %c0_5 = arith.constant 0 : index
    %5 = vector.load %arg2[%c0_4, %c0_5] : memref<128x128xbf16, #tpu.memory_space<vmem>>, vector<128x128xbf16>
    %cst = arith.constant dense<0.000000e+00> : vector<2x128xf32>
    %6 = tpu.matmul %4, %5, %cst {dimension_numbers = #tpu.dot_dimension_numbers<[1], [0], [0], [1], [0, 0, 1, 1], [], []>} : vector<2x128xbf16>, vector<128x128xbf16>, vector<2x128xf32> -> vector<2x128xf32>
    %7 = arith.addf %3, %6 : vector<2x128xf32>
    %c0_6 = arith.constant 0 : index
    %c0_7 = arith.constant 0 : index
    %8 = vector.load %arg5[%c0_6, %c0_7] : memref<2x128xf32, #tpu.memory_space<vmem>>, vector<2x128xf32>
    tpu.vector_store %arg5[%c0_6, %c0_7], %7 {strides = array<i32>} : memref<2x128xf32, #tpu.memory_space<vmem>>, vector<2x128xf32>,
    %c0_i32_8 = arith.constant 0 : i32
    %9 = arith.cmpi eq, %arg0, %c0_i32_8 : i32
    %10 = arith.extui %9 : i1 to i32
    %c0_i32_9 = arith.constant 0 : i32
    %11 = arith.cmpi ne, %10, %c0_i32_9 : i32
    scf.if %11 {
      %c0_10 = arith.constant 0 : index
      %c0_11 = arith.constant 0 : index
      %12 = vector.load %arg5[%c0_10, %c0_11] : memref<2x128xf32, #tpu.memory_space<vmem>>, vector<2x128xf32>
      %c0_12 = arith.constant 0 : index
      %c0_13 = arith.constant 0 : index
      %13 = vector.load %arg3[%c0_12, %c0_13] : memref<1x128xf32, #tpu.memory_space<vmem>>, vector<1x128xf32>
      %14 = vector.broadcast %13 : vector<1x128xf32> to vector<2x128xf32>
      %15 = arith.addf %12, %14 : vector<2x128xf32>
      %c0_14 = arith.constant 0 : index
      %c0_15 = arith.constant 0 : index
      %16 = vector.load %arg4[%c0_14, %c0_15] : memref<2x128xf32, #tpu.memory_space<vmem>>, vector<2x128xf32>
      tpu.vector_store %arg4[%c0_14, %c0_15], %15 {strides = array<i32>} : memref<2x128xf32, #tpu.memory_space<vmem>>, vector<2x128xf32>,
    } else {
    }
    return
  }
  func.func @transform_0(%arg0: i32) -> (i32, i32) {
    %c0_i32 = arith.constant 0 : i32
    %c0_i32_0 = arith.constant 0 : i32
    return %c0_i32, %arg0 : i32, i32
  }
  func.func @transform_1(%arg0: i32) -> (i32, i32) {
    %c0_i32 = arith.constant 0 : i32
    %c0_i32_0 = arith.constant 0 : i32
    return %arg0, %c0_i32 : i32, i32
  }
  func.func @transform_2(%arg0: i32) -> (i32, i32) {
    %c0_i32 = arith.constant 0 : i32
    %c0_i32_0 = arith.constant 0 : i32
    %c0_i32_1 = arith.constant 0 : i32
    return %c0_i32, %c0_i32_0 : i32, i32
  }
  func.func @transform_3(%arg0: i32) -> (i32, i32) {
    %c0_i32 = arith.constant 0 : i32
    %c0_i32_0 = arith.constant 0 : i32
    %c0_i32_1 = arith.constant 0 : i32
    return %c0_i32, %c0_i32_0 : i32, i32
  }
}

</mosaic_0001>

<bundles_post_ra>
// kernel: discriminator_forward.8
= control target key start
LH: loop header
LB: loop body
LE: loop exit
PB: predicated region body
PF: predicated region fallthrough
CT: control target
= control target key end

     0   :  { %s1730_s13 = smov 32   ;;  %s1731_s22 = smov 16   ;;  %vm1739_vm0 = vmmov 0   ;;  %vm232_vm1 = vcmask 130048   ;;  %vm237_vm2 = vcmask 261120   ;;  %vm242_vm3 = vcmask 392192   ;;  %s2372_s0 = inlined_call_operand.vmem [shape: bf16[4,2,4,4,16], index: 0, kind: input, shape index: {}]   ;;  %s2373_s1 = inlined_call_operand.vmem [shape: bf16[4,144,32], index: 1, kind: input, shape index: {}]   ;;  %s2374_s2 = inlined_call_operand.vmem [shape: f32[1,32], index: 2, kind: input, shape index: {}]   ;;  %s2375_s3 = inlined_call_operand.vmem [shape: f32[1,32], index: 3, kind: input, shape index: {}]   ;;  %s2376_s4 = inlined_call_operand.vmem [shape: bf16[2,2,2,32], index: 4, kind: output, shape index: {}]  }
   0x1   :  { %v1312_v0 = vld [vmem:[%s2372_s0 + $0x12] sm:$0x1]  ;;  %v1313_v1 = vld [vmem:[%s2372_s0 + $0x14] sm:$0x1]  ;;  %v1308_v2 = vld [vmem:[%s2372_s0 + $0x10] sm:$0x3] }
   0x2   :  { %v378_v3 = vunpack.c.l.bf16 %v1312_v0  ;;  %v379_v4 = vunpack.c.l.bf16 %v1313_v1  ;;  %v1309_v5 = vld [vmem:[%s2372_s0 + $0x12] sm:$0x3]  ;;  %v374_v6 = vunpack.c.l.bf16 %v1308_v2  ;;  %v1314_v7 = vld [vmem:[%s2372_s0 + $0x1a] sm:$0x1]  ;;  %v1315_v8 = vld [vmem:[%s2372_s0 + $0x1c] sm:$0x1] }
   0x3   :  { %v375_v9 = vunpack.c.l.bf16 %v1309_v5  ;;  %v380_v10 = vunpack.c.l.bf16 %v1314_v7  ;;  %v381_v11 = vunpack.c.l.bf16 %v1315_v8  ;;  %v1310_v12 = vld [vmem:[%s2372_s0 + $0x18] sm:$0x3]  ;;  %v1311_v13 = vld [vmem:[%s2372_s0 + $0x1a] sm:$0x3]  ;;  %v1319_v19 = vld [vmem:[%s2372_s0 + $0x1c] sm:$0x3] }
   0x4   :  { %v1503_v14 = vpack.i.bf16 %v379_v4, %v378_v3  ;;  %v398_v15 = vrot.slane %v374_v6, 1  ;;  %v376_v16 = vunpack.c.l.bf16 %v1310_v12  ;;  %v377_v17 = vunpack.c.l.bf16 %v1311_v13  ;;  %v1318_v18 = vld [vmem:[%s2372_s0 + $0x1a] sm:$0x3]  ;;  %v1316_v24 = vld [vmem:[%s2372_s0 + $0x12] sm:$0x3]  ;;  %s1732_s9 = smov 48  }
   0x5   :  { %v399_v20 = vrot.slane %v375_v9, 1  ;;  %v1508_v21 = vpack.i.bf16 %v381_v11, %v380_v10  ;;  %v384_v22 = vunpack.c.l.bf16 %v1318_v18  ;;  %v385_v23 = vunpack.c.l.bf16 %v1319_v19  ;;  %v1317_v25 = vld [vmem:[%s2372_s0 + $0x14] sm:$0x3]  ;;  %v24_v30 = vld [vmem:[%s2372_s0 + $0x8] sm:$0x3]  ;;  %s1733_s26 = smov 64  }
   0x6   :  { %1504 = vrot.lane.b32.xlu1 %v1503_v14, %s1730_s13  ;;  %v400_v26 = vrot.slane %v376_v16, 1  ;;  %v401_v27 = vrot.slane %v377_v17, 1  ;;  %v382_v28 = vunpack.c.l.bf16 %v1316_v24  ;;  %v383_v29 = vunpack.c.l.bf16 %v1317_v25  ;;  %v25_v31 = vld [vmem:[%s2372_s0 + $0xa] sm:$0x3]  ;;  %v22_v36 = vld [vmem:[%s2372_s0] sm:$0x3] }
   0x7   :  { %v1513_v32 = vpack.i.bf16 %v399_v20, %v398_v15  ;;  %v436_v33 = vrot.slane %v384_v22, 1  ;;  %v437_v34 = vrot.slane %v385_v23, 1  ;;  %v62_v35 = vunpack.c.l.bf16 %v24_v30  ;;  %v23_v37 = vld [vmem:[%s2372_s0 + $0x2] sm:$0x3]  ;;  %v1322_v47 = vld [vmem:[%s2372_s0 + $0x1c] sm:$0x1] }
   0x8   :  { %v434_v38 = vrot.slane %v382_v28, 1  ;;  %v435_v39 = vrot.slane %v383_v29, 1  ;;  %v63_v40 = vunpack.c.l.bf16 %v25_v31  ;;  %v1518_v41 = vpack.i.bf16 %v401_v27, %v400_v26  ;;  %v1323_v48 = vld [vmem:[%s2372_s0 + $0x1e] sm:$0x1]  ;;  %v28_v49 = vld [vmem:[%s2372_s0 + $0x8] sm:$0x2] }
   0x9   :  { %1514 = vrot.lane.b32.xlu0 %v1513_v32, %s1731_s22  ;;  %v60_v42 = vunpack.c.l.bf16 %v22_v36  ;;  %v61_v43 = vunpack.c.l.bf16 %v23_v37  ;;  %v1528_v44 = vpack.i.bf16 %v437_v34, %v436_v33  ;;  %v98_v45 = vrot.slane %v62_v35, 1  ;;  %v29_v50 = vld [vmem:[%s2372_s0 + $0xa] sm:$0x2]  ;;  %v1320_v56 = vld [vmem:[%s2372_s0 + $0x14] sm:$0x1]  ;;  %s1734_s27 = smov 80  }
   0xa   :  { %1509 = vrot.lane.b32.xlu1 %v1508_v21, %s1730_s13  ;;  %v99_v46 = vrot.slane %v63_v40, 1  ;;  %v1523_v51 = vpack.i.bf16 %v435_v39, %v434_v38  ;;  %v388_v54 = vunpack.c.l.bf16 %v1322_v47  ;;  %v389_v55 = vunpack.c.l.bf16 %v1323_v48  ;;  %v1321_v57 = vld [vmem:[%s2372_s0 + $0x16] sm:$0x1]  ;;  %v26_v61 = vld [vmem:[%s2372_s0] sm:$0x2]  ;;  %s1735_s15 = smov 96  }
   0xb   :  { %v96_v52 = vrot.slane %v60_v42, 1  ;;  %v97_v53 = vrot.slane %v61_v43, 1  ;;  %v66_v59 = vunpack.c.l.bf16 %v28_v49  ;;  %v67_v60 = vunpack.c.l.bf16 %v29_v50  ;;  %v27_v62 = vld [vmem:[%s2372_s0 + $0x2] sm:$0x2]  ;;  %v1326_v63 = vld [vmem:[%s2372_s0 + $0x1c] sm:$0x3] }
   0xc   :  { %v1538_v58 = vpack.i.bf16 %v99_v46, %v98_v45  ;;  %v1327_v0 = vld [vmem:[%s2372_s0 + $0x1e] sm:$0x3]  ;;  %v386_v1 = vunpack.c.l.bf16 %v1320_v56  ;;  %v387_v2 = vunpack.c.l.bf16 %v1321_v57  ;;  %v1548_v4 = vpack.i.bf16 %v389_v55, %v388_v54  ;;  %v1324_v11 = vld [vmem:[%s2372_s0 + $0x14] sm:$0x3]  ;;  %v1325_v12 = vld [vmem:[%s2372_s0 + $0x16] sm:$0x3] }
   0xd   :  { %1519 = vrot.lane.b32.xlu0 %v1518_v41, %s1731_s22  ;;  %v1533_v3 = vpack.i.bf16 %v97_v53, %v96_v52  ;;  %v64_v5 = vunpack.c.l.bf16 %v26_v61  ;;  %v65_v6 = vunpack.c.l.bf16 %v27_v62  ;;  %v118_v7 = vrot.slane %v66_v59, 2  ;;  %v1282_v18 = vld [vmem:[%s2372_s0 + $0xa] sm:$0x1]  ;;  %v1283_v22 = vld [vmem:[%s2372_s0 + $0xc] sm:$0x1]  ;;  %s1737_s29 = smov 112  }
   0xe   :  { %1529 = vrot.lane.b32.xlu1 %v1528_v44, %s1732_s9  ;;  %v119_v8 = vrot.slane %v67_v60, 2  ;;  %v392_v9 = vunpack.c.l.bf16 %v1326_v63  ;;  %v393_v10 = vunpack.c.l.bf16 %v1327_v0  ;;  %v1543_v13 = vpack.i.bf16 %v387_v2, %v386_v1  ;;  %v1286_v23 = vld [vmem:[%s2372_s0 + $0xa] sm:$0x3]  ;;  %v1287_v24 = vld [vmem:[%s2372_s0 + $0xc] sm:$0x3] }
   0xf   :  { %v116_v14 = vrot.slane %v64_v5, 2  ;;  %v117_v15 = vrot.slane %v65_v6, 2  ;;  %v390_v16 = vunpack.c.l.bf16 %v1324_v11  ;;  %v391_v17 = vunpack.c.l.bf16 %v1325_v12  ;;  %v1280_v30 = vld [vmem:[%s2372_s0 + $0x2] sm:$0x1]  ;;  %v1281_v31 = vld [vmem:[%s2372_s0 + $0x4] sm:$0x1] }
  0x10   :  { %v1558_v19 = vpack.i.bf16 %v119_v8, %v118_v7  ;;  %v472_v20 = vrot.slane %v392_v9, 1  ;;  %v473_v21 = vrot.slane %v393_v10, 1  ;;  %v70_v25 = vunpack.c.l.bf16 %v1282_v18  ;;  %v1284_v35 = vld [vmem:[%s2372_s0 + $0x2] sm:$0x3]  ;;  %v1285_v36 = vld [vmem:[%s2372_s0 + $0x4] sm:$0x3] }
  0x11   :  { %1524 = vrot.lane.b32.xlu0 %v1523_v51, %s1732_s9  ;;  %v1553_v26 = vpack.i.bf16 %v117_v15, %v116_v14  ;;  %v470_v27 = vrot.slane %v390_v16, 1  ;;  %v471_v28 = vrot.slane %v391_v17, 1  ;;  %v71_v29 = vunpack.c.l.bf16 %v1283_v22  ;;  %v1290_v37 = vld [vmem:[%s2372_s0 + $0xa] sm:$0x2]  ;;  %v1291_v38 = vld [vmem:[%s2372_s0 + $0xc] sm:$0x2] }
  0x12   :  { %1539 = vrot.lane.b32.xlu1 %v1538_v58, %s1731_s22  ;;  %v1568_v32 = vpack.i.bf16 %v473_v21, %v472_v20  ;;  %v74_v33 = vunpack.c.l.bf16 %v1286_v23  ;;  %v75_v34 = vunpack.c.l.bf16 %v1287_v24  ;;  %v68_v39 = vunpack.c.l.bf16 %v1280_v30  ;;  %v1288_v45 = vld [vmem:[%s2372_s0 + $0x2] sm:$0x2]  ;;  %v1289_v46 = vld [vmem:[%s2372_s0 + $0x4] sm:$0x2]  ;;  %v1294_v56 = vld [vmem:[%s2372_s0 + $0xc] sm:$0x1] }
  0x13   :  { %v69_v40 = vunpack.c.l.bf16 %v1281_v31  ;;  %v1563_v41 = vpack.i.bf16 %v471_v28, %v470_v27  ;;  %v1578_v42 = vpack.i.bf16 %v71_v29, %v70_v25  ;;  %v72_v43 = vunpack.c.l.bf16 %v1284_v35  ;;  %v1298_v60 = vld [vmem:[%s2372_s0 + $0xc] sm:$0x3]  ;;  %v1299_v61 = vld [vmem:[%s2372_s0 + $0xe] sm:$0x3]  ;;  %v1296_v63 = vld [vmem:[%s2372_s0 + $0x4] sm:$0x3] }
  0x14   :  { %v73_v44 = vunpack.c.l.bf16 %v1285_v36  ;;  %v154_v47 = vrot.slane %v74_v33, 1  ;;  %v155_v48 = vrot.slane %v75_v34, 1  ;;  %v78_v49 = vunpack.c.l.bf16 %v1290_v37  ;;  %v1295_v62 = vld [vmem:[%s2372_s0 + $0xe] sm:$0x1]  ;;  %v1297_v0 = vld [vmem:[%s2372_s0 + $0x6] sm:$0x3] }
  0x15   :  { %1534 = vrot.lane.b32.xlu0 %v1533_v3, %s1731_s22  ;;  %v79_v50 = vunpack.c.l.bf16 %v1291_v38  ;;  %v76_v51 = vunpack.c.l.bf16 %v1288_v45  ;;  %v77_v52 = vunpack.c.l.bf16 %v1289_v46  ;;  %v1573_v53 = vpack.i.bf16 %v69_v40, %v68_v39  ;;  %v1292_v5 = vld [vmem:[%s2372_s0 + $0x4] sm:$0x1]  ;;  %v1293_v6 = vld [vmem:[%s2372_s0 + $0x6] sm:$0x1]  ;;  %v1364_v14 = vld [vmem:[%s2372_s0 + $0x2a] sm:$0x3] }
  0x16   :  { %1549 = vrot.lane.b32.xlu1 %v1548_v4, %s1733_s26  ;;  %v152_v54 = vrot.slane %v72_v43, 1  ;;  %v153_v55 = vrot.slane %v73_v44, 1  ;;  %v1588_v57 = vpack.i.bf16 %v155_v48, %v154_v47  ;;  %v174_v58 = vrot.slane %v78_v49, 2  ;;  %v1361_v15 = vld [vmem:[%s2372_s0 + $0x20] sm:$0x3]  ;;  %v1703_v31 = vld [vmem:[%s2373_s1 + $0x70] sm:$0xff]  }
  0x17   :  { %v175_v59 = vrot.slane %v79_v50, 2  ;;  %v172_v1 = vrot.slane %v76_v51, 2  ;;  %v173_v2 = vrot.slane %v77_v52, 2  ;;  %v82_v4 = vunpack.c.l.bf16 %v1294_v56  ;;  %v1367_v24 = vld [vmem:[%s2372_s0 + $0x28] sm:$0x2] }
  0x18   :  { %v1583_v3 = vpack.i.bf16 %v153_v55, %v152_v54  ;;  %v86_v7 = vunpack.c.l.bf16 %v1298_v60  ;;  %v87_v8 = vunpack.c.l.bf16 %v1299_v61  ;;  %v83_v10 = vunpack.c.l.bf16 %v1295_v62  ;;  %v1368_v25 = vld [vmem:[%s2372_s0 + $0x2a] sm:$0x2]  ;;  %v1365_v30 = vld [vmem:[%s2372_s0 + $0x20] sm:$0x2]  ;;  %v1366_v39 = vld [vmem:[%s2372_s0 + $0x22] sm:$0x2] }
  0x19   :  { %1544 = vrot.lane.b32.xlu0 %v1543_v13, %s1733_s26  ;;  %v1598_v9 = vpack.i.bf16 %v175_v59, %v174_v58  ;;  %v84_v11 = vunpack.c.l.bf16 %v1296_v63  ;;  %v85_v12 = vunpack.c.l.bf16 %v1297_v0  ;;  %v1363_v13 = vld [vmem:[%s2372_s0 + $0x28] sm:$0x3]  ;;  %v1593_v16 = vpack.i.bf16 %v173_v2, %v172_v1  ;;  %v1371_v47 = vld [vmem:[%s2372_s0 + $0x2a] sm:$0x1]  ;;  %v1372_v48 = vld [vmem:[%s2372_s0 + $0x2c] sm:$0x1] }
  0x1a   :  { %1559 = vrot.lane.b32.xlu1 %v1558_v19, %s1730_s13  ;;  %v80_v17 = vunpack.c.l.bf16 %v1292_v5  ;;  %v81_v18 = vunpack.c.l.bf16 %v1293_v6  ;;  %v1362_v19 = vld [vmem:[%s2372_s0 + $0x22] sm:$0x3]  ;;  %v210_v20 = vrot.slane %v86_v7, 1  ;;  %v211_v21 = vrot.slane %v87_v8, 1  ;;  %v1704_v50 = vld [vmem:[%s2373_s1 + $0x68] sm:$0xff]   ;;  %v1709_v60 = vld [vmem:[%s2373_s1 + $0x30] sm:$0xff]  }
  0x1b   :  { %v750_v22 = vunpack.c.l.bf16 %v1363_v13  ;;  %v751_v23 = vunpack.c.l.bf16 %v1364_v14  ;;  %v208_v27 = vrot.slane %v84_v11, 1  ;;  %v209_v28 = vrot.slane %v85_v12, 1  ;;  %v1375_v54 = vld [vmem:[%s2372_s0 + $0x2a] sm:$0x3]  ;;  %v1376_v55 = vld [vmem:[%s2372_s0 + $0x2c] sm:$0x3] }
  0x1c   :  { %v748_v29 = vunpack.c.l.bf16 %v1361_v15  ;;  %v749_v35 = vunpack.c.l.bf16 %v1362_v19  ;;  %v1618_v36 = vpack.i.bf16 %v211_v21, %v210_v20  ;;  %v754_v37 = vunpack.c.l.bf16 %v1367_v24  ;;  %v1373_v58 = vld [vmem:[%s2372_s0 + $0x22] sm:$0x3]  ;;  %v1374_v5 = vld [vmem:[%s2372_s0 + $0x24] sm:$0x3]  ;;  %v1379_v6 = vld [vmem:[%s2372_s0 + $0x2a] sm:$0x2] }
  0x1d   :  { %1554 = vrot.lane.b32.xlu0 %v1553_v26, %s1730_s13  ;;  %v1608_v26 = vpack.i.bf16 %v83_v10, %v82_v4  ;;  %v774_v33 = vrot.slane %v750_v22, 1  ;;  %v775_v34 = vrot.slane %v751_v23, 1  ;;  %v755_v38 = vunpack.c.l.bf16 %v1368_v25  ;;  %v1705_v59 = vld [vmem:[%s2373_s1 + $0x60] sm:$0xff]   ;;  %v1380_v7 = vld [vmem:[%s2372_s0 + $0x2c] sm:$0x2]  ;;  %v1706_v13 = vld [vmem:[%s2373_s1 + $0x58] sm:$0xff]  }
  0x1e   :  { %1569 = vrot.lane.b32.xlu1 %v1568_v32, %s1734_s27  ;;  %v1603_v32 = vpack.i.bf16 %v81_v18, %v80_v17  ;;  %v772_v40 = vrot.slane %v748_v29, 1  ;;  %v773_v44 = vrot.slane %v749_v35, 1  ;;  %v752_v45 = vunpack.c.l.bf16 %v1365_v30  ;;  %v1377_v8 = vld [vmem:[%s2372_s0 + $0x22] sm:$0x2]  ;;  %v1711_v10 = vld [vmem:[%s2373_s1 + $0x28] sm:$0xff]  }
  0x1f   :  { %v1628_v43 = vpack.i.bf16 %v775_v34, %v774_v33  ;;  %v753_v46 = vunpack.c.l.bf16 %v1366_v39  ;;  %v1736_v49 = vmov 0.0   ;;  %v794_v51 = vrot.slane %v754_v37, 2  ;;  %v1406_v18 = vld [vmem:[%s2372_s0 + $0x38] sm:$0x3]  ;;  %v1407_v23 = vld [vmem:[%s2372_s0 + $0x3a] sm:$0x3] }
  0x20   :  { %1448 = vmatprep.subr.bf16.mxu0 %v1736_v49  ;;  %v795_v52 = vrot.slane %v755_v38, 2  ;;  %v1738_v56 = vmov 0   ;;  %1460 = vmatprep.mubr.msk.bf16.mxu0 %vm1739_vm0, %v1736_v49  ;;  %v1623_v61 = vpack.i.bf16 %v773_v44, %v772_v40  ;;  %v792_v62 = vrot.slane %v752_v45, 2  ;;  %v1712_v29 = vld [vmem:[%s2373_s1 + $0x20] sm:$0xff]   ;;  %v1708_v37 = vld [vmem:[%s2373_s1 + $0x50] sm:$0xff]  }
  0x21   :  { %1564 = vrot.lane.b32.xlu0 %v1563_v41, %s1734_s27  ;;  %v1613_v41 = vpack.i.bf16 %v209_v28, %v208_v27  ;;  %1449 = vmatpush3.bf16.msra.mxu0 %v1703_v31  ;;  %v793_v63 = vrot.slane %v753_v46, 2  ;;  %v758_v0 = vunpack.c.l.bf16 %v1371_v47  ;;  %v759_v2 = vunpack.c.l.bf16 %v1372_v48  ;;  %v1404_v27 = vld [vmem:[%s2372_s0 + $0x30] sm:$0x3]  ;;  %v1405_v28 = vld [vmem:[%s2372_s0 + $0x32] sm:$0x3] }
  0x22   :  { %1579 = vrot.lane.b32.xlu1 %v1578_v42, %s1732_s9  ;;  %v1707_v42 = vld [vmem:[%s2373_s1 + $0x38] sm:$0xff]   ;;  %1450 = vmatprep.subr.bf16.mxu0 %v1736_v49  ;;  %v1638_v1 = vpack.i.bf16 %v795_v52, %v794_v51  ;;  %v763_v4 = vunpack.c.l.bf16 %v1376_v55  ;;  %v760_v12 = vunpack.c.l.bf16 %v1373_v58  ;;  %v766_v17 = vunpack.c.l.bf16 %v1379_v6  ;;  %v1710_v52 = vld [vmem:[%s2373_s1 + $0x48] sm:$0xff]  }
  0x23   :  { %678 = vmatprep.subr.bf16.mxu1 %v1738_v56  ;;  %v1633_v14 = vpack.i.bf16 %v793_v63, %v792_v62  ;;  %v1648_v19 = vpack.i.bf16 %v759_v2, %v758_v0  ;;  %v767_v22 = vunpack.c.l.bf16 %v1380_v7  ;;  %v764_v25 = vunpack.c.l.bf16 %v1377_v8  ;;  %v1410_v40 = vld [vmem:[%s2372_s0 + $0x3a] sm:$0x1]  ;;  %v1411_v45 = vld [vmem:[%s2372_s0 + $0x3c] sm:$0x1]  ;;  %v1409_v62 = vld [vmem:[%s2372_s0 + $0x34] sm:$0x1] }
  0x24   :  { %679 = vmatpush1.bf16.msra.mxu1 %v1707_v42  ;;  %v831_v21 = vrot.slane %v763_v4, 1  ;;  %v828_v24 = vrot.slane %v760_v12, 1  ;;  %v1024_v35 = vunpack.c.l.bf16 %v1406_v18  ;;  %v1023_v44 = vunpack.c.l.bf16 %v1405_v28  ;;  %v1414_v46 = vld [vmem:[%s2372_s0 + $0x3a] sm:$0x3]  ;;  %v1415_v47 = vld [vmem:[%s2372_s0 + $0x3c] sm:$0x3] }
  0x25   :  { %1574 = vrot.lane.b32.xlu0 %v1573_v53, %s1732_s9  ;;  %v1369_v53 = vld [vmem:[%s2372_s0 + $0x22] sm:$0x1]  ;;  %680 = vmatprep.subr.bf16.mxu1 %v1738_v56  ;;  %v851_v34 = vrot.slane %v767_v22, 2  ;;  %v848_v38 = vrot.slane %v764_v25, 2  ;;  %v1028_v58 = vunpack.c.l.bf16 %v1410_v40  ;;  %v1032_v63 = vunpack.c.l.bf16 %v1414_v46  ;;  %v1413_v2 = vld [vmem:[%s2372_s0 + $0x34] sm:$0x3] }
  0x26   :  { %1589 = vrot.lane.b32.xlu1 %v1588_v57, %s1733_s26  ;;  %v1370_v57 = vld [vmem:[%s2372_s0 + $0x24] sm:$0x1]  ;;  %1451 = vmatpush3.bf16.msra.mxu0 %v1704_v50  ;;  %v756_v11 = vunpack.c.l.bf16 %v1369_v53  ;;  %v1040_v50 = vrot.slane %v1024_v35, 1  ;;  %v1714_v53 = vld [vmem:[%s2373_s1 + $0x10] sm:$0xff]   ;;  %v1033_v0 = vunpack.c.l.bf16 %v1415_v47  ;;  %v1715_v4 = vld [vmem:[%s2373_s1 + $0x8] sm:$0xff]   ;;  %v1027_v6 = vunpack.c.l.bf16 %v1409_v62 }
  0x27   :  { %1452 = vmatprep.subr.bf16.mxu0 %v1736_v49  ;;  %v757_v15 = vunpack.c.l.bf16 %v1370_v57  ;;  %v1039_v57 = vrot.slane %v1023_v44, 1  ;;  %v1031_v8 = vunpack.c.l.bf16 %v1413_v2  ;;  %v1717_v12 = vld [vmem:[%s2373_s1] sm:$0xff]   ;;  %vm247_vm4 = vcmask 523264  }
  0x28   :  { %681 = vmatpush1.bf16.msra.mxu1 %v1709_v60  ;;  %vm252_vm5 = vcmask 654336   ;;  %vm257_vm6 = vcmask 785408   ;;  %vm262_vm7 = vcmask 916480   ;;  %vm1271_vm9 = vcmask 253952  }
  0x29   :  { %1584 = vrot.lane.b32.xlu0 %v1583_v3, %s1733_s26  ;;  %v762_v3 = vunpack.c.l.bf16 %v1375_v54  ;;  %682 = vmatprep.subr.bf16.mxu1 %v1738_v56  ;;  %v1643_v30 = vpack.i.bf16 %v757_v15, %v756_v11  ;;  %v1077_v11 = vrot.slane %v1033_v0, 1  ;;  %v1075_v15 = vrot.slane %v1031_v8, 1 }
  0x2a   :  { %1599 = vrot.lane.b32.xlu1 %v1598_v9, %s1734_s27  ;;  %v1378_v9 = vld [vmem:[%s2372_s0 + $0x24] sm:$0x2]  ;;  %1453 = vmatpush3.bf16.msra.mxu0 %v1705_v59  ;;  %v1408_v59 = vld [vmem:[%s2372_s0 + $0x32] sm:$0x1] }
  0x2b   :  { %v830_v20 = vrot.slane %v762_v3, 1  ;;  %1454 = vmatprep.subr.bf16.mxu0 %v1736_v49  ;;  %v1026_v3 = vunpack.c.l.bf16 %v1408_v59 }
  0x2c   :  { %683 = vmatpush1.bf16.msra.mxu1 %v1711_v10  ;;  %v1076_v10 = vrot.slane %v1032_v63, 1 }
  0x2d   :  { %1594 = vrot.lane.b32.xlu0 %v1593_v16, %s1734_s27  ;;  %v761_v16 = vunpack.c.l.bf16 %v1374_v5  ;;  %684 = vmatprep.subr.bf16.mxu1 %v1738_v56  ;;  %v1658_v33 = vpack.i.bf16 %v831_v21, %v830_v20 }
  0x2e   :  { %1609 = vrot.lane.b32.xlu1 %v1608_v26, %s1735_s15  ;;  %v765_v26 = vunpack.c.l.bf16 %v1378_v9  ;;  %1455 = vmatpush3.bf16.msra.mxu0 %v1706_v13  ;;  %v1683_v13 = vpack.i.bf16 %v1027_v6, %v1026_v3 }
  0x2f   :  { %v829_v31 = vrot.slane %v761_v16, 1  ;;  %1456 = vmatprep.subr.bf16.mxu0 %v1736_v49  ;;  %v1698_v16 = vpack.i.bf16 %v1077_v11, %v1076_v10 }
  0x30   :  { %v849_v39 = vrot.slane %v765_v26, 2  ;;  %685 = vmatpush1.bf16.msra.mxu1 %v1712_v29 }
  0x31   :  { %1604 = vrot.lane.b32.xlu0 %v1603_v32, %s1735_s15  ;;  %v850_v32 = vrot.slane %v766_v17, 2  ;;  %v1653_v42 = vpack.i.bf16 %v829_v31, %v828_v24  ;;  %686 = vmatprep.subr.bf16.mxu1 %v1738_v56  ;;  %v1719_v17 = vld [vmem:[%s2373_s1 + $0x40] sm:$0xff]   ;;  %v1306_v24 = vld [vmem:[%s2372_s0 + $0x18] sm:$0x1] }
  0x32   :  { %1619 = vrot.lane.b32.xlu1 %v1618_v36, %s1737_s29  ;;  %v1025_v36 = vunpack.c.l.bf16 %v1407_v23  ;;  %1457 = vmatpush3.bf16.msra.mxu0 %v1708_v37  ;;  %v1663_v54 = vpack.i.bf16 %v849_v39, %v848_v38  ;;  %v372_v29 = vunpack.c.l.bf16 %v1306_v24  ;;  %v1740_v39 = vmov 1983009808  }
  0x33   :  { %v1668_v48 = vpack.i.bf16 %v851_v34, %v850_v32  ;;  %1458 = vmatprep.subr.bf16.mxu0 %v1736_v49  ;;  %v1304_v32 = vld [vmem:[%s2372_s0 + $0x10] sm:$0x1]  ;;  %v273_v40 = vunpack.c.l.s4 %v1740_v39 }
  0x34   :  { %v1041_v51 = vrot.slane %v1025_v36, 1  ;;  %v370_v44 = vunpack.c.l.bf16 %v1304_v32  ;;  %v19_v32 = vld [vmem:[%s2372_s0 + $0x2] sm:$0x1] }
  0x35   :  { %1614 = vrot.lane.b32.xlu0 %v1613_v41, %s1737_s29  ;;  %v1713_v41 = vld [vmem:[%s2373_s1 + $0x18] sm:$0xff]  }
  0x36   :  { %1629 = vrot.lane.b32.xlu1 %v1628_v43, %s1731_s22  ;;  %v1022_v43 = vunpack.c.l.bf16 %v1404_v27  ;;  %687 = vmatpush1.bf16.msra.mxu1 %v1713_v41  ;;  %v1678_v60 = vpack.i.bf16 %v1041_v51, %v1040_v50  ;;  %v275_v41 = vlaneseq }
  0x37   :  { %688 = vmatprep.subr.bf16.mxu1 %v1738_v56  ;;  %1459 = vmatpush3.bf16.msra.mxu0 %v1710_v52 }
  0x38   :  { %v1038_v55 = vrot.slane %v1022_v43, 1  ;;  %1464 = vmatprep.subr.bf16.mxu0 %v1736_v49 }
  0x39   :  { %1624 = vrot.lane.b32.xlu0 %v1623_v61, %s1731_s22  ;;  %v1029_v61 = vunpack.c.l.bf16 %v1411_v45 }
  0x3a   :  { %1639 = vrot.lane.b32.xlu1 %v1638_v1, %s1730_s13  ;;  %v1412_v1 = vld [vmem:[%s2372_s0 + $0x32] sm:$0x3]  ;;  %689 = vmatpush1.bf16.msra.mxu1 %v1714_v53  ;;  %v1673_v5 = vpack.i.bf16 %v1039_v57, %v1038_v55  ;;  %v274_v55 = vunpack.c.0.s8 %v273_v40  ;;  %v2128_v57 = vshrl.u32 %v275_v41, 7 }
  0x3b   :  { %v1030_v7 = vunpack.c.l.bf16 %v1412_v1  ;;  %690 = vmatprep.subr.bf16.mxu1 %v1738_v56  ;;  %v1688_v9 = vpack.i.bf16 %v1029_v61, %v1028_v58 }
  0x3d   :  { %1634 = vrot.lane.b32.xlu0 %v1633_v14, %s1730_s13  ;;  %v1074_v14 = vrot.slane %v1030_v7, 1 }
  0x3e   :  { %1649 = vrot.lane.b32.xlu1 %v1648_v19, %s1732_s9  ;;  %691 = vmatpush1.bf16.msra.mxu1 %v1715_v4 }
  0x3f   :  { %692 = vmatprep.subr.bf16.mxu1 %v1738_v56  ;;  %v1693_v18 = vpack.i.bf16 %v1075_v15, %v1074_v14 }
  0x41   :  { %1644 = vrot.lane.b32.xlu0 %v1643_v30, %s1732_s9 }
  0x42   :  { %1659 = vrot.lane.b32.xlu1 %v1658_v33, %s1733_s26  ;;  %693 = vmatpush1.bf16.msra.mxu1 %v1717_v12  ;;  %v1305_v33 = vld [vmem:[%s2372_s0 + $0x12] sm:$0x1]  ;;  %v20_v12 = vld [vmem:[%s2372_s0 + $0x8] sm:$0x1] }
  0x43   :  { %708 = vmatprep.subr.bf16.mxu1 %v1738_v56  ;;  %v1307_v56 = vld [vmem:[%s2372_s0 + $0x1a] sm:$0x1]  ;;  %v371_v45 = vunpack.c.l.bf16 %v1305_v33 }
  0x44   :  { %v373_v30 = vunpack.c.l.bf16 %v1307_v56 }
  0x45   :  { %1654 = vrot.lane.b32.xlu0 %v1653_v42, %s1733_s26 }
  0x46   :  { %1669 = vrot.lane.b32.xlu1 %v1668_v48, %s1734_s27  ;;  %709 = vmatpush2.bf16.msra.mxu1 %v1719_v17 }
  0x47   :  { %1480 = vmatprep.subr.bf16.mxu1 %v1736_v49 }
  0x49   :  { %1664 = vrot.lane.b32.xlu0 %v1663_v54, %s1734_s27 }
  0x4a   :  { %1679 = vrot.lane.b32.xlu1 %v1678_v60, %s1731_s22 }
  0x4d   :  { %1674 = vrot.lane.b32.xlu0 %v1673_v5, %s1731_s22 }
  0x4e   :  { %1689 = vrot.lane.b32.xlu1 %v1688_v9, %s1730_s13 }
  0x51   :  { %1684 = vrot.lane.b32.xlu0 %v1683_v13, %s1730_s13 }
  0x52   :  { %1699 = vrot.lane.b32.xlu1 %v1698_v16, %s1732_s9 }
  0x55   :  { %1694 = vrot.lane.b32.xlu0 %v1693_v18, %s1732_s9  ;;  %v21_v18 = vld [vmem:[%s2372_s0 + $0xa] sm:$0x1] }
  0x78   :  { %v1505_v19 = vpop.permute.xlu1 %1504 }
  0x79   :  { %v1507_v58 = vunpack.i.h.bf16 %v1505_v19  ;;  %v1506_v59 = vunpack.i.l.bf16 %v1505_v19  ;;  %v18_v19 = vld [vmem:[%s2372_s0] sm:$0x1] }
  0x7a   :  { %v56_v40 = vunpack.c.l.bf16 %v18_v19 }
  0x7b   :  { %v1515_v20 = vpop.permute.xlu0 %1514 }
  0x7c   :  { %v1510_v21 = vpop.permute.xlu1 %1509  ;;  %v1517_v42 = vunpack.i.h.bf16 %v1515_v20  ;;  %v1516_v43 = vunpack.i.l.bf16 %v1515_v20 }
  0x7d   :  { %v1512_v35 = vunpack.i.h.bf16 %v1510_v21  ;;  %v1511_v36 = vunpack.i.l.bf16 %v1510_v21 }
  0x7e   :  { %v486_v60 = vsel %vm232_vm1, %v370_v44, %v1516_v43  ;;  %v487_v61 = vsel %vm232_vm1, %v371_v45, %v1517_v42  ;;  %v57_v45 = vunpack.c.l.bf16 %v19_v32 }
  0x7f   :  { %v1520_v22 = vpop.permute.xlu0 %1519  ;;  %v490_v10 = vsel %vm237_vm2, %v486_v60, %v1506_v59  ;;  %v491_v11 = vsel %vm237_vm2, %v487_v61, %v1507_v58 }
  0x80   :  { %v1530_v23 = vpop.permute.xlu1 %1529  ;;  %v1522_v27 = vunpack.i.h.bf16 %v1520_v22  ;;  %v1521_v28 = vunpack.i.l.bf16 %v1520_v22 }
  0x81   :  { %v1532_v47 = vunpack.i.h.bf16 %v1530_v23  ;;  %v1531_v48 = vunpack.i.l.bf16 %v1530_v23  ;;  %v1302_v23 = vld [vmem:[%s2372_s0 + $0xc] sm:$0x2] }
  0x82   :  { %v488_v37 = vsel %vm232_vm1, %v372_v29, %v1521_v28  ;;  %v489_v38 = vsel %vm232_vm1, %v373_v30, %v1522_v27  ;;  %v1303_v28 = vld [vmem:[%s2372_s0 + $0xe] sm:$0x2]  ;;  %v1300_v29 = vld [vmem:[%s2372_s0 + $0x4] sm:$0x2]  ;;  %v1301_v30 = vld [vmem:[%s2372_s0 + $0x6] sm:$0x2]  ;;  %v90_v39 = vunpack.c.l.bf16 %v1302_v23 }
  0x83   :  { %v1525_v25 = vpop.permute.xlu0 %1524  ;;  %v492_v51 = vsel %vm237_vm2, %v488_v37, %v1511_v36  ;;  %v493_v52 = vsel %vm237_vm2, %v489_v38, %v1512_v35  ;;  %v58_v35 = vunpack.c.l.bf16 %v20_v12  ;;  %v59_v36 = vunpack.c.l.bf16 %v21_v18  ;;  %v1718_v18 = vld [vmem:[%s2373_s1 + $0xb0] sm:$0xff]  }
  0x84   :  { %v2112_v26 = vpop.permute.xlu1 %1539  ;;  %v496_v63 = vsel %vm242_vm3, %v492_v51, %v1531_v48  ;;  %v497_v0 = vsel %vm242_vm3, %v493_v52, %v1532_v47  ;;  %v1527_v1 = vunpack.i.h.bf16 %v1525_v25  ;;  %v1526_v2 = vunpack.i.l.bf16 %v1525_v25 }
  0x85   :  { %v2161_v25 = vsub.s32 %v274_v55, %v2128_v57  ;;  %v91_v42 = vunpack.c.l.bf16 %v1303_v28  ;;  %v88_v43 = vunpack.c.l.bf16 %v1300_v29  ;;  %v89_v44 = vunpack.c.l.bf16 %v1301_v30 }
  0x86   :  { %v494_v16 = vsel %vm242_vm3, %v490_v10, %v1526_v2  ;;  %v495_v17 = vsel %vm242_vm3, %v491_v11, %v1527_v1  ;;  %v1542_v48 = vunpack.i.h.bf16 %v2112_v26  ;;  %v1541_v51 = vunpack.i.l.bf16 %v2112_v26 }
  0x87   :  { %v2114_v31 = vpop.permute.xlu0 %1534  ;;  %v2187_v60 = vrot.slane %v90_v39, 2  ;;  %v2192_v1 = vrot.slane %v88_v43, 2  ;;  %v2194_v26 = vrot.slane %v89_v44, 2  ;;  %v1720_v39 = vld [vmem:[%s2373_s1 + $0xa8] sm:$0xff]  }
  0x88   :  { %v1550_v34 = vpop.permute.xlu1 %1549  ;;  %v1537_v52 = vunpack.i.h.bf16 %v2114_v31 }
  0x89   :  { %v1552_v53 = vunpack.i.h.bf16 %v1550_v34  ;;  %v1551_v54 = vunpack.i.l.bf16 %v1550_v34 }
  0x8b   :  { %v1545_v46 = vpop.permute.xlu0 %1544  ;;  %v501_v8 = vsel %vm247_vm4, %v497_v0, %v1552_v53  ;;  %v500_v9 = vsel %vm247_vm4, %v496_v63, %v1551_v54  ;;  %v1536_v53 = vunpack.i.l.bf16 %v2114_v31  ;;  %v2190_v0 = vrot.slane %v91_v42, 2  ;;  %v1716_v31 = vld [vmem:[%s2373_s1 + $0xb8] sm:$0xff]  }
  0x8c   :  { %v2124_v50 = vpop.permute.xlu1 %1559  ;;  %v1547_v4 = vunpack.i.h.bf16 %v1545_v46  ;;  %v1546_v5 = vunpack.i.l.bf16 %v1545_v46 }
  0x8d   :  { %v1562_v54 = vunpack.i.h.bf16 %v2124_v50  ;;  %v1561_v55 = vunpack.i.l.bf16 %v2124_v50 }
  0x8e   :  { %v499_v24 = vsel %vm247_vm4, %v495_v17, %v1547_v4  ;;  %v498_v56 = vsel %vm247_vm4, %v494_v16, %v1546_v5  ;;  %v235_v5 = vsel %vm232_vm1, %v58_v35, %v1541_v51 }
  0x8f   :  { %v2132_v62 = vpop.permute.xlu0 %1554 }
  0x90   :  { %v1570_v3 = vpop.permute.xlu1 %1569  ;;  %v1557_v61 = vunpack.i.h.bf16 %v2132_v62  ;;  %v1556_v50 = vunpack.i.l.bf16 %v2132_v62 }
  0x91   :  { %v1572_v6 = vunpack.i.h.bf16 %v1570_v3  ;;  %v1571_v7 = vunpack.i.l.bf16 %v1570_v3 }
  0x93   :  { %v504_v13 = vsel %vm252_vm5, %v500_v9, %v1571_v7  ;;  %v505_v14 = vsel %vm252_vm5, %v501_v8, %v1572_v6  ;;  %v1565_v15 = vpop.permute.xlu0 %1564  ;;  %v236_v6 = vsel %vm232_vm1, %v59_v36, %v1542_v48  ;;  %v233_v7 = vsel %vm232_vm1, %v56_v40, %v1536_v53 }
  0x94   :  { %v1567_v20 = vunpack.i.h.bf16 %v1565_v15  ;;  %v1566_v21 = vunpack.i.l.bf16 %v1565_v15  ;;  %v2153_v22 = vpop.permute.xlu1 %1579  ;;  %v511_v27 = vcombine.low %v504_v13, %v505_v14  ;;  %v234_v8 = vsel %vm232_vm1, %v57_v45, %v1537_v52 }
  0x95   :  { %v1582_v2 = vunpack.i.h.bf16 %v2153_v22  ;;  %v1581_v3 = vunpack.i.l.bf16 %v2153_v22  ;;  %v240_v9 = vsel %vm237_vm2, %v235_v5, %v1561_v55  ;;  %v241_v10 = vsel %vm237_vm2, %v236_v6, %v1562_v54 }
  0x96   :  { %v502_v33 = vsel %vm252_vm5, %v498_v56, %v1566_v21  ;;  %v503_v34 = vsel %vm252_vm5, %v499_v24, %v1567_v20  ;;  %v525_v46 = vrot.slane %v511_v27, %v2161_v25  ;;  %v238_v19 = vsel %vm237_vm2, %v233_v7, %v1556_v50 }
  0x97   :  { %v510_v37 = vcombine.low %v502_v33, %v503_v34  ;;  %v2177_v38 = vpop.permute.xlu0 %1574  ;;  %v239_v20 = vsel %vm237_vm2, %v234_v8, %v1557_v61  ;;  %v245_v21 = vsel %vm242_vm3, %v240_v9, %v1581_v3  ;;  %v246_v22 = vsel %vm242_vm3, %v241_v10, %v1582_v2  ;;  %v1722_v9 = vld [vmem:[%s2373_s1 + $0x98] sm:$0xff]   ;;  %v1359_v10 = vld [vmem:[%s2372_s0 + $0x28] sm:$0x1] }
  0x98   :  { %v1590_v41 = vpop.permute.xlu1 %1589  ;;  %v1577_v13 = vunpack.i.h.bf16 %v2177_v38  ;;  %v1576_v14 = vunpack.i.l.bf16 %v2177_v38 }
  0x99   :  { %v518_v47 = vrot.slane %v510_v37, %v2161_v25  ;;  %v1592_v11 = vunpack.i.h.bf16 %v1590_v41  ;;  %v1591_v12 = vunpack.i.l.bf16 %v1590_v41 }
  0x9a   :  { %v243_v34 = vsel %vm242_vm3, %v238_v19, %v1576_v14  ;;  %v244_v35 = vsel %vm242_vm3, %v239_v20, %v1577_v13  ;;  %v746_v14 = vunpack.c.l.bf16 %v1359_v10  ;;  %v1723_v19 = vld [vmem:[%s2373_s1 + $0x90] sm:$0xff]  }
  0x9b   :  { %v1585_v58 = vpop.permute.xlu0 %1584  ;;  %v526_v59 = vcombine.low %v518_v47, %v525_v46  ;;  %v250_v28 = vsel %vm247_vm4, %v245_v21, %v1591_v12  ;;  %v251_v29 = vsel %vm247_vm4, %v246_v22, %v1592_v11  ;;  %v1360_v11 = vld [vmem:[%s2372_s0 + $0x2a] sm:$0x1]  ;;  %v1357_v22 = vld [vmem:[%s2372_s0 + $0x20] sm:$0x1] }
  0x9c   :  { %v1600_v63 = vpop.permute.xlu1 %1599  ;;  %v1587_v23 = vunpack.i.h.bf16 %v1585_v58  ;;  %v1586_v24 = vunpack.i.l.bf16 %v1585_v58 }
  0x9d   :  { %v528_v4 = vpack.c.bf16 %v526_v59, %v526_v59  ;;  %v1602_v15 = vunpack.i.h.bf16 %v1600_v63  ;;  %v1601_v16 = vunpack.i.l.bf16 %v1600_v63 }
  0x9e   :  { %v248_v44 = vsel %vm247_vm4, %v243_v34, %v1586_v24  ;;  %v249_v45 = vsel %vm247_vm4, %v244_v35, %v1587_v23  ;;  %v1358_v23 = vld [vmem:[%s2372_s0 + $0x22] sm:$0x1] }
  0x9f   :  { %v1595_v62 = vpop.permute.xlu0 %1594  ;;  %1461 = vmatmul.mubr.msk.bf16.vlgmr.msra.gmra.mxu0 %vm257_vm6, %v528_v4  ;;  %v255_v36 = vsel %vm252_vm5, %v250_v28, %v1601_v16  ;;  %v256_v37 = vsel %vm252_vm5, %v251_v29, %v1602_v15  ;;  %v747_v15 = vunpack.c.l.bf16 %v1360_v11 }
  0xa0   :  { %v1610_v17 = vpop.permute.xlu1 %1609  ;;  %1465 = vmatpush3.bf16.msra.mxu0 %v1716_v31  ;;  %1476 = vmatprep.mubr.msk.bf16.mxu0 %vm1739_vm0, %v1736_v49  ;;  %v1597_v30 = vunpack.i.h.bf16 %v1595_v62  ;;  %v1596_v32 = vunpack.i.l.bf16 %v1595_v62  ;;  %v1721_v31 = vld [vmem:[%s2373_s1 + $0xa0] sm:$0xff]  }
  0xa1   :  { %1466 = vmatprep.subr.bf16.mxu0 %v1736_v49  ;;  %v1612_v56 = vunpack.i.h.bf16 %v1610_v17  ;;  %v1611_v27 = vunpack.i.l.bf16 %v1610_v17 }
  0xa2   :  { %v253_v48 = vsel %vm252_vm5, %v248_v44, %v1596_v32  ;;  %v254_v51 = vsel %vm252_vm5, %v249_v45, %v1597_v30 }
  0xa3   :  { %v1605_v33 = vpop.permute.xlu0 %1604  ;;  %v260_v46 = vsel %vm257_vm6, %v255_v36, %v1611_v27  ;;  %v261_v47 = vsel %vm257_vm6, %v256_v37, %v1612_v56  ;;  %v744_v36 = vunpack.c.l.bf16 %v1357_v22  ;;  %v745_v37 = vunpack.c.l.bf16 %v1358_v23 }
  0xa4   :  { %v1620_v38 = vpop.permute.xlu1 %1619  ;;  %1467 = vmatpush3.bf16.msra.mxu0 %v1718_v18  ;;  %v1607_v40 = vunpack.i.h.bf16 %v1605_v33  ;;  %v1606_v41 = vunpack.i.l.bf16 %v1605_v33 }
  0xa5   :  { %v1622_v42 = vunpack.i.h.bf16 %v1620_v38  ;;  %v1621_v43 = vunpack.i.l.bf16 %v1620_v38  ;;  %1468 = vmatprep.subr.bf16.mxu0 %v1736_v49 }
  0xa6   :  { %v258_v50 = vsel %vm257_vm6, %v253_v48, %v1606_v41  ;;  %v259_v2 = vsel %vm257_vm6, %v254_v51, %v1607_v40  ;;  %v1724_v40 = vld [vmem:[%s2373_s1 + $0xf0] sm:$0xff]  }
  0xa7   :  { %v265_v52 = vsel %vm262_vm7, %v260_v46, %v1621_v43  ;;  %v266_v53 = vsel %vm262_vm7, %v261_v47, %v1622_v42  ;;  %v1615_v54 = vpop.permute.xlu0 %1614 }
  0xa8   :  { %v287_v55 = vcombine.low %v265_v52, %v2187_v60  ;;  %v295_v58 = vcombine.low %v266_v53, %v2190_v0  ;;  %v1617_v59 = vunpack.i.h.bf16 %v1615_v54  ;;  %v1616_v61 = vunpack.i.l.bf16 %v1615_v54  ;;  %v1630_v63 = vpop.permute.xlu1 %1629  ;;  %1469 = vmatpush3.bf16.msra.mxu0 %v1720_v39 }
  0xa9   :  { %1470 = vmatprep.subr.bf16.mxu0 %v1736_v49  ;;  %v1632_v16 = vunpack.i.h.bf16 %v1630_v63  ;;  %v1631_v17 = vunpack.i.l.bf16 %v1630_v63 }
  0xaa   :  { %v263_v3 = vsel %vm262_vm7, %v258_v50, %v1616_v61  ;;  %v264_v60 = vsel %vm262_vm7, %v259_v2, %v1617_v59  ;;  %v294_v0 = vrot.slane %v287_v55, %v2161_v25  ;;  %v302_v4 = vrot.slane %v295_v58, %v2161_v25  ;;  %v1725_v50 = vld [vmem:[%s2373_s1 + $0xe8] sm:$0xff]  }
  0xab   :  { %v271_v5 = vcombine.low %v263_v3, %v2192_v1  ;;  %v279_v6 = vcombine.low %v264_v60, %v2194_v26  ;;  %v2253_v7 = vpop.permute.xlu0 %1624  ;;  %v867_v30 = vsel %vm232_vm1, %v747_v15, %v1632_v16  ;;  %v866_v32 = vsel %vm232_vm1, %v746_v14, %v1631_v17  ;;  %v1726_v16 = vld [vmem:[%s2373_s1 + $0xe0] sm:$0xff]  }
  0xac   :  { %v1640_v8 = vpop.permute.xlu1 %1639  ;;  %1471 = vmatpush3.bf16.msra.mxu0 %v1721_v31  ;;  %v304_v12 = vcombine.low %v294_v0, %v302_v4  ;;  %v1627_v41 = vunpack.i.h.bf16 %v2253_v7  ;;  %v1626_v42 = vunpack.i.l.bf16 %v2253_v7 }
  0xad   :  { %v278_v1 = vrot.slane %v271_v5, %v2161_v25  ;;  %v286_v26 = vrot.slane %v279_v6, %v2161_v25  ;;  %1472 = vmatprep.subr.bf16.mxu0 %v1736_v49  ;;  %v1642_v24 = vunpack.i.h.bf16 %v1640_v8  ;;  %v1641_v56 = vunpack.i.l.bf16 %v1640_v8 }
  0xae   :  { %v318_v21 = vrot.slane %v304_v12, %v2161_v25  ;;  %v865_v2 = vsel %vm232_vm1, %v745_v37, %v1627_v41  ;;  %v864_v3 = vsel %vm232_vm1, %v744_v36, %v1626_v42  ;;  %v1403_v12 = vld [vmem:[%s2372_s0 + $0x3a] sm:$0x1] }
  0xaf   :  { %v1635_v62 = vpop.permute.xlu0 %1634  ;;  %v303_v13 = vcombine.low %v278_v1, %v286_v26  ;;  %v870_v45 = vsel %vm237_vm2, %v866_v32, %v1641_v56  ;;  %v871_v46 = vsel %vm237_vm2, %v867_v30, %v1642_v24  ;;  %v1400_v56 = vld [vmem:[%s2372_s0 + $0x30] sm:$0x1]  ;;  %v1401_v30 = vld [vmem:[%s2372_s0 + $0x32] sm:$0x1]  ;;  %v1727_v32 = vld [vmem:[%s2373_s1 + $0xd8] sm:$0xff]  }
  0xb0   :  { %v1650_v18 = vpop.permute.xlu1 %1649  ;;  %1473 = vmatpush3.bf16.msra.mxu0 %v1722_v9  ;;  %v1637_v47 = vunpack.i.h.bf16 %v1635_v62  ;;  %v1636_v48 = vunpack.i.l.bf16 %v1635_v62  ;;  %v1402_v9 = vld [vmem:[%s2372_s0 + $0x38] sm:$0x1] }
  0xb1   :  { %v311_v20 = vrot.slane %v303_v13, %v2161_v25  ;;  %1474 = vmatprep.subr.bf16.mxu0 %v1736_v49  ;;  %v1652_v33 = vunpack.i.h.bf16 %v1650_v18  ;;  %v1651_v34 = vunpack.i.l.bf16 %v1650_v18 }
  0xb2   :  { %v868_v4 = vsel %vm237_vm2, %v864_v3, %v1636_v48  ;;  %v869_v5 = vsel %vm237_vm2, %v865_v2, %v1637_v47 }
  0xb3   :  { %v1645_v27 = vpop.permute.xlu0 %1644  ;;  %v320_v28 = vcombine.high %v311_v20, %v318_v21  ;;  %v319_v29 = vcombine.low %v311_v20, %v318_v21  ;;  %v874_v52 = vsel %vm242_vm3, %v870_v45, %v1651_v34  ;;  %v875_v53 = vsel %vm242_vm3, %v871_v46, %v1652_v33 }
  0xb4   :  { %v1660_v35 = vpop.permute.xlu1 %1659  ;;  %1475 = vmatpush3.bf16.msra.mxu0 %v1723_v19  ;;  %v1647_v54 = vunpack.i.h.bf16 %v1645_v27  ;;  %v1646_v55 = vunpack.i.l.bf16 %v1645_v27  ;;  %v1020_v19 = vunpack.c.l.bf16 %v1402_v9  ;;  %v1021_v21 = vunpack.c.l.bf16 %v1403_v12 }
  0xb5   :  { %v324_v38 = vpack.c.bf16 %v320_v28, %v320_v28  ;;  %v323_v39 = vpack.c.bf16 %v319_v29, %v319_v29  ;;  %v1662_v43 = vunpack.i.h.bf16 %v1660_v35  ;;  %v1661_v44 = vunpack.i.l.bf16 %v1660_v35 }
  0xb6   :  { %v872_v10 = vsel %vm242_vm3, %v868_v4, %v1646_v55  ;;  %v873_v11 = vsel %vm242_vm3, %v869_v5, %v1647_v54 }
  0xb7   :  { %v1655_v51 = vpop.permute.xlu0 %1654  ;;  %1356 = vmatprep.mubr.msk.bf16.mxu1 %vm232_vm1, %v324_v38  ;;  %v878_v60 = vsel %vm247_vm4, %v874_v52, %v1661_v44  ;;  %v879_v0 = vsel %vm247_vm4, %v875_v53, %v1662_v43  ;;  %v1018_v38 = vunpack.c.l.bf16 %v1400_v56 }
  0xb8   :  { %711 = vmatmul.mubr.bf16.vlgmr.msra.gmra.mxu1 %v323_v39  ;;  %v1670_v58 = vpop.permute.xlu1 %1669  ;;  %v1657_v59 = vunpack.i.h.bf16 %v1655_v51  ;;  %v1656_v61 = vunpack.i.l.bf16 %v1655_v51 }
  0xb9   :  { %v1672_v63 = vunpack.i.h.bf16 %v1670_v58  ;;  %v1671_v31 = vunpack.i.l.bf16 %v1670_v58  ;;  %1481 = vmatpush3.bf16.msra.mxu1 %v1724_v40  ;;  %1488 = vmatprep.mubr.msk.bf16.mxu1 %vm1739_vm0, %v1736_v49  ;;  %v1019_v40 = vunpack.c.l.bf16 %v1401_v30 }
  0xba   :  { %1482 = vmatprep.subr.bf16.mxu1 %v1736_v49  ;;  %v876_v13 = vsel %vm247_vm4, %v872_v10, %v1656_v61  ;;  %v877_v14 = vsel %vm247_vm4, %v873_v11, %v1657_v59 }
  0xbb   :  { %v882_v6 = vsel %vm252_vm5, %v878_v60, %v1671_v31  ;;  %v883_v7 = vsel %vm252_vm5, %v879_v0, %v1672_v63  ;;  %v1665_v8 = vpop.permute.xlu0 %1664 }
  0xbc   :  { %v1667_v1 = vunpack.i.h.bf16 %v1665_v8  ;;  %v1666_v26 = vunpack.i.l.bf16 %v1665_v8  ;;  %v1680_v62 = vpop.permute.xlu1 %1679  ;;  %v889_v15 = vcombine.low %v882_v6, %v883_v7 }
  0xbd   :  { %1483 = vmatpush3.bf16.msra.mxu1 %v1725_v50  ;;  %v1682_v22 = vunpack.i.h.bf16 %v1680_v62  ;;  %v1681_v23 = vunpack.i.l.bf16 %v1680_v62 }
  0xbe   :  { %v880_v17 = vsel %vm252_vm5, %v876_v13, %v1666_v26  ;;  %v881_v18 = vsel %vm252_vm5, %v877_v14, %v1667_v1  ;;  %1484 = vmatprep.subr.bf16.mxu1 %v1736_v49  ;;  %v903_v28 = vrot.slane %v889_v15, %v2161_v25 }
  0xbf   :  { %v888_v20 = vcombine.low %v880_v17, %v881_v18  ;;  %v1675_v24 = vpop.permute.xlu0 %1674  ;;  %v1093_v36 = vsel %vm232_vm1, %v1021_v21, %v1682_v22  ;;  %v1092_v37 = vsel %vm232_vm1, %v1020_v19, %v1681_v23 }
  0xc0   :  { %v1690_v27 = vpop.permute.xlu1 %1689  ;;  %v1677_v41 = vunpack.i.h.bf16 %v1675_v24  ;;  %v1676_v42 = vunpack.i.l.bf16 %v1675_v24 }
  0xc1   :  { %v896_v29 = vrot.slane %v888_v20, %v2161_v25  ;;  %1485 = vmatpush3.bf16.msra.mxu1 %v1726_v16  ;;  %v1692_v33 = vunpack.i.h.bf16 %v1690_v27  ;;  %v1691_v34 = vunpack.i.l.bf16 %v1690_v27 }
  0xc2   :  { %1486 = vmatprep.subr.bf16.mxu1 %v1736_v49  ;;  %v1091_v55 = vsel %vm232_vm1, %v1019_v40, %v1677_v41  ;;  %v1090_v58 = vsel %vm232_vm1, %v1018_v38, %v1676_v42 }
  0xc3   :  { %v904_v35 = vcombine.low %v896_v29, %v903_v28  ;;  %v1685_v39 = vpop.permute.xlu0 %1684  ;;  %v1096_v51 = vsel %vm237_vm2, %v1092_v37, %v1691_v34  ;;  %v1097_v49 = vsel %vm237_vm2, %v1093_v36, %v1692_v33 }
  0xc4   :  { %v1687_v43 = vunpack.i.h.bf16 %v1685_v39  ;;  %v1700_v44 = vpop.permute.xlu1 %1699  ;;  %v1686_v46 = vunpack.i.l.bf16 %v1685_v39 }
  0xc5   :  { %v906_v45 = vpack.c.bf16 %v904_v35, %v904_v35  ;;  %v1702_v47 = vunpack.i.h.bf16 %v1700_v44  ;;  %v1701_v48 = vunpack.i.l.bf16 %v1700_v44  ;;  %1487 = vmatpush3.bf16.msra.mxu1 %v1727_v32  ;;  %v1221_v44 = vld [vmem:[%s2374_s2] sm:$0x1] }
  0xc6   :  { %v1094_v63 = vsel %vm237_vm2, %v1090_v58, %v1686_v46  ;;  %v1095_v31 = vsel %vm237_vm2, %v1091_v55, %v1687_v43 }
  0xc7   :  { %v1100_v52 = vsel %vm242_vm3, %v1096_v51, %v1701_v48  ;;  %v1101_v53 = vsel %vm242_vm3, %v1097_v49, %v1702_v47  ;;  %v1695_v54 = vpop.permute.xlu0 %1694  ;;  %1477 = vmatmul.mubr.msk.bf16.vlgmr.msra.gmra.mxu0 %vm257_vm6, %v906_v45  ;;  %v1228_v45 = vsub.s32 0, %v2128_v57  ;;  %v1232_v48 = vld [vmem:[%s2375_s3] sm:$0x1] }
  0xc8   :  { %v1697_v59 = vunpack.i.h.bf16 %v1695_v54  ;;  %v1696_v61 = vunpack.i.l.bf16 %v1695_v54  ;;  %v1107_v50 = vcombine.low %v1100_v52, %v1101_v53 }
  0xca   :  { %v1098_v2 = vsel %vm242_vm3, %v1094_v63, %v1696_v61  ;;  %v1099_v3 = vsel %vm242_vm3, %v1095_v31, %v1697_v59  ;;  %v1121_v0 = vrot.slane %v1107_v50, %v2161_v25 }
  0xcb   :  { %v1106_v60 = vcombine.low %v1098_v2, %v1099_v3 }
  0xcd   :  { %v1114_v4 = vrot.slane %v1106_v60, %v2161_v25 }
  0xcf   :  { %v1122_v5 = vcombine.low %v1114_v4, %v1121_v0 }
  0xd1   :  { %v1124_v6 = vpack.c.bf16 %v1122_v5, %v1122_v5 }
  0xd3   :  { %1489 = vmatmul.mubr.msk.bf16.vlgmr.msra.gmra.mxu1 %vm247_vm4, %v1124_v6 }
 0x15f   :  { %v615_v7 = vpop.f32.mrf.mxu0 }
 0x161   :  { %v1462_v8 = vpop.f32.mrf.mxu0 }
 0x163   :  { %v618_v9 = vpop.f32.mrf.mxu0 }
 0x165   :  { %v1463_v10 = vpop.f32.mrf.mxu0 }
 0x178   :  { %v712_v11 = vpop.f32.mrf.mxu1 }
 0x179   :  { %v713_v16 = vadd.f32 %v712_v11, %v615_v7 }
 0x17a   :  { %v714_v1 = vpop.f32.mrf.mxu1 }
 0x17c   :  { %v715_v26 = vpop.f32.mrf.mxu1 }
 0x17e   :  { %v716_v12 = vpop.f32.mrf.mxu1 }
 0x187   :  { %v993_v62 = vpop.f32.mrf.mxu0 }
 0x188   :  { %v999_v17 = vadd.f32 %v993_v62, %v713_v16 }
 0x189   :  { %v1478_v13 = vpop.f32.mrf.mxu0 }
 0x18b   :  { %v996_v14 = vpop.f32.mrf.mxu0 }
 0x18d   :  { %v1479_v15 = vpop.f32.mrf.mxu0 }
 0x193   :  { %v1195_v18 = vpop.f32.mrf.mxu1 }
 0x194   :  { %v1201_v19 = vadd.f32 %v1195_v18, %v999_v17 }
 0x195   :  { %v1490_v20 = vpop.f32.mrf.mxu1 }
 0x196   :  { %v1202_v21 = vsel %vm237_vm2, %v1201_v19, 0.0 }
 0x197   :  { %v1203_v22 = vrot.slane %v1202_v21, 4  ;;  %v1198_v23 = vpop.f32.mrf.mxu1 }
 0x199   :  { %v1204_v24 = vadd.f32 %v1203_v22, %v1202_v21  ;;  %v1491_v56 = vpop.f32.mrf.mxu1 }
 0x19b   :  { %v1205_v27 = vrot.slane %v1204_v24, 2 }
 0x19d   :  { %v1206_v28 = vadd.f32 %v1205_v27, %v1204_v24 }
 0x19f   :  { %v1207_v29 = vrot.slane %v1206_v28, 1 }
 0x1a1   :  { %v1208_v30 = vadd.f32 %v1207_v29, %v1206_v28 }
 0x1a3   :  { %v1210_v32 = vmul.f32 0.125, %v1208_v30 }
 0x1a5   :  { %v1211_v33 = vsub.f32 %v1201_v19, %v1210_v32 }
 0x1a7   :  { %v1212_v34 = vmul.f32 %v1211_v33, %v1211_v33 }
 0x1a9   :  { %v1213_v35 = vsel %vm237_vm2, %v1212_v34, 0.0 }
 0x1aa   :  { %v1214_v36 = vrot.slane %v1213_v35, 4 }
 0x1ac   :  { %v1215_v37 = vadd.f32 %v1214_v36, %v1213_v35 }
 0x1ae   :  { %v1216_v38 = vrot.slane %v1215_v37, 2 }
 0x1b0   :  { %v1217_v39 = vadd.f32 %v1216_v38, %v1215_v37 }
 0x1b2   :  { %v1218_v40 = vrot.slane %v1217_v39, 1 }
 0x1b4   :  { %v1219_v41 = vadd.f32 %v1218_v40, %v1217_v39 }
 0x1b6   :  { %v1220_v42 = vmul.f32 0.125, %v1219_v41 }
 0x1b8   :  { %v1222_v43 = vadd.f32 1e-05, %v1220_v42 }
 0x1ba   :  { %1728 = vrsqrt.f32 %v1222_v43 }
 0x1c7   :  { %v1729_v46 = vpop.eup %1728 }
 0x1c8   :  { %v1224_v47 = vmul.f32 %v1729_v46, %v1221_v44 }
 0x1ca   :  { %v1229_v51 = vrot.slane %v1224_v47, %v1228_v45  ;;  %v1233_v49 = vmul.f32 %v1224_v47, %v1210_v32 }
 0x1cc   :  { %v1234_v52 = vsub.f32 %v1232_v48, %v1233_v49  ;;  %v1231_v53 = vmul.f32 %v1229_v51, %v1201_v19 }
 0x1ce   :  { %v1239_v54 = vrot.slane %v1234_v52, %v1228_v45 }
 0x1d0   :  { %v1241_v55 = vadd.f32 %v1239_v54, %v1231_v53 }
 0x1d2   :  { %vm1242_vm8 = vcmp.ge.f32.partialorder %v1241_v55, 0.0  ;;  %v1243_v58 = vmul.f32 0.2, %v1241_v55 }
 0x1d4   :  { %v1244_v59 = vsel %vm1242_vm8, %v1241_v55, %v1243_v58 }
 0x1d5   :  { %v1246_v61 = vcombine.high %v1244_v59, %v1244_v59  ;;  %v1253_v63 = vrot.slane %v1244_v59, %v2161_v25 }
 0x1d7   :  { %v1260_v57 = vrot.slane %v1246_v61, %v2161_v25  ;;  %v1261_v31 = vcombine.high %v1253_v63, %v1253_v63  ;;  %v1267_v50 = vpack.c.bf16 %v1253_v63, %v1253_v63 }
 0x1d9   :  { %v1262_v2 = vcombine.high %v1260_v57, %v1260_v57  ;;  %v1268_v3 = vpack.c.bf16 %v1261_v31, %v1261_v31  ;;  %v1269_v60 = vpack.c.bf16 %v1260_v57, %v1260_v57  ;;  %1272 = vst.msk [vmem:[%s2376_s4] sm:$0x1] %vm1271_vm9, %v1267_v50 }
 0x1db   :  { %v1270_v0 = vpack.c.bf16 %v1262_v2, %v1262_v2  ;;  %1273 = vst.msk [vmem:[%s2376_s4 + $0x1] sm:$0x1] %vm1271_vm9, %v1268_v3  ;;  %1274 = vst.msk [vmem:[%s2376_s4 + $0x2] sm:$0x1] %vm1271_vm9, %v1269_v60 }
 0x1dd   :  { %1275 = vst.msk [vmem:[%s2376_s4 + $0x3] sm:$0x1] %vm1271_vm9, %v1270_v0 }

// kernel: discriminator_forward.6
= control target key start
LH: loop header
LB: loop body
LE: loop exit
PB: predicated region body
PF: predicated region fallthrough
CT: control target
= control target key end

     0   :  { %s3517_s12 = smov 0   ;;  %s3519_s13 = smov 0   ;;  %s4825_s0 = inlined_call_operand.vmem [shape: bf16[4,2,10,10,4], index: 0, kind: input, shape index: {}]   ;;  %s4826_s1 = inlined_call_operand.vmem [shape: bf16[4,36,16], index: 1, kind: input, shape index: {}]   ;;  %s4827_s2 = inlined_call_operand.vmem [shape: f32[1,16], index: 2, kind: input, shape index: {}]   ;;  %s4828_s3 = inlined_call_operand.vmem [shape: bf16[2,8,8,16], index: 3, kind: output, shape index: {}]  }
   0x1   :  { %s3521_s14 = smov 0  }
   0x2 LB: > { %s2707_s15 = sadd.s32 4294967295, %s3487_s14   ;;  %s3534_s16 = sadd.s32 1, %s3487_s14   ;;  %s3487_s14 = sphi %s3521_s14, %s4859_s14   ;;  %s3483_s13 = sphi %s3519_s13, %s4858_s13   ;;  %s3479_s12 = sphi %s3517_s12, %s4857_s12  }
   0x3   : > { %s17_s17 = ssub.s32 %s3487_s14, %s3534_s16  ;;  %s20_s18 = sadd.s32 1, %s3483_s13 }
   0x4   : > { %p18_p0 = scmp.eq.s32.totalorder %s17_s17, 0  ;;  %p27_p1 = scmp.ne.s32.totalorder %s3483_s13, %s3479_s12 }
   0x5   : > { %p28_p2 = scmp.eq.s32.totalorder %s3487_s14, 0  ;;  %p2710_p4 = scmp.ge.s32.totalorder %s3487_s14, 2 }
   0x6   : > { %s3543_s19 = scalar_select %p18_p0, %s3483_s13, %s20_s18  }
   0x7   : > { %p29_p3 = por %p28_p2, %p27_p1  ;;  %127 = sbr.rel (%p2710_p4) target bundleno = 37 (0x25), region = 24 }
   0xc   : > { %130 = sbr.rel (!%p29_p3) target bundleno = 37 (0x25), region = 28  ;;  %s132_s20 = sand.u32 (%p29_p3), 1, %s3483_s13  }
   0xd   : > { %s3003_s21 = smul.u32 (%p29_p3), 80, %s3487_s14 }
   0xe   : > { %s3002_s22 = smul.u32 (%p29_p3), 320, %s132_s20 }
   0xf   : > { %s3551_s25 = scalar_lea.vmem (%p29_p3), %s4825_s0, %s3003_s21 }
  0x10   : > { %v154_v0 = vld [vmem:[%s3551_s25] sm:$0xff] (%p29_p3)   ;;  %v158_v1 = vld [vmem:[%s3551_s25 + $0x8] sm:$0xff] (%p29_p3)   ;;  %v162_v2 = vld [vmem:[%s3551_s25 + $0x10] sm:$0xff] (%p29_p3)   ;;  %s3556_s26 = scalar_lea.vmem (%p29_p3), [#allocation2], %s3002_s22 }
  0x11   : > { %155 = vst [vmem:[%s3556_s26] sm:$0xff] %v154_v0   ;;  %159 = vst [vmem:[%s3556_s26 + $0x8] sm:$0xff] %v158_v1   ;;  %v166_v3 = vld [vmem:[%s3551_s25 + $0x18] sm:$0xff]   ;;  %v170_v4 = vld [vmem:[%s3551_s25 + $0x20] sm:$0xff]  }
  0x12   : > { %163 = vst [vmem:[%s3556_s26 + $0x10] sm:$0xff] %v162_v2   ;;  %v174_v5 = vld [vmem:[%s3551_s25 + $0x28] sm:$0xff]   ;;  %167 = vst [vmem:[%s3556_s26 + $0x18] sm:$0xff] %v166_v3   ;;  %v178_v6 = vld [vmem:[%s3551_s25 + $0x30] sm:$0xff]  }
  0x13   : > { %171 = vst [vmem:[%s3556_s26 + $0x20] sm:$0xff] %v170_v4   ;;  %175 = vst [vmem:[%s3556_s26 + $0x28] sm:$0xff] %v174_v5   ;;  %v182_v7 = vld [vmem:[%s3551_s25 + $0x38] sm:$0xff]   ;;  %v186_v8 = vld [vmem:[%s3551_s25 + $0x40] sm:$0xff]  }
  0x14   : > { %179 = vst [vmem:[%s3556_s26 + $0x30] sm:$0xff] %v178_v6   ;;  %183 = vst [vmem:[%s3556_s26 + $0x38] sm:$0xff] %v182_v7   ;;  %v190_v9 = vld [vmem:[%s3551_s25 + $0x48] sm:$0xff]   ;;  %v194_v10 = vld [vmem:[%s3551_s25 + $0xa0] sm:$0xff]  }
  0x15   : > { %187 = vst [vmem:[%s3556_s26 + $0x40] sm:$0xff] %v186_v8   ;;  %v198_v11 = vld [vmem:[%s3551_s25 + $0xa8] sm:$0xff]   ;;  %191 = vst [vmem:[%s3556_s26 + $0x48] sm:$0xff] %v190_v9   ;;  %v202_v12 = vld [vmem:[%s3551_s25 + $0xb0] sm:$0xff]  }
  0x16   : > { %195 = vst [vmem:[%s3556_s26 + $0x50] sm:$0xff] %v194_v10   ;;  %199 = vst [vmem:[%s3556_s26 + $0x58] sm:$0xff] %v198_v11   ;;  %v206_v13 = vld [vmem:[%s3551_s25 + $0xb8] sm:$0xff]   ;;  %v210_v14 = vld [vmem:[%s3551_s25 + $0xc0] sm:$0xff]  }
  0x17   : > { %203 = vst [vmem:[%s3556_s26 + $0x60] sm:$0xff] %v202_v12   ;;  %207 = vst [vmem:[%s3556_s26 + $0x68] sm:$0xff] %v206_v13   ;;  %v214_v15 = vld [vmem:[%s3551_s25 + $0xc8] sm:$0xff]   ;;  %v218_v16 = vld [vmem:[%s3551_s25 + $0xd0] sm:$0xff]  }
  0x18   : > { %211 = vst [vmem:[%s3556_s26 + $0x70] sm:$0xff] %v210_v14   ;;  %v222_v17 = vld [vmem:[%s3551_s25 + $0xd8] sm:$0xff]   ;;  %215 = vst [vmem:[%s3556_s26 + $0x78] sm:$0xff] %v214_v15   ;;  %v226_v18 = vld [vmem:[%s3551_s25 + $0xe0] sm:$0xff]  }
  0x19   : > { %219 = vst [vmem:[%s3556_s26 + $0x80] sm:$0xff] %v218_v16   ;;  %223 = vst [vmem:[%s3556_s26 + $0x88] sm:$0xff] %v222_v17   ;;  %v230_v19 = vld [vmem:[%s3551_s25 + $0xe8] sm:$0xff]   ;;  %v234_v20 = vld [vmem:[%s3551_s25 + $0x140] sm:$0xff]  }
  0x1a   : > { %227 = vst [vmem:[%s3556_s26 + $0x90] sm:$0xff] %v226_v18   ;;  %231 = vst [vmem:[%s3556_s26 + $0x98] sm:$0xff] %v230_v19   ;;  %v238_v21 = vld [vmem:[%s3551_s25 + $0x148] sm:$0xff]   ;;  %v242_v22 = vld [vmem:[%s3551_s25 + $0x150] sm:$0xff]  }
  0x1b   : > { %235 = vst [vmem:[%s3556_s26 + $0xa0] sm:$0xff] %v234_v20   ;;  %v246_v23 = vld [vmem:[%s3551_s25 + $0x158] sm:$0xff]   ;;  %239 = vst [vmem:[%s3556_s26 + $0xa8] sm:$0xff] %v238_v21   ;;  %v250_v24 = vld [vmem:[%s3551_s25 + $0x160] sm:$0xff]  }
  0x1c   : > { %243 = vst [vmem:[%s3556_s26 + $0xb0] sm:$0xff] %v242_v22   ;;  %247 = vst [vmem:[%s3556_s26 + $0xb8] sm:$0xff] %v246_v23   ;;  %v254_v25 = vld [vmem:[%s3551_s25 + $0x168] sm:$0xff]   ;;  %v258_v26 = vld [vmem:[%s3551_s25 + $0x170] sm:$0xff]  }
  0x1d   : > { %251 = vst [vmem:[%s3556_s26 + $0xc0] sm:$0xff] %v250_v24   ;;  %255 = vst [vmem:[%s3556_s26 + $0xc8] sm:$0xff] %v254_v25   ;;  %v262_v27 = vld [vmem:[%s3551_s25 + $0x178] sm:$0xff]   ;;  %v266_v28 = vld [vmem:[%s3551_s25 + $0x180] sm:$0xff]  }
  0x1e   : > { %259 = vst [vmem:[%s3556_s26 + $0xd0] sm:$0xff] %v258_v26   ;;  %v270_v29 = vld [vmem:[%s3551_s25 + $0x188] sm:$0xff]   ;;  %263 = vst [vmem:[%s3556_s26 + $0xd8] sm:$0xff] %v262_v27   ;;  %v274_v30 = vld [vmem:[%s3551_s25 + $0x1e0] sm:$0xff]  }
  0x1f   : > { %267 = vst [vmem:[%s3556_s26 + $0xe0] sm:$0xff] %v266_v28   ;;  %271 = vst [vmem:[%s3556_s26 + $0xe8] sm:$0xff] %v270_v29   ;;  %v278_v31 = vld [vmem:[%s3551_s25 + $0x1e8] sm:$0xff]   ;;  %v282_v32 = vld [vmem:[%s3551_s25 + $0x1f0] sm:$0xff]  }
  0x20   : > { %275 = vst [vmem:[%s3556_s26 + $0xf0] sm:$0xff] %v274_v30   ;;  %279 = vst [vmem:[%s3556_s26 + $0xf8] sm:$0xff] %v278_v31   ;;  %v286_v33 = vld [vmem:[%s3551_s25 + $0x1f8] sm:$0xff]   ;;  %v290_v34 = vld [vmem:[%s3551_s25 + $0x200] sm:$0xff]  }
  0x21   : > { %283 = vst [vmem:[%s3556_s26 + $0x100] sm:$0xff] %v282_v32   ;;  %v294_v35 = vld [vmem:[%s3551_s25 + $0x208] sm:$0xff]   ;;  %287 = vst [vmem:[%s3556_s26 + $0x108] sm:$0xff] %v286_v33   ;;  %v298_v36 = vld [vmem:[%s3551_s25 + $0x210] sm:$0xff]  }
  0x22   : > { %291 = vst [vmem:[%s3556_s26 + $0x110] sm:$0xff] %v290_v34   ;;  %295 = vst [vmem:[%s3556_s26 + $0x118] sm:$0xff] %v294_v35   ;;  %v302_v37 = vld [vmem:[%s3551_s25 + $0x218] sm:$0xff]   ;;  %v306_v38 = vld [vmem:[%s3551_s25 + $0x220] sm:$0xff]  }
  0x23   : > { %299 = vst [vmem:[%s3556_s26 + $0x120] sm:$0xff] %v298_v36   ;;  %303 = vst [vmem:[%s3556_s26 + $0x128] sm:$0xff] %v302_v37   ;;  %v310_v39 = vld [vmem:[%s3551_s25 + $0x228] sm:$0xff]  }
  0x24   : > { %307 = vst [vmem:[%s3556_s26 + $0x130] sm:$0xff] %v306_v38   ;;  %311 = vst [vmem:[%s3556_s26 + $0x138] sm:$0xff] %v310_v39  }
  0x25 PF: > { %p2712_p5 = scmp.ge.s32.totalorder %s3487_s14, 1  ;;  %p496_p6 = scmp.lt.s32.totalorder %s3487_s14, 3 }
  0x27   : > { %p497_p7 = pnand %p2712_p5, %p496_p6 }
  0x28   : > { %s503_s27 = sand.u32 (!%p497_p7), 1, %s3479_s12   ;;  %s3489_s30 = smov (!%p497_p7), 4  }
  0x29   : > { %500 = sbr.rel (%p497_p7) target bundleno = 569 (0x239), region = 69  ;;  %s3490_s4 = smov (!%p497_p7), 8  }
  0x2a   : > { %s3004_s28 = smul.u32 (!%p497_p7), 320, %s503_s27  ;;  %s3491_s5 = smov (!%p497_p7), 12  }
  0x2b   : > { %s3492_s6 = smov (!%p497_p7), 16   ;;  %s3493_s7 = smov (!%p497_p7), 20  }
  0x2c   : > { %s3638_s29 = scalar_lea.vmem (!%p497_p7), [#allocation2], %s3004_s28  ;;  %s3494_s8 = smov (!%p497_p7), 24  }
  0x2d   : > { %s3495_s9 = smov (!%p497_p7), 28   ;;  %s3496_s10 = smov (!%p497_p7), 32  }
  0x2e   : > { %vm694_vm0 = vcmask 1046528   ;;  %v3641_v40 = vld [vmem:[%s3638_s29 + $0x20] ss:$8 sps:$4 sm:$0xff]   ;;  %v3644_v41 = vld [vmem:[%s3638_s29 + $0x24] sm:$0x1]  ;;  %vm751_vm1 = vcmask 1045504  }
  0x2f   : > { %v3647_v42 = vld [vmem:[%s3638_s29 + $0x2c] sm:$0x1]  ;;  %v610_v43 = vunpack.c.l.bf16 %v3641_v40  ;;  %v611_v44 = vunpack.c.h.bf16 %v3641_v40  ;;  %v618_v45 = vunpack.c.l.bf16 %v3644_v41  ;;  %v3654_v47 = vld [vmem:[%s3638_s29] ss:$8 sps:$4 sm:$0xff]   ;;  %v3657_v48 = vld [vmem:[%s3638_s29 + $0x4] sm:$0x1] }
  0x30   : > { %v619_v46 = vunpack.c.l.bf16 %v3647_v42  ;;  %v3660_v49 = vld [vmem:[%s3638_s29 + $0xc] sm:$0x1]  ;;  %v606_v50 = vunpack.c.l.bf16 %v3654_v47  ;;  %v607_v51 = vunpack.c.h.bf16 %v3654_v47  ;;  %v614_v52 = vunpack.c.l.bf16 %v3657_v48  ;;  %v3667_v54 = vld [vmem:[%s3638_s29 + $0x30] ss:$8 sps:$4 sm:$0xff]   ;;  %v3678_v59 = vld [vmem:[%s3638_s29 + $0x34] sm:$0x1] }
  0x31   : > { %v615_v53 = vunpack.c.l.bf16 %v3660_v49  ;;  %v707_v55 = vrot.slane %v610_v43, 1  ;;  %v708_v56 = vrot.slane %v618_v45, 1  ;;  %v710_v57 = vrot.slane %v611_v44, 1  ;;  %v3689_v0 = vld [vmem:[%s3638_s29 + $0x3c] sm:$0x1]  ;;  %p526_p8 = scmp.lt.s32.totalorder %s2707_s15, 1 }
  0x32   : > { %v711_v58 = vrot.slane %v619_v46, 1  ;;  %v695_v60 = vrot.slane %v606_v50, 1  ;;  %v696_v61 = vrot.slane %v614_v52, 1  ;;  %v698_v62 = vrot.slane %v607_v51, 1  ;;  %v3696_v5 = vld [vmem:[%s3638_s29 + $0x10] ss:$8 sps:$4 sm:$0xff]  }
  0x33   : > { %v699_v63 = vrot.slane %v615_v53, 1  ;;  %v709_v1 = vsel %vm694_vm0, %v707_v55, %v708_v56  ;;  %v612_v3 = vunpack.c.l.bf16 %v3667_v54  ;;  %v613_v4 = vunpack.c.h.bf16 %v3667_v54  ;;  %v542_v6 = vld [vmem:[%s3638_s29 + $0x14] sm:$0x1]  ;;  %v543_v11 = vld [vmem:[%s3638_s29 + $0x1c] sm:$0x1]  ;;  %s4861_s15 = smov (!%p526_p8, %s2707_s15), 1 }
  0x34   : > { %v712_v2 = vsel %vm694_vm0, %v710_v57, %v711_v58  ;;  %v697_v8 = vsel %vm694_vm0, %v695_v60, %v696_v61  ;;  %v620_v10 = vunpack.c.l.bf16 %v3678_v59  ;;  %v550_v12 = vld [vmem:[%s3638_s29 + $0x10] sm:$0xe]  ;;  %v551_v13 = vld [vmem:[%s3638_s29 + $0x18] sm:$0xe]  ;;  %v621_v15 = vunpack.c.l.bf16 %v3689_v0  ;;  %v548_v26 = vld [vmem:[%s3638_s29] sm:$0xe] }
  0x35   : > { %v3047_v7 = vpack.i.bf16 %v712_v2, %v709_v1  ;;  %v700_v9 = vsel %vm694_vm0, %v698_v62, %v699_v63  ;;  %v713_v16 = vrot.slane %v612_v3, 1  ;;  %v716_v17 = vrot.slane %v613_v4, 1  ;;  %v549_v31 = vld [vmem:[%s3638_s29 + $0x8] sm:$0xe]  ;;  %v554_v55 = vld [vmem:[%s3638_s29 + $0x30] sm:$0xe] }
  0x36   : > { %v3037_v14 = vpack.i.bf16 %v700_v9, %v697_v8  ;;  %v714_v18 = vrot.slane %v620_v10, 1  ;;  %v608_v19 = vunpack.c.l.bf16 %v3696_v5  ;;  %v609_v20 = vunpack.c.h.bf16 %v3696_v5  ;;  %v555_v60 = vld [vmem:[%s3638_s29 + $0x38] sm:$0xe]  ;;  %v552_v61 = vld [vmem:[%s3638_s29 + $0x20] sm:$0xe] }
  0x37   : > { %3048 = vrot.lane.b32.xlu1 %v3047_v7, %s3489_s30  ;;  %v616_v21 = vunpack.c.l.bf16 %v542_v6  ;;  %v717_v22 = vrot.slane %v621_v15, 1  ;;  %v617_v23 = vunpack.c.l.bf16 %v543_v11  ;;  %v624_v24 = vunpack.c.l.bf16 %v550_v12  ;;  %v553_v2 = vld [vmem:[%s3638_s29 + $0x28] sm:$0xe]  ;;  %v4219_v47 = vld [vmem:[%s3638_s29 + $0xd0] ss:$8 sps:$4 sm:$0xff]  }
  0x38   : > { %3038 = vrot.lane.b32.xlu0 %v3037_v14, %s3489_s30  ;;  %v625_v25 = vunpack.c.l.bf16 %v551_v13  ;;  %v715_v27 = vsel %vm694_vm0, %v713_v16, %v714_v18  ;;  %v701_v28 = vrot.slane %v608_v19, 1  ;;  %v704_v30 = vrot.slane %v609_v20, 1  ;;  %v3737_v16 = vld [vmem:[%s3638_s29 + $0x50] ss:$8 sps:$4 sm:$0xff]  }
  0x39   : > { %v702_v29 = vrot.slane %v616_v21, 1  ;;  %v718_v32 = vsel %vm694_vm0, %v716_v17, %v717_v22  ;;  %v705_v33 = vrot.slane %v617_v23, 1  ;;  %v758_v34 = vrot.slane %v624_v24, 2  ;;  %v2771_v17 = vld [vmem:[%s3638_s29 + $0x54] sm:$0x1] }
  0x3a   : > { %v759_v35 = vrot.slane %v616_v21, 2  ;;  %v3052_v36 = vpack.i.bf16 %v718_v32, %v715_v27  ;;  %v761_v38 = vrot.slane %v625_v25, 2  ;;  %v762_v39 = vrot.slane %v617_v23, 2  ;;  %v2715_v27 = vld [vmem:[%s3638_s29 + $0x8] ss:$8 sps:$4 sm:$0xff]  }
  0x3b   : > { %v703_v37 = vsel %vm694_vm0, %v701_v28, %v702_v29  ;;  %v706_v56 = vsel %vm694_vm0, %v704_v30, %v705_v33  ;;  %v622_v58 = vunpack.c.l.bf16 %v548_v26  ;;  %v623_v59 = vunpack.c.l.bf16 %v549_v31  ;;  %v2779_v30 = vld [vmem:[%s3638_s29 + $0x58] ss:$8 sps:$4 sm:$0xff]  }
  0x3c   : > { %v760_v57 = vsel %vm751_vm1, %v758_v34, %v759_v35  ;;  %3053 = vrot.lane.b32.xlu1 %v3052_v36, %s3489_s30  ;;  %v3042_v62 = vpack.i.bf16 %v706_v56, %v703_v37  ;;  %v763_v63 = vsel %vm751_vm1, %v761_v38, %v762_v39  ;;  %v753_v0 = vrot.slane %v614_v52, 2 }
  0x3d   : > { %v756_v1 = vrot.slane %v615_v53, 2  ;;  %v3062_v6 = vpack.i.bf16 %v763_v63, %v760_v57  ;;  %v752_v7 = vrot.slane %v622_v58, 2  ;;  %v755_v8 = vrot.slane %v623_v59, 2  ;;  %v2773_v57 = vld [vmem:[%s3638_s29 + $0x64] sm:$0x1] }
  0x3e   : > { %v628_v9 = vunpack.c.l.bf16 %v554_v55  ;;  %3043 = vrot.lane.b32.xlu0 %v3042_v62, %s3489_s30  ;;  %v629_v11 = vunpack.c.l.bf16 %v555_v60  ;;  %v771_v12 = vrot.slane %v620_v10, 2  ;;  %v774_v13 = vrot.slane %v621_v15, 2  ;;  %v2772_v15 = vld [vmem:[%s3638_s29 + $0x5c] sm:$0x1]  ;;  %v2774_v60 = vld [vmem:[%s3638_s29 + $0x6c] sm:$0x1] }
  0x3f   : > { %v626_v14 = vunpack.c.l.bf16 %v552_v61  ;;  %v754_v48 = vsel %vm751_vm1, %v752_v7, %v753_v0  ;;  %v757_v49 = vsel %vm751_vm1, %v755_v8, %v756_v1  ;;  %v627_v53 = vunpack.c.l.bf16 %v553_v2  ;;  %v2723_v63 = vld [vmem:[%s3638_s29 + $0xc] sm:$0x1]  ;;  %v2724_v7 = vld [vmem:[%s3638_s29 + $0x14] sm:$0x1]  ;;  %v2717_v8 = vld [vmem:[%s3638_s29 + $0x18] ss:$8 sps:$4 sm:$0xff]  }
  0x40   : > { %v770_v52 = vrot.slane %v628_v9, 2  ;;  %3063 = vrot.lane.b32.xlu1 %v3062_v6, %s3490_s4  ;;  %v3057_v18 = vpack.i.bf16 %v757_v49, %v754_v48  ;;  %v773_v21 = vrot.slane %v629_v11, 2  ;;  %v765_v10 = vrot.slane %v618_v45, 2  ;;  %v2788_v48 = vld [vmem:[%s3638_s29 + $0x64] sm:$0x1] }
  0x41   : > { %v764_v22 = vrot.slane %v626_v14, 2  ;;  %v767_v24 = vrot.slane %v627_v53, 2  ;;  %v768_v25 = vrot.slane %v619_v46, 2  ;;  %v1220_v26 = vunpack.c.l.bf16 %v3737_v16  ;;  %v3760_v46 = vld [vmem:[%s3638_s29 + $0x60] ss:$8 sps:$4 sm:$0xff]  }
  0x42   : > { %v772_v23 = vsel %vm751_vm1, %v770_v52, %v771_v12  ;;  %3058 = vrot.lane.b32.xlu0 %v3057_v18, %s3490_s4  ;;  %v775_v28 = vsel %vm751_vm1, %v773_v21, %v774_v13  ;;  %v1221_v41 = vunpack.c.h.bf16 %v3737_v16  ;;  %v1228_v45 = vunpack.c.l.bf16 %v2771_v17  ;;  %v2787_v14 = vld [vmem:[%s3638_s29 + $0x5c] sm:$0x1] }
  0x43   : > { %v766_v29 = vsel %vm751_vm1, %v764_v22, %v765_v10  ;;  %v3072_v31 = vpack.i.bf16 %v775_v28, %v772_v23  ;;  %v769_v32 = vsel %vm751_vm1, %v767_v24, %v768_v25  ;;  %v1229_v33 = vunpack.c.l.bf16 %v2772_v15 }
  0x44   : > { %v1284_v42 = vrot.slane %v1220_v26, 1  ;;  %v3067_v34 = vpack.i.bf16 %v769_v32, %v766_v29  ;;  %v1285_v35 = vrot.slane %v1228_v45, 1  ;;  %v1287_v36 = vrot.slane %v1221_v41, 1 }
  0x45   : > { %v630_v37 = vunpack.c.l.bf16 %v2715_v27  ;;  %3073 = vrot.lane.b32.xlu1 %v3072_v31, %s3490_s4  ;;  %v1288_v38 = vrot.slane %v1229_v33, 1  ;;  %v631_v39 = vunpack.c.h.bf16 %v2715_v27  ;;  %v1236_v55 = vunpack.c.l.bf16 %v2779_v30  ;;  %v2781_v27 = vld [vmem:[%s3638_s29 + $0x68] ss:$8 sps:$4 sm:$0xff]  }
  0x46   : > { %v1237_v56 = vunpack.c.h.bf16 %v2779_v30  ;;  %3068 = vrot.lane.b32.xlu0 %v3067_v34, %s3490_s4  ;;  %v1286_v58 = vsel %vm694_vm0, %v1284_v42, %v1285_v35  ;;  %v1222_v61 = vunpack.c.l.bf16 %v3760_v46  ;;  %v1223_v62 = vunpack.c.h.bf16 %v3760_v46  ;;  %v2731_v31 = vld [vmem:[%s3638_s29 + $0x8] sm:$0xe]  ;;  %v2732_v35 = vld [vmem:[%s3638_s29 + $0x10] sm:$0xe] }
  0x47   : > { %v840_v59 = vrot.slane %v630_v37, 1  ;;  %v1289_v0 = vsel %vm694_vm0, %v1287_v36, %v1288_v38  ;;  %v843_v1 = vrot.slane %v631_v39, 1  ;;  %v3077_v2 = vpack.i.bf16 %v631_v39, %v630_v37 }
  0x48   : > { %v1375_v6 = vrot.slane %v1237_v56, 1  ;;  %v3082_v9 = vpack.i.bf16 %v1289_v0, %v1286_v58  ;;  %v3092_v11 = vpack.i.bf16 %v1237_v56, %v1236_v55  ;;  %v1372_v12 = vrot.slane %v1236_v55, 1 }
  0x49   : > { %v1230_v13 = vunpack.c.l.bf16 %v2773_v57  ;;  %v1231_v49 = vunpack.c.l.bf16 %v2774_v60  ;;  %v1290_v52 = vrot.slane %v1222_v61, 1  ;;  %v1293_v53 = vrot.slane %v1223_v62, 1  ;;  %v2725_v60 = vld [vmem:[%s3638_s29 + $0x1c] sm:$0x1] }
  0x4a   : > { %v638_v17 = vunpack.c.l.bf16 %v2723_v63  ;;  %3083 = vrot.lane.b32.xlu1 %v3082_v9, %s3489_s30  ;;  %3078 = vrot.lane.b32.xlu0 %v3077_v2, %s3491_s5  ;;  %v639_v21 = vunpack.c.l.bf16 %v2724_v7  ;;  %v632_v22 = vunpack.c.l.bf16 %v2717_v8  ;;  %v633_v10 = vunpack.c.h.bf16 %v2717_v8  ;;  %v2795_v8 = vld [vmem:[%s3638_s29 + $0x60] ss:$8 sps:$4 sm:$0xff]   ;;  %v2789_v9 = vld [vmem:[%s3638_s29 + $0x6c] sm:$0x1] }
  0x4b   : > { %v1291_v18 = vrot.slane %v1230_v13, 1  ;;  %v1294_v15 = vrot.slane %v1231_v49, 1  ;;  %v1244_v24 = vunpack.c.l.bf16 %v2787_v14  ;;  %v1245_v25 = vunpack.c.l.bf16 %v2788_v48  ;;  %v2790_v48 = vld [vmem:[%s3638_s29 + $0x74] sm:$0x1] }
  0x4c   : > { %v841_v23 = vrot.slane %v638_v17, 1  ;;  %v844_v29 = vrot.slane %v639_v21, 1  ;;  %v849_v45 = vrot.slane %v633_v10, 1  ;;  %v3097_v30 = vpack.i.bf16 %v633_v10, %v632_v22 }
  0x4d   : > { %v1292_v28 = vsel %vm694_vm0, %v1290_v52, %v1291_v18  ;;  %v1295_v32 = vsel %vm694_vm0, %v1293_v53, %v1294_v15  ;;  %v846_v42 = vrot.slane %v632_v22, 1  ;;  %v1373_v34 = vrot.slane %v1244_v24, 1 }
  0x4e   : > { %v842_v33 = vsel %vm694_vm0, %v840_v59, %v841_v23  ;;  %3093 = vrot.lane.b32.xlu1 %v3092_v11, %s3490_s4  ;;  %v3087_v36 = vpack.i.bf16 %v1295_v32, %v1292_v28  ;;  %v845_v37 = vsel %vm694_vm0, %v843_v1, %v844_v29  ;;  %v1376_v38 = vrot.slane %v1245_v25, 1  ;;  %v2726_v59 = vld [vmem:[%s3638_s29 + $0x24] sm:$0x1]  ;;  %v2733_v25 = vld [vmem:[%s3638_s29 + $0x18] sm:$0xe] }
  0x4f   : > { %v1238_v39 = vunpack.c.l.bf16 %v2781_v27  ;;  %v3102_v55 = vpack.i.bf16 %v845_v37, %v842_v33  ;;  %v1374_v56 = vsel %vm694_vm0, %v1372_v12, %v1373_v34  ;;  %v1239_v57 = vunpack.c.h.bf16 %v2781_v27  ;;  %v2739_v32 = vld [vmem:[%s3638_s29 + $0x10] ss:$8 sps:$4 sm:$0xff]   ;;  %v2803_v37 = vld [vmem:[%s3638_s29 + $0x64] sm:$0x1] }
  0x50   : > { %v646_v58 = vunpack.c.l.bf16 %v2731_v31  ;;  %3088 = vrot.lane.b32.xlu0 %v3087_v36, %s3489_s30  ;;  %v1377_v63 = vsel %vm694_vm0, %v1375_v6, %v1376_v38  ;;  %v647_v2 = vunpack.c.l.bf16 %v2732_v35  ;;  %v897_v7 = vrot.slane %v638_v17, 2  ;;  %v2804_v38 = vld [vmem:[%s3638_s29 + $0x6c] sm:$0x1] }
  0x51   : > { %v1378_v0 = vrot.slane %v1238_v39, 1  ;;  %v3112_v1 = vpack.i.bf16 %v1377_v63, %v1374_v56  ;;  %v1381_v11 = vrot.slane %v1239_v57, 1  ;;  %v3107_v13 = vpack.i.bf16 %v1239_v57, %v1238_v39  ;;  %v3816_v57 = vld [vmem:[%s3638_s29 + $0x14] sm:$0x1] }
  0x52   : > { %v896_v14 = vrot.slane %v646_v58, 2  ;;  %3103 = vrot.lane.b32.xlu1 %v3102_v55, %s3492_s6  ;;  %v899_v12 = vrot.slane %v647_v2, 2  ;;  %v900_v49 = vrot.slane %v639_v21, 2  ;;  %v640_v52 = vunpack.c.l.bf16 %v2725_v60  ;;  %v2734_v21 = vld [vmem:[%s3638_s29 + $0x20] sm:$0xe] }
  0x53   : > { %v641_v53 = vunpack.c.l.bf16 %v2726_v59  ;;  %v1252_v18 = vunpack.c.l.bf16 %v2795_v8  ;;  %v1253_v17 = vunpack.c.h.bf16 %v2795_v8  ;;  %v1246_v22 = vunpack.c.l.bf16 %v2789_v9  ;;  %v3819_v2 = vld [vmem:[%s3638_s29 + $0x1c] sm:$0x1] }
  0x54   : > { %v898_v6 = vsel %vm751_vm1, %v896_v14, %v897_v7  ;;  %3098 = vrot.lane.b32.xlu0 %v3097_v30, %s3491_s5  ;;  %v901_v10 = vsel %vm751_vm1, %v899_v12, %v900_v49  ;;  %v847_v15 = vrot.slane %v640_v52, 1  ;;  %v1247_v24 = vunpack.c.l.bf16 %v2790_v48 }
  0x55   : > { %v850_v23 = vrot.slane %v641_v53, 1  ;;  %v3122_v27 = vpack.i.bf16 %v901_v10, %v898_v6  ;;  %v1379_v31 = vrot.slane %v1246_v22, 1  ;;  %v1463_v34 = vrot.slane %v1253_v17, 1  ;;  %v2741_v6 = vld [vmem:[%s3638_s29 + $0x20] ss:$8 sps:$4 sm:$0xff]  }
  0x56   : > { %3113 = vrot.lane.b32.xlu1 %v3112_v1, %s3491_s5  ;;  %v848_v28 = vsel %vm694_vm0, %v846_v42, %v847_v15  ;;  %v1382_v30 = vrot.slane %v1247_v24, 1  ;;  %v3132_v35 = vpack.i.bf16 %v1253_v17, %v1252_v18  ;;  %v648_v36 = vunpack.c.l.bf16 %v2733_v25  ;;  %v2750_v15 = vld [vmem:[%s3638_s29 + $0x2c] sm:$0x1] }
  0x57   : > { %v851_v29 = vsel %vm694_vm0, %v849_v45, %v850_v23  ;;  %v1380_v39 = vsel %vm694_vm0, %v1378_v0, %v1379_v31  ;;  %v649_v55 = vunpack.c.l.bf16 %v2734_v21  ;;  %v903_v56 = vrot.slane %v640_v52, 2  ;;  %v2797_v45 = vld [vmem:[%s3638_s29 + $0x70] ss:$8 sps:$4 sm:$0xff]  }
  0x58   : > { %v3117_v33 = vpack.i.bf16 %v851_v29, %v848_v28  ;;  %3108 = vrot.lane.b32.xlu0 %v3107_v13, %s3490_s4  ;;  %v1383_v42 = vsel %vm694_vm0, %v1381_v11, %v1382_v30  ;;  %v1460_v58 = vrot.slane %v1252_v18, 1  ;;  %v654_v59 = vunpack.c.l.bf16 %v2739_v32  ;;  %v2749_v18 = vld [vmem:[%s3638_s29 + $0x24] sm:$0x1]  ;;  %v2805_v30 = vld [vmem:[%s3638_s29 + $0x74] sm:$0x1] }
  0x59   : > { %v3127_v60 = vpack.i.bf16 %v1383_v42, %v1380_v39  ;;  %v655_v63 = vunpack.c.h.bf16 %v2739_v32  ;;  %v902_v7 = vrot.slane %v648_v36, 2  ;;  %v905_v0 = vrot.slane %v649_v55, 2  ;;  %v2806_v32 = vld [vmem:[%s3638_s29 + $0x7c] sm:$0x1]  ;;  %v2758_v39 = vld [vmem:[%s3638_s29 + $0x28] sm:$0xe] }
  0x5a   : > { %3123 = vrot.lane.b32.xlu1 %v3122_v27, %s3493_s7  ;;  %v906_v8 = vrot.slane %v641_v53, 2  ;;  %v1260_v9 = vunpack.c.l.bf16 %v2803_v37  ;;  %v1261_v1 = vunpack.c.l.bf16 %v2804_v38  ;;  %v1254_v11 = vunpack.c.l.bf16 %v2797_v45  ;;  %v2757_v38 = vld [vmem:[%s3638_s29 + $0x20] sm:$0xe] }
  0x5b   : > { %v1255_v13 = vunpack.c.h.bf16 %v2797_v45  ;;  %v662_v14 = vunpack.c.l.bf16 %v3816_v57  ;;  %v904_v48 = vsel %vm751_vm1, %v902_v7, %v903_v56  ;;  %v663_v52 = vunpack.c.l.bf16 %v3819_v2  ;;  %v2777_v2 = vld [vmem:[%s3638_s29 + $0x84] sm:$0x1] }
  0x5c   : > { %3118 = vrot.lane.b32.xlu0 %v3117_v33, %s3492_s6  ;;  %v907_v12 = vsel %vm751_vm1, %v905_v0, %v906_v8  ;;  %v1461_v49 = vrot.slane %v1260_v9, 1  ;;  %v987_v53 = vrot.slane %v655_v63, 1  ;;  %v3142_v17 = vpack.i.bf16 %v655_v63, %v654_v59  ;;  %v2755_v63 = vld [vmem:[%s3638_s29 + $0x10] sm:$0xe] }
  0x5d   : > { %v984_v22 = vrot.slane %v654_v59, 1  ;;  %v1464_v10 = vrot.slane %v1261_v1, 1  ;;  %v3137_v23 = vpack.i.bf16 %v907_v12, %v904_v48  ;;  %v985_v25 = vrot.slane %v662_v14, 1  ;;  %v2756_v1 = vld [vmem:[%s3638_s29 + $0x18] sm:$0xe] }
  0x5e   : > { %3133 = vrot.lane.b32.xlu1 %v3132_v35, %s3492_s6  ;;  %v1462_v24 = vsel %vm694_vm0, %v1460_v58, %v1461_v49  ;;  %v988_v27 = vrot.slane %v663_v52, 1  ;;  %v656_v28 = vunpack.c.l.bf16 %v2741_v6  ;;  %v657_v29 = vunpack.c.h.bf16 %v2741_v6 }
  0x5f   : > { %v1465_v21 = vsel %vm694_vm0, %v1463_v34, %v1464_v10  ;;  %v664_v31 = vunpack.c.l.bf16 %v2749_v18  ;;  %v1469_v33 = vrot.slane %v1255_v13, 1  ;;  %v3147_v35 = vpack.i.bf16 %v1255_v13, %v1254_v11  ;;  %v2719_v10 = vld [vmem:[%s3638_s29 + $0x28] ss:$8 sps:$4 sm:$0xff]  }
  0x60   : > { %3128 = vrot.lane.b32.xlu0 %v3127_v60, %s3491_s5  ;;  %v1466_v36 = vrot.slane %v1254_v11, 1  ;;  %v665_v37 = vunpack.c.l.bf16 %v2750_v15  ;;  %v3152_v42 = vpack.i.bf16 %v1465_v21, %v1462_v24  ;;  %v986_v55 = vsel %vm694_vm0, %v984_v22, %v985_v25  ;;  %v3853_v15 = vld [vmem:[%s3638_s29 + $0x70] ss:$8 sps:$4 sm:$0xff]   ;;  %v2775_v21 = vld [vmem:[%s3638_s29 + $0x74] sm:$0x1] }
  0x61   : > { %v993_v56 = vrot.slane %v657_v29, 1  ;;  %v990_v34 = vrot.slane %v656_v28, 1  ;;  %v991_v45 = vrot.slane %v664_v31, 1  ;;  %v1262_v59 = vunpack.c.l.bf16 %v2805_v30 }
  0x62   : > { %3143 = vrot.lane.b32.xlu1 %v3142_v17, %s3494_s8  ;;  %v994_v58 = vrot.slane %v665_v37, 1  ;;  %v1263_v60 = vunpack.c.l.bf16 %v2806_v32  ;;  %v989_v7 = vsel %vm694_vm0, %v987_v53, %v988_v27  ;;  %v672_v0 = vunpack.c.l.bf16 %v2757_v38 }
  0x63   : > { %v673_v8 = vunpack.c.l.bf16 %v2758_v39  ;;  %v1047_v9 = vrot.slane %v664_v31, 2  ;;  %v992_v11 = vsel %vm694_vm0, %v990_v34, %v991_v45  ;;  %v1467_v48 = vrot.slane %v1262_v59, 1  ;;  %v2776_v31 = vld [vmem:[%s3638_s29 + $0x7c] sm:$0x1]  ;;  %v2778_v45 = vld [vmem:[%s3638_s29 + $0x8c] sm:$0x1] }
  0x64   : > { %3138 = vrot.lane.b32.xlu0 %v3137_v23, %s3493_s7  ;;  %v995_v13 = vsel %vm694_vm0, %v993_v56, %v994_v58  ;;  %v1470_v12 = vrot.slane %v1263_v60, 1  ;;  %v1046_v49 = vrot.slane %v672_v0, 2  ;;  %v1050_v18 = vrot.slane %v665_v37, 2 }
  0x65   : > { %v1049_v6 = vrot.slane %v673_v8, 2  ;;  %v670_v53 = vunpack.c.l.bf16 %v2755_v63  ;;  %v3162_v17 = vpack.i.bf16 %v989_v7, %v986_v55  ;;  %v671_v22 = vunpack.c.l.bf16 %v2756_v1  ;;  %v2783_v7 = vld [vmem:[%s3638_s29 + $0x78] ss:$8 sps:$4 sm:$0xff]  }
  0x66   : > { %3153 = vrot.lane.b32.xlu1 %v3152_v42, %s3493_s7  ;;  %v3157_v23 = vpack.i.bf16 %v657_v29, %v656_v28  ;;  %v3172_v24 = vpack.i.bf16 %v995_v13, %v992_v11  ;;  %v1041_v27 = vrot.slane %v662_v14, 2  ;;  %v1468_v30 = vsel %vm694_vm0, %v1466_v36, %v1467_v48  ;;  %v3870_v42 = vld [vmem:[%s3638_s29 + $0x80] ss:$8 sps:$4 sm:$0xff]   ;;  %v2727_v11 = vld [vmem:[%s3638_s29 + $0x2c] sm:$0x1] }
  0x67   : > { %v1040_v25 = vrot.slane %v670_v53, 2  ;;  %v1471_v32 = vsel %vm694_vm0, %v1469_v33, %v1470_v12  ;;  %v1043_v37 = vrot.slane %v671_v22, 2  ;;  %v1044_v38 = vrot.slane %v663_v52, 2 }
  0x68   : > { %3148 = vrot.lane.b32.xlu0 %v3147_v35, %s3492_s6  ;;  %v1048_v28 = vsel %vm751_vm1, %v1046_v49, %v1047_v9  ;;  %v1051_v57 = vsel %vm751_vm1, %v1049_v6, %v1050_v18  ;;  %v4831_v14 = vunpack.c.l.bf16 %v3853_v15  ;;  %v1225_v29 = vunpack.c.h.bf16 %v3853_v15  ;;  %v2728_v6 = vld [vmem:[%s3638_s29 + $0x34] sm:$0x1]  ;;  %v2791_v18 = vld [vmem:[%s3638_s29 + $0x7c] sm:$0x1] }
  0x69   : > { %v634_v35 = vunpack.c.l.bf16 %v2719_v10  ;;  %v635_v36 = vunpack.c.h.bf16 %v2719_v10  ;;  %v1232_v33 = vunpack.c.l.bf16 %v2775_v21  ;;  %v1233_v39 = vunpack.c.l.bf16 %v2776_v31  ;;  %v3897_v31 = vld [vmem:[%s3638_s29 + $0x38] ss:$8 sps:$4 sm:$0xff]  }
  0x6a   : > { %3163 = vrot.lane.b32.xlu1 %v3162_v17, %s3495_s9  ;;  %v3167_v52 = vpack.i.bf16 %v1471_v32, %v1468_v30  ;;  %v1042_v55 = vsel %vm751_vm1, %v1040_v25, %v1041_v27  ;;  %v1045_v56 = vsel %vm751_vm1, %v1043_v37, %v1044_v38  ;;  %v1296_v34 = vrot.slane %v4831_v14, 1  ;;  %v2759_v14 = vld [vmem:[%s3638_s29 + $0x30] sm:$0xe] }
  0x6b   : > { %v3182_v58 = vpack.i.bf16 %v1051_v57, %v1048_v28  ;;  %v1297_v59 = vrot.slane %v1232_v33, 1  ;;  %v1299_v60 = vrot.slane %v1225_v29, 1  ;;  %v1300_v63 = vrot.slane %v1233_v39, 1  ;;  %v2735_v33 = vld [vmem:[%s3638_s29 + $0x28] sm:$0xe] }
  0x6c   : > { %3158 = vrot.lane.b32.xlu0 %v3157_v23, %s3494_s8  ;;  %v852_v0 = vrot.slane %v634_v35, 1  ;;  %v4829_v8 = vunpack.c.l.bf16 %v3870_v42  ;;  %v4830_v9 = vunpack.c.h.bf16 %v3870_v42  ;;  %v1234_v1 = vunpack.c.l.bf16 %v2777_v2  ;;  %v2792_v23 = vld [vmem:[%s3638_s29 + $0x84] sm:$0x1] }
  0x6d   : > { %v3177_v13 = vpack.i.bf16 %v1045_v56, %v1042_v55  ;;  %v855_v48 = vrot.slane %v635_v36, 1  ;;  %v3192_v12 = vpack.i.bf16 %v635_v36, %v634_v35  ;;  %v1235_v49 = vunpack.c.l.bf16 %v2778_v45  ;;  %v2785_v56 = vld [vmem:[%s3638_s29 + $0x88] ss:$8 sps:$4 sm:$0xff]  }
  0x6e   : > { %3173 = vrot.lane.b32.xlu1 %v3172_v24, %s3495_s9  ;;  %v1298_v53 = vsel %vm694_vm0, %v1296_v34, %v1297_v59  ;;  %v1301_v17 = vsel %vm694_vm0, %v1299_v60, %v1300_v63  ;;  %v1240_v22 = vunpack.c.l.bf16 %v2783_v7  ;;  %v1302_v10 = vrot.slane %v4829_v8, 1  ;;  %v2736_v34 = vld [vmem:[%s3638_s29 + $0x30] sm:$0xe] }
  0x6f   : > { %v1303_v24 = vrot.slane %v1234_v1, 1  ;;  %v1305_v25 = vrot.slane %v4830_v9, 1  ;;  %v1306_v27 = vrot.slane %v1235_v49, 1  ;;  %v642_v21 = vunpack.c.l.bf16 %v2727_v11 }
  0x70   : > { %3168 = vrot.lane.b32.xlu0 %v3167_v52, %s3493_s7  ;;  %v1241_v30 = vunpack.c.h.bf16 %v2783_v7  ;;  %v1384_v32 = vrot.slane %v1240_v22, 1  ;;  %v643_v37 = vunpack.c.l.bf16 %v2728_v6  ;;  %v1248_v38 = vunpack.c.l.bf16 %v2791_v18 }
  0x71   : > { %v1304_v28 = vsel %vm694_vm0, %v1302_v10, %v1303_v24  ;;  %v1307_v57 = vsel %vm694_vm0, %v1305_v25, %v1306_v27  ;;  %v853_v35 = vrot.slane %v642_v21, 1  ;;  %v1249_v36 = vunpack.c.l.bf16 %v2792_v23  ;;  %v2793_v24 = vld [vmem:[%s3638_s29 + $0x8c] sm:$0x1]  ;;  %v2794_v25 = vld [vmem:[%s3638_s29 + $0x94] sm:$0x1] }
  0x72   : > { %3183 = vrot.lane.b32.xlu1 %v3182_v58, %s3496_s10  ;;  %v3187_v39 = vpack.i.bf16 %v1301_v17, %v1298_v53  ;;  %v1387_v2 = vrot.slane %v1241_v30, 1  ;;  %v856_v52 = vrot.slane %v643_v37, 1  ;;  %v636_v55 = vunpack.c.l.bf16 %v3897_v31  ;;  %v2729_v53 = vld [vmem:[%s3638_s29 + $0x3c] sm:$0x1] }
  0x73   : > { %v854_v45 = vsel %vm694_vm0, %v852_v0, %v853_v35  ;;  %v637_v58 = vunpack.c.h.bf16 %v3897_v31  ;;  %v1385_v59 = vrot.slane %v1248_v38, 1  ;;  %v1388_v60 = vrot.slane %v1249_v36, 1  ;;  %v2730_v0 = vld [vmem:[%s3638_s29 + $0x44] sm:$0x1] }
  0x74   : > { %3178 = vrot.lane.b32.xlu0 %v3177_v13, %s3496_s10  ;;  %v3202_v63 = vpack.i.bf16 %v1241_v30, %v1240_v22  ;;  %v3197_v7 = vpack.i.bf16 %v1307_v57, %v1304_v28  ;;  %v857_v1 = vsel %vm694_vm0, %v855_v48, %v856_v52  ;;  %v650_v11 = vunpack.c.l.bf16 %v2735_v33  ;;  %v2799_v30 = vld [vmem:[%s3638_s29 + $0x80] ss:$8 sps:$4 sm:$0xff]  }
  0x75   : > { %v861_v49 = vrot.slane %v637_v58, 1  ;;  %v858_v6 = vrot.slane %v636_v55, 1  ;;  %v1242_v18 = vunpack.c.l.bf16 %v2785_v56  ;;  %v651_v13 = vunpack.c.l.bf16 %v2736_v34 }
  0x76   : > { %3193 = vrot.lane.b32.xlu1 %v3192_v12, %s3491_s5  ;;  %v3212_v17 = vpack.i.bf16 %v857_v1, %v854_v45  ;;  %v1386_v10 = vsel %vm694_vm0, %v1384_v32, %v1385_v59  ;;  %v1389_v23 = vsel %vm694_vm0, %v1387_v2, %v1388_v60  ;;  %v1243_v22 = vunpack.c.h.bf16 %v2785_v56  ;;  %v2738_v45 = vld [vmem:[%s3638_s29 + $0x40] sm:$0xe] }
  0x77   : > { %v908_v48 = vrot.slane %v650_v11, 2  ;;  %v909_v12 = vrot.slane %v642_v21, 2  ;;  %v911_v27 = vrot.slane %v651_v13, 2  ;;  %v912_v31 = vrot.slane %v643_v37, 2  ;;  %v2737_v37 = vld [vmem:[%s3638_s29 + $0x38] sm:$0xe] }
  0x78   : > { %3188 = vrot.lane.b32.xlu0 %v3187_v39, %s3489_s30  ;;  %v1393_v38 = vrot.slane %v1243_v22, 1  ;;  %v1390_v28 = vrot.slane %v1242_v18, 1  ;;  %v644_v57 = vunpack.c.l.bf16 %v2729_v53  ;;  %v645_v35 = vunpack.c.l.bf16 %v2730_v0  ;;  %v2743_v39 = vld [vmem:[%s3638_s29 + $0x30] ss:$8 sps:$4 sm:$0xff]   ;;  %v2807_v11 = vld [vmem:[%s3638_s29 + $0x84] sm:$0x1] }
  0x79   : > { %v3921_v32 = vsel %vm751_vm1, %v908_v48, %v909_v12  ;;  %v3924_v36 = vsel %vm751_vm1, %v911_v27, %v912_v31  ;;  %v1250_v33 = vunpack.c.l.bf16 %v2793_v24  ;;  %v1251_v21 = vunpack.c.l.bf16 %v2794_v25  ;;  %v2808_v13 = vld [vmem:[%s3638_s29 + $0x8c] sm:$0x1]  ;;  %v3944_v12 = vld [vmem:[%s3638_s29 + $0x34] sm:$0x1] }
  0x7a   : > { %3203 = vrot.lane.b32.xlu1 %v3202_v63, %s3490_s4  ;;  %v859_v2 = vrot.slane %v644_v57, 1  ;;  %v862_v52 = vrot.slane %v645_v35, 1  ;;  %v1256_v56 = vunpack.c.l.bf16 %v2799_v30  ;;  %v1257_v34 = vunpack.c.h.bf16 %v2799_v30  ;;  %v2801_v30 = vld [vmem:[%s3638_s29 + $0x90] ss:$8 sps:$4 sm:$0xff]  }
  0x7b   : > { %v3207_v59 = vpack.i.bf16 %v637_v58, %v636_v55  ;;  %v3222_v60 = vpack.i.bf16 %v1389_v23, %v1386_v10  ;;  %v1391_v63 = vrot.slane %v1250_v33, 1  ;;  %v1394_v1 = vrot.slane %v1251_v21, 1 }
  0x7c   : > { %3198 = vrot.lane.b32.xlu0 %v3197_v7, %s3489_s30  ;;  %v3217_v53 = vpack.i.bf16 %v1243_v22, %v1242_v18  ;;  %v3232_v0 = vpack.i.bf16 %v3924_v36, %v3921_v32  ;;  %v860_v24 = vsel %vm694_vm0, %v858_v6, %v859_v2  ;;  %v863_v25 = vsel %vm694_vm0, %v861_v49, %v862_v52  ;;  %v3947_v6 = vld [vmem:[%s3638_s29 + $0x3c] sm:$0x1]  ;;  %v2745_v2 = vld [vmem:[%s3638_s29 + $0x40] ss:$8 sps:$4 sm:$0xff]  }
  0x7d   : > { %v1475_v7 = vrot.slane %v1257_v34, 1  ;;  %v3938_v55 = vsel %vm694_vm0, %v1390_v28, %v1391_v63  ;;  %v3941_v58 = vsel %vm694_vm0, %v1393_v38, %v1394_v1  ;;  %v652_v10 = vunpack.c.l.bf16 %v2737_v37  ;;  %v2753_v63 = vld [vmem:[%s3638_s29 + $0x44] sm:$0x1]  ;;  %v2754_v1 = vld [vmem:[%s3638_s29 + $0x4c] sm:$0x1] }
  0x7e   : > { %3213 = vrot.lane.b32.xlu1 %v3212_v17, %s3492_s6  ;;  %v3242_v23 = vpack.i.bf16 %v1257_v34, %v1256_v56  ;;  %v1472_v18 = vrot.slane %v1256_v56, 1  ;;  %v658_v22 = vunpack.c.l.bf16 %v2743_v39  ;;  %v659_v48 = vunpack.c.h.bf16 %v2743_v39 }
  0x7f   : > { %v3227_v49 = vpack.i.bf16 %v863_v25, %v860_v24  ;;  %v3237_v17 = vpack.i.bf16 %v3941_v58, %v3938_v55  ;;  %v653_v27 = vunpack.c.l.bf16 %v2738_v45  ;;  %v914_v31 = vrot.slane %v652_v10, 2  ;;  %v2809_v10 = vld [vmem:[%s3638_s29 + $0x94] sm:$0x1]  ;;  %v4015_v58 = vld [vmem:[%s3638_s29 + $0xa0] ss:$8 sps:$4 sm:$0xff]  }
  0x80   : > { %3208 = vrot.lane.b32.xlu0 %v3207_v59, %s3491_s5  ;;  %v915_v38 = vrot.slane %v644_v57, 2  ;;  %v918_v28 = vrot.slane %v645_v35, 2  ;;  %v1264_v32 = vunpack.c.l.bf16 %v2807_v11  ;;  %v1265_v36 = vunpack.c.l.bf16 %v2808_v13 }
  0x81   : > { %v999_v33 = vrot.slane %v659_v48, 1  ;;  %v917_v21 = vrot.slane %v653_v27, 2  ;;  %v666_v39 = vunpack.c.l.bf16 %v3944_v12  ;;  %v667_v37 = vunpack.c.l.bf16 %v3947_v6  ;;  %v2845_v12 = vld [vmem:[%s3638_s29 + $0xb0] sm:$0xe] }
  0x82   : > { %3223 = vrot.lane.b32.xlu1 %v3222_v60, %s3491_s5  ;;  %v996_v52 = vrot.slane %v658_v22, 1  ;;  %v1473_v56 = vrot.slane %v1264_v32, 1  ;;  %v1476_v34 = vrot.slane %v1265_v36, 1  ;;  %v1259_v57 = vunpack.c.h.bf16 %v2801_v30  ;;  %v2761_v32 = vld [vmem:[%s3638_s29 + $0x40] sm:$0xe] }
  0x83   : > { %v3252_v35 = vpack.i.bf16 %v659_v48, %v658_v22  ;;  %v1258_v45 = vunpack.c.l.bf16 %v2801_v30  ;;  %v997_v59 = vrot.slane %v666_v39, 1  ;;  %v1000_v60 = vrot.slane %v667_v37, 1 }
  0x84   : > { %3218 = vrot.lane.b32.xlu0 %v3217_v53, %s3490_s4  ;;  %v916_v11 = vsel %vm751_vm1, %v914_v31, %v915_v38  ;;  %v919_v13 = vsel %vm751_vm1, %v917_v21, %v918_v28  ;;  %v1481_v24 = vrot.slane %v1259_v57, 1  ;;  %v660_v25 = vunpack.c.l.bf16 %v2745_v2  ;;  %v2810_v53 = vld [vmem:[%s3638_s29 + $0x9c] sm:$0x1]  ;;  %v2762_v21 = vld [vmem:[%s3638_s29 + $0x48] sm:$0xe] }
  0x85   : > { %v3970_v22 = vsel %vm694_vm0, %v1472_v18, %v1473_v56  ;;  %v3973_v48 = vsel %vm694_vm0, %v1475_v7, %v1476_v34  ;;  %v1478_v27 = vrot.slane %v1258_v45, 1  ;;  %v661_v30 = vunpack.c.h.bf16 %v2745_v2 }
  0x86   : > { %3233 = vrot.lane.b32.xlu1 %v3232_v0, %s3493_s7  ;;  %v3977_v31 = vsel %vm694_vm0, %v996_v52, %v997_v59  ;;  %v1002_v38 = vrot.slane %v660_v25, 1  ;;  %v668_v28 = vunpack.c.l.bf16 %v2753_v63  ;;  %v669_v36 = vunpack.c.l.bf16 %v2754_v1  ;;  %v2760_v1 = vld [vmem:[%s3638_s29 + $0x38] sm:$0xe] }
  0x87   : > { %v3982_v0 = vsel %vm694_vm0, %v999_v33, %v1000_v60  ;;  %v1005_v18 = vrot.slane %v661_v30, 1  ;;  %v1266_v7 = vunpack.c.l.bf16 %v2809_v10  ;;  %v1267_v56 = vunpack.c.l.bf16 %v2810_v53  ;;  %v4010_v53 = vld [vmem:[%s3638_s29 + $0xb0] ss:$8 sps:$4 sm:$0xff]  }
  0x88   : > { %3228 = vrot.lane.b32.xlu0 %v3227_v49, %s3492_s6  ;;  %v3257_v34 = vpack.i.bf16 %v1259_v57, %v1258_v45  ;;  %v1003_v2 = vrot.slane %v668_v28, 1  ;;  %v1006_v8 = vrot.slane %v669_v36, 1  ;;  %v676_v9 = vunpack.c.l.bf16 %v2761_v32 }
  0x89   : > { %v3247_v52 = vpack.i.bf16 %v919_v13, %v916_v11  ;;  %v1479_v59 = vrot.slane %v1266_v7, 1  ;;  %v1482_v63 = vrot.slane %v1267_v56, 1  ;;  %v677_v49 = vunpack.c.l.bf16 %v2762_v21 }
  0x8a   : > { %3243 = vrot.lane.b32.xlu1 %v3242_v23, %s3492_s6  ;;  %v3262_v33 = vpack.i.bf16 %v3973_v48, %v3970_v22  ;;  %v3272_v57 = vpack.i.bf16 %v3982_v0, %v3977_v31  ;;  %v3992_v45 = vsel %vm694_vm0, %v1002_v38, %v1003_v2  ;;  %v3995_v60 = vsel %vm694_vm0, %v1005_v18, %v1006_v8  ;;  %v2837_v22 = vld [vmem:[%s3638_s29 + $0xb4] sm:$0x1]  ;;  %v2838_v8 = vld [vmem:[%s3638_s29 + $0xbc] sm:$0x1] }
  0x8b   : > { %v4001_v23 = vpack.i.bf16 %v661_v30, %v660_v25  ;;  %v4004_v11 = vsel %vm694_vm0, %v1478_v27, %v1479_v59  ;;  %v4007_v13 = vsel %vm694_vm0, %v1481_v24, %v1482_v63  ;;  %v674_v10 = vunpack.c.l.bf16 %v2759_v14  ;;  %v2846_v59 = vld [vmem:[%s3638_s29 + $0xb8] sm:$0xe] }
  0x8c   : > { %3238 = vrot.lane.b32.xlu0 %v3237_v17, %s3491_s5  ;;  %v1058_v48 = vrot.slane %v676_v9, 2  ;;  %v1059_v32 = vrot.slane %v668_v28, 2  ;;  %v1062_v31 = vrot.slane %v669_v36, 2  ;;  %v675_v55 = vunpack.c.l.bf16 %v2760_v1  ;;  %v2835_v28 = vld [vmem:[%s3638_s29 + $0xa4] sm:$0x1] }
  0x8d   : > { %v3282_v17 = vpack.i.bf16 %v3995_v60, %v3992_v45  ;;  %v3277_v14 = vpack.i.bf16 %v4007_v13, %v4004_v11  ;;  %v1061_v24 = vrot.slane %v677_v49, 2  ;;  %v1052_v25 = vrot.slane %v674_v10, 2  ;;  %v2843_v10 = vld [vmem:[%s3638_s29 + $0xa0] sm:$0xe] }
  0x8e   : > { %3253 = vrot.lane.b32.xlu1 %v3252_v35, %s3494_s8  ;;  %v1053_v27 = vrot.slane %v666_v39, 2  ;;  %v4832_v9 = vunpack.c.l.bf16 %v4010_v53  ;;  %v4833_v30 = vunpack.c.h.bf16 %v4010_v53  ;;  %v1803_v38 = vunpack.c.l.bf16 %v2837_v22  ;;  %v2836_v35 = vld [vmem:[%s3638_s29 + $0xac] sm:$0x1] }
  0x8f   : > { %v1056_v36 = vrot.slane %v667_v37, 2  ;;  %v1804_v21 = vunpack.c.l.bf16 %v2838_v8  ;;  %v1793_v0 = vunpack.c.l.bf16 %v4015_v58  ;;  %v1794_v18 = vunpack.c.h.bf16 %v4015_v58 }
  0x90   : > { %3248 = vrot.lane.b32.xlu0 %v3247_v52, %s3493_s7  ;;  %v1055_v39 = vrot.slane %v675_v55, 2  ;;  %v1863_v7 = vrot.slane %v4832_v9, 1  ;;  %v1864_v56 = vrot.slane %v1803_v38, 1  ;;  %v1866_v2 = vrot.slane %v4833_v30, 1  ;;  %v4121_v30 = vld [vmem:[%s3638_s29 + $0x100] ss:$8 sps:$4 sm:$0xff]  }
  0x91   : > { %v4041_v6 = vsel %vm751_vm1, %v1058_v48, %v1059_v32  ;;  %v1867_v37 = vrot.slane %v1804_v21, 1  ;;  %v1801_v52 = vunpack.c.l.bf16 %v2835_v28  ;;  %v1802_v63 = vunpack.c.l.bf16 %v2836_v35  ;;  %v2844_v32 = vld [vmem:[%s3638_s29 + $0xa8] sm:$0xe]  ;;  %v2853_v35 = vld [vmem:[%s3638_s29 + $0xb8] ss:$8 sps:$4 sm:$0xff]  }
  0x92   : > { %3263 = vrot.lane.b32.xlu1 %v3262_v33, %s3493_s7  ;;  %v1063_v49 = vsel %vm751_vm1, %v1061_v24, %v1062_v31  ;;  %v1857_v1 = vrot.slane %v1793_v0, 1  ;;  %v1860_v45 = vrot.slane %v1794_v18, 1  ;;  %v1811_v60 = vunpack.c.l.bf16 %v2845_v12 }
  0x93   : > { %v4051_v33 = vsel %vm751_vm1, %v1052_v25, %v1053_v27  ;;  %v1858_v22 = vrot.slane %v1801_v52, 1  ;;  %v1861_v8 = vrot.slane %v1802_v63, 1  ;;  %v1812_v48 = vunpack.c.l.bf16 %v2846_v59  ;;  %v2851_v59 = vld [vmem:[%s3638_s29 + $0xa8] ss:$8 sps:$4 sm:$0xff]  }
  0x94   : > { %3258 = vrot.lane.b32.xlu0 %v3257_v34, %s3492_s6  ;;  %v1057_v31 = vsel %vm751_vm1, %v1055_v39, %v1056_v36  ;;  %v4056_v55 = vsel %vm694_vm0, %v1863_v7, %v1864_v56  ;;  %v4059_v24 = vsel %vm694_vm0, %v1866_v2, %v1867_v37  ;;  %v1919_v28 = vrot.slane %v1811_v60, 2  ;;  %v4071_v2 = vld [vmem:[%s3638_s29 + $0xbc] sm:$0x1] }
  0x95   : > { %v4064_v34 = vsel %vm694_vm0, %v1857_v1, %v1858_v22  ;;  %v1920_v25 = vrot.slane %v1803_v38, 2  ;;  %v1923_v27 = vrot.slane %v1804_v21, 2  ;;  %v1809_v12 = vunpack.c.l.bf16 %v2843_v10  ;;  %v4078_v10 = vld [vmem:[%s3638_s29 + $0xc4] sm:$0x1]  ;;  %v2860_v22 = vld [vmem:[%s3638_s29 + $0xb4] sm:$0x1] }
  0x96   : > { %3273 = vrot.lane.b32.xlu1 %v3272_v57, %s3495_s9  ;;  %v4068_v36 = vsel %vm694_vm0, %v1860_v45, %v1861_v8  ;;  %v1922_v39 = vrot.slane %v1812_v48, 2  ;;  %v1810_v7 = vunpack.c.l.bf16 %v2844_v32  ;;  %v1914_v56 = vrot.slane %v1801_v52, 2  ;;  %v4092_v8 = vld [vmem:[%s3638_s29 + $0xf0] ss:$8 sps:$4 sm:$0xff]  }
  0x97   : > { %v3292_v57 = vpack.i.bf16 %v1063_v49, %v4041_v6  ;;  %v1913_v38 = vrot.slane %v1809_v12, 2  ;;  %v1917_v21 = vrot.slane %v1802_v63, 2  ;;  %v1819_v37 = vunpack.c.l.bf16 %v2853_v35 }
  0x98   : > { %3268 = vrot.lane.b32.xlu0 %v4001_v23, %s3494_s8  ;;  %v3287_v1 = vpack.i.bf16 %v1057_v31, %v4051_v33  ;;  %v1916_v45 = vrot.slane %v1810_v7, 2  ;;  %v1820_v60 = vunpack.c.h.bf16 %v2853_v35  ;;  %v1817_v52 = vunpack.c.l.bf16 %v2851_v59  ;;  %v2859_v33 = vld [vmem:[%s3638_s29 + $0xac] sm:$0x1]  ;;  %v2867_v7 = vld [vmem:[%s3638_s29 + $0xa8] sm:$0xe] }
  0x99   : > { %v3302_v23 = vpack.i.bf16 %v4059_v24, %v4056_v55  ;;  %v3297_v6 = vpack.i.bf16 %v4068_v36, %v4064_v34  ;;  %v4086_v63 = vsel %vm751_vm1, %v1919_v28, %v1920_v25  ;;  %v1827_v49 = vunpack.c.l.bf16 %v4071_v2  ;;  %v2892_v55 = vld [vmem:[%s3638_s29 + $0xf4] sm:$0x1]  ;;  %v2893_v24 = vld [vmem:[%s3638_s29 + $0xfc] sm:$0x1] }
  0x9a   : > { %3283 = vrot.lane.b32.xlu1 %v3282_v17, %s3495_s9  ;;  %v1924_v48 = vsel %vm751_vm1, %v1922_v39, %v1923_v27  ;;  %v4096_v32 = vsel %vm751_vm1, %v1913_v38, %v1914_v56  ;;  %v2007_v17 = vrot.slane %v1819_v37, 1  ;;  %v1818_v31 = vunpack.c.h.bf16 %v2851_v59 }
  0x9b   : > { %v1918_v28 = vsel %vm751_vm1, %v1916_v45, %v1917_v21  ;;  %v2010_v35 = vrot.slane %v1820_v60, 1  ;;  %v2001_v34 = vrot.slane %v1817_v52, 1  ;;  %v1828_v25 = vunpack.c.l.bf16 %v4078_v10  ;;  %v2868_v10 = vld [vmem:[%s3638_s29 + $0xb0] sm:$0xe] }
  0x9c   : > { %3278 = vrot.lane.b32.xlu0 %v3277_v14, %s3493_s7  ;;  %v2008_v27 = vrot.slane %v1827_v49, 1  ;;  %v1825_v12 = vunpack.c.l.bf16 %v2859_v33  ;;  %v1826_v59 = vunpack.c.l.bf16 %v2860_v22  ;;  %v4834_v36 = vunpack.c.l.bf16 %v4092_v8 }
  0x9d   : > { %v2011_v39 = vrot.slane %v1828_v25, 1  ;;  %v2285_v11 = vunpack.c.h.bf16 %v4092_v8  ;;  %v2292_v13 = vunpack.c.l.bf16 %v2892_v55  ;;  %v2293_v14 = vunpack.c.l.bf16 %v2893_v24 }
  0x9e   : > { %3293 = vrot.lane.b32.xlu1 %v3292_v57, %s3496_s10  ;;  %v3312_v56 = vpack.i.bf16 %v1924_v48, %v4086_v63  ;;  %v2004_v38 = vrot.slane %v1818_v31, 1  ;;  %v2002_v21 = vrot.slane %v1825_v12, 1  ;;  %v2005_v45 = vrot.slane %v1826_v59, 1 }
  0x9f   : > { %v3307_v33 = vpack.i.bf16 %v1918_v28, %v4096_v32  ;;  %v3322_v57 = vpack.i.bf16 %v1820_v60, %v1819_v37  ;;  %v2332_v22 = vrot.slane %v4834_v36, 1  ;;  %v2333_v55 = vrot.slane %v2292_v13, 1  ;;  %v2894_v32 = vld [vmem:[%s3638_s29 + $0x104] sm:$0x1]  ;;  %v2869_v28 = vld [vmem:[%s3638_s29 + $0xb8] sm:$0xe] }
  0xa0   : > { %3288 = vrot.lane.b32.xlu0 %v3287_v1, %s3496_s10  ;;  %v3317_v24 = vpack.i.bf16 %v1818_v31, %v1817_v52  ;;  %vm1088_vm2 = vcmask 31744   ;;  %v2335_v63 = vrot.slane %v2285_v11, 1  ;;  %v2336_v48 = vrot.slane %v2293_v14, 1  ;;  %v2895_v31 = vld [vmem:[%s3638_s29 + $0x10c] sm:$0x1] }
  0xa1   : > { %v1833_v9 = vunpack.c.l.bf16 %v2867_v7  ;;  %v4125_v1 = vsel %vm694_vm0, %v2007_v17, %v2008_v27  ;;  %v4128_v37 = vsel %vm694_vm0, %v2010_v35, %v2011_v39  ;;  %v4131_v60 = vsel %vm694_vm0, %v2001_v34, %v2002_v21  ;;  %v2870_v36 = vld [vmem:[%s3638_s29 + $0xc0] sm:$0xe] }
  0xa2   : > { %3303 = vrot.lane.b32.xlu1 %v3302_v23, %s3489_s30  ;;  %v1834_v52 = vunpack.c.l.bf16 %v2868_v10  ;;  %v4137_v13 = vsel %vm694_vm0, %v2004_v38, %v2005_v45  ;;  %v2058_v7 = vrot.slane %v1825_v12, 2  ;;  %v2061_v23 = vrot.slane %v1826_v59, 2 }
  0xa3   : > { %v2057_v14 = vrot.slane %v1833_v9, 2  ;;  %v4142_v17 = vsel %vm694_vm0, %v2332_v22, %v2333_v55  ;;  %v2286_v34 = vunpack.c.l.bf16 %v4121_v30  ;;  %v2287_v27 = vunpack.c.h.bf16 %v4121_v30  ;;  %v4150_v9 = vld [vmem:[%s3638_s29 + $0x108] ss:$8 sps:$4 sm:$0xff]  }
  0xa4   : > { %3298 = vrot.lane.b32.xlu0 %v3297_v6, %s3489_s30  ;;  %v2060_v35 = vrot.slane %v1834_v52, 2  ;;  %v4147_v39 = vsel %vm694_vm0, %v2335_v63, %v2336_v48  ;;  %v2294_v21 = vunpack.c.l.bf16 %v2894_v32  ;;  %v2295_v38 = vunpack.c.l.bf16 %v2895_v31 }
  0xa5   : > { %v1835_v45 = vunpack.c.l.bf16 %v2869_v28  ;;  %v4154_v6 = vsel %vm751_vm1, %v2057_v14, %v2058_v7  ;;  %v2338_v12 = vrot.slane %v2286_v34, 1  ;;  %v2341_v59 = vrot.slane %v2287_v27, 1 }
  0xa6   : > { %3313 = vrot.lane.b32.xlu1 %v3312_v56, %s3490_s4  ;;  %v1836_v10 = vunpack.c.l.bf16 %v2870_v36  ;;  %v4161_v22 = vsel %vm751_vm1, %v2060_v35, %v2061_v23  ;;  %v2339_v55 = vrot.slane %v2294_v21, 1  ;;  %v2342_v63 = vrot.slane %v2295_v38, 1 }
  0xa7   : > { %v2063_v48 = vrot.slane %v1835_v45, 2  ;;  %v2064_v52 = vrot.slane %v1827_v49, 2  ;;  %v2067_v31 = vrot.slane %v1828_v25, 2  ;;  %v2302_v28 = vunpack.c.l.bf16 %v4150_v9 }
  0xa8   : > { %3308 = vrot.lane.b32.xlu0 %v3307_v33, %s3490_s4  ;;  %v2066_v32 = vrot.slane %v1836_v10, 2  ;;  %v4168_v23 = vsel %vm694_vm0, %v2338_v12, %v2339_v55  ;;  %v4171_v35 = vsel %vm694_vm0, %v2341_v59, %v2342_v63  ;;  %v3332_v2 = vpack.i.bf16 %v4128_v37, %v4125_v1  ;;  %v2900_v33 = vld [vmem:[%s3638_s29 + $0xf8] ss:$8 sps:$4 sm:$0xff]   ;;  %v2911_v59 = vld [vmem:[%s3638_s29 + $0x114] sm:$0x1] }
  0xa9   : > { %v3049_v56 = vpop.permute.xlu1 %3048  ;;  %v3327_v49 = vpack.i.bf16 %v4137_v13, %v4131_v60  ;;  %v3342_v25 = vpack.i.bf16 %v4147_v39, %v4142_v17  ;;  %v3337_v45 = vpack.i.bf16 %v4161_v22, %v4154_v6  ;;  %vm1097_vm3 = vcmask 64512   ;;  %v2908_v10 = vld [vmem:[%s3638_s29 + $0xfc] sm:$0x1]  ;;  %v2909_v6 = vld [vmem:[%s3638_s29 + $0x104] sm:$0x1] }
  0xaa   : > { %v3051_v14 = vunpack.i.h.bf16 %v3049_v56  ;;  %v3050_v36 = vunpack.i.l.bf16 %v3049_v56  ;;  %v3039_v7 = vpop.permute.xlu0 %3038  ;;  %3323 = vrot.lane.b32.xlu1 %v3322_v57, %s3491_s5  ;;  %v2303_v12 = vunpack.c.h.bf16 %v4150_v9  ;;  %v2910_v57 = vld [vmem:[%s3638_s29 + $0x10c] sm:$0x1]  ;;  %v3352_v37 = vpack.i.bf16 %v4171_v35, %v4168_v23 }
  0xab   : > { %v3041_v21 = vunpack.i.h.bf16 %v3039_v7  ;;  %v3040_v38 = vunpack.i.l.bf16 %v3039_v7  ;;  %v4196_v60 = vsel %vm751_vm1, %v2063_v48, %v2064_v52  ;;  %v2068_v13 = vsel %vm751_vm1, %v2066_v32, %v2067_v31 }
  0xac   : > { %3318 = vrot.lane.b32.xlu0 %v3317_v24, %s3491_s5  ;;  %v4191_v1 = vsel %vm1088_vm2, %v611_v44, %v3051_v14  ;;  %v4202_v17 = vsel %vm1088_vm2, %v610_v43, %v3050_v36  ;;  %v2426_v39 = vrot.slane %v2302_v28, 1  ;;  %v2300_v24 = vunpack.c.l.bf16 %v2900_v33 }
  0xad   : > { %v2301_v9 = vunpack.c.h.bf16 %v2900_v33  ;;  %v2429_v22 = vrot.slane %v2303_v12, 1  ;;  %v2310_v55 = vunpack.c.l.bf16 %v2910_v57  ;;  %v2311_v63 = vunpack.c.l.bf16 %v2911_v59 }
  0xae   : > { %3333 = vrot.lane.b32.xlu1 %v3332_v2, %s3492_s6  ;;  %v3054_v44 = vpop.permute.xlu1 %3053  ;;  %v2308_v48 = vunpack.c.l.bf16 %v2908_v10  ;;  %v4209_v56 = vsel %vm1088_vm2, %v607_v51, %v3041_v21  ;;  %v4214_v40 = vsel %vm1088_vm2, %v606_v50, %v3040_v38  ;;  %v3347_v52 = vpack.i.bf16 %v2068_v13, %v4196_v60  ;;  %v4238_v13 = vld [vmem:[%s3638_s29 + $0xdc] sm:$0x1] }
  0xaf   : > { %v3056_v43 = vunpack.i.h.bf16 %v3054_v44  ;;  %v3055_v32 = vunpack.i.l.bf16 %v3054_v44  ;;  %v2427_v14 = vrot.slane %v2310_v55, 1  ;;  %v2430_v36 = vrot.slane %v2311_v63, 1 }
  0xb0   : > { %3328 = vrot.lane.b32.xlu0 %v3327_v49, %s3492_s6  ;;  %v3044_v31 = vpop.permute.xlu0 %3043  ;;  %v2309_v7 = vunpack.c.l.bf16 %v2909_v6  ;;  %v2423_v35 = vrot.slane %v2301_v9, 1  ;;  %v2420_v2 = vrot.slane %v2300_v24, 1  ;;  %v2421_v21 = vrot.slane %v2308_v48, 1 }
  0xb1   : > { %v3046_v23 = vunpack.i.h.bf16 %v3044_v31  ;;  %v3045_v51 = vunpack.i.l.bf16 %v3044_v31  ;;  %v4225_v33 = vsel %vm694_vm0, %v2426_v39, %v2427_v14  ;;  %v4228_v49 = vsel %vm694_vm0, %v2429_v22, %v2430_v36 }
  0xb2   : > { %3343 = vrot.lane.b32.xlu1 %v3342_v25, %s3489_s30  ;;  %v4222_v50 = vpop.permute.xlu1 %3063  ;;  %v2424_v38 = vrot.slane %v2309_v7, 1  ;;  %v1096_v57 = vsel %vm1088_vm2, %v613_v4, %v3056_v43  ;;  %v3362_v10 = vpack.i.bf16 %v2303_v12, %v2302_v28  ;;  %v3357_v60 = vpack.i.bf16 %v2301_v9, %v2300_v24  ;;  %v4235_v25 = vld [vmem:[%s3638_s29 + $0xd4] sm:$0x1]  ;;  %v4252_v24 = vld [vmem:[%s3638_s29 + $0xc0] ss:$8 sps:$4 sm:$0xff]  }
  0xb3   : > { %v3065_v59 = vunpack.i.l.bf16 %v4222_v50  ;;  %v1095_v39 = vsel %vm1088_vm2, %v612_v3, %v3055_v32  ;;  %v1092_v6 = vsel %vm1088_vm2, %v609_v20, %v3046_v23  ;;  %v1091_v4 = vsel %vm1088_vm2, %v608_v19, %v3045_v51  ;;  %v4269_v43 = vld [vmem:[%s3638_s29 + $0xc4] sm:$0x1]  ;;  %v4276_v23 = vld [vmem:[%s3638_s29 + $0xcc] sm:$0x1] }
  0xb4   : > { %3338 = vrot.lane.b32.xlu0 %v3337_v45, %s3493_s7  ;;  %v3059_v28 = vpop.permute.xlu0 %3058  ;;  %v4839_v12 = vunpack.c.l.bf16 %v4219_v47  ;;  %v3066_v54 = vunpack.i.h.bf16 %v4222_v50  ;;  %v3372_v3 = vpack.i.bf16 %v4228_v49, %v4225_v33  ;;  %v2422_v9 = vsel %vm694_vm0, %v2420_v2, %v2421_v21 }
  0xb5   : > { %v2425_v20 = vsel %vm694_vm0, %v2423_v35, %v2424_v38  ;;  %v4260_v5 = vsel %vm1097_vm3, %v1091_v4, %v3065_v59  ;;  %v4840_v19 = vunpack.c.h.bf16 %v4219_v47  ;;  %v1807_v45 = vunpack.c.l.bf16 %v4235_v25 }
  0xb6   : > { %3353 = vrot.lane.b32.xlu1 %v3352_v37, %s3489_s30  ;;  %v1808_v44 = vunpack.c.l.bf16 %v4238_v13  ;;  %v3061_v22 = vunpack.i.h.bf16 %v3059_v28  ;;  %v3060_v55 = vunpack.i.l.bf16 %v3059_v28  ;;  %vm1106_vm4 = vcmask 97280   ;;  %v2849_v13 = vld [vmem:[%s3638_s29 + $0xd0] sm:$0xe] }
  0xb7   : > { %v3074_v63 = vpop.permute.xlu1 %3073  ;;  %v1875_v48 = vrot.slane %v4839_v12, 1  ;;  %v4841_v32 = vunpack.c.l.bf16 %v4252_v24  ;;  %v1876_v36 = vrot.slane %v1807_v45, 1  ;;  %v1878_v7 = vrot.slane %v4840_v19, 1  ;;  %v3458_v19 = vld [vmem:[%s4826_s1 + $0x10] ss:$0 sps:$4 sm:$0x33]  }
  0xb8   : > { %3348 = vrot.lane.b32.xlu0 %v3347_v52, %s3493_s7  ;;  %v3076_v37 = vunpack.i.h.bf16 %v3074_v63  ;;  %v3075_v31 = vunpack.i.l.bf16 %v3074_v63  ;;  %v3069_v14 = vpop.permute.xlu0 %3068  ;;  %v1879_v2 = vrot.slane %v1808_v44, 1  ;;  %v4842_v50 = vunpack.c.h.bf16 %v4252_v24 }
  0xb9   : > { %v3071_v51 = vunpack.i.h.bf16 %v3069_v14  ;;  %v3070_v35 = vunpack.i.l.bf16 %v3069_v14  ;;  %v1877_v49 = vsel %vm694_vm0, %v1875_v48, %v1876_v36  ;;  %v1805_v21 = vunpack.c.l.bf16 %v4269_v43 }
  0xba   : > { %v4280_v33 = vsel %vm1097_vm3, %v1095_v39, %v3075_v31  ;;  %v4283_v52 = vsel %vm1097_vm3, %v1096_v57, %v3076_v37  ;;  %3363 = vrot.lane.b32.xlu1 %v3362_v10, %s3490_s4  ;;  %v1880_v25 = vsel %vm694_vm0, %v1878_v7, %v1879_v2  ;;  %v1806_v57 = vunpack.c.l.bf16 %v4276_v23  ;;  %v2850_v31 = vld [vmem:[%s3638_s29 + $0xd8] sm:$0xe] }
  0xbb   : > { %v4290_v38 = vsel %vm1097_vm3, %v4191_v1, %v3071_v51  ;;  %v4294_v59 = vsel %vm1097_vm3, %v4202_v17, %v3070_v35  ;;  %v3367_v4 = vpack.i.bf16 %v2425_v20, %v2422_v9  ;;  %v1869_v28 = vrot.slane %v4841_v32, 1 }
  0xbc   : > { %3358 = vrot.lane.b32.xlu0 %v3357_v60, %s3490_s4  ;;  %v3084_v10 = vpop.permute.xlu1 %3083  ;;  %v3079_v39 = vpop.permute.xlu0 %3078  ;;  %v1870_v1 = vrot.slane %v1805_v21, 1  ;;  %v1872_v63 = vrot.slane %v4842_v50, 1  ;;  %v4305_v17 = vsel %vm1097_vm3, %v1092_v6, %v3066_v54  ;;  %v3382_v37 = vpack.i.bf16 %v1880_v25, %v1877_v49  ;;  %v2847_v6 = vld [vmem:[%s3638_s29 + $0xc0] sm:$0xe]  ;;  %v2848_v54 = vld [vmem:[%s3638_s29 + $0xc8] sm:$0xe] }
  0xbd   : > { %v3086_v48 = vunpack.i.h.bf16 %v3084_v10  ;;  %v3085_v43 = vunpack.i.l.bf16 %v3084_v10  ;;  %v3080_v60 = vunpack.i.l.bf16 %v3079_v39  ;;  %v1873_v20 = vrot.slane %v1806_v57, 1 }
  0xbe   : > { %3373 = vrot.lane.b32.xlu1 %v3372_v3, %s3491_s5  ;;  %v1871_v9 = vsel %vm694_vm0, %v1869_v28, %v1870_v1  ;;  %v1815_v14 = vunpack.c.l.bf16 %v2849_v13  ;;  %v1098_v36 = vsel %vm1097_vm3, %v4214_v40, %v3060_v55  ;;  %v1099_v7 = vsel %vm1097_vm3, %v4209_v56, %v3061_v22 }
  0xbf   : > { %v3081_v23 = vunpack.i.h.bf16 %v3079_v39  ;;  %vm1115_vm5 = vcmask 130048   ;;  %v1874_v35 = vsel %vm694_vm0, %v1872_v63, %v1873_v20  ;;  %v1816_v3 = vunpack.c.l.bf16 %v2850_v31  ;;  %v2857_v63 = vld [vmem:[%s3638_s29 + $0xd8] ss:$8 sps:$4 sm:$0xff]   ;;  %v2855_v20 = vld [vmem:[%s3638_s29 + $0xc8] ss:$8 sps:$4 sm:$0xff]  }
  0xc0   : > { %3368 = vrot.lane.b32.xlu0 %v3367_v4, %s3491_s5  ;;  %v3094_v51 = vpop.permute.xlu1 %3093  ;;  %v1931_v2 = vrot.slane %v1815_v14, 2  ;;  %v1932_v49 = vrot.slane %v1807_v45, 2  ;;  %v1509_v40 = vsel %vm1088_vm2, %v1221_v41, %v3086_v48  ;;  %v1508_v56 = vsel %vm1088_vm2, %v1220_v26, %v3085_v43 }
  0xc1   : > { %v3377_v22 = vpack.i.bf16 %v1874_v35, %v1871_v9  ;;  %v1935_v55 = vrot.slane %v1808_v44, 2  ;;  %v1107_v25 = vsel %vm1106_vm4, %v1098_v36, %v3080_v60  ;;  %v1934_v10 = vrot.slane %v1816_v3, 2 }
  0xc2   : > { %v3089_v13 = vpop.permute.xlu0 %3088  ;;  %3383 = vrot.lane.b32.xlu1 %v3382_v37, %s3489_s30  ;;  %v1813_v39 = vunpack.c.l.bf16 %v2847_v6  ;;  %v1814_v4 = vunpack.c.l.bf16 %v2848_v54  ;;  %v3096_v45 = vunpack.i.h.bf16 %v3094_v51  ;;  %v3095_v28 = vunpack.i.l.bf16 %v3094_v51 }
  0xc3   : > { %v3091_v1 = vunpack.i.h.bf16 %v3089_v13  ;;  %v1933_v41 = vsel %vm751_vm1, %v1931_v2, %v1932_v49  ;;  %v1936_v26 = vsel %vm751_vm1, %v1934_v10, %v1935_v55  ;;  %v1926_v48 = vrot.slane %v1805_v21, 2 }
  0xc4   : > { %3378 = vrot.lane.b32.xlu0 %v3377_v22, %s3489_s30  ;;  %v3104_v16 = vpop.permute.xlu1 %3103  ;;  %v1925_v44 = vrot.slane %v1813_v39, 2  ;;  %v1928_v43 = vrot.slane %v1814_v4, 2  ;;  %v1108_v37 = vsel %vm1106_vm4, %v1099_v7, %v3081_v23  ;;  %v3090_v31 = vunpack.i.l.bf16 %v3089_v13 }
  0xc5   : > { %v3106_v60 = vunpack.i.h.bf16 %v3104_v16  ;;  %v3105_v9 = vunpack.i.l.bf16 %v3104_v16  ;;  %v3392_v36 = vpack.i.bf16 %v1936_v26, %v1933_v41  ;;  %v1929_v54 = vrot.slane %v1806_v57, 2  ;;  %v4358_v16 = vld [vmem:[%s3638_s29 + $0xd4] sm:$0x1] }
  0xc6   : > { %v3099_v14 = vpop.permute.xlu0 %3098  ;;  %v1927_v6 = vsel %vm751_vm1, %v1925_v44, %v1926_v48  ;;  %v1823_v51 = vunpack.c.l.bf16 %v2857_v63  ;;  %v1516_v35 = vsel %vm1097_vm3, %v1508_v56, %v3095_v28  ;;  %v1517_v3 = vsel %vm1097_vm3, %v1509_v40, %v3096_v45  ;;  %v4348_v28 = vld [vmem:[%s3638_s29 + $0xdc] sm:$0x1] }
  0xc7   : > { %v3101_v2 = vunpack.i.h.bf16 %v3099_v14  ;;  %v3100_v49 = vunpack.i.l.bf16 %v3099_v14  ;;  %v1511_v21 = vsel %vm1088_vm2, %v1223_v62, %v3091_v1  ;;  %3393 = vrot.lane.b32.xlu1 %v3392_v36, %s3490_s4  ;;  %v1930_v7 = vsel %vm751_vm1, %v1928_v43, %v1929_v54  ;;  %v4351_v1 = vld [vmem:[%s3638_s29 + $0xe4] sm:$0x1] }
  0xc8   : > { %v3114_v23 = vpop.permute.xlu1 %3113  ;;  %v1824_v22 = vunpack.c.h.bf16 %v2857_v63  ;;  %v1821_v57 = vunpack.c.l.bf16 %v2855_v20  ;;  %v1510_v56 = vsel %vm1088_vm2, %v1222_v61, %v3090_v31  ;;  %v1116_v40 = vsel %vm1115_vm5, %v1107_v25, %v3105_v9  ;;  %v2863_v63 = vld [vmem:[%s3638_s29 + $0xcc] sm:$0x1] }
  0xc9   : > { %v1117_v55 = vsel %vm1115_vm5, %v1108_v37, %v3106_v60  ;;  %v3387_v13 = vpack.i.bf16 %v1930_v7, %v1927_v6  ;;  %v1109_v62 = vsel %vm1106_vm4, %v4260_v5, %v3100_v49  ;;  %v2019_v4 = vrot.slane %v1823_v51, 1 }
  0xca   : > { %v3109_v10 = vpop.permute.xlu0 %3108  ;;  %v3402_v39 = vpack.i.bf16 %v1824_v22, %v1823_v51  ;;  %v1822_v45 = vunpack.c.h.bf16 %v2855_v20  ;;  %v1110_v46 = vsel %vm1106_vm4, %v4305_v17, %v3101_v2  ;;  %v3116_v61 = vunpack.i.h.bf16 %v3114_v23 }
  0xcb   : > { %3388 = vrot.lane.b32.xlu0 %v3387_v13, %s3490_s4  ;;  %v3115_v25 = vunpack.i.l.bf16 %v3114_v23  ;;  %v2022_v41 = vrot.slane %v1824_v22, 1  ;;  %v3111_v5 = vunpack.i.h.bf16 %v3109_v10  ;;  %v3110_v26 = vunpack.i.l.bf16 %v3109_v10 }
  0xcc   : > { %3403 = vrot.lane.b32.xlu1 %v3402_v39, %s3491_s5  ;;  %v3397_v44 = vpack.i.bf16 %v1822_v45, %v1821_v57  ;;  %v2013_v48 = vrot.slane %v1821_v57, 1  ;;  %v3124_v43 = vpop.permute.xlu1 %3123  ;;  %v2016_v37 = vrot.slane %v1822_v45, 1  ;;  %vm1124_vm6 = vcmask 162816   ;;  %v4386_v39 = vld [vmem:[%s3638_s29 + $0x110] ss:$8 sps:$4 sm:$0xff]  }
  0xcd   : > { %v3126_v31 = vunpack.i.h.bf16 %v3124_v43  ;;  %v3125_v60 = vunpack.i.l.bf16 %v3124_v43  ;;  %v1831_v9 = vunpack.c.l.bf16 %v4348_v28  ;;  %v1832_v20 = vunpack.c.l.bf16 %v4351_v1  ;;  %v2896_v45 = vld [vmem:[%s3638_s29 + $0x114] sm:$0x1] }
  0xce   : > { %v3119_v17 = vpop.permute.xlu0 %3118  ;;  %v1829_v14 = vunpack.c.l.bf16 %v2863_v63  ;;  %v1830_v36 = vunpack.c.l.bf16 %v4358_v16  ;;  %v4365_v6 = vsel %vm1106_vm4, %v1516_v35, %v3115_v25  ;;  %v4368_v54 = vsel %vm1106_vm4, %v1517_v3, %v3116_v61  ;;  %v2897_v61 = vld [vmem:[%s3638_s29 + $0x11c] sm:$0x1] }
  0xcf   : > { %3398 = vrot.lane.b32.xlu0 %v3397_v44, %s3491_s5  ;;  %v3121_v51 = vunpack.i.h.bf16 %v3119_v17  ;;  %v3120_v2 = vunpack.i.l.bf16 %v3119_v17  ;;  %v2020_v49 = vrot.slane %v1831_v9, 1  ;;  %v2023_v7 = vrot.slane %v1832_v20, 1 }
  0xd0   : > { %v2014_v23 = vrot.slane %v1829_v14, 1  ;;  %v2017_v22 = vrot.slane %v1830_v36, 1  ;;  %v4375_v35 = vpop.permute.xlu1 %3133  ;;  %v1518_v57 = vsel %vm1097_vm3, %v1510_v56, %v3110_v26  ;;  %v1519_v3 = vsel %vm1097_vm3, %v1511_v21, %v3111_v5  ;;  %v2871_v21 = vld [vmem:[%s3638_s29 + $0xc8] sm:$0xe]  ;;  %v2872_v5 = vld [vmem:[%s3638_s29 + $0xd0] sm:$0xe] }
  0xd1   : > { %v4380_v13 = vsel %vm1124_vm6, %v1116_v40, %v3125_v60  ;;  %v4383_v10 = vsel %vm1124_vm6, %v1117_v55, %v3126_v31  ;;  %v2021_v25 = vsel %vm694_vm0, %v2019_v4, %v2020_v49  ;;  %v2024_v63 = vsel %vm694_vm0, %v2022_v41, %v2023_v7 }
  0xd2   : > { %v2015_v16 = vsel %vm694_vm0, %v2013_v48, %v2014_v23  ;;  %v2018_v56 = vsel %vm694_vm0, %v2016_v37, %v2017_v22  ;;  %v3129_v26 = vpop.permute.xlu0 %3128  ;;  %v1118_v40 = vsel %vm1115_vm5, %v1109_v62, %v3120_v2  ;;  %v4398_v55 = vsel %vm1115_vm5, %v1110_v46, %v3121_v51 }
  0xd3   : > { %v3412_v44 = vpack.i.bf16 %v2024_v63, %v2021_v25  ;;  %v3407_v43 = vpack.i.bf16 %v2018_v56, %v2015_v16  ;;  %v4835_v31 = vunpack.c.l.bf16 %v4386_v39  ;;  %v4836_v4 = vunpack.c.h.bf16 %v4386_v39 }
  0xd4   : > { %v2296_v60 = vunpack.c.l.bf16 %v2896_v45  ;;  %v2297_v41 = vunpack.c.l.bf16 %v2897_v61  ;;  %v4402_v17 = vpop.permute.xlu1 %3143  ;;  %v3131_v48 = vunpack.i.h.bf16 %v3129_v26  ;;  %v3130_v37 = vunpack.i.l.bf16 %v3129_v26 }
  0xd5   : > { %3413 = vrot.lane.b32.xlu1 %v3412_v44, %s3492_s6  ;;  %3408 = vrot.lane.b32.xlu0 %v3407_v43, %s3492_s6  ;;  %v1837_v62 = vunpack.c.l.bf16 %v2871_v21  ;;  %v1838_v46 = vunpack.c.l.bf16 %v2872_v5  ;;  %v2344_v51 = vrot.slane %v4835_v31, 1  ;;  %v2347_v49 = vrot.slane %v4836_v4, 1  ;;  %v4415_v21 = vld [vmem:[%s3638_s29 + $0x120] ss:$8 sps:$4 sm:$0xff]   ;;  %v2898_v5 = vld [vmem:[%s3638_s29 + $0x124] sm:$0x1] }
  0xd6   : > { %v2345_v2 = vrot.slane %v2296_v60, 1  ;;  %v2348_v7 = vrot.slane %v2297_v41, 1  ;;  %v3139_v23 = vpop.permute.xlu0 %3138  ;;  %v2070_v45 = vrot.slane %v1829_v14, 2  ;;  %v2073_v25 = vrot.slane %v1830_v36, 2  ;;  %v2899_v41 = vld [vmem:[%s3638_s29 + $0x12c] sm:$0x1] }
  0xd7   : > { %v2069_v22 = vrot.slane %v1837_v62, 2  ;;  %v2072_v61 = vrot.slane %v1838_v46, 2  ;;  %v3136_v63 = vunpack.i.h.bf16 %v4375_v35  ;;  %v3135_v16 = vunpack.i.l.bf16 %v4375_v35  ;;  %v2873_v62 = vld [vmem:[%s3638_s29 + $0xd8] sm:$0xe]  ;;  %v3460_v35 = vld [vmem:[%s4826_s1 + $0x8] sm:$0xff]  }
  0xd8   : > { %v2346_v56 = vsel %vm694_vm0, %v2344_v51, %v2345_v2  ;;  %v2349_v26 = vsel %vm694_vm0, %v2347_v49, %v2348_v7  ;;  %v4418_v44 = vpop.permute.xlu1 %3153  ;;  %v1526_v43 = vsel %vm1106_vm4, %v1518_v57, %v3130_v37  ;;  %v1527_v46 = vsel %vm1106_vm4, %v1519_v3, %v3131_v48  ;;  %v2874_v49 = vld [vmem:[%s3638_s29 + $0xe0] sm:$0xe] }
  0xd9   : > { %v3422_v60 = vpack.i.bf16 %v2349_v26, %v2346_v56  ;;  %v2071_v14 = vsel %vm751_vm1, %v2069_v22, %v2070_v45  ;;  %v2074_v36 = vsel %vm751_vm1, %v2072_v61, %v2073_v25  ;;  %v3146_v51 = vunpack.i.h.bf16 %v4402_v17 }
  0xda   : > { %v3417_v31 = vpack.i.bf16 %v2074_v36, %v2071_v14  ;;  %v3140_v2 = vunpack.i.l.bf16 %v3139_v23  ;;  %v3149_v7 = vpop.permute.xlu0 %3148  ;;  %v3141_v4 = vunpack.i.h.bf16 %v3139_v23  ;;  %v4837_v57 = vunpack.c.l.bf16 %v4415_v21  ;;  %v2906_v36 = vld [vmem:[%s3638_s29 + $0x128] ss:$8 sps:$4 sm:$0xff]  }
  0xdb   : > { %3423 = vrot.lane.b32.xlu1 %v3422_v60, %s3489_s30  ;;  %v4838_v37 = vunpack.c.h.bf16 %v4415_v21  ;;  %v2298_v22 = vunpack.c.l.bf16 %v2898_v5  ;;  %v3145_v45 = vunpack.i.l.bf16 %v4402_v17  ;;  %v2299_v48 = vunpack.c.l.bf16 %v2899_v41 }
  0xdc   : > { %3418 = vrot.lane.b32.xlu0 %v3417_v31, %s3493_s7  ;;  %v4434_v3 = vsel %vm1124_vm6, %v1118_v40, %v3140_v2  ;;  %v1839_v61 = vunpack.c.l.bf16 %v2873_v62  ;;  %v4436_v25 = vpop.permute.xlu1 %3163  ;;  %v2350_v23 = vrot.slane %v4837_v57, 1  ;;  %v1840_v5 = vunpack.c.l.bf16 %v2874_v49  ;;  %v2904_v57 = vld [vmem:[%s3638_s29 + $0x118] ss:$8 sps:$4 sm:$0xff]  }
  0xdd   : > { %v2351_v56 = vrot.slane %v2298_v22, 1  ;;  %v2353_v26 = vrot.slane %v4838_v37, 1  ;;  %vm1133_vm7 = vcmask 195584   ;;  %v2354_v31 = vrot.slane %v2299_v48, 1 }
  0xde   : > { %v2075_v60 = vrot.slane %v1839_v61, 2  ;;  %v2076_v40 = vrot.slane %v1831_v9, 2  ;;  %v2079_v14 = vrot.slane %v1832_v20, 2  ;;  %v4447_v41 = vpop.permute.xlu0 %3158  ;;  %v1128_v62 = vsel %vm1124_vm6, %v4398_v55, %v3141_v4 }
  0xdf   : > { %v2352_v2 = vsel %vm694_vm0, %v2350_v23, %v2351_v56  ;;  %v2078_v22 = vrot.slane %v1840_v5, 2  ;;  %v3156_v49 = vunpack.i.h.bf16 %v4418_v44  ;;  %v2355_v48 = vsel %vm694_vm0, %v2353_v26, %v2354_v31 }
  0xe0   : > { %v2077_v28 = vsel %vm751_vm1, %v2075_v60, %v2076_v40  ;;  %v3151_v9 = vunpack.i.h.bf16 %v3149_v7  ;;  %v3150_v61 = vunpack.i.l.bf16 %v3149_v7  ;;  %v4456_v1 = vpop.permute.xlu1 %3173  ;;  %v3432_v20 = vpack.i.bf16 %v2355_v48, %v2352_v2  ;;  %v3457_v7 = vld [vmem:[%s4826_s1 + $0x1c] ss:$0 sps:$4 sm:$0xff]  }
  0xe1   : > { %v2080_v37 = vsel %vm751_vm1, %v2078_v22, %v2079_v14  ;;  %v2306_v55 = vunpack.c.l.bf16 %v2906_v36  ;;  %v2307_v4 = vunpack.c.h.bf16 %v2906_v36  ;;  %v3155_v56 = vunpack.i.l.bf16 %v4418_v44  ;;  %v2914_v14 = vld [vmem:[%s3638_s29 + $0x12c] sm:$0x1] }
  0xe2   : > { %v3427_v23 = vpack.i.bf16 %v2080_v37, %v2077_v28  ;;  %v4461_v5 = vsel %vm1115_vm5, %v1526_v43, %v3150_v61  ;;  %v2304_v26 = vunpack.c.l.bf16 %v2904_v57  ;;  %v4466_v31 = vpop.permute.xlu0 %3168  ;;  %3433 = vrot.lane.b32.xlu1 %v3432_v20, %s3489_s30  ;;  %v4470_v60 = vsel %vm1115_vm5, %v1527_v46, %v3151_v9  ;;  %v2915_v43 = vld [vmem:[%s3638_s29 + $0x134] sm:$0x1]  ;;  %v2912_v28 = vld [vmem:[%s3638_s29 + $0x11c] sm:$0x1] }
  0xe3   : > { %v2441_v40 = vrot.slane %v2307_v4, 1  ;;  %v3442_v37 = vpack.i.bf16 %v2307_v4, %v2306_v55  ;;  %v2305_v44 = vunpack.c.h.bf16 %v2904_v57  ;;  %v2438_v36 = vrot.slane %v2306_v55, 1  ;;  %v2913_v4 = vld [vmem:[%s3638_s29 + $0x124] sm:$0x1] }
  0xe4   : > { %3428 = vrot.lane.b32.xlu0 %v3427_v23, %s3493_s7  ;;  %v2432_v2 = vrot.slane %v2304_v26, 1  ;;  %v3166_v22 = vunpack.i.h.bf16 %v4436_v25  ;;  %v3161_v48 = vunpack.i.h.bf16 %v4447_v41  ;;  %v4478_v61 = vpop.permute.xlu1 %3183  ;;  %v3165_v9 = vunpack.i.l.bf16 %v4436_v25  ;;  %v3463_v25 = vld [vmem:[%s4826_s1 + $0x28] sm:$0xff]   ;;  %s2926_s7 = sshll.u32 %s4861_s15, 5 }
  0xe5   : > { %v2435_v20 = vrot.slane %v2305_v44, 1  ;;  %v3437_v46 = vpack.i.bf16 %v2305_v44, %v2304_v26  ;;  %vm1577_vm8 = vcmask 1043456   ;;  %v3160_v57 = vunpack.i.l.bf16 %v4447_v41  ;;  %s4789_s9 = scalar_lea.vmem %s4828_s3, %s2926_s7 }
  0xe6   : > { %2999 = vmatprep.subr.msk.bf16.mxu0 %vm1577_vm8, %v3457_v7  ;;  %v2314_v23 = vunpack.c.l.bf16 %v2914_v14  ;;  %v2315_v55 = vunpack.c.l.bf16 %v2915_v43  ;;  %v1532_v12 = vsel %vm1115_vm5, %v4365_v6, %v3135_v16  ;;  %v4491_v26 = vpop.permute.xlu0 %3178  ;;  %3443 = vrot.lane.b32.xlu1 %v3442_v37, %s3490_s4  ;;  %v1137_v44 = vsel %vm1133_vm7, %v1128_v62, %v3161_v48  ;;  %v3459_v37 = vld [vmem:[%s4826_s1 + $0x14] sm:$0xff]  }
  0xe7   : > { %v1533_v41 = vsel %vm1115_vm5, %v4368_v54, %v3136_v63  ;;  %v1540_v14 = vsel %vm1124_vm6, %v1532_v12, %v3155_v56  ;;  %v2312_v43 = vunpack.c.l.bf16 %v2912_v28  ;;  %v2313_v50 = vunpack.c.l.bf16 %v2913_v4 }
  0xe8   : > { %3438 = vrot.lane.b32.xlu0 %v3437_v46, %s3490_s4  ;;  %v2439_v6 = vrot.slane %v2314_v23, 1  ;;  %v2442_v16 = vrot.slane %v2315_v55, 1  ;;  %v1541_v32 = vsel %vm1124_vm6, %v1533_v41, %v3156_v49  ;;  %v4508_v62 = vpop.permute.xlu1 %3193  ;;  %v1579_v63 = vsel %vm1577_vm8, %v3457_v7, 0 }
  0xe9   : > { %v1548_v54 = vpack.c.bf16 %v1541_v32, %v1540_v14  ;;  %v2433_v12 = vrot.slane %v2312_v43, 1  ;;  %vm1674_vm9 = vcmask 1041408   ;;  %v2436_v48 = vrot.slane %v2313_v50, 1  ;;  %2952 = vmatpush3.bf16.msra.mxu0 %v1579_v63 }
  0xea   : > { %v2440_v56 = vsel %vm694_vm0, %v2438_v36, %v2439_v6  ;;  %v2443_v49 = vsel %vm694_vm0, %v2441_v40, %v2442_v16  ;;  %3000 = vmatprep.subr.msk.bf16.mxu1 %vm1674_vm9, %v3458_v19  ;;  %v1676_v28 = vsel %vm1674_vm9, %v3458_v19, 0  ;;  %v4513_v46 = vpop.permute.xlu0 %3188  ;;  %v1136_v4 = vsel %vm1133_vm7, %v4434_v3, %v3160_v57  ;;  %2953 = vmatprep.subr.bf16.mxu0 %v3459_v37  ;;  %v3461_v3 = vld [vmem:[%s4826_s1] sm:$0xff]  }
  0xeb   : > { %v3452_v23 = vpack.i.bf16 %v2443_v49, %v2440_v56  ;;  %2955 = vmatprep.mubr.msk.bf16.mxu0 %vm1133_vm7, %v1548_v54  ;;  %v2434_v32 = vsel %vm694_vm0, %v2432_v2, %v2433_v12  ;;  %2964 = vmatpush3.bf16.msra.mxu1 %v1676_v28  ;;  %v3176_v7 = vunpack.i.h.bf16 %v4456_v1  ;;  %v2437_v36 = vsel %vm694_vm0, %v2435_v20, %v2436_v48  ;;  %v3462_v2 = vld [vmem:[%s4826_s1 + $0x30] ss:$0 sps:$4 sm:$0xff]  }
  0xec   : > { %v3175_v50 = vunpack.i.l.bf16 %v4456_v1  ;;  %v3171_v40 = vunpack.i.h.bf16 %v4466_v31  ;;  %v3170_v19 = vunpack.i.l.bf16 %v4466_v31  ;;  %2965 = vmatprep.subr.bf16.mxu1 %v3460_v35  ;;  %v4527_v57 = vpop.permute.xlu1 %3203  ;;  %v3447_v20 = vpack.i.bf16 %v2437_v36, %v2434_v32 }
  0xed   : > { %3453 = vrot.lane.b32.xlu1 %v3452_v23, %s3491_s5  ;;  %vm1142_vm10 = vcmask 228352   ;;  %vm1151_vm11 = vcmask 261120   ;;  %v3186_v1 = vunpack.i.h.bf16 %v4478_v61  ;;  %2954 = vmatpush3.bf16.msra.mxu0 %v3459_v37  ;;  %v3185_v14 = vunpack.i.l.bf16 %v4478_v61 }
  0xee   : > { %v1146_v31 = vsel %vm1142_vm10, %v1137_v44, %v3176_v7  ;;  %v1542_v55 = vsel %vm1124_vm6, %v4461_v5, %v3170_v19  ;;  %v1543_v41 = vsel %vm1124_vm6, %v4470_v60, %v3171_v40  ;;  %v4540_v43 = vpop.permute.xlu0 %3198  ;;  %3448 = vrot.lane.b32.xlu0 %v3447_v20, %s3491_s5  ;;  %v1145_v6 = vsel %vm1142_vm10, %v1136_v4, %v3175_v50 }
  0xef   : > { %v1549_v16 = vpack.c.bf16 %v1543_v41, %v1542_v55  ;;  %2966 = vmatpush3.bf16.msra.mxu1 %v3460_v35  ;;  %v3181_v54 = vunpack.i.h.bf16 %v4491_v26  ;;  %v3180_v44 = vunpack.i.l.bf16 %v4491_v26  ;;  %v1134_v5 = vsel %vm1133_vm7, %v4380_v13, %v3145_v45  ;;  %3001 = vmatprep.subr.msk.bf16.mxu0 %vm1577_vm8, %v3462_v2  ;;  %v3464_v35 = vld [vmem:[%s4826_s1 + $0x3c] sm:$0xff]  }
  0xf0   : > { %v1154_v60 = vsel %vm1151_vm11, %v1145_v6, %v3185_v14  ;;  %v1155_v61 = vsel %vm1151_vm11, %v1146_v31, %v3186_v1  ;;  %2967 = vmatprep.subr.bf16.mxu1 %v3461_v3  ;;  %v3214_v37 = vpop.permute.xlu1 %3213  ;;  %v1135_v26 = vsel %vm1133_vm7, %v4383_v10, %v3146_v51  ;;  %v1143_v13 = vsel %vm1142_vm10, %v1134_v5, %v3165_v9 }
  0xf1   : > { %2956 = vmatmul.mubr.msk.bf16.vlgmr.msra.gmra.mxu0 %vm1133_vm7, %v1549_v16  ;;  %v1144_v45 = vsel %vm1142_vm10, %v1135_v26, %v3166_v22  ;;  %v1152_v12 = vsel %vm1151_vm11, %v1143_v13, %v3180_v44  ;;  %v1161_v56 = vpack.c.bf16 %v1155_v61, %v1154_v60  ;;  %vm1661_vm12 = vcmask 293888  }
  0xf2   : > { %v4568_v63 = vpop.permute.xlu0 %3208  ;;  %v1153_v17 = vsel %vm1151_vm11, %v1144_v45, %v3181_v54  ;;  %v2175_v9 = vsel %vm1577_vm8, %v3462_v2, 0  ;;  %v3196_v4 = vunpack.i.h.bf16 %v4508_v62  ;;  %v3195_v23 = vunpack.i.l.bf16 %v4508_v62 }
  0xf3   : > { %2968 = vmatpush3.bf16.msra.mxu1 %v3461_v3  ;;  %v1160_v10 = vpack.c.bf16 %v1153_v17, %v1152_v12  ;;  %2978 = vmatpush3.bf16.msra.mxu0 %v2175_v9  ;;  %v3191_v32 = vunpack.i.h.bf16 %v4513_v46  ;;  %v3190_v7 = vunpack.i.l.bf16 %v4513_v46  ;;  %v3206_v50 = vunpack.i.h.bf16 %v4527_v57 }
  0xf4   : > { %v3224_v51 = vpop.permute.xlu1 %3223  ;;  %2989 = vmatprep.subr.bf16.mxu1 %v3464_v35  ;;  %2979 = vmatprep.subr.bf16.mxu0 %v3463_v25  ;;  %v3205_v40 = vunpack.i.l.bf16 %v4527_v57  ;;  %v3201_v19 = vunpack.i.h.bf16 %v4540_v43  ;;  %v3200_v3 = vunpack.i.l.bf16 %v4540_v43  ;;  %v3216_v2 = vunpack.i.h.bf16 %v3214_v37 }
  0xf5   : > { %2969 = vmatprep.mubr.msk.bf16.mxu1 %vm1661_vm12, %v1160_v10  ;;  %v3215_v20 = vunpack.i.l.bf16 %v3214_v37  ;;  %v1111_v62 = vsel %vm1106_vm4, %v4294_v59, %v3195_v23  ;;  %v1112_v46 = vsel %vm1106_vm4, %v4290_v38, %v3196_v4  ;;  %v3226_v31 = vunpack.i.h.bf16 %v3224_v51 }
  0xf6   : > { %v4572_v49 = vpop.permute.xlu0 %3218  ;;  %2970 = vmatmul.mubr.msk.bf16.vlgmr.msra.gmra.mxu1 %vm1661_vm12, %v1161_v56  ;;  %v3225_v55 = vunpack.i.l.bf16 %v3224_v51  ;;  %v1513_v57 = vsel %vm1088_vm2, %v1225_v29, %v3191_v32  ;;  %v4843_v41 = vunpack.c.l.bf16 %v3853_v15  ;;  %v4844_v44 = vunpack.c.h.bf16 %v3870_v42 }
  0xf7   : > { %2990 = vmatpush3.bf16.msra.mxu1 %v3464_v35  ;;  %2980 = vmatpush3.bf16.msra.mxu0 %v3463_v25  ;;  %v1521_v59 = vsel %vm1097_vm3, %v1513_v57, %v3206_v50  ;;  %v3211_v5 = vunpack.i.h.bf16 %v4568_v63  ;;  %v4845_v60 = vunpack.c.l.bf16 %v3870_v42  ;;  %v1120_v15 = vsel %vm1115_vm5, %v1111_v62, %v3215_v20 }
  0xf8   : > { %v4578_v22 = vpop.permute.xlu1 %3233  ;;  %v1512_v14 = vsel %vm1088_vm2, %v4843_v41, %v3190_v7  ;;  %v1515_v38 = vsel %vm1088_vm2, %v4844_v44, %v3201_v19  ;;  %v1121_v61 = vsel %vm1115_vm5, %v1112_v46, %v3216_v2  ;;  %v3210_v37 = vunpack.i.l.bf16 %v4568_v63 }
  0xf9   : > { %v1520_v54 = vsel %vm1097_vm3, %v1512_v14, %v3205_v40  ;;  %v1514_v29 = vsel %vm1088_vm2, %v4845_v60, %v3200_v3  ;;  %v1529_v13 = vsel %vm1106_vm4, %v1521_v59, %v3226_v31  ;;  %v3221_v56 = vunpack.i.h.bf16 %v4572_v49 }
  0xfa   : > { %v4581_v48 = vpop.permute.xlu0 %3228  ;;  %v1528_v26 = vsel %vm1106_vm4, %v1520_v54, %v3225_v55  ;;  %v3220_v17 = vunpack.i.l.bf16 %v4572_v49  ;;  %v3236_v25 = vunpack.i.h.bf16 %v4578_v22  ;;  %v3235_v63 = vunpack.i.l.bf16 %v4578_v22 }
  0xfb   : > { %v1114_v4 = vsel %vm1106_vm4, %v4283_v52, %v3211_v5  ;;  %v3231_v23 = vunpack.i.h.bf16 %v4581_v48  ;;  %v3230_v49 = vunpack.i.l.bf16 %v4581_v48  ;;  %v1113_v50 = vsel %vm1106_vm4, %v4280_v33, %v3210_v37 }
  0xfc   : > { %v3244_v28 = vpop.permute.xlu1 %3243  ;;  %v1522_v3 = vsel %vm1097_vm3, %v1514_v29, %v3220_v17  ;;  %v1523_v2 = vsel %vm1097_vm3, %v1515_v38, %v3221_v56  ;;  %v1129_v48 = vsel %vm1124_vm6, %v1120_v15, %v3235_v63  ;;  %v1130_v46 = vsel %vm1124_vm6, %v1121_v61, %v3236_v25 }
  0xfd   : > { %v3246_v43 = vunpack.i.h.bf16 %v3244_v28  ;;  %v3245_v6 = vunpack.i.l.bf16 %v3244_v28  ;;  %v1122_v55 = vsel %vm1115_vm5, %v1113_v50, %v3230_v49  ;;  %vm2637_vm14 = vcmask 125952  }
  0xfe   : > { %v4587_v36 = vpop.permute.xlu0 %3238 }
  0xff   : > { %v1536_v42 = vsel %vm1115_vm5, %v1528_v26, %v3245_v6  ;;  %v1537_v10 = vsel %vm1115_vm5, %v1529_v13, %v3246_v43  ;;  %v3241_v40 = vunpack.i.h.bf16 %v4587_v36  ;;  %v3240_v22 = vunpack.i.l.bf16 %v4587_v36 }
 0x100   : > { %v4593_v1 = vpop.permute.xlu1 %3253  ;;  %v1123_v36 = vsel %vm1115_vm5, %v1114_v4, %v3231_v23 }
 0x101   : > { %v3255_v19 = vunpack.i.l.bf16 %v4593_v1  ;;  %v1530_v43 = vsel %vm1106_vm4, %v1522_v3, %v3240_v22  ;;  %v1531_v6 = vsel %vm1106_vm4, %v1523_v2, %v3241_v40 }
 0x102   : > { %v3249_v16 = vpop.permute.xlu0 %3248 }
 0x103   : > { %v3251_v52 = vunpack.i.h.bf16 %v3249_v16  ;;  %v3250_v20 = vunpack.i.l.bf16 %v3249_v16  ;;  %v3256_v16 = vunpack.i.h.bf16 %v4593_v1  ;;  %v1138_v54 = vsel %vm1133_vm7, %v1129_v48, %v3255_v19 }
 0x104   : > { %v3264_v35 = vpop.permute.xlu1 %3263 }
 0x105   : > { %v3266_v45 = vunpack.i.h.bf16 %v3264_v35  ;;  %v3265_v12 = vunpack.i.l.bf16 %v3264_v35  ;;  %v1131_v59 = vsel %vm1124_vm6, %v1122_v55, %v3250_v20  ;;  %v1132_v44 = vsel %vm1124_vm6, %v1123_v36, %v3251_v52 }
 0x106   : > { %v3259_v51 = vpop.permute.xlu0 %3258 }
 0x107   : > { %v1544_v9 = vsel %vm1124_vm6, %v1536_v42, %v3265_v12  ;;  %v1545_v28 = vsel %vm1124_vm6, %v1537_v10, %v3266_v45  ;;  %v3261_v33 = vunpack.i.h.bf16 %v3259_v51  ;;  %v3260_v31 = vunpack.i.l.bf16 %v3259_v51 }
 0x108   : > { %v1550_v32 = vpack.c.bf16 %v1545_v28, %v1544_v9  ;;  %v3274_v7 = vpop.permute.xlu1 %3273  ;;  %v1139_v10 = vsel %vm1133_vm7, %v1130_v46, %v3256_v16 }
 0x109   : > { %v1538_v29 = vsel %vm1115_vm5, %v1530_v43, %v3260_v31  ;;  %v1539_v15 = vsel %vm1115_vm5, %v1531_v6, %v3261_v33  ;;  %v3276_v35 = vunpack.i.h.bf16 %v3274_v7  ;;  %v3275_v26 = vunpack.i.l.bf16 %v3274_v7 }
 0x10a   : > { %v3269_v62 = vpop.permute.xlu0 %3268  ;;  %2959 = vmatprep.mubr.msk.bf16.mxu0 %vm1133_vm7, %v1550_v32 }
 0x10b   : > { %v3271_v57 = vunpack.i.h.bf16 %v3269_v62  ;;  %v3270_v41 = vunpack.i.l.bf16 %v3269_v62  ;;  %v1147_v32 = vsel %vm1142_vm10, %v1138_v54, %v3275_v26  ;;  %v1148_v7 = vsel %vm1142_vm10, %v1139_v10, %v3276_v35 }
 0x10c   : > { %v3284_v14 = vpop.permute.xlu1 %3283  ;;  %v4847_v10 = vunpack.c.l.bf16 %v4010_v53 }
 0x10d   : > { %v3286_v38 = vunpack.i.h.bf16 %v3284_v14  ;;  %v3285_v5 = vunpack.i.l.bf16 %v3284_v14  ;;  %v1140_v13 = vsel %vm1133_vm7, %v1131_v59, %v3270_v41  ;;  %v1141_v1 = vsel %vm1133_vm7, %v1132_v44, %v3271_v57 }
 0x10e   : > { %v3279_v60 = vpop.permute.xlu0 %3278 }
 0x10f   : > { %v3281_v61 = vunpack.i.h.bf16 %v3279_v60  ;;  %v3280_v37 = vunpack.i.l.bf16 %v3279_v60  ;;  %v1149_v51 = vsel %vm1142_vm10, %v1140_v13, %v3285_v5  ;;  %v1150_v25 = vsel %vm1142_vm10, %v1141_v1, %v3286_v38 }
 0x110   : > { %v3294_v45 = vpop.permute.xlu1 %3293 }
 0x111   : > { %v1546_v12 = vsel %vm1124_vm6, %v1538_v29, %v3280_v37  ;;  %v1547_v56 = vsel %vm1124_vm6, %v1539_v15, %v3281_v61  ;;  %v3296_v17 = vunpack.i.h.bf16 %v3294_v45  ;;  %v3295_v42 = vunpack.i.l.bf16 %v3294_v45 }
 0x112   : > { %v1551_v63 = vpack.c.bf16 %v1547_v56, %v1546_v12  ;;  %v3289_v9 = vpop.permute.xlu0 %3288 }
 0x113   : > { %v1158_v28 = vsel %vm1151_vm11, %v1149_v51, %v3295_v42  ;;  %v1159_v4 = vsel %vm1151_vm11, %v1150_v25, %v3296_v17  ;;  %v3291_v23 = vunpack.i.h.bf16 %v3289_v9  ;;  %v3290_v49 = vunpack.i.l.bf16 %v3289_v9 }
 0x114   : > { %v1163_v50 = vpack.c.bf16 %v1159_v4, %v1158_v28  ;;  %2960 = vmatmul.mubr.msk.bf16.gmra.mxu0 %vm1133_vm7, %v1551_v63  ;;  %v3304_v40 = vpop.permute.xlu1 %3303  ;;  %v4846_v17 = vunpack.c.h.bf16 %v4010_v53 }
 0x115   : > { %v1156_v22 = vsel %vm1151_vm11, %v1147_v32, %v3290_v49  ;;  %v1157_v19 = vsel %vm1151_vm11, %v1148_v7, %v3291_v23  ;;  %v3306_v43 = vunpack.i.h.bf16 %v3304_v40  ;;  %v3305_v6 = vunpack.i.l.bf16 %v3304_v40 }
 0x116   : > { %v1162_v3 = vpack.c.bf16 %v1157_v19, %v1156_v22  ;;  %v3299_v2 = vpop.permute.xlu0 %3298 }
 0x117   : > { %v3301_v33 = vunpack.i.h.bf16 %v3299_v2  ;;  %v3300_v31 = vunpack.i.l.bf16 %v3299_v2  ;;  %v2108_v42 = vsel %vm1088_vm2, %v4846_v17, %v3306_v43  ;;  %v2107_v51 = vsel %vm1088_vm2, %v4847_v10, %v3305_v6 }
 0x118   : > { %2973 = vmatprep.mubr.msk.bf16.mxu1 %vm1661_vm12, %v1162_v3  ;;  %v3314_v52 = vpop.permute.xlu1 %3313 }
 0x119   : > { %2974 = vmatmul.mubr.msk.bf16.gmra.mxu1 %vm1661_vm12, %v1163_v50  ;;  %v2106_v44 = vsel %vm1088_vm2, %v1794_v18, %v3301_v33  ;;  %v2105_v38 = vsel %vm1088_vm2, %v1793_v0, %v3300_v31  ;;  %v3316_v5 = vunpack.i.h.bf16 %v3314_v52  ;;  %v3315_v60 = vunpack.i.l.bf16 %v3314_v52 }
 0x11a   : > { %v3309_v20 = vpop.permute.xlu0 %3308 }
 0x11b   : > { %v3311_v55 = vunpack.i.h.bf16 %v3309_v20  ;;  %v3310_v36 = vunpack.i.l.bf16 %v3309_v20  ;;  %v2115_v9 = vsel %vm1097_vm3, %v2107_v51, %v3315_v60  ;;  %v2116_v28 = vsel %vm1097_vm3, %v2108_v42, %v3316_v5 }
 0x11c   : > { %v3324_v62 = vpop.permute.xlu1 %3323 }
 0x11d   : > { %v2113_v29 = vsel %vm1097_vm3, %v2105_v38, %v3310_v36  ;;  %v2114_v15 = vsel %vm1097_vm3, %v2106_v44, %v3311_v55  ;;  %v3326_v61 = vunpack.i.h.bf16 %v3324_v62  ;;  %v3325_v37 = vunpack.i.l.bf16 %v3324_v62 }
 0x11e   : > { %v3319_v48 = vpop.permute.xlu0 %3318 }
 0x11f   : > { %v3321_v41 = vunpack.i.h.bf16 %v3319_v48  ;;  %v3320_v14 = vunpack.i.l.bf16 %v3319_v48  ;;  %v2123_v49 = vsel %vm1106_vm4, %v2115_v9, %v3325_v37  ;;  %v2124_v32 = vsel %vm1106_vm4, %v2116_v28, %v3326_v61 }
 0x120   : > { %v3334_v46 = vpop.permute.xlu1 %3333  ;;  %v4849_v9 = vunpack.c.h.bf16 %v4252_v24 }
 0x121   : > { %v2121_v26 = vsel %vm1106_vm4, %v2113_v29, %v3320_v14  ;;  %v2122_v13 = vsel %vm1106_vm4, %v2114_v15, %v3321_v41  ;;  %v3336_v18 = vunpack.i.h.bf16 %v3334_v46  ;;  %v3335_v12 = vunpack.i.l.bf16 %v3334_v46 }
 0x122   : > { %v3329_v57 = vpop.permute.xlu0 %3328 }
 0x123   : > { %v3331_v16 = vunpack.i.h.bf16 %v3329_v57  ;;  %v3330_v54 = vunpack.i.l.bf16 %v3329_v57  ;;  %v2131_v53 = vsel %vm1115_vm5, %v2123_v49, %v3335_v12  ;;  %v2132_v40 = vsel %vm1115_vm5, %v2124_v32, %v3336_v18 }
 0x124   : > { %v3344_v59 = vpop.permute.xlu1 %3343 }
 0x125   : > { %v2129_v58 = vsel %vm1115_vm5, %v2121_v26, %v3330_v54  ;;  %v2130_v0 = vsel %vm1115_vm5, %v2122_v13, %v3331_v16  ;;  %v3346_v22 = vunpack.i.h.bf16 %v3344_v59  ;;  %v3345_v62 = vunpack.i.l.bf16 %v3344_v59 }
 0x126   : > { %v3339_v35 = vpop.permute.xlu0 %3338  ;;  %v4848_v54 = vunpack.c.l.bf16 %v4092_v8 }
 0x127   : > { %v3341_v1 = vunpack.i.h.bf16 %v3339_v35  ;;  %v3340_v45 = vunpack.i.l.bf16 %v3339_v35  ;;  %v2469_v16 = vsel %vm1088_vm2, %v2285_v11, %v3346_v22 }
 0x128   : > { %v3354_v56 = vpop.permute.xlu1 %3353  ;;  %v2468_v59 = vsel %vm1088_vm2, %v4848_v54, %v3345_v62 }
 0x129   : > { %v2137_v25 = vsel %vm1124_vm6, %v2129_v58, %v3340_v45  ;;  %v2138_v63 = vsel %vm1124_vm6, %v2130_v0, %v3341_v1  ;;  %v3356_v3 = vunpack.i.h.bf16 %v3354_v56  ;;  %v3355_v2 = vunpack.i.l.bf16 %v3354_v56 }
 0x12a   : > { %v2145_v4 = vpack.c.bf16 %v2138_v63, %v2137_v25  ;;  %v3349_v23 = vpop.permute.xlu0 %3348 }
 0x12b   : > { %v3351_v7 = vunpack.i.h.bf16 %v3349_v23  ;;  %v3350_v50 = vunpack.i.l.bf16 %v3349_v23  ;;  %v2471_v41 = vsel %vm1088_vm2, %v2287_v27, %v3356_v3  ;;  %v2470_v14 = vsel %vm1088_vm2, %v2286_v34, %v3355_v2 }
 0x12c   : > { %2981 = vmatprep.mubr.msk.bf16.mxu0 %vm1133_vm7, %v2145_v4  ;;  %v3364_v19 = vpop.permute.xlu1 %3363  ;;  %v4850_v4 = vunpack.c.l.bf16 %v4252_v24 }
 0x12d   : > { %v2140_v52 = vsel %vm1124_vm6, %v2132_v40, %v3351_v7  ;;  %v2139_v20 = vsel %vm1124_vm6, %v2131_v53, %v3350_v50  ;;  %v3366_v46 = vunpack.i.h.bf16 %v3364_v19  ;;  %v3365_v33 = vunpack.i.l.bf16 %v3364_v19 }
 0x12e   : > { %v2146_v48 = vpack.c.bf16 %v2140_v52, %v2139_v20  ;;  %v3359_v31 = vpop.permute.xlu0 %3358 }
 0x12f   : > { %v3361_v55 = vunpack.i.h.bf16 %v3359_v31  ;;  %v3360_v36 = vunpack.i.l.bf16 %v3359_v31  ;;  %v2478_v44 = vsel %vm1097_vm3, %v2470_v14, %v3365_v33  ;;  %v2479_v38 = vsel %vm1097_vm3, %v2471_v41, %v3366_v46 }
 0x130   : > { %2982 = vmatmul.mubr.msk.bf16.vlgmr.msra.gmra.mxu0 %vm1133_vm7, %v2146_v48  ;;  %v3374_v57 = vpop.permute.xlu1 %3373  ;;  %v4851_v41 = vunpack.c.h.bf16 %v4219_v47 }
 0x131   : > { %v3376_v43 = vunpack.i.h.bf16 %v3374_v57  ;;  %v3375_v6 = vunpack.i.l.bf16 %v3374_v57  ;;  %v2477_v29 = vsel %vm1097_vm3, %v2469_v16, %v3361_v55  ;;  %v2476_v15 = vsel %vm1097_vm3, %v2468_v59, %v3360_v36 }
 0x132   : > { %v3369_v5 = vpop.permute.xlu0 %3368 }
 0x133   : > { %v2486_v27 = vsel %vm1106_vm4, %v2478_v44, %v3375_v6  ;;  %v2487_v30 = vsel %vm1106_vm4, %v2479_v38, %v3376_v43  ;;  %v3371_v34 = vunpack.i.h.bf16 %v3369_v5  ;;  %v3370_v60 = vunpack.i.l.bf16 %v3369_v5 }
 0x134   : > { %v2493_v11 = vpack.c.bf16 %v2487_v30, %v2486_v27  ;;  %v3384_v35 = vpop.permute.xlu1 %3383  ;;  %v4852_v43 = vunpack.c.l.bf16 %v4219_v47 }
 0x135   : > { %v2484_v8 = vsel %vm1106_vm4, %v2476_v15, %v3370_v60  ;;  %v2485_v61 = vsel %vm1106_vm4, %v2477_v29, %v3371_v34  ;;  %v3386_v52 = vunpack.i.h.bf16 %v3384_v35  ;;  %v3385_v24 = vunpack.i.l.bf16 %v3384_v35 }
 0x136   : > { %v2492_v37 = vpack.c.bf16 %v2485_v61, %v2484_v8  ;;  %v3379_v26 = vpop.permute.xlu0 %3378 }
 0x137   : > { %v3381_v58 = vunpack.i.h.bf16 %v3379_v26  ;;  %v3380_v0 = vunpack.i.l.bf16 %v3379_v26  ;;  %v2112_v14 = vsel %vm1088_vm2, %v4851_v41, %v3386_v52  ;;  %v2111_v6 = vsel %vm1088_vm2, %v4852_v43, %v3385_v24 }
 0x138   : > { %2991 = vmatprep.mubr.msk.bf16.mxu1 %vm1115_vm5, %v2492_v37 }
 0x139   : > { %2992 = vmatmul.mubr.msk.bf16.vlgmr.msra.gmra.mxu1 %vm1115_vm5, %v2493_v11  ;;  %v3394_v13 = vpop.permute.xlu1 %3393  ;;  %v2110_v28 = vsel %vm1088_vm2, %v4849_v9, %v3381_v58  ;;  %v2109_v23 = vsel %vm1088_vm2, %v4850_v4, %v3380_v0  ;;  %v4853_v58 = vunpack.c.h.bf16 %v4415_v21 }
 0x13a   : > { %v3396_v48 = vunpack.i.h.bf16 %v3394_v13  ;;  %v3395_v46 = vunpack.i.l.bf16 %v3394_v13 }
 0x13c   : > { %v2119_v54 = vsel %vm1097_vm3, %v2111_v6, %v3395_v46  ;;  %v2120_v59 = vsel %vm1097_vm3, %v2112_v14, %v3396_v48 }
 0x13d   : > { %v3389_v1 = vpop.permute.xlu0 %3388 }
 0x13e   : > { %v3404_v18 = vpop.permute.xlu1 %3403  ;;  %v3391_v17 = vunpack.i.h.bf16 %v3389_v1  ;;  %v3390_v42 = vunpack.i.l.bf16 %v3389_v1 }
 0x13f   : > { %v3406_v31 = vunpack.i.h.bf16 %v3404_v18  ;;  %v3405_v55 = vunpack.i.l.bf16 %v3404_v18 }
 0x140   : > { %v2117_v49 = vsel %vm1097_vm3, %v2109_v23, %v3390_v42  ;;  %v2118_v32 = vsel %vm1097_vm3, %v2110_v28, %v3391_v17 }
 0x141   : > { %v3399_v45 = vpop.permute.xlu0 %3398  ;;  %v2127_v38 = vsel %vm1106_vm4, %v2119_v54, %v3405_v55  ;;  %v2128_v5 = vsel %vm1106_vm4, %v2120_v59, %v3406_v31 }
 0x142   : > { %v3401_v10 = vunpack.i.h.bf16 %v3399_v45  ;;  %v3400_v51 = vunpack.i.l.bf16 %v3399_v45 }
 0x144   : > { %v2125_v50 = vsel %vm1106_vm4, %v2117_v49, %v3400_v51  ;;  %v2126_v53 = vsel %vm1106_vm4, %v2118_v32, %v3401_v10  ;;  %v4855_v51 = vunpack.c.h.bf16 %v4386_v39 }
 0x147   : > { %v3409_v12 = vpop.permute.xlu0 %3408  ;;  %v3414_v56 = vpop.permute.xlu1 %3413 }
 0x148   : > { %v3411_v25 = vunpack.i.h.bf16 %v3409_v12  ;;  %v3410_v63 = vunpack.i.l.bf16 %v3409_v12  ;;  %v3416_v36 = vunpack.i.h.bf16 %v3414_v56  ;;  %v3415_v57 = vunpack.i.l.bf16 %v3414_v56 }
 0x149   : > { %v4854_v56 = vunpack.c.l.bf16 %v4415_v21 }
 0x14a   : > { %v2133_v3 = vsel %vm1115_vm5, %v2125_v50, %v3410_v63  ;;  %v2134_v2 = vsel %vm1115_vm5, %v2126_v53, %v3411_v25  ;;  %v2135_v34 = vsel %vm1115_vm5, %v2127_v38, %v3415_v57  ;;  %v2136_v60 = vsel %vm1115_vm5, %v2128_v5, %v3416_v36 }
 0x14b   : > { %v4856_v63 = vunpack.c.l.bf16 %v4386_v39 }
 0x14d   : > { %v3424_v40 = vpop.permute.xlu1 %3423 }
 0x14e   : > { %v3419_v7 = vpop.permute.xlu0 %3418  ;;  %v3426_v35 = vunpack.i.h.bf16 %v3424_v40  ;;  %v3425_v26 = vunpack.i.l.bf16 %v3424_v40 }
 0x14f   : > { %v3421_v22 = vunpack.i.h.bf16 %v3419_v7  ;;  %v3420_v19 = vunpack.i.l.bf16 %v3419_v7 }
 0x150   : > { %v2473_v25 = vsel %vm1088_vm2, %v4855_v51, %v3426_v35  ;;  %v2472_v9 = vsel %vm1088_vm2, %v4856_v63, %v3425_v26 }
 0x151   : > { %v2141_v20 = vsel %vm1124_vm6, %v2133_v3, %v3420_v19  ;;  %v2142_v62 = vsel %vm1124_vm6, %v2134_v2, %v3421_v22 }
 0x152   : > { %v2147_v33 = vpack.c.bf16 %v2142_v62, %v2141_v20 }
 0x154   : > { %2985 = vmatprep.mubr.msk.bf16.mxu0 %vm1133_vm7, %v2147_v33  ;;  %v3434_v16 = vpop.permute.xlu1 %3433 }
 0x155   : > { %v3436_v61 = vunpack.i.h.bf16 %v3434_v16  ;;  %v3435_v37 = vunpack.i.l.bf16 %v3434_v16 }
 0x156   : > { %v3429_v44 = vpop.permute.xlu0 %3428 }
 0x157   : > { %v3431_v27 = vunpack.i.h.bf16 %v3429_v44  ;;  %v3430_v30 = vunpack.i.l.bf16 %v3429_v44  ;;  %v2475_v0 = vsel %vm1088_vm2, %v4853_v58, %v3436_v61  ;;  %v2474_v17 = vsel %vm1088_vm2, %v4854_v56, %v3435_v37 }
 0x158   : > { %v3444_v15 = vpop.permute.xlu1 %3443 }
 0x159   : > { %v2144_v47 = vsel %vm1124_vm6, %v2136_v60, %v3431_v27  ;;  %v2143_v29 = vsel %vm1124_vm6, %v2135_v34, %v3430_v30  ;;  %v3446_v13 = vunpack.i.h.bf16 %v3444_v15  ;;  %v3445_v1 = vunpack.i.l.bf16 %v3444_v15  ;;  %v4782_v27 = vld [vmem:[%s4827_s2] ss:$0 sm:$0xff] }
 0x15a   : > { %v2148_v11 = vpack.c.bf16 %v2144_v47, %v2143_v29  ;;  %v3439_v8 = vpop.permute.xlu0 %3438 }
 0x15b   : > { %v3441_v45 = vunpack.i.h.bf16 %v3439_v8  ;;  %v3440_v18 = vunpack.i.l.bf16 %v3439_v8  ;;  %v2482_v28 = vsel %vm1097_vm3, %v2474_v17, %v3445_v1  ;;  %v2483_v4 = vsel %vm1097_vm3, %v2475_v0, %v3446_v13 }
 0x15c   : > { %2986 = vmatmul.mubr.msk.bf16.gmra.mxu0 %vm1133_vm7, %v2148_v11 }
 0x15d   : > { %v2481_v50 = vsel %vm1097_vm3, %v2473_v25, %v3441_v45  ;;  %v2480_v53 = vsel %vm1097_vm3, %v2472_v9, %v3440_v18 }
 0x15f   : > { %v3454_v12 = vpop.permute.xlu1 %3453 }
 0x160   : > { %v3456_v42 = vunpack.i.h.bf16 %v3454_v12  ;;  %v3455_v10 = vunpack.i.l.bf16 %v3454_v12  ;;  %v3449_v23 = vpop.permute.xlu0 %3448 }
 0x161   : > { %v3451_v32 = vunpack.i.h.bf16 %v3449_v23  ;;  %v3450_v7 = vunpack.i.l.bf16 %v3449_v23 }
 0x162   : > { %v2490_v49 = vsel %vm1106_vm4, %v2482_v28, %v3455_v10  ;;  %v2491_v21 = vsel %vm1106_vm4, %v2483_v4, %v3456_v42 }
 0x163   : > { %v2495_v40 = vpack.c.bf16 %v2491_v21, %v2490_v49  ;;  %v2488_v39 = vsel %vm1106_vm4, %v2480_v53, %v3450_v7  ;;  %v2489_v22 = vsel %vm1106_vm4, %v2481_v50, %v3451_v32 }
 0x164   : > { %v2494_v19 = vpack.c.bf16 %v2489_v22, %v2488_v39 }
 0x166   : > { %2995 = vmatprep.mubr.msk.bf16.mxu1 %vm1115_vm5, %v2494_v19 }
 0x167   : > { %2996 = vmatmul.mubr.msk.bf16.gmra.mxu1 %vm1115_vm5, %v2495_v40 }
 0x1b1   : > { %v2957_v3 = vpop.f32.mrf.mxu0 }
 0x1b3   : > { %v1615_v2 = vpop.f32.mrf.mxu0 }
 0x1b5   : > { %v2958_v52 = vpop.f32.mrf.mxu0 }
 0x1b6   : > { %v2971_v24 = vpop.f32.mrf.mxu1 }
 0x1b7   : > { %v1618_v20 = vpop.f32.mrf.mxu0  ;;  %v1721_v16 = vadd.f32 %v2971_v24, %v2957_v3 }
 0x1b8   : > { %v1712_v62 = vpop.f32.mrf.mxu1 }
 0x1b9   : > { %v1713_v59 = vadd.f32 %v1712_v62, %v1615_v2 }
 0x1ba   : > { %v2972_v46 = vpop.f32.mrf.mxu1 }
 0x1bb   : > { %v1724_v30 = vadd.f32 %v2972_v46, %v2958_v52 }
 0x1bc   : > { %v1715_v31 = vpop.f32.mrf.mxu1 }
 0x1bd   : > { %v1716_v61 = vadd.f32 %v1715_v31, %v1618_v20 }
 0x1d4   : > { %v2961_v48 = vpop.f32.mrf.mxu0 }
 0x1d6   : > { %v1631_v33 = vpop.f32.mrf.mxu0 }
 0x1d8   : > { %v4771_v55 = vpop.f32.mrf.mxu0 }
 0x1d9   : > { %v2975_v36 = vpop.f32.mrf.mxu1 }
 0x1da   : > { %v4773_v57 = vpop.f32.mrf.mxu0  ;;  %v1737_v21 = vadd.f32 %v2975_v36, %v2961_v48 }
 0x1db   : > { %v1728_v41 = vpop.f32.mrf.mxu1 }
 0x1dc   : > { %v1729_v32 = vadd.f32 %v1728_v41, %v1631_v33 }
 0x1dd   : > { %v2976_v43 = vpop.f32.mrf.mxu1 }
 0x1de   : > { %v1740_v40 = vadd.f32 %v2976_v43, %v4771_v55 }
 0x1df   : > { %v1731_v54 = vpop.f32.mrf.mxu1 }
 0x1e0   : > { %v1732_v20 = vadd.f32 %v1731_v54, %v4773_v57 }
 0x1f0   : > { %v2983_v14 = vpop.f32.mrf.mxu0 }
 0x1f1   : > { %v2244_v44 = vadd.f32 %v2983_v14, %v1721_v16 }
 0x1f2   : > { %v2211_v6 = vpop.f32.mrf.mxu0 }
 0x1f3   : > { %v2242_v34 = vadd.f32 %v2211_v6, %v1713_v59 }
 0x1f4   : > { %v2984_v38 = vpop.f32.mrf.mxu0 }
 0x1f5   : > { %v2245_v29 = vadd.f32 %v2984_v38, %v1724_v30 }
 0x1f6   : > { %v2214_v15 = vpop.f32.mrf.mxu0 }
 0x1f7   : > { %v2243_v1 = vadd.f32 %v2214_v15, %v1716_v61 }
 0x1f9   : > { %v2993_v5 = vpop.f32.mrf.mxu1 }
 0x1fa   : > { %v2584_v60 = vadd.f32 %v2993_v5, %v2244_v44 }
 0x1fb   : > { %v2551_v47 = vpop.f32.mrf.mxu1 }
 0x1fc   : > { %v2599_v11 = vadd.f32 %v4782_v27, %v2584_v60  ;;  %v2582_v8 = vadd.f32 %v2551_v47, %v2242_v34 }
 0x1fd   : > { %v2994_v37 = vpop.f32.mrf.mxu1 }
 0x1fe   : > { %vm2607_vm13 = vcmp.ge.f32.partialorder %v2599_v11, 0.0  ;;  %v2615_v35 = vmul.f32 0.2, %v2599_v11  ;;  %v2597_v26 = vadd.f32 %v4782_v27, %v2582_v8  ;;  %v2585_v13 = vadd.f32 %v2994_v37, %v2245_v29 }
 0x1ff   : > { %v2554_v45 = vpop.f32.mrf.mxu1 }
 0x200   : > { %v2623_v18 = vsel %vm2607_vm13, %v2599_v11, %v2615_v35  ;;  %vm2605_vm15 = vcmp.ge.f32.partialorder %v2597_v26, 0.0  ;;  %v2613_v12 = vmul.f32 0.2, %v2597_v26  ;;  %v2600_v58 = vadd.f32 %v4782_v27, %v2585_v13 }
 0x201   : > { %v2631_v0 = vpack.c.bf16 %v2623_v18, %v2623_v18  ;;  %v2583_v56 = vadd.f32 %v2554_v45, %v2243_v1 }
 0x202   : > { %v2621_v17 = vsel %vm2605_vm15, %v2597_v26, %v2613_v12  ;;  %vm2608_vm0 = vcmp.ge.f32.partialorder %v2600_v58, 0.0  ;;  %v2616_v42 = vmul.f32 0.2, %v2600_v58 }
 0x203   : > { %2640 = vst.msk [vmem:[%s4789_s9 + $0x8] sm:$0xf] %vm2637_vm14, %v2631_v0  ;;  %v2629_v10 = vpack.c.bf16 %v2621_v17, %v2621_v17  ;;  %v2598_v51 = vadd.f32 %v4782_v27, %v2583_v56 }
 0x204   : > { %v2624_v25 = vsel %vm2608_vm0, %v2600_v58, %v2616_v42 }
 0x205   : > { %2638 = vst.msk [vmem:[%s4789_s9] sm:$0xf] %vm2637_vm14, %v2629_v10  ;;  %v2632_v63 = vpack.c.bf16 %v2624_v25, %v2624_v25  ;;  %vm2606_vm1 = vcmp.ge.f32.partialorder %v2598_v51, 0.0  ;;  %v2614_v9 = vmul.f32 0.2, %v2598_v51 }
 0x207   : > { %2641 = vst.msk [vmem:[%s4789_s9 + $0xc] sm:$0xf] %vm2637_vm14, %v2632_v63  ;;  %v2622_v28 = vsel %vm2606_vm1, %v2598_v51, %v2614_v9 }
 0x208   : > { %v2630_v4 = vpack.c.bf16 %v2622_v28, %v2622_v28 }
 0x20a   : > { %2639 = vst.msk [vmem:[%s4789_s9 + $0x4] sm:$0xf] %vm2637_vm14, %v2630_v4 }
 0x21c   : > { %v2987_v23 = vpop.f32.mrf.mxu0 }
 0x21d   : > { %v2248_v7 = vadd.f32 %v2987_v23, %v1737_v21 }
 0x21e   : > { %v2227_v49 = vpop.f32.mrf.mxu0 }
 0x21f   : > { %v2246_v39 = vadd.f32 %v2227_v49, %v1729_v32 }
 0x220   : > { %v2988_v50 = vpop.f32.mrf.mxu0 }
 0x221   : > { %v2249_v3 = vadd.f32 %v2988_v50, %v1740_v40 }
 0x222   : > { %v2230_v2 = vpop.f32.mrf.mxu0 }
 0x223   : > { %v2247_v31 = vadd.f32 %v2230_v2, %v1732_v20 }
 0x227   : > { %v2997_v53 = vpop.f32.mrf.mxu1 }
 0x228   : > { %v2588_v22 = vadd.f32 %v2997_v53, %v2248_v7 }
 0x229   : > { %v2567_v19 = vpop.f32.mrf.mxu1 }
 0x22a   : > { %v2603_v52 = vadd.f32 %v4782_v27, %v2588_v22  ;;  %v2586_v24 = vadd.f32 %v2567_v19, %v2246_v39 }
 0x22b   : > { %v2998_v62 = vpop.f32.mrf.mxu1 }
 0x22c   : > { %vm2611_vm2 = vcmp.ge.f32.partialorder %v2603_v52, 0.0  ;;  %v2619_v48 = vmul.f32 0.2, %v2603_v52  ;;  %v2601_v46 = vadd.f32 %v4782_v27, %v2586_v24  ;;  %v2589_v33 = vadd.f32 %v2998_v62, %v2249_v3 }
 0x22d   : > { %v2570_v55 = vpop.f32.mrf.mxu1 }
 0x22e   : > { %v2627_v36 = vsel %vm2611_vm2, %v2603_v52, %v2619_v48  ;;  %vm2609_vm3 = vcmp.ge.f32.partialorder %v2601_v46, 0.0  ;;  %v2617_v41 = vmul.f32 0.2, %v2601_v46  ;;  %v2604_v14 = vadd.f32 %v4782_v27, %v2589_v33 }
 0x22f   : > { %v2635_v43 = vpack.c.bf16 %v2627_v36, %v2627_v36  ;;  %v2587_v6 = vadd.f32 %v2570_v55, %v2247_v31 }
 0x230   : > { %v2625_v57 = vsel %vm2609_vm3, %v2601_v46, %v2617_v41  ;;  %vm2612_vm4 = vcmp.ge.f32.partialorder %v2604_v14, 0.0  ;;  %v2620_v16 = vmul.f32 0.2, %v2604_v14 }
 0x231   : > { %2644 = vst.msk [vmem:[%s4789_s9 + $0x18] sm:$0xf] %vm2637_vm14, %v2635_v43  ;;  %v2633_v54 = vpack.c.bf16 %v2625_v57, %v2625_v57  ;;  %v2602_v59 = vadd.f32 %v4782_v27, %v2587_v6 }
 0x232   : > { %v2628_v44 = vsel %vm2612_vm4, %v2604_v14, %v2620_v16 }
 0x233   : > { %2642 = vst.msk [vmem:[%s4789_s9 + $0x10] sm:$0xf] %vm2637_vm14, %v2633_v54  ;;  %v2636_v38 = vpack.c.bf16 %v2628_v44, %v2628_v44  ;;  %vm2610_vm5 = vcmp.ge.f32.partialorder %v2602_v59, 0.0  ;;  %v2618_v5 = vmul.f32 0.2, %v2602_v59 }
 0x235   : > { %2645 = vst.msk [vmem:[%s4789_s9 + $0x1c] sm:$0xf] %vm2637_vm14, %v2636_v38  ;;  %v2626_v30 = vsel %vm2610_vm5, %v2602_v59, %v2618_v5 }
 0x236   : > { %v2634_v34 = vpack.c.bf16 %v2626_v30, %v2626_v30 }
 0x238   : > { %2643 = vst.msk [vmem:[%s4789_s9 + $0x14] sm:$0xf] %vm2637_vm14, %v2634_v34 }
 0x239 PF: > { %p10_p9 = scmp.ge.s32.totalorder %s3534_s16, 4   ;;  %s4857_s12 = smov %s3483_s13 }
 0x23a   : > { %s4858_s13 = smov %s3543_s19  ;;  %s4859_s14 = smov %s3534_s16 }
 0x23b   :  { %12 = sbr.rel (!%p10_p9) target bundleno = 2 (0x2), region = 120 }

// kernel: discriminator_forward.7
= control target key start
LH: loop header
LB: loop body
LE: loop exit
PB: predicated region body
PF: predicated region fallthrough
CT: control target
= control target key end

     0   :  { %s2742_s15 = smov 16   ;;  %s2743_s14 = smov 32   ;;  %vm444_vm0 = vcmask 130048   ;;  %vm453_vm1 = vcmask 261120   ;;  %vm462_vm2 = vcmask 392192   ;;  %vm471_vm3 = vcmask 523264   ;;  %s4038_s0 = inlined_call_operand.vmem [shape: bf16[4,2,6,6,16], index: 0, kind: input, shape index: {}]   ;;  %s4039_s1 = inlined_call_operand.vmem [shape: bf16[4,144,16], index: 1, kind: input, shape index: {}]   ;;  %s4040_s2 = inlined_call_operand.vmem [shape: f32[1,16], index: 2, kind: input, shape index: {}]   ;;  %s4041_s3 = inlined_call_operand.vmem [shape: f32[1,16], index: 3, kind: input, shape index: {}]   ;;  %s4042_s4 = inlined_call_operand.vmem [shape: bf16[2,4,4,16], index: 4, kind: output, shape index: {}]  }
   0x1   :  { %v2060_v0 = vld [vmem:[%s4038_s0 + $0x48] sm:$0x7]  ;;  %v2061_v1 = vld [vmem:[%s4038_s0 + $0x4c] sm:$0x7]  ;;  %v2056_v2 = vld [vmem:[%s4038_s0 + $0x30] sm:$0x7] }
   0x2   :  { %v624_v3 = vunpack.c.l.bf16 %v2060_v0  ;;  %v625_v4 = vunpack.c.l.bf16 %v2061_v1  ;;  %v2057_v5 = vld [vmem:[%s4038_s0 + $0x34] sm:$0x7]  ;;  %v620_v6 = vunpack.c.l.bf16 %v2056_v2  ;;  %v2062_v7 = vld [vmem:[%s4038_s0 + $0x50] sm:$0x7]  ;;  %v2058_v12 = vld [vmem:[%s4038_s0 + $0x38] sm:$0x7] }
   0x3   :  { %v2063_v8 = vld [vmem:[%s4038_s0 + $0x54] sm:$0x7]  ;;  %v621_v9 = vunpack.c.l.bf16 %v2057_v5  ;;  %v626_v10 = vunpack.c.l.bf16 %v2062_v7  ;;  %v2059_v13 = vld [vmem:[%s4038_s0 + $0x3c] sm:$0x7]  ;;  %v622_v17 = vunpack.c.l.bf16 %v2058_v12  ;;  %v2067_v23 = vld [vmem:[%s4038_s0 + $0x40] sm:$0x3] }
   0x4   :  { %v627_v11 = vunpack.c.l.bf16 %v2063_v8  ;;  %v672_v14 = vrot.slane %v624_v3, 1  ;;  %v673_v15 = vrot.slane %v625_v4, 1  ;;  %v668_v16 = vrot.slane %v620_v6, 1  ;;  %v2066_v18 = vld [vmem:[%s4038_s0 + $0x3c] sm:$0x3]  ;;  %v2715_v60 = vld [vmem:[%s4039_s1 + $0x70] sm:$0xff]  }
   0x5   :  { %v669_v19 = vrot.slane %v621_v9, 1  ;;  %v674_v20 = vrot.slane %v626_v10, 1  ;;  %v623_v22 = vunpack.c.l.bf16 %v2059_v13  ;;  %v670_v25 = vrot.slane %v622_v17, 1  ;;  %v2064_v26 = vld [vmem:[%s4038_s0 + $0x34] sm:$0x3]  ;;  %2263 = vmatprep.subr.bf16.mxu0 %v2715_v60  ;;  %s2744_s28 = smov 48  }
   0x6   :  { %v675_v21 = vrot.slane %v627_v11, 1  ;;  %v2330_v24 = vpack.i.bf16 %v673_v15, %v672_v14  ;;  %v2065_v27 = vld [vmem:[%s4038_s0 + $0x38] sm:$0x3]  ;;  %v2070_v30 = vld [vmem:[%s4038_s0 + $0x54] sm:$0x3]  ;;  %v630_v32 = vunpack.c.l.bf16 %v2066_v18  ;;  %v631_v33 = vunpack.c.l.bf16 %v2067_v23  ;;  %2264 = vmatpush3.bf16.msra.mxu0 %v2715_v60  ;;  %v2716_v11 = vld [vmem:[%s4039_s1 + $0x68] sm:$0xff]  }
   0x7   :  { %v2315_v28 = vpack.i.bf16 %v669_v19, %v668_v16  ;;  %v671_v29 = vrot.slane %v623_v22, 1  ;;  %v2071_v34 = vld [vmem:[%s4038_s0 + $0x58] sm:$0x3]  ;;  %v2068_v35 = vld [vmem:[%s4038_s0 + $0x4c] sm:$0x3]  ;;  %v628_v38 = vunpack.c.l.bf16 %v2064_v26  ;;  %v629_v39 = vunpack.c.l.bf16 %v2065_v27  ;;  %v2717_v16 = vld [vmem:[%s4039_s1 + $0x60] sm:$0xff]   ;;  %2265 = vmatprep.subr.bf16.mxu0 %v2716_v11 }
   0x8   :  { %2331 = vrot.lane.b32.xlu1 %v2330_v24, %s2742_s15  ;;  %v2335_v31 = vpack.i.bf16 %v675_v21, %v674_v20  ;;  %v2069_v36 = vld [vmem:[%s4038_s0 + $0x50] sm:$0x3]  ;;  %v2074_v40 = vld [vmem:[%s4038_s0 + $0x3c] sm:$0x7]  ;;  %v2075_v41 = vld [vmem:[%s4038_s0 + $0x40] sm:$0x7]  ;;  %v634_v44 = vunpack.c.l.bf16 %v2070_v30  ;;  %v635_v45 = vunpack.c.l.bf16 %v2071_v34  ;;  %v632_v46 = vunpack.c.l.bf16 %v2068_v35 }
   0x9   :  { %2316 = vrot.lane.b32.xlu0 %v2315_v28, %s2742_s15  ;;  %v2320_v37 = vpack.i.bf16 %v671_v29, %v670_v25  ;;  %v2072_v42 = vld [vmem:[%s4038_s0 + $0x34] sm:$0x7]  ;;  %v2073_v43 = vld [vmem:[%s4038_s0 + $0x38] sm:$0x7]  ;;  %v633_v47 = vunpack.c.l.bf16 %v2069_v36  ;;  %v2340_v48 = vpack.i.bf16 %v631_v33, %v630_v32  ;;  %v638_v49 = vunpack.c.l.bf16 %v2074_v40  ;;  %v2076_v56 = vld [vmem:[%s4038_s0 + $0x4c] sm:$0x7] }
   0xa   :  { %v639_v50 = vunpack.c.l.bf16 %v2075_v41  ;;  %v2325_v51 = vpack.i.bf16 %v629_v39, %v628_v38  ;;  %v636_v52 = vunpack.c.l.bf16 %v2072_v42  ;;  %v637_v53 = vunpack.c.l.bf16 %v2073_v43  ;;  %v2078_v54 = vld [vmem:[%s4038_s0 + $0x54] sm:$0x7]  ;;  %v2079_v55 = vld [vmem:[%s4038_s0 + $0x58] sm:$0x7]  ;;  %v2077_v57 = vld [vmem:[%s4038_s0 + $0x50] sm:$0x7]  ;;  %2266 = vmatpush3.bf16.msra.mxu0 %v2716_v11 }
   0xb   :  { %v2350_v58 = vpack.i.bf16 %v635_v45, %v634_v44  ;;  %v2345_v59 = vpack.i.bf16 %v633_v47, %v632_v46  ;;  %v742_v61 = vrot.slane %v638_v49, 1  ;;  %v642_v63 = vunpack.c.l.bf16 %v2078_v54  ;;  %v2082_v5 = vld [vmem:[%s4038_s0 + $0x40] sm:$0x3]  ;;  %v2083_v6 = vld [vmem:[%s4038_s0 + $0x44] sm:$0x3]  ;;  %2267 = vmatprep.subr.bf16.mxu0 %v2717_v16  ;;  %v2718_v28 = vld [vmem:[%s4039_s1 + $0x58] sm:$0xff]  }
   0xc   :  { %2336 = vrot.lane.b32.xlu1 %v2335_v31, %s2742_s15  ;;  %v743_v62 = vrot.slane %v639_v50, 1  ;;  %v643_v0 = vunpack.c.l.bf16 %v2079_v55  ;;  %v740_v1 = vrot.slane %v636_v52, 1  ;;  %v741_v2 = vrot.slane %v637_v53, 1  ;;  %v2080_v10 = vld [vmem:[%s4038_s0 + $0x38] sm:$0x3]  ;;  %s2745_s6 = smov 64  }
   0xd   :  { %2321 = vrot.lane.b32.xlu0 %v2320_v37, %s2742_s15  ;;  %v640_v3 = vunpack.c.l.bf16 %v2076_v56  ;;  %v641_v4 = vunpack.c.l.bf16 %v2077_v57  ;;  %v746_v8 = vrot.slane %v642_v63, 1  ;;  %v2081_v15 = vld [vmem:[%s4038_s0 + $0x3c] sm:$0x3]  ;;  %v646_v17 = vunpack.c.l.bf16 %v2082_v5  ;;  %v2086_v22 = vld [vmem:[%s4038_s0 + $0x58] sm:$0x3]  ;;  %s2746_s27 = smov 80  }
   0xe   :  { %v2360_v7 = vpack.i.bf16 %v743_v62, %v742_v61  ;;  %v747_v9 = vrot.slane %v643_v0, 1  ;;  %v2355_v12 = vpack.i.bf16 %v741_v2, %v740_v1  ;;  %v647_v19 = vunpack.c.l.bf16 %v2083_v6  ;;  %v2087_v23 = vld [vmem:[%s4038_s0 + $0x5c] sm:$0x3]  ;;  %v2084_v24 = vld [vmem:[%s4038_s0 + $0x50] sm:$0x3]  ;;  %2268 = vmatpush3.bf16.msra.mxu0 %v2717_v16  ;;  %s2747_s22 = smov 96  }
   0xf   :  { %v744_v13 = vrot.slane %v640_v3, 1  ;;  %v745_v14 = vrot.slane %v641_v4, 1  ;;  %v644_v20 = vunpack.c.l.bf16 %v2080_v10  ;;  %v645_v21 = vunpack.c.l.bf16 %v2081_v15  ;;  %v2090_v26 = vld [vmem:[%s4038_s0 + $0x40] sm:$0x7]  ;;  %v2091_v27 = vld [vmem:[%s4038_s0 + $0x44] sm:$0x7]  ;;  %2269 = vmatprep.subr.bf16.mxu0 %v2718_v28 }
  0x10   :  { %2341 = vrot.lane.b32.xlu1 %v2340_v48, %s2743_s14  ;;  %v2370_v18 = vpack.i.bf16 %v747_v9, %v746_v8  ;;  %v2085_v29 = vld [vmem:[%s4038_s0 + $0x54] sm:$0x3]  ;;  %v2088_v30 = vld [vmem:[%s4038_s0 + $0x38] sm:$0x7]  ;;  %v2089_v31 = vld [vmem:[%s4038_s0 + $0x3c] sm:$0x7]  ;;  %v650_v32 = vunpack.c.l.bf16 %v2086_v22  ;;  %v651_v33 = vunpack.c.l.bf16 %v2087_v23  ;;  %v2380_v34 = vpack.i.bf16 %v647_v19, %v646_v17 }
  0x11   :  { %2326 = vrot.lane.b32.xlu0 %v2325_v51, %s2743_s14  ;;  %v2365_v25 = vpack.i.bf16 %v745_v14, %v744_v13  ;;  %v2375_v35 = vpack.i.bf16 %v645_v21, %v644_v20  ;;  %v654_v36 = vunpack.c.l.bf16 %v2090_v26  ;;  %v655_v37 = vunpack.c.l.bf16 %v2091_v27  ;;  %v2094_v38 = vld [vmem:[%s4038_s0 + $0x58] sm:$0x7]  ;;  %v2095_v39 = vld [vmem:[%s4038_s0 + $0x5c] sm:$0x7]  ;;  %v2092_v44 = vld [vmem:[%s4038_s0 + $0x50] sm:$0x7] }
  0x12   :  { %v648_v40 = vunpack.c.l.bf16 %v2084_v24  ;;  %v649_v41 = vunpack.c.l.bf16 %v2085_v29  ;;  %v652_v42 = vunpack.c.l.bf16 %v2088_v30  ;;  %v653_v43 = vunpack.c.l.bf16 %v2089_v31  ;;  %v2093_v45 = vld [vmem:[%s4038_s0 + $0x54] sm:$0x7]  ;;  %2270 = vmatpush3.bf16.msra.mxu0 %v2718_v28  ;;  %v28_v53 = vld [vmem:[%s4038_s0 + $0x8] sm:$0x7]  ;;  %v29_v57 = vld [vmem:[%s4038_s0 + $0xc] sm:$0x7] }
  0x13   :  { %v2390_v46 = vpack.i.bf16 %v651_v33, %v650_v32  ;;  %v658_v47 = vunpack.c.l.bf16 %v2094_v38  ;;  %v659_v48 = vunpack.c.l.bf16 %v2095_v39  ;;  %v814_v49 = vrot.slane %v654_v36, 1  ;;  %v36_v6 = vld [vmem:[%s4038_s0 + $0x8] sm:$0x6]  ;;  %v2719_v8 = vld [vmem:[%s4039_s1 + $0x50] sm:$0xff]   ;;  %v34_v9 = vld [vmem:[%s4038_s0] sm:$0x6] }
  0x14   :  { %2351 = vrot.lane.b32.xlu1 %v2350_v58, %s2743_s14  ;;  %v815_v50 = vrot.slane %v655_v37, 1  ;;  %v656_v51 = vunpack.c.l.bf16 %v2092_v44  ;;  %v657_v52 = vunpack.c.l.bf16 %v2093_v45  ;;  %v2385_v54 = vpack.i.bf16 %v649_v41, %v648_v40  ;;  %v26_v58 = vld [vmem:[%s4038_s0] sm:$0x7]  ;;  %v35_v10 = vld [vmem:[%s4038_s0 + $0x4] sm:$0x6]  ;;  %2271 = vmatprep.subr.bf16.mxu0 %v2719_v8  ;;  %v2721_v23 = vld [vmem:[%s4039_s1 + $0x48] sm:$0xff]  }
  0x15   :  { %2346 = vrot.lane.b32.xlu0 %v2345_v59, %s2743_s14  ;;  %v812_v55 = vrot.slane %v652_v42, 1  ;;  %v813_v56 = vrot.slane %v653_v43, 1  ;;  %v27_v59 = vld [vmem:[%s4038_s0 + $0x4] sm:$0x7]  ;;  %v818_v60 = vrot.slane %v658_v47, 1  ;;  %v819_v61 = vrot.slane %v659_v48, 1 }
  0x16   :  { %v102_v62 = vunpack.c.l.bf16 %v28_v53  ;;  %v2400_v63 = vpack.i.bf16 %v815_v50, %v814_v49  ;;  %v816_v0 = vrot.slane %v656_v51, 1  ;;  %v817_v1 = vrot.slane %v657_v52, 1  ;;  %2272 = vmatpush3.bf16.msra.mxu0 %v2719_v8  ;;  %v1994_v21 = vld [vmem:[%s4038_s0 + $0xc] sm:$0x3]  ;;  %v1995_v22 = vld [vmem:[%s4038_s0 + $0x10] sm:$0x3] }
  0x17   :  { %v103_v2 = vunpack.c.l.bf16 %v29_v57  ;;  %v2395_v3 = vpack.i.bf16 %v813_v56, %v812_v55  ;;  %v100_v4 = vunpack.c.l.bf16 %v26_v58  ;;  %v101_v5 = vunpack.c.l.bf16 %v27_v59  ;;  %v1992_v27 = vld [vmem:[%s4038_s0 + $0x4] sm:$0x3]  ;;  %v1993_v28 = vld [vmem:[%s4038_s0 + $0x8] sm:$0x3]  ;;  %v2002_v32 = vld [vmem:[%s4038_s0 + $0xc] sm:$0x7]  ;;  %2273 = vmatprep.subr.bf16.mxu0 %v2721_v23 }
  0x18   :  { %2361 = vrot.lane.b32.xlu1 %v2360_v7, %s2744_s28  ;;  %v37_v7 = vld [vmem:[%s4038_s0 + $0xc] sm:$0x6]  ;;  %v2410_v11 = vpack.i.bf16 %v819_v61, %v818_v60  ;;  %v2405_v13 = vpack.i.bf16 %v817_v1, %v816_v0  ;;  %v110_v15 = vunpack.c.l.bf16 %v36_v6  ;;  %v108_v19 = vunpack.c.l.bf16 %v34_v9  ;;  %v2003_v33 = vld [vmem:[%s4038_s0 + $0x10] sm:$0x7]  ;;  %v2008_v48 = vld [vmem:[%s4038_s0 + $0x4] sm:$0x6] }
  0x19   :  { %2356 = vrot.lane.b32.xlu0 %v2355_v12, %s2744_s28  ;;  %v174_v12 = vrot.slane %v102_v62, 1  ;;  %v175_v14 = vrot.slane %v103_v2, 1  ;;  %v111_v16 = vunpack.c.l.bf16 %v37_v7  ;;  %v172_v17 = vrot.slane %v100_v4, 1  ;;  %v2011_v47 = vld [vmem:[%s4038_s0 + $0x10] sm:$0x6]  ;;  %s2748_s5 = smov 112  }
  0x1a   :  { %v109_v20 = vunpack.c.l.bf16 %v35_v10  ;;  %v212_v30 = vrot.slane %v108_v19, 2  ;;  %2274 = vmatpush3.bf16.msra.mxu0 %v2721_v23  ;;  %v118_v36 = vunpack.c.l.bf16 %v1994_v21  ;;  %v119_v37 = vunpack.c.l.bf16 %v1995_v22  ;;  %v2009_v49 = vld [vmem:[%s4038_s0 + $0x8] sm:$0x6]  ;;  %v2018_v60 = vld [vmem:[%s4038_s0 + $0x10] sm:$0x3] }
  0x1b   :  { %v2420_v24 = vpack.i.bf16 %v175_v14, %v174_v12  ;;  %v215_v26 = vrot.slane %v111_v16, 2  ;;  %v116_v38 = vunpack.c.l.bf16 %v1992_v27  ;;  %v117_v39 = vunpack.c.l.bf16 %v1993_v28  ;;  %v2019_v0 = vld [vmem:[%s4038_s0 + $0x14] sm:$0x3]  ;;  %v2016_v1 = vld [vmem:[%s4038_s0 + $0x8] sm:$0x3] }
  0x1c   :  { %2371 = vrot.lane.b32.xlu1 %v2370_v18, %s2744_s28  ;;  %v173_v18 = vrot.slane %v101_v5, 1  ;;  %v213_v31 = vrot.slane %v109_v20, 2  ;;  %v126_v41 = vunpack.c.l.bf16 %v2002_v32  ;;  %v127_v42 = vunpack.c.l.bf16 %v2003_v33  ;;  %v2026_v5 = vld [vmem:[%s4038_s0 + $0x10] sm:$0x7]  ;;  %v2027_v6 = vld [vmem:[%s4038_s0 + $0x14] sm:$0x7] }
  0x1d   :  { %2366 = vrot.lane.b32.xlu0 %v2365_v25, %s2744_s28  ;;  %v214_v25 = vrot.slane %v110_v15, 2  ;;  %v2440_v50 = vpack.i.bf16 %v119_v37, %v118_v36  ;;  %v2435_v51 = vpack.i.bf16 %v117_v39, %v116_v38  ;;  %v135_v55 = vunpack.c.l.bf16 %v2011_v47  ;;  %v2017_v7 = vld [vmem:[%s4038_s0 + $0xc] sm:$0x3]  ;;  %v2024_v8 = vld [vmem:[%s4038_s0 + $0x8] sm:$0x7] }
  0x1e   :  { %v2415_v29 = vpack.i.bf16 %v173_v18, %v172_v17  ;;  %v2425_v43 = vpack.i.bf16 %v213_v31, %v212_v30  ;;  %v286_v52 = vrot.slane %v126_v41, 1  ;;  %v287_v53 = vrot.slane %v127_v42, 1  ;;  %v2025_v9 = vld [vmem:[%s4038_s0 + $0xc] sm:$0x7]  ;;  %v32_v16 = vld [vmem:[%s4038_s0 + $0x20] sm:$0x7] }
  0x1f   :  { %v2430_v40 = vpack.i.bf16 %v215_v26, %v214_v25  ;;  %v132_v58 = vunpack.c.l.bf16 %v2008_v48  ;;  %v133_v59 = vunpack.c.l.bf16 %v2009_v49  ;;  %v142_v10 = vunpack.c.l.bf16 %v2018_v60  ;;  %v33_v21 = vld [vmem:[%s4038_s0 + $0x24] sm:$0x7]  ;;  %v30_v22 = vld [vmem:[%s4038_s0 + $0x18] sm:$0x7]  ;;  %v31_v23 = vld [vmem:[%s4038_s0 + $0x1c] sm:$0x7] }
  0x20   :  { %2381 = vrot.lane.b32.xlu1 %v2380_v34, %s2745_s6  ;;  %v2000_v34 = vld [vmem:[%s4038_s0 + $0x4] sm:$0x7]  ;;  %v2450_v61 = vpack.i.bf16 %v287_v53, %v286_v52  ;;  %v150_v14 = vunpack.c.l.bf16 %v2026_v5  ;;  %v151_v15 = vunpack.c.l.bf16 %v2027_v6  ;;  %v141_v18 = vunpack.c.l.bf16 %v2017_v7  ;;  %v40_v30 = vld [vmem:[%s4038_s0 + $0x20] sm:$0x6]  ;;  %v38_v36 = vld [vmem:[%s4038_s0 + $0x18] sm:$0x6] }
  0x21   :  { %2376 = vrot.lane.b32.xlu0 %v2375_v35, %s2745_s6  ;;  %v2001_v35 = vld [vmem:[%s4038_s0 + $0x8] sm:$0x7]  ;;  %v124_v44 = vunpack.c.l.bf16 %v2000_v34  ;;  %v325_v4 = vrot.slane %v133_v59, 2  ;;  %v148_v19 = vunpack.c.l.bf16 %v2024_v8  ;;  %v149_v20 = vunpack.c.l.bf16 %v2025_v9  ;;  %v39_v37 = vld [vmem:[%s4038_s0 + $0x1c] sm:$0x6] }
  0x22   :  { %v125_v45 = vunpack.c.l.bf16 %v2001_v35  ;;  %v106_v25 = vunpack.c.l.bf16 %v32_v16  ;;  %v398_v26 = vrot.slane %v150_v14, 1  ;;  %v399_v27 = vrot.slane %v151_v15, 1  ;;  %v41_v35 = vld [vmem:[%s4038_s0 + $0x24] sm:$0x6]  ;;  %v1999_v49 = vld [vmem:[%s4038_s0 + $0x28] sm:$0x3] }
  0x23   :  { %v284_v56 = vrot.slane %v124_v44, 1  ;;  %v107_v28 = vunpack.c.l.bf16 %v33_v21  ;;  %v396_v32 = vrot.slane %v148_v19, 1  ;;  %v397_v33 = vrot.slane %v149_v20, 1  ;;  %v1998_v48 = vld [vmem:[%s4038_s0 + $0x24] sm:$0x3] }
  0x24   :  { %2391 = vrot.lane.b32.xlu1 %v2390_v46, %s2745_s6  ;;  %v2010_v46 = vld [vmem:[%s4038_s0 + $0xc] sm:$0x6]  ;;  %v285_v57 = vrot.slane %v125_v45, 1  ;;  %v105_v34 = vunpack.c.l.bf16 %v31_v23  ;;  %v178_v38 = vrot.slane %v106_v25, 1  ;;  %v114_v39 = vunpack.c.l.bf16 %v40_v30  ;;  %v2007_v59 = vld [vmem:[%s4038_s0 + $0x28] sm:$0x7] }
  0x25   :  { %2386 = vrot.lane.b32.xlu0 %v2385_v54, %s2745_s6  ;;  %v134_v54 = vunpack.c.l.bf16 %v2010_v46  ;;  %v179_v41 = vrot.slane %v107_v28, 1  ;;  %v2475_v44 = vpack.i.bf16 %v397_v33, %v396_v32  ;;  %v112_v46 = vunpack.c.l.bf16 %v38_v36  ;;  %v2004_v60 = vld [vmem:[%s4038_s0 + $0x1c] sm:$0x7]  ;;  %v2014_v5 = vld [vmem:[%s4038_s0 + $0x24] sm:$0x6] }
  0x26   :  { %v2445_v2 = vpack.i.bf16 %v285_v57, %v284_v56  ;;  %v177_v45 = vrot.slane %v105_v34, 1  ;;  %v113_v47 = vunpack.c.l.bf16 %v39_v37  ;;  %v218_v52 = vrot.slane %v114_v39, 2  ;;  %v2015_v6 = vld [vmem:[%s4038_s0 + $0x28] sm:$0x6]  ;;  %v2023_v25 = vld [vmem:[%s4038_s0 + $0x2c] sm:$0x3] }
  0x27   :  { %v326_v62 = vrot.slane %v134_v54, 2  ;;  %v1997_v54 = vld [vmem:[%s4038_s0 + $0x20] sm:$0x3]  ;;  %v216_v57 = vrot.slane %v112_v46, 2  ;;  %v128_v8 = vunpack.c.l.bf16 %v2004_v60  ;;  %v138_v16 = vunpack.c.l.bf16 %v2014_v5  ;;  %v2030_v23 = vld [vmem:[%s4038_s0 + $0x28] sm:$0x7] }
  0x28   :  { %2401 = vrot.lane.b32.xlu1 %v2400_v63, %s2746_s27  ;;  %v327_v63 = vrot.slane %v135_v55, 2  ;;  %v2006_v55 = vld [vmem:[%s4038_s0 + $0x24] sm:$0x7]  ;;  %v2720_v28 = vld [vmem:[%s4039_s1 + $0x38] sm:$0xff]   ;;  %v2137_v32 = vld [vmem:[%s4038_s0 + $0x68] sm:$0x7]  ;;  %v154_v39 = vunpack.c.l.bf16 %v2030_v23 }
  0x29   :  { %2396 = vrot.lane.b32.xlu0 %v2395_v3, %s2746_s27  ;;  %v324_v3 = vrot.slane %v132_v58, 2  ;;  %v217_v58 = vrot.slane %v113_v47, 2  ;;  %v330_v30 = vrot.slane %v138_v16, 2  ;;  %v2138_v36 = vld [vmem:[%s4038_s0 + $0x6c] sm:$0x7]  ;;  %v147_v47 = vunpack.c.l.bf16 %v2023_v25 }
  0x2a   :  { %v2460_v12 = vpack.i.bf16 %v327_v63, %v326_v62  ;;  %v122_v62 = vunpack.c.l.bf16 %v1998_v48  ;;  %v123_v63 = vunpack.c.l.bf16 %v1999_v49  ;;  %v2020_v37 = vld [vmem:[%s4038_s0 + $0x20] sm:$0x3]  ;;  %v1175_v48 = vunpack.c.l.bf16 %v2137_v32  ;;  %v2033_v23 = vld [vmem:[%s4038_s0 + $0xc] sm:$0x6] }
  0x2b   :  { %v2455_v17 = vpack.i.bf16 %v325_v4, %v324_v3  ;;  %v130_v3 = vunpack.c.l.bf16 %v2006_v55  ;;  %v131_v4 = vunpack.c.l.bf16 %v2007_v59  ;;  %v2495_v7 = vpack.i.bf16 %v217_v58, %v216_v57  ;;  %v2141_v55 = vld [vmem:[%s4038_s0 + $0x80] sm:$0x7]  ;;  %v2142_v58 = vld [vmem:[%s4038_s0 + $0x84] sm:$0x7] }
  0x2c   :  { %2411 = vrot.lane.b32.xlu1 %v2410_v11, %s2746_s27  ;;  %v143_v11 = vunpack.c.l.bf16 %v2019_v0  ;;  %v1176_v49 = vunpack.c.l.bf16 %v2138_v36  ;;  %vm480_vm4 = vcmask 654336   ;;  %vm489_vm5 = vcmask 785408  }
  0x2d   :  { %2406 = vrot.lane.b32.xlu0 %v2405_v13, %s2746_s27  ;;  %v140_v13 = vunpack.c.l.bf16 %v2016_v1  ;;  %v121_v1 = vunpack.c.l.bf16 %v1997_v54  ;;  %v290_v14 = vrot.slane %v130_v3, 1  ;;  %v291_v15 = vrot.slane %v131_v4, 1 }
  0x2e   :  { %v3159_v3 = vrot.slane %v1175_v48, 1  ;;  %v3161_v4 = vrot.slane %v1176_v49, 1  ;;  %v2725_v48 = vld [vmem:[%s4039_s1 + $0x18] sm:$0xff]   ;;  %vm498_vm6 = vcmask 916480   ;;  %vm1979_vm11 = vcmask 123904  }
  0x2f   :  { %v2465_v31 = vpack.i.bf16 %v141_v18, %v140_v13  ;;  %v288_v18 = vrot.slane %v128_v8, 1  ;;  %v2143_v8 = vld [vmem:[%s4038_s0 + $0x60] sm:$0x6] }
  0x30   :  { %2421 = vrot.lane.b32.xlu1 %v2420_v24, %s2742_s15  ;;  %v2470_v24 = vpack.i.bf16 %v143_v11, %v142_v10  ;;  %v2012_v10 = vld [vmem:[%s4038_s0 + $0x1c] sm:$0x6]  ;;  %v2013_v11 = vld [vmem:[%s4038_s0 + $0x20] sm:$0x6] }
  0x31   :  { %2416 = vrot.lane.b32.xlu0 %v2415_v29, %s2742_s15  ;;  %v104_v29 = vunpack.c.l.bf16 %v30_v22  ;;  %v136_v20 = vunpack.c.l.bf16 %v2012_v10  ;;  %v137_v21 = vunpack.c.l.bf16 %v2013_v11  ;;  %v2022_v22 = vld [vmem:[%s4038_s0 + $0x28] sm:$0x3]  ;;  %v1179_v10 = vunpack.c.l.bf16 %v2141_v55  ;;  %v2144_v11 = vld [vmem:[%s4038_s0 + $0x64] sm:$0x6] }
  0x32   :  { %v1182_v32 = vunpack.c.l.bf16 %v2144_v11  ;;  %v2158_v11 = vld [vmem:[%s4038_s0 + $0x88] sm:$0x3] }
  0x33   :  { %v176_v42 = vrot.slane %v104_v29, 1  ;;  %v2520_v29 = vpack.i.bf16 %v291_v15, %v290_v14  ;;  %v328_v34 = vrot.slane %v136_v20, 2 }
  0x34   :  { %2431 = vrot.lane.b32.xlu1 %v2430_v40, %s2743_s14  ;;  %v2480_v40 = vpack.i.bf16 %v399_v27, %v398_v26  ;;  %v2028_v26 = vld [vmem:[%s4038_s0 + $0x20] sm:$0x7]  ;;  %v2029_v27 = vld [vmem:[%s4038_s0 + $0x24] sm:$0x7] }
  0x35   :  { %2426 = vrot.lane.b32.xlu0 %v2425_v43, %s2743_s14  ;;  %v115_v43 = vunpack.c.l.bf16 %v41_v35  ;;  %v2485_v56 = vpack.i.bf16 %v177_v45, %v176_v42  ;;  %v329_v35 = vrot.slane %v137_v21, 2  ;;  %v146_v42 = vunpack.c.l.bf16 %v2022_v22  ;;  %v2722_v45 = vld [vmem:[%s4039_s1 + $0x30] sm:$0xff]   ;;  %v2032_v22 = vld [vmem:[%s4038_s0 + $0x8] sm:$0x6] }
  0x37   :  { %v219_v53 = vrot.slane %v115_v43, 2  ;;  %v152_v43 = vunpack.c.l.bf16 %v2028_v26  ;;  %v2724_v26 = vld [vmem:[%s4039_s1 + $0x20] sm:$0xff]  }
  0x38   :  { %2441 = vrot.lane.b32.xlu1 %v2440_v50, %s2744_s28  ;;  %v1996_v50 = vld [vmem:[%s4038_s0 + $0x1c] sm:$0x3] }
  0x39   :  { %2436 = vrot.lane.b32.xlu0 %v2435_v51, %s2744_s28  ;;  %v2490_v51 = vpack.i.bf16 %v179_v41, %v178_v38  ;;  %v120_v0 = vunpack.c.l.bf16 %v1996_v50  ;;  %v2021_v38 = vld [vmem:[%s4038_s0 + $0x24] sm:$0x3]  ;;  %v2135_v41 = vld [vmem:[%s4038_s0 + $0x60] sm:$0x7]  ;;  %v400_v59 = vrot.slane %v152_v43, 1 }
  0x3a   :  { %v2136_v50 = vld [vmem:[%s4038_s0 + $0x64] sm:$0x7]  ;;  %v145_v54 = vunpack.c.l.bf16 %v2021_v38 }
  0x3b   :  { %v2505_v13 = vpack.i.bf16 %v121_v1, %v120_v0  ;;  %v2140_v0 = vld [vmem:[%s4038_s0 + $0x7c] sm:$0x7]  ;;  %v2723_v1 = vld [vmem:[%s4039_s1 + $0x28] sm:$0xff]  }
  0x3c   :  { %2451 = vrot.lane.b32.xlu1 %v2450_v61, %s2745_s6  ;;  %v2005_v61 = vld [vmem:[%s4038_s0 + $0x20] sm:$0x7]  ;;  %v1178_v20 = vunpack.c.l.bf16 %v2140_v0  ;;  %v2154_v0 = vld [vmem:[%s4038_s0 + $0x70] sm:$0x3] }
  0x3d   :  { %2446 = vrot.lane.b32.xlu0 %v2445_v2, %s2745_s6  ;;  %v2500_v2 = vpack.i.bf16 %v219_v53, %v218_v52  ;;  %v129_v9 = vunpack.c.l.bf16 %v2005_v61  ;;  %v2525_v52 = vpack.i.bf16 %v329_v35, %v328_v34  ;;  %v144_v53 = vunpack.c.l.bf16 %v2020_v37 }
  0x3e   :  { %v1173_v61 = vunpack.c.l.bf16 %v2135_v41 }
  0x3f   :  { %v289_v19 = vrot.slane %v129_v9, 1  ;;  %v2535_v5 = vpack.i.bf16 %v145_v54, %v144_v53  ;;  %v1262_v53 = vrot.slane %v1182_v32, 2 }
  0x40   :  { %2461 = vrot.lane.b32.xlu1 %v2460_v12, %s2746_s27  ;;  %v2510_v12 = vpack.i.bf16 %v123_v63, %v122_v62  ;;  %v1174_v62 = vunpack.c.l.bf16 %v2136_v50  ;;  %v2139_v63 = vld [vmem:[%s4038_s0 + $0x78] sm:$0x7]  ;;  %v1221_v15 = vrot.slane %v1173_v61, 1 }
  0x41   :  { %2456 = vrot.lane.b32.xlu0 %v2455_v17, %s2746_s27  ;;  %v139_v17 = vunpack.c.l.bf16 %v2015_v6  ;;  %v2515_v33 = vpack.i.bf16 %v289_v19, %v288_v18  ;;  %v2145_v6 = vld [vmem:[%s4038_s0 + $0x68] sm:$0x6]  ;;  %v2560_v18 = vpack.i.bf16 %v3161_v4, %v3159_v3  ;;  %v1177_v19 = vunpack.c.l.bf16 %v2139_v63  ;;  %v2153_v63 = vld [vmem:[%s4038_s0 + $0x6c] sm:$0x3] }
  0x42   :  { %v1222_v16 = vrot.slane %v1174_v62, 1  ;;  %v1183_v21 = vunpack.c.l.bf16 %v2145_v6  ;;  %v1191_v6 = vunpack.c.l.bf16 %v2153_v63 }
  0x44   :  { %2471 = vrot.lane.b32.xlu1 %v2470_v24, %s2747_s22  ;;  %v2031_v24 = vld [vmem:[%s4038_s0 + $0x2c] sm:$0x7] }
  0x45   :  { %2466 = vrot.lane.b32.xlu0 %v2465_v31, %s2747_s22  ;;  %v331_v31 = vrot.slane %v139_v17, 2  ;;  %v1180_v17 = vunpack.c.l.bf16 %v2142_v58 }
  0x47   :  { %v2530_v46 = vpack.i.bf16 %v331_v31, %v330_v30  ;;  %v1181_v31 = vunpack.c.l.bf16 %v2143_v8  ;;  %v1228_v41 = vrot.slane %v1180_v17, 1  ;;  %v2151_v8 = vld [vmem:[%s4038_s0 + $0x64] sm:$0x3]  ;;  %v2160_v17 = vld [vmem:[%s4038_s0 + $0x68] sm:$0x7] }
  0x48   :  { %2481 = vrot.lane.b32.xlu1 %v2480_v40, %s2748_s5  ;;  %v155_v40 = vunpack.c.l.bf16 %v2031_v24  ;;  %v2034_v24 = vld [vmem:[%s4038_s0 + $0x10] sm:$0x6] }
  0x49   :  { %2476 = vrot.lane.b32.xlu0 %v2475_v44, %s2748_s5  ;;  %v153_v44 = vunpack.c.l.bf16 %v2029_v27  ;;  %v2035_v27 = vld [vmem:[%s4038_s0 + $0x14] sm:$0x6]  ;;  %v158_v30 = vunpack.c.l.bf16 %v2034_v24  ;;  %v3279_v24 = vld [vmem:[%s4039_s1 + $0xb8] sm:$0xff]  }
  0x4a   :  { %v403_v57 = vrot.slane %v155_v40, 1  ;;  %v159_v34 = vunpack.c.l.bf16 %v2035_v27  ;;  %v1227_v40 = vrot.slane %v1179_v10, 1  ;;  %v3243_v10 = vld [vmem:[%s4038_s0 + $0x84] sm:$0x3]  ;;  %v2166_v27 = vld [vmem:[%s4038_s0 + $0x88] sm:$0x7]  ;;  %2279 = vmatprep.subr.bf16.mxu0 %v3279_v24 }
  0x4b   :  { %v401_v60 = vrot.slane %v153_v44, 1  ;;  %v438_v38 = vrot.slane %v158_v30, 2  ;;  %v1225_v44 = vrot.slane %v1177_v19, 1  ;;  %v1189_v19 = vunpack.c.l.bf16 %v2151_v8  ;;  %v3299_v30 = vld [vmem:[%s4038_s0 + $0x30] sm:$0x3] }
  0x4c   :  { %2491 = vrot.lane.b32.xlu1 %v2490_v51, %s2742_s15  ;;  %v2749_v51 = vmov 0   ;;  %v439_v43 = vrot.slane %v159_v34, 2  ;;  %v2570_v58 = vpack.i.bf16 %v1228_v41, %v1227_v40  ;;  %v1198_v34 = vunpack.c.l.bf16 %v2160_v17  ;;  %v3315_v41 = vld [vmem:[%s4038_s0 + $0x50] sm:$0x3]  ;;  %v2174_v8 = vld [vmem:[%s4038_s0 + $0x88] sm:$0x6] }
  0x4d   :  { %2486 = vrot.lane.b32.xlu0 %v2485_v56, %s2742_s15  ;;  %1066 = vmatprep.subr.bf16.mxu1 %v2749_v51  ;;  %v402_v56 = vrot.slane %v154_v39, 1  ;;  %v2545_v14 = vpack.i.bf16 %v401_v60, %v400_v59  ;;  %v2555_v39 = vpack.i.bf16 %v1222_v16, %v1221_v15  ;;  %v2162_v15 = vld [vmem:[%s4038_s0 + $0x70] sm:$0x7]  ;;  %v2159_v16 = vld [vmem:[%s4038_s0 + $0x64] sm:$0x7] }
  0x4e   :  { %1067 = vmatpush1.bf16.msra.mxu1 %v2720_v28  ;;  %v156_v28 = vunpack.c.l.bf16 %v2032_v22  ;;  %v2043_v54 = vcombine.low %v438_v38, %v439_v43  ;;  %v2156_v22 = vld [vmem:[%s4038_s0 + $0x80] sm:$0x3]  ;;  %v1200_v32 = vunpack.c.l.bf16 %v2162_v15  ;;  %v1196_v38 = vunpack.c.l.bf16 %v2158_v11 }
  0x4f   :  { %1068 = vmatprep.subr.bf16.mxu1 %v2749_v51  ;;  %v2550_v9 = vpack.i.bf16 %v403_v57, %v402_v56  ;;  %v2726_v57 = vld [vmem:[%s4039_s1 + $0x10] sm:$0xff]   ;;  %v1194_v40 = vunpack.c.l.bf16 %v2156_v22  ;;  %v2172_v15 = vld [vmem:[%s4038_s0 + $0x80] sm:$0x6] }
  0x50   :  { %2501 = vrot.lane.b32.xlu1 %v2500_v2, %s2743_s14  ;;  %v2540_v2 = vpack.i.bf16 %v147_v47, %v146_v42  ;;  %v436_v36 = vrot.slane %v156_v28, 2  ;;  %v2147_v42 = vld [vmem:[%s4038_s0 + $0x78] sm:$0x6]  ;;  %v2148_v47 = vld [vmem:[%s4038_s0 + $0x7c] sm:$0x6] }
  0x51   :  { %2496 = vrot.lane.b32.xlu0 %v2495_v7, %s2743_s14  ;;  %v2146_v7 = vld [vmem:[%s4038_s0 + $0x6c] sm:$0x6]  ;;  %v1185_v61 = vunpack.c.l.bf16 %v2147_v42  ;;  %v1186_v62 = vunpack.c.l.bf16 %v2148_v47  ;;  %v2163_v28 = vld [vmem:[%s4038_s0 + $0x7c] sm:$0x7]  ;;  %v2170_v47 = vld [vmem:[%s4038_s0 + $0x70] sm:$0x6] }
  0x52   :  { %1069 = vmatpush1.bf16.msra.mxu1 %v2722_v45  ;;  %v1184_v25 = vunpack.c.l.bf16 %v2146_v7  ;;  %v1226_v45 = vrot.slane %v1178_v20, 1  ;;  %v1192_v7 = vunpack.c.l.bf16 %v2154_v0  ;;  %v1208_v11 = vunpack.c.l.bf16 %v2170_v47  ;;  %v3423_v47 = vld [vmem:[%s4038_s0 + $0x3c] sm:$0x3] }
  0x53   :  { %1070 = vmatprep.subr.bf16.mxu1 %v2749_v51  ;;  %v1265_v4 = vrot.slane %v1185_v61, 2  ;;  %v2206_v61 = vld [vmem:[%s4038_s0 + $0x9c] sm:$0x7] }
  0x54   :  { %2511 = vrot.lane.b32.xlu1 %v2510_v12, %s2744_s28  ;;  %v2149_v12 = vld [vmem:[%s4038_s0 + $0x80] sm:$0x6]  ;;  %v1264_v50 = vrot.slane %v1184_v25, 2  ;;  %v2565_v60 = vpack.i.bf16 %v1226_v45, %v1225_v44  ;;  %v2600_v25 = vpack.i.bf16 %v1192_v7, %v1191_v6  ;;  %v1204_v44 = vunpack.c.l.bf16 %v2166_v27  ;;  %v2209_v27 = vld [vmem:[%s4038_s0 + $0xb0] sm:$0x7] }
  0x55   :  { %2506 = vrot.lane.b32.xlu0 %v2505_v13, %s2744_s28  ;;  %v2150_v13 = vld [vmem:[%s4038_s0 + $0x84] sm:$0x6]  ;;  %v1201_v45 = vunpack.c.l.bf16 %v2163_v28  ;;  %v2210_v28 = vld [vmem:[%s4038_s0 + $0xb4] sm:$0x7] }
  0x56   :  { %1071 = vmatpush1.bf16.msra.mxu1 %v2723_v1  ;;  %v1188_v35 = vunpack.c.l.bf16 %v2150_v13  ;;  %v2727_v1 = vld [vmem:[%s4039_s1 + $0x8] sm:$0xff]  }
  0x57   :  { %1072 = vmatprep.subr.bf16.mxu1 %v2749_v51  ;;  %v2161_v13 = vld [vmem:[%s4038_s0 + $0x6c] sm:$0x7]  ;;  %v3362_v6 = vrot.slane %v1201_v45, 1 }
  0x58   :  { %2521 = vrot.lane.b32.xlu1 %v2520_v29, %s2745_s6  ;;  %v157_v29 = vunpack.c.l.bf16 %v2033_v23  ;;  %v1268_v56 = vrot.slane %v1188_v35, 2  ;;  %v2728_v23 = vld [vmem:[%s4039_s1] sm:$0xff]  }
  0x59   :  { %2516 = vrot.lane.b32.xlu0 %v2515_v33, %s2745_s6  ;;  %v1187_v33 = vunpack.c.l.bf16 %v2149_v12  ;;  %v2155_v12 = vld [vmem:[%s4038_s0 + $0x7c] sm:$0x3]  ;;  %v2164_v35 = vld [vmem:[%s4038_s0 + $0x80] sm:$0x7] }
  0x5a   :  { %v437_v37 = vrot.slane %v157_v29, 2  ;;  %1073 = vmatpush1.bf16.msra.mxu1 %v2724_v26  ;;  %v2165_v26 = vld [vmem:[%s4038_s0 + $0x84] sm:$0x7]  ;;  %v3294_v29 = vld [vmem:[%s4038_s0 + $0x4c] sm:$0x3] }
  0x5b   :  { %1074 = vmatprep.subr.bf16.mxu1 %v2749_v51  ;;  %v1267_v55 = vrot.slane %v1187_v33, 2  ;;  %v1197_v33 = vunpack.c.l.bf16 %v2159_v16  ;;  %v1203_v43 = vunpack.c.l.bf16 %v2165_v26  ;;  %v1212_v26 = vunpack.c.l.bf16 %v2174_v8 }
  0x5c   :  { %2531 = vrot.lane.b32.xlu1 %v2530_v46, %s2746_s27  ;;  %v1263_v46 = vrot.slane %v1183_v21, 2  ;;  %v2041_v49 = vcombine.low %v436_v36, %v437_v37  ;;  %v3268_v21 = vld [vmem:[%s4038_s0 + $0x48] sm:$0x3]  ;;  %v3309_v36 = vld [vmem:[%s4038_s0 + $0x34] sm:$0x3]  ;;  %v1195_v37 = vunpack.c.l.bf16 %v3243_v10 }
  0x5d   :  { %2526 = vrot.lane.b32.xlu0 %v2525_v52, %s2746_s27  ;;  %v1261_v52 = vrot.slane %v1181_v31, 2  ;;  %v1199_v31 = vunpack.c.l.bf16 %v2161_v13 }
  0x5e   :  { %v540_v59 = vpack.c.bf16 %v2043_v54, %v2041_v49  ;;  %1075 = vmatpush1.bf16.msra.mxu1 %v2725_v48  ;;  %v2729_v48 = vld [vmem:[%s4039_s1 + $0x40] sm:$0xff]   ;;  %v616_v49 = vunpack.c.l.bf16 %v3268_v21  ;;  %v2610_v63 = vpack.i.bf16 %v1196_v38, %v1195_v37  ;;  %v2207_v37 = vld [vmem:[%s4038_s0 + $0xa8] sm:$0x7] }
  0x5f   :  { %1076 = vmatprep.subr.bf16.mxu1 %v2749_v51  ;;  %v2575_v3 = vpack.i.bf16 %v1262_v53, %v1261_v52  ;;  %v612_v52 = vunpack.c.l.bf16 %v3299_v30  ;;  %v1202_v53 = vunpack.c.l.bf16 %v2164_v35  ;;  %v2167_v54 = vld [vmem:[%s4038_s0 + $0x64] sm:$0x6]  ;;  %v1210_v35 = vunpack.c.l.bf16 %v2172_v15 }
  0x60   :  { %2541 = vrot.lane.b32.xlu1 %v2540_v2, %s2747_s22  ;;  %2125 = vmatprep.mubr.msk.bf16.mxu1 %vm444_vm0, %v540_v59  ;;  %v2580_v2 = vpack.i.bf16 %v1264_v50, %v1263_v46  ;;  %v2169_v46 = vld [vmem:[%s4038_s0 + $0x6c] sm:$0x6]  ;;  %v617_v50 = vunpack.c.l.bf16 %v3294_v29  ;;  %v3340_v59 = vrot.slane %v1197_v33, 1 }
  0x61   :  { %2536 = vrot.lane.b32.xlu0 %v2535_v5, %s2747_s22  ;;  %v1266_v5 = vrot.slane %v1186_v62, 2  ;;  %v613_v62 = vunpack.c.l.bf16 %v3309_v36  ;;  %v1207_v7 = vunpack.c.l.bf16 %v2169_v46  ;;  %v3369_v10 = vrot.slane %v1202_v53, 1  ;;  %v3418_v46 = vld [vmem:[%s4038_s0 + $0x38] sm:$0x3] }
  0x62   :  { %1077 = vmatpush1.bf16.msra.mxu1 %v2726_v57  ;;  %v1335_v57 = vrot.slane %v1199_v31, 1  ;;  %v3391_v31 = vld [vmem:[%s4038_s0 + $0x54] sm:$0x3] }
  0x63   :  { %1078 = vmatprep.subr.bf16.mxu1 %v2749_v51  ;;  %v3395_v33 = vrot.slane %v1207_v7, 2  ;;  %v4043_v36 = vunpack.c.l.bf16 %v3391_v31 }
  0x64   :  { %2551 = vrot.lane.b32.xlu1 %v2550_v9, %s2748_s5  ;;  %v2152_v9 = vld [vmem:[%s4038_s0 + $0x68] sm:$0x3] }
  0x65   :  { %2546 = vrot.lane.b32.xlu0 %v2545_v14, %s2748_s5  ;;  %v2590_v14 = vpack.i.bf16 %v1268_v56, %v1267_v55  ;;  %v1190_v20 = vunpack.c.l.bf16 %v2152_v9  ;;  %v2168_v55 = vld [vmem:[%s4038_s0 + $0x68] sm:$0x6]  ;;  %v2205_v56 = vld [vmem:[%s4038_s0 + $0x98] sm:$0x7] }
  0x66   :  { %1079 = vmatpush1.bf16.msra.mxu1 %v2727_v1  ;;  %v618_v1 = vunpack.c.l.bf16 %v3315_v41  ;;  %v1206_v13 = vunpack.c.l.bf16 %v2168_v55  ;;  %v1620_v55 = vunpack.c.l.bf16 %v2210_v28  ;;  %v2226_v28 = vld [vmem:[%s4038_s0 + $0xb8] sm:$0x7] }
  0x67   :  { %1080 = vmatprep.subr.bf16.mxu1 %v2749_v51  ;;  %v2595_v42 = vpack.i.bf16 %v1190_v20, %v1189_v19  ;;  %v1615_v19 = vunpack.c.l.bf16 %v2205_v56  ;;  %v1616_v20 = vunpack.c.l.bf16 %v2206_v61 }
  0x68   :  { %2561 = vrot.lane.b32.xlu1 %v2560_v18, %s2742_s15  ;;  %v2585_v18 = vpack.i.bf16 %v1266_v5, %v1265_v4  ;;  %v3358_v4 = vrot.slane %v1203_v43, 1  ;;  %v3360_v5 = vrot.slane %v1204_v44, 1  ;;  %v3408_v43 = vrot.slane %v1206_v13, 2  ;;  %v2208_v44 = vld [vmem:[%s4038_s0 + $0xac] sm:$0x7] }
  0x69   :  { %2556 = vrot.lane.b32.xlu0 %v2555_v39, %s2742_s15  ;;  %v1193_v39 = vunpack.c.l.bf16 %v2155_v12  ;;  %v1205_v12 = vunpack.c.l.bf16 %v2167_v54  ;;  %v3427_v53 = vrot.slane %v1616_v20, 1  ;;  %v1619_v54 = vunpack.c.l.bf16 %v2209_v27  ;;  %v2220_v20 = vld [vmem:[%s4038_s0 + $0x98] sm:$0x7]  ;;  %v2225_v27 = vld [vmem:[%s4038_s0 + $0xb4] sm:$0x7] }
  0x6a   :  { %1081 = vmatpush1.bf16.msra.mxu1 %v2728_v23 }
  0x6b   :  { %1096 = vmatprep.subr.bf16.mxu1 %v2749_v51  ;;  %v2605_v0 = vpack.i.bf16 %v1194_v40, %v1193_v39  ;;  %v2203_v51 = vld [vmem:[%s4038_s0 + $0x90] sm:$0x7]  ;;  %v2625_v39 = vpack.i.bf16 %v3369_v10, %v3362_v6  ;;  %v3404_v40 = vrot.slane %v1208_v11, 2  ;;  %v2212_v10 = vld [vmem:[%s4038_s0 + $0x98] sm:$0x3] }
  0x6c   :  { %2571 = vrot.lane.b32.xlu1 %v2570_v58, %s2742_s15  ;;  %v1336_v58 = vrot.slane %v1200_v32, 1  ;;  %v1613_v22 = vunpack.c.l.bf16 %v2203_v51  ;;  %v2630_v32 = vpack.i.bf16 %v3360_v5, %v3358_v4  ;;  %v1618_v51 = vunpack.c.l.bf16 %v2208_v44  ;;  %v2221_v11 = vld [vmem:[%s4038_s0 + $0x9c] sm:$0x7] }
  0x6d   :  { %2566 = vrot.lane.b32.xlu0 %v2565_v60, %s2742_s15  ;;  %v1334_v60 = vrot.slane %v1198_v34, 1  ;;  %v614_v5 = vunpack.c.l.bf16 %v3418_v46  ;;  %v2640_v8 = vpack.i.bf16 %v3404_v40, %v3395_v33  ;;  %v2217_v40 = vld [vmem:[%s4038_s0 + $0xb4] sm:$0x3]  ;;  %v1622_v44 = vunpack.c.l.bf16 %v2212_v10 }
  0x6e   :  { %1097 = vmatpush2.bf16.msra.mxu1 %v2729_v48  ;;  %v2620_v17 = vpack.i.bf16 %v1336_v58, %v1335_v57  ;;  %v3425_v48 = vrot.slane %v1615_v19, 1  ;;  %v3430_v56 = vrot.slane %v1613_v22, 1  ;;  %v2219_v19 = vld [vmem:[%s4038_s0 + $0x94] sm:$0x7]  ;;  %v1627_v6 = vunpack.c.l.bf16 %v2217_v40 }
  0x70   :  { %2581 = vrot.lane.b32.xlu1 %v2580_v2, %s2743_s14  ;;  %v2204_v2 = vld [vmem:[%s4038_s0 + $0x94] sm:$0x7]  ;;  %v2650_v15 = vpack.i.bf16 %v3427_v53, %v3425_v48  ;;  %v2215_v48 = vld [vmem:[%s4038_s0 + $0xac] sm:$0x3]  ;;  %v2216_v53 = vld [vmem:[%s4038_s0 + $0xb0] sm:$0x3] }
  0x71   :  { %2576 = vrot.lane.b32.xlu0 %v2575_v3, %s2743_s14  ;;  %v2173_v3 = vld [vmem:[%s4038_s0 + $0x84] sm:$0x6]  ;;  %v1614_v23 = vunpack.c.l.bf16 %v2204_v2  ;;  %v2214_v2 = vld [vmem:[%s4038_s0 + $0xa0] sm:$0x3] }
  0x73   :  { %v3432_v57 = vrot.slane %v1614_v23, 1 }
  0x74   :  { %2591 = vrot.lane.b32.xlu1 %v2590_v14, %s2743_s14  ;;  %v2171_v14 = vld [vmem:[%s4038_s0 + $0x7c] sm:$0x6] }
  0x75   :  { %2586 = vrot.lane.b32.xlu0 %v2585_v18, %s2743_s14  ;;  %v2615_v18 = vpack.i.bf16 %v1334_v60, %v3340_v59  ;;  %v1209_v34 = vunpack.c.l.bf16 %v2171_v14  ;;  %v3436_v59 = vrot.slane %v1212_v26, 2  ;;  %v2213_v60 = vld [vmem:[%s4038_s0 + $0x9c] sm:$0x3]  ;;  %v2645_v22 = vpack.i.bf16 %v3432_v57, %v3430_v56 }
  0x76   :  { %v1624_v26 = vunpack.c.l.bf16 %v2214_v2  ;;  %v1629_v56 = vunpack.c.l.bf16 %v2219_v19  ;;  %v1625_v19 = vunpack.c.l.bf16 %v2215_v48 }
  0x77   :  { %v3442_v61 = vrot.slane %v1209_v34, 2 }
  0x78   :  { %2601 = vrot.lane.b32.xlu1 %v2600_v25, %s2744_s28  ;;  %v1211_v25 = vunpack.c.l.bf16 %v2173_v3  ;;  %v2211_v3 = vld [vmem:[%s4038_s0 + $0x94] sm:$0x3] }
  0x79   :  { %2596 = vrot.lane.b32.xlu0 %v2595_v42, %s2744_s28  ;;  %v3406_v42 = vrot.slane %v1205_v12, 2  ;;  %v2222_v12 = vld [vmem:[%s4038_s0 + $0xa0] sm:$0x7] }
  0x7a   :  { %v3367_v9 = vpop.permute.xlu1 %2331  ;;  %v3434_v58 = vrot.slane %v1211_v25, 2  ;;  %v1623_v25 = vunpack.c.l.bf16 %v2213_v60  ;;  %v1630_v60 = vunpack.c.l.bf16 %v2220_v20  ;;  %v1626_v20 = vunpack.c.l.bf16 %v2216_v53 }
  0x7b   :  { %v3377_v16 = vpop.permute.xlu0 %2316  ;;  %v2635_v14 = vpack.i.bf16 %v3408_v43, %v3406_v42  ;;  %v2224_v42 = vld [vmem:[%s4038_s0 + $0xb0] sm:$0x7]  ;;  %v2334_v48 = vunpack.i.h.bf16 %v3367_v9 }
  0x7c   :  { %2611 = vrot.lane.b32.xlu1 %v2610_v63, %s2744_s28  ;;  %v3444_v63 = vrot.slane %v1210_v35, 2  ;;  %v2660_v23 = vpack.i.bf16 %v3436_v59, %v3434_v58  ;;  %v3503_v35 = vrot.slane %v1618_v51, 1  ;;  %v1636_v51 = vunpack.c.l.bf16 %v2226_v28 }
  0x7d   :  { %2606 = vrot.lane.b32.xlu0 %v2605_v0, %s2744_s28  ;;  %v1617_v0 = vunpack.c.l.bf16 %v2207_v37  ;;  %v1621_v37 = vunpack.c.l.bf16 %v2211_v3  ;;  %v3527_v10 = vpack.i.bf16 %v1624_v26, %v1623_v25  ;;  %v1634_v4 = vunpack.c.l.bf16 %v2224_v42 }
  0x7e   :  { %v3400_v38 = vpop.permute.xlu1 %2336  ;;  %v2655_v33 = vpack.i.bf16 %v3444_v63, %v3442_v61  ;;  %v3540_v25 = vrot.slane %v1629_v56, 1  ;;  %v3544_v40 = vrot.slane %v1630_v60, 1  ;;  %v3548_v42 = vrot.slane %v1636_v51, 1 }
  0x7f   :  { %v3413_v45 = vpop.permute.xlu0 %2321  ;;  %v3501_v34 = vrot.slane %v1617_v0, 1  ;;  %v1635_v0 = vunpack.c.l.bf16 %v2225_v27  ;;  %v3534_v28 = vpack.i.bf16 %v1622_v44, %v1621_v37  ;;  %v2333_v37 = vunpack.i.l.bf16 %v3367_v9  ;;  %v3568_v9 = vld [vmem:[%s4039_s1 + $0xf0] sm:$0xff]  }
  0x80   :  { %2621 = vrot.lane.b32.xlu1 %v2620_v17, %s2745_s6  ;;  %v3474_v17 = vrot.slane %v1619_v54, 1  ;;  %v1631_v54 = vunpack.c.l.bf16 %v2221_v11  ;;  %v2318_v44 = vunpack.i.l.bf16 %v3377_v16  ;;  %v3556_v53 = vrot.slane %v1634_v4, 1  ;;  %2295 = vmatprep.subr.bf16.mxu1 %v3568_v9 }
  0x81   :  { %2616 = vrot.lane.b32.xlu0 %v2615_v18, %s2745_s6  ;;  %v3476_v18 = vrot.slane %v1620_v55, 1  ;;  %v1632_v55 = vunpack.c.l.bf16 %v2222_v12  ;;  %v2665_v11 = vpack.i.bf16 %v3503_v35, %v3501_v34  ;;  %v3563_v60 = vpack.i.bf16 %v1626_v20, %v1625_v19 }
  0x82   :  { %v3455_v7 = vpop.permute.xlu1 %2341  ;;  %v2338_v4 = vunpack.i.l.bf16 %v3400_v38 }
  0x83   :  { %v3468_v13 = vpop.permute.xlu0 %2326  ;;  %v2670_v3 = vpack.i.bf16 %v3476_v18, %v3474_v17 }
  0x84   :  { %2631 = vrot.lane.b32.xlu1 %v2630_v32, %s2745_s6  ;;  %v2223_v32 = vld [vmem:[%s4038_s0 + $0xac] sm:$0x7]  ;;  %v2329_v30 = vunpack.i.h.bf16 %v3468_v13 }
  0x85   :  { %2626 = vrot.lane.b32.xlu0 %v2625_v39, %s2745_s6  ;;  %v2218_v39 = vld [vmem:[%s4038_s0 + $0xb8] sm:$0x3]  ;;  %v1633_v2 = vunpack.c.l.bf16 %v2223_v32  ;;  %v3538_v32 = vrot.slane %v1632_v55, 1  ;;  %v2323_v55 = vunpack.i.l.bf16 %v3413_v45 }
  0x86   :  { %v3511_v43 = vpop.permute.xlu1 %2351  ;;  %v1628_v12 = vunpack.c.l.bf16 %v2218_v39 }
  0x87   :  { %v3522_v57 = vpop.permute.xlu0 %2346  ;;  %v3550_v39 = vrot.slane %v1633_v2, 1  ;;  %v846_v29 = vsel %vm444_vm0, %v614_v5, %v2323_v55  ;;  %v2354_v61 = vunpack.i.h.bf16 %v3511_v43  ;;  %v2353_v41 = vunpack.i.l.bf16 %v3511_v43 }
  0x88   :  { %2641 = vrot.lane.b32.xlu1 %v2640_v8, %s2746_s27  ;;  %v3536_v8 = vrot.slane %v1631_v54, 1  ;;  %v2319_v54 = vunpack.i.h.bf16 %v3377_v16  ;;  %v3561_v56 = vpack.i.bf16 %v1628_v12, %v1627_v6  ;;  %v2324_v16 = vunpack.i.h.bf16 %v3413_v45 }
  0x89   :  { %2636 = vrot.lane.b32.xlu0 %v2635_v14, %s2746_s27  ;;  %v3546_v14 = vrot.slane %v1635_v0, 1  ;;  %v2343_v0 = vunpack.i.l.bf16 %v3455_v7  ;;  %v2695_v12 = vpack.i.bf16 %v3544_v40, %v3540_v25  ;;  %v849_v45 = vsel %vm444_vm0, %v617_v50, %v2334_v48  ;;  %v2731_v40 = vld [vmem:[%s4039_s1 + $0xb0] sm:$0xff]  }
  0x8a   :  { %v3532_v27 = vpop.permute.xlu1 %2361  ;;  %v2700_v2 = vpack.i.bf16 %v3538_v32, %v3536_v8  ;;  %v2705_v20 = vpack.i.bf16 %v3556_v53, %v3550_v39  ;;  %v845_v21 = vsel %vm444_vm0, %v613_v62, %v2319_v54  ;;  %v850_v50 = vsel %vm444_vm0, %v618_v1, %v2338_v4  ;;  %v2038_v39 = vld [vmem:[%s4038_s0 + $0x28] sm:$0x6]  ;;  %v2039_v53 = vld [vmem:[%s4038_s0 + $0x2c] sm:$0x6] }
  0x8b   :  { %v3542_v26 = vpop.permute.xlu0 %2356  ;;  %v2710_v19 = vpack.i.bf16 %v3548_v42, %v3546_v14  ;;  %v4044_v62 = vunpack.c.l.bf16 %v3423_v47  ;;  %v854_v58 = vsel %vm453_vm1, %v846_v29, %v2343_v0  ;;  %v2348_v1 = vunpack.i.l.bf16 %v3522_v57  ;;  %v2037_v14 = vld [vmem:[%s4038_s0 + $0x24] sm:$0x6] }
  0x8c   :  { %2651 = vrot.lane.b32.xlu1 %v2650_v15, %s2742_s15  ;;  %v2339_v15 = vunpack.i.h.bf16 %v3400_v38  ;;  %v848_v38 = vsel %vm444_vm0, %v616_v49, %v2333_v37  ;;  %v2328_v49 = vunpack.i.l.bf16 %v3468_v13  ;;  %v2349_v31 = vunpack.i.h.bf16 %v3522_v57 }
  0x8d   :  { %2646 = vrot.lane.b32.xlu0 %v2645_v22, %s2742_s15  ;;  %v2344_v22 = vunpack.i.h.bf16 %v3455_v7  ;;  %v844_v7 = vsel %vm444_vm0, %v612_v52, %v2318_v44  ;;  %v847_v46 = vsel %vm444_vm0, %v4044_v62, %v2324_v16  ;;  %v2364_v13 = vunpack.i.h.bf16 %v3532_v27 }
  0x8e   :  { %v2372_v51 = vpop.permute.xlu1 %2371  ;;  %v851_v52 = vsel %vm444_vm0, %v4043_v36, %v2339_v15  ;;  %v2363_v47 = vunpack.i.l.bf16 %v3532_v27  ;;  %v853_v43 = vsel %vm453_vm1, %v845_v21, %v2329_v30  ;;  %v2359_v48 = vunpack.i.h.bf16 %v3542_v26 }
  0x8f   :  { %v3575_v6 = vpop.permute.xlu0 %2366  ;;  %v855_v5 = vsel %vm453_vm1, %v847_v46, %v2344_v22  ;;  %v2373_v37 = vunpack.i.l.bf16 %v2372_v51  ;;  %v2374_v57 = vunpack.i.h.bf16 %v2372_v51  ;;  %v858_v17 = vsel %vm453_vm1, %v850_v50, %v2353_v41 }
  0x90   :  { %2661 = vrot.lane.b32.xlu1 %v2660_v23, %s2746_s27  ;;  %v2358_v23 = vunpack.i.l.bf16 %v3542_v26  ;;  %v2368_v27 = vunpack.i.l.bf16 %v3575_v6  ;;  %v859_v18 = vsel %vm453_vm1, %v851_v52, %v2354_v61  ;;  %v857_v4 = vsel %vm453_vm1, %v849_v45, %v2349_v31 }
  0x91   :  { %2656 = vrot.lane.b32.xlu0 %v2655_v33, %s2746_s27  ;;  %v852_v33 = vsel %vm453_vm1, %v844_v7, %v2328_v49  ;;  %v862_v16 = vsel %vm462_vm2, %v854_v58, %v2363_v47  ;;  %v863_v34 = vsel %vm462_vm2, %v855_v5, %v2364_v13  ;;  %v866_v0 = vsel %vm462_vm2, %v858_v17, %v2373_v37 }
  0x92   :  { %v2382_v59 = vpop.permute.xlu1 %2381  ;;  %v860_v35 = vsel %vm462_vm2, %v852_v33, %v2358_v23  ;;  %v2369_v51 = vunpack.i.h.bf16 %v3575_v6 }
  0x93   :  { %v2377_v63 = vpop.permute.xlu0 %2376  ;;  %v2384_v44 = vunpack.i.h.bf16 %v2382_v59  ;;  %v2383_v54 = vunpack.i.l.bf16 %v2382_v59 }
  0x94   :  { %2671 = vrot.lane.b32.xlu1 %v2670_v3, %s2742_s15  ;;  %v856_v3 = vsel %vm453_vm1, %v848_v38, %v2348_v1  ;;  %v2378_v15 = vunpack.i.l.bf16 %v2377_v63  ;;  %v2379_v22 = vunpack.i.h.bf16 %v2377_v63  ;;  %v867_v38 = vsel %vm462_vm2, %v859_v18, %v2374_v57 }
  0x95   :  { %2666 = vrot.lane.b32.xlu0 %v2665_v11, %s2742_s15  ;;  %v861_v11 = vsel %vm462_vm2, %v853_v43, %v2359_v48  ;;  %v864_v45 = vsel %vm462_vm2, %v856_v3, %v2368_v27  ;;  %v870_v7 = vsel %vm471_vm3, %v862_v16, %v2383_v54  ;;  %v871_v21 = vsel %vm471_vm3, %v863_v34, %v2384_v44 }
  0x96   :  { %v2392_v55 = vpop.permute.xlu1 %2391  ;;  %v868_v29 = vsel %vm471_vm3, %v860_v35, %v2378_v15  ;;  %v865_v61 = vsel %vm462_vm2, %v857_v4, %v2369_v51  ;;  %v2732_v15 = vld [vmem:[%s4039_s1 + $0xa8] sm:$0xff]   ;;  %v162_v34 = vunpack.c.l.bf16 %v2038_v39  ;;  %v163_v35 = vunpack.c.l.bf16 %v2039_v53 }
  0x97   :  { %v2387_v26 = vpop.permute.xlu0 %2386  ;;  %v2393_v30 = vunpack.i.l.bf16 %v2392_v55  ;;  %v2394_v6 = vunpack.i.h.bf16 %v2392_v55  ;;  %v21_v4 = vld [vmem:[%s4038_s0 + $0xc] sm:$0x3] }
  0x98   :  { %2681 = vrot.lane.b32.xlu1 %v3527_v10, %s2743_s14  ;;  %v2388_v52 = vunpack.i.l.bf16 %v2387_v26  ;;  %v2389_v58 = vunpack.i.h.bf16 %v2387_v26  ;;  %v20_v26 = vld [vmem:[%s4038_s0 + $0x8] sm:$0x3] }
  0x99   :  { %2676 = vrot.lane.b32.xlu0 %v3534_v28, %s2743_s14  ;;  %v869_v28 = vsel %vm471_vm3, %v861_v11, %v2379_v22  ;;  %v94_v51 = vunpack.c.l.bf16 %v20_v26  ;;  %v95_v22 = vunpack.c.l.bf16 %v21_v4 }
  0x9a   :  { %v2402_v10 = vpop.permute.xlu1 %2401  ;;  %v872_v43 = vsel %vm471_vm3, %v864_v45, %v2388_v52  ;;  %v873_v57 = vsel %vm471_vm3, %v865_v61, %v2389_v58 }
  0x9b   :  { %v2404_v49 = vunpack.i.h.bf16 %v2402_v10  ;;  %v2403_v50 = vunpack.i.l.bf16 %v2402_v10  ;;  %v2397_v36 = vpop.permute.xlu0 %2396 }
  0x9c   :  { %v2399_v62 = vunpack.i.h.bf16 %v2397_v36  ;;  %v2398_v46 = vunpack.i.l.bf16 %v2397_v36  ;;  %2691 = vrot.lane.b32.xlu1 %v3561_v56, %s2743_s14  ;;  %v874_v56 = vsel %vm471_vm3, %v866_v0, %v2393_v30  ;;  %v19_v0 = vld [vmem:[%s4038_s0 + $0x4] sm:$0x3]  ;;  %v3734_v30 = vrot.slane %v162_v34, 2 }
  0x9d   :  { %2686 = vrot.lane.b32.xlu0 %v3563_v60, %s2743_s14  ;;  %v878_v59 = vsel %vm480_vm4, %v870_v7, %v2403_v50  ;;  %v879_v5 = vsel %vm480_vm4, %v871_v21, %v2404_v49  ;;  %v875_v60 = vsel %vm471_vm3, %v867_v38, %v2394_v6  ;;  %v2733_v7 = vld [vmem:[%s4039_s1 + $0xa0] sm:$0xff]   ;;  %v3736_v49 = vrot.slane %v163_v35, 2 }
  0x9e   :  { %v2412_v41 = vpop.permute.xlu1 %2411  ;;  %v876_v1 = vsel %vm480_vm4, %v868_v29, %v2398_v46  ;;  %v877_v63 = vsel %vm480_vm4, %v869_v28, %v2399_v62  ;;  %v893_v31 = vcombine.low %v878_v59, %v879_v5  ;;  %v93_v52 = vunpack.c.l.bf16 %v19_v0  ;;  %v2734_v5 = vld [vmem:[%s4039_s1 + $0x98] sm:$0xff]  }
  0x9f   :  { %v2414_v13 = vunpack.i.h.bf16 %v2412_v41  ;;  %v2413_v47 = vunpack.i.l.bf16 %v2412_v41  ;;  %v2407_v23 = vpop.permute.xlu0 %2406  ;;  %v892_v33 = vcombine.low %v876_v1, %v877_v63 }
  0xa0   :  { %v2409_v48 = vunpack.i.h.bf16 %v2407_v23  ;;  %v2408_v37 = vunpack.i.l.bf16 %v2407_v23  ;;  %2701 = vrot.lane.b32.xlu1 %v2700_v2, %s2744_s28 }
  0xa1   :  { %v882_v27 = vsel %vm480_vm4, %v874_v56, %v2413_v47  ;;  %v883_v44 = vsel %vm480_vm4, %v875_v60, %v2414_v13  ;;  %2696 = vrot.lane.b32.xlu0 %v2695_v12, %s2744_s28  ;;  %v900_v54 = vpack.c.bf16 %v893_v31, %v892_v33  ;;  %v2036_v12 = vld [vmem:[%s4038_s0 + $0x20] sm:$0x6]  ;;  %v2047_v31 = vcombine.low %v3734_v30, %v3736_v49 }
  0xa2   :  { %v895_v55 = vcombine.low %v882_v27, %v883_v44  ;;  %v880_v17 = vsel %vm480_vm4, %v872_v43, %v2408_v37  ;;  %v881_v18 = vsel %vm480_vm4, %v873_v57, %v2409_v48  ;;  %v2422_v3 = vpop.permute.xlu1 %2421 }
  0xa3   :  { %v894_v8 = vcombine.low %v880_v17, %v881_v18  ;;  %2275 = vmatprep.mubr.msk.bf16.mxu0 %vm489_vm5, %v900_v54  ;;  %v2417_v32 = vpop.permute.xlu0 %2416  ;;  %v2424_v21 = vunpack.i.h.bf16 %v2422_v3  ;;  %v2423_v10 = vunpack.i.l.bf16 %v2422_v3 }
  0xa4   :  { %2711 = vrot.lane.b32.xlu1 %v2710_v19, %s2744_s28  ;;  %v160_v19 = vunpack.c.l.bf16 %v2036_v12  ;;  %v2419_v50 = vunpack.i.h.bf16 %v2417_v32  ;;  %v2418_v36 = vunpack.i.l.bf16 %v2417_v32 }
  0xa5   :  { %2706 = vrot.lane.b32.xlu0 %v2705_v20, %s2744_s28  ;;  %v901_v25 = vpack.c.bf16 %v895_v55, %v894_v8  ;;  %v161_v20 = vunpack.c.l.bf16 %v2037_v14  ;;  %v447_v61 = vsel %vm444_vm0, %v94_v51, %v2423_v10  ;;  %v448_v41 = vsel %vm444_vm0, %v95_v22, %v2424_v21  ;;  %v2735_v55 = vld [vmem:[%s4039_s1 + $0x90] sm:$0xff]  }
  0xa6   :  { %v2432_v2 = vpop.permute.xlu1 %2431  ;;  %v3727_v38 = vrot.slane %v160_v19, 2  ;;  %v446_v13 = vsel %vm444_vm0, %v93_v52, %v2419_v50 }
  0xa7   :  { %2276 = vmatmul.mubr.msk.bf16.vlgmr.msra.gmra.mxu0 %vm489_vm5, %v901_v25  ;;  %v2427_v42 = vpop.permute.xlu0 %2426  ;;  %v3729_v45 = vrot.slane %v161_v20, 2  ;;  %v2434_v46 = vunpack.i.h.bf16 %v2432_v2  ;;  %v2433_v28 = vunpack.i.l.bf16 %v2432_v2 }
  0xa8   :  { %2280 = vmatpush3.bf16.msra.mxu0 %v3279_v24  ;;  %v18_v24 = vld [vmem:[%s4038_s0] sm:$0x3]  ;;  %v2429_v58 = vunpack.i.h.bf16 %v2427_v42  ;;  %v2428_v59 = vunpack.i.l.bf16 %v2427_v42 }
  0xa9   :  { %2281 = vmatprep.subr.bf16.mxu0 %v2731_v40  ;;  %v92_v6 = vunpack.c.l.bf16 %v18_v24  ;;  %v2045_v63 = vcombine.low %v3727_v38, %v3729_v45  ;;  %v456_v60 = vsel %vm453_vm1, %v447_v61, %v2433_v28  ;;  %v457_v43 = vsel %vm453_vm1, %v448_v41, %v2434_v46  ;;  %v24_v38 = vld [vmem:[%s4038_s0 + $0x20] sm:$0x3]  ;;  %v25_v45 = vld [vmem:[%s4038_s0 + $0x24] sm:$0x3] }
  0xaa   :  { %v2442_v16 = vpop.permute.xlu1 %2441  ;;  %v455_v27 = vsel %vm453_vm1, %v446_v13, %v2429_v58 }
  0xab   :  { %v2437_v11 = vpop.permute.xlu0 %2436  ;;  %v445_v56 = vsel %vm444_vm0, %v92_v6, %v2418_v36  ;;  %v2444_v47 = vunpack.i.h.bf16 %v2442_v16  ;;  %v2443_v23 = vunpack.i.l.bf16 %v2442_v16  ;;  %v542_v61 = vpack.c.bf16 %v2047_v31, %v2045_v63  ;;  %v22_v31 = vld [vmem:[%s4038_s0 + $0x18] sm:$0x3] }
  0xac   :  { %2282 = vmatpush3.bf16.msra.mxu0 %v2731_v40  ;;  %v2439_v48 = vunpack.i.h.bf16 %v2437_v11  ;;  %v2438_v37 = vunpack.i.l.bf16 %v2437_v11  ;;  %v454_v57 = vsel %vm453_vm1, %v445_v56, %v2428_v59 }
  0xad   :  { %2283 = vmatprep.subr.bf16.mxu0 %v2732_v15  ;;  %v465_v25 = vsel %vm462_vm2, %v456_v60, %v2443_v23  ;;  %v466_v40 = vsel %vm462_vm2, %v457_v43, %v2444_v47  ;;  %v2738_v47 = vld [vmem:[%s4039_s1 + $0xe0] sm:$0xff]  }
  0xae   :  { %v2452_v29 = vpop.permute.xlu1 %2451  ;;  %v463_v42 = vsel %vm462_vm2, %v454_v57, %v2438_v37  ;;  %v464_v39 = vsel %vm462_vm2, %v455_v27, %v2439_v48  ;;  %v98_v48 = vunpack.c.l.bf16 %v24_v38  ;;  %v99_v37 = vunpack.c.l.bf16 %v25_v45 }
  0xaf   :  { %v2447_v62 = vpop.permute.xlu0 %2446  ;;  %v2454_v44 = vunpack.i.h.bf16 %v2452_v29  ;;  %v2453_v54 = vunpack.i.l.bf16 %v2452_v29 }
  0xb0   :  { %2284 = vmatpush3.bf16.msra.mxu0 %v2732_v15  ;;  %v2449_v17 = vunpack.i.h.bf16 %v2447_v62  ;;  %v2448_v18 = vunpack.i.l.bf16 %v2447_v62 }
  0xb1   :  { %2285 = vmatprep.subr.bf16.mxu0 %v2733_v7  ;;  %v474_v20 = vsel %vm471_vm3, %v465_v25, %v2453_v54  ;;  %v475_v15 = vsel %vm471_vm3, %v466_v40, %v2454_v44  ;;  %v96_v54 = vunpack.c.l.bf16 %v22_v31 }
  0xb2   :  { %v2462_v1 = vpop.permute.xlu1 %2461  ;;  %v472_v16 = vsel %vm471_vm3, %v463_v42, %v2448_v18  ;;  %v473_v34 = vsel %vm471_vm3, %v464_v39, %v2449_v17 }
  0xb3   :  { %v2457_v33 = vpop.permute.xlu0 %2456  ;;  %v2464_v3 = vunpack.i.h.bf16 %v2462_v1  ;;  %v2463_v8 = vunpack.i.l.bf16 %v2462_v1  ;;  %v2737_v1 = vld [vmem:[%s4039_s1 + $0xe8] sm:$0xff]  }
  0xb4   :  { %2286 = vmatpush3.bf16.msra.mxu0 %v2733_v7  ;;  %v2459_v2 = vunpack.i.h.bf16 %v2457_v33  ;;  %v2458_v12 = vunpack.i.l.bf16 %v2457_v33  ;;  %v2739_v33 = vld [vmem:[%s4039_s1 + $0xd8] sm:$0xff]  }
  0xb5   :  { %2287 = vmatprep.subr.bf16.mxu0 %v2734_v5  ;;  %v483_v35 = vsel %vm480_vm4, %v474_v20, %v2463_v8  ;;  %v484_v11 = vsel %vm480_vm4, %v475_v15, %v2464_v3 }
  0xb6   :  { %v2472_v32 = vpop.permute.xlu1 %2471  ;;  %v481_v0 = vsel %vm480_vm4, %v472_v16, %v2458_v12  ;;  %v482_v51 = vsel %vm480_vm4, %v473_v34, %v2459_v2 }
  0xb7   :  { %v2467_v14 = vpop.permute.xlu0 %2466  ;;  %v2474_v53 = vunpack.i.h.bf16 %v2472_v32  ;;  %v2473_v19 = vunpack.i.l.bf16 %v2472_v32 }
  0xb8   :  { %2288 = vmatpush3.bf16.msra.mxu0 %v2734_v5  ;;  %v2469_v26 = vunpack.i.h.bf16 %v2467_v14  ;;  %v2468_v4 = vunpack.i.l.bf16 %v2467_v14 }
  0xb9   :  { %2289 = vmatprep.subr.bf16.mxu0 %v2735_v55  ;;  %v492_v10 = vsel %vm489_vm5, %v483_v35, %v2473_v19  ;;  %v493_v29 = vsel %vm489_vm5, %v484_v11, %v2474_v53 }
  0xba   :  { %v2482_v24 = vpop.permute.xlu1 %2481  ;;  %v490_v50 = vsel %vm489_vm5, %v481_v0, %v2468_v4  ;;  %v491_v36 = vsel %vm489_vm5, %v482_v51, %v2469_v26 }
  0xbb   :  { %v2484_v22 = vunpack.i.h.bf16 %v2482_v24  ;;  %v2483_v7 = vunpack.i.l.bf16 %v2482_v24  ;;  %v2477_v21 = vpop.permute.xlu0 %2476 }
  0xbc   :  { %v2479_v30 = vunpack.i.h.bf16 %v2477_v21  ;;  %v2478_v49 = vunpack.i.l.bf16 %v2477_v21  ;;  %2290 = vmatpush3.bf16.msra.mxu0 %v2735_v55 }
  0xbd   :  { %v501_v6 = vsel %vm498_vm6, %v492_v10, %v2483_v7  ;;  %v502_v52 = vsel %vm498_vm6, %v493_v29, %v2484_v22 }
  0xbe   :  { %v499_v62 = vsel %vm498_vm6, %v490_v50, %v2478_v49  ;;  %v500_v46 = vsel %vm498_vm6, %v491_v36, %v2479_v30  ;;  %v2492_v28 = vpop.permute.xlu1 %2491  ;;  %v2042_v58 = vcombine.low %v501_v6, %v502_v52 }
  0xbf   :  { %v2487_v59 = vpop.permute.xlu0 %2486  ;;  %v2040_v5 = vcombine.low %v499_v62, %v500_v46  ;;  %v2494_v60 = vunpack.i.h.bf16 %v2492_v28  ;;  %v2493_v43 = vunpack.i.l.bf16 %v2492_v28 }
  0xc0   :  { %v2489_v27 = vunpack.i.h.bf16 %v2487_v59  ;;  %v2488_v44 = vunpack.i.l.bf16 %v2487_v59 }
  0xc1   :  { %v539_v41 = vpack.c.bf16 %v2042_v58, %v2040_v5  ;;  %v451_v25 = vsel %vm444_vm0, %v98_v48, %v2493_v43  ;;  %v452_v40 = vsel %vm444_vm0, %v99_v37, %v2494_v60 }
  0xc2   :  { %v2502_v56 = vpop.permute.xlu1 %2501  ;;  %v449_v12 = vsel %vm444_vm0, %v96_v54, %v2488_v44 }
  0xc3   :  { %v2497_v13 = vpop.permute.xlu0 %2496  ;;  %1099 = vmatmul.mubr.bf16.vlgmr.msra.gmra.mxu1 %v539_v41  ;;  %v2504_v18 = vunpack.i.h.bf16 %v2502_v56  ;;  %v2503_v3 = vunpack.i.l.bf16 %v2502_v56 }
  0xc4   :  { %2126 = vmatprep.mubr.msk.bf16.mxu1 %vm444_vm0, %v542_v61  ;;  %2296 = vmatpush3.bf16.msra.mxu1 %v3568_v9  ;;  %v23_v9 = vld [vmem:[%s4038_s0 + $0x1c] sm:$0x3]  ;;  %v2499_v8 = vunpack.i.h.bf16 %v2497_v13  ;;  %v2498_v32 = vunpack.i.l.bf16 %v2497_v13 }
  0xc5   :  { %2297 = vmatprep.subr.bf16.mxu1 %v2737_v1  ;;  %v97_v55 = vunpack.c.l.bf16 %v23_v9  ;;  %v460_v19 = vsel %vm453_vm1, %v451_v25, %v2503_v3  ;;  %v461_v20 = vsel %vm453_vm1, %v452_v40, %v2504_v18 }
  0xc6   :  { %v2512_v23 = vpop.permute.xlu1 %2511  ;;  %v458_v4 = vsel %vm453_vm1, %v449_v12, %v2498_v32  ;;  %v2129_v12 = vld [vmem:[%s4038_s0 + $0x68] sm:$0x3] }
  0xc7   :  { %v2507_v63 = vpop.permute.xlu0 %2506  ;;  %v450_v14 = vsel %vm444_vm0, %v97_v55, %v2489_v27  ;;  %v2514_v42 = vunpack.i.h.bf16 %v2512_v23  ;;  %v2513_v39 = vunpack.i.l.bf16 %v2512_v23 }
  0xc8   :  { %2298 = vmatpush3.bf16.msra.mxu1 %v2737_v1  ;;  %v2509_v15 = vunpack.i.h.bf16 %v2507_v63  ;;  %v2508_v26 = vunpack.i.l.bf16 %v2507_v63  ;;  %v459_v16 = vsel %vm453_vm1, %v450_v14, %v2499_v8  ;;  %v2130_v14 = vld [vmem:[%s4038_s0 + $0x6c] sm:$0x3] }
  0xc9   :  { %2299 = vmatprep.subr.bf16.mxu1 %v2738_v47  ;;  %v469_v7 = vsel %vm462_vm2, %v460_v19, %v2513_v39  ;;  %v470_v21 = vsel %vm462_vm2, %v461_v20, %v2514_v42  ;;  %v2128_v42 = vld [vmem:[%s4038_s0 + $0x64] sm:$0x3]  ;;  %v2127_v39 = vld [vmem:[%s4038_s0 + $0x60] sm:$0x3]  ;;  %v1167_v20 = vunpack.c.l.bf16 %v2129_v12 }
  0xca   :  { %v2522_v57 = vpop.permute.xlu1 %2521  ;;  %v467_v49 = vsel %vm462_vm2, %v458_v4, %v2508_v26  ;;  %v468_v50 = vsel %vm462_vm2, %v459_v16, %v2509_v15  ;;  %v1168_v15 = vunpack.c.l.bf16 %v2130_v14  ;;  %v2133_v26 = vld [vmem:[%s4038_s0 + $0x80] sm:$0x3]  ;;  %v3861_v4 = vld [vmem:[%s4038_s0 + $0x78] sm:$0x3] }
  0xcb   :  { %v2517_v17 = vpop.permute.xlu0 %2516  ;;  %v2524_v34 = vunpack.i.h.bf16 %v2522_v57  ;;  %v2523_v35 = vunpack.i.l.bf16 %v2522_v57 }
  0xcc   :  { %2300 = vmatpush3.bf16.msra.mxu1 %v2738_v47  ;;  %v2519_v11 = vunpack.i.h.bf16 %v2517_v17  ;;  %v2518_v24 = vunpack.i.l.bf16 %v2517_v17 }
  0xcd   :  { %2301 = vmatprep.subr.bf16.mxu1 %v2739_v33  ;;  %v478_v52 = vsel %vm471_vm3, %v469_v7, %v2523_v35  ;;  %v479_v62 = vsel %vm471_vm3, %v470_v21, %v2524_v34 }
  0xce   :  { %v2532_v2 = vpop.permute.xlu1 %2531  ;;  %v476_v58 = vsel %vm471_vm3, %v467_v49, %v2518_v24  ;;  %v477_v59 = vsel %vm471_vm3, %v468_v50, %v2519_v11  ;;  %v1166_v11 = vunpack.c.l.bf16 %v2128_v42 }
  0xcf   :  { %v2527_v53 = vpop.permute.xlu0 %2526  ;;  %v2534_v0 = vunpack.i.h.bf16 %v2532_v2  ;;  %v2533_v51 = vunpack.i.l.bf16 %v2532_v2 }
  0xd0   :  { %2302 = vmatpush3.bf16.msra.mxu1 %v2739_v33  ;;  %v2529_v10 = vunpack.i.h.bf16 %v2527_v53  ;;  %v2528_v29 = vunpack.i.l.bf16 %v2527_v53  ;;  %v2134_v53 = vld [vmem:[%s4038_s0 + $0x84] sm:$0x3] }
  0xd1   :  { %v487_v5 = vsel %vm480_vm4, %v478_v52, %v2533_v51  ;;  %v488_v61 = vsel %vm480_vm4, %v479_v62, %v2534_v0  ;;  %v3868_v0 = vld [vmem:[%s4038_s0 + $0x7c] sm:$0x3]  ;;  %v1165_v51 = vunpack.c.l.bf16 %v2127_v39  ;;  %v1172_v7 = vunpack.c.l.bf16 %v2134_v53 }
  0xd2   :  { %v2542_v22 = vpop.permute.xlu1 %2541  ;;  %v485_v1 = vsel %vm480_vm4, %v476_v58, %v2528_v29  ;;  %v486_v56 = vsel %vm480_vm4, %v477_v59, %v2529_v10  ;;  %v1171_v10 = vunpack.c.l.bf16 %v2133_v26  ;;  %v1170_v50 = vunpack.c.l.bf16 %v3868_v0 }
  0xd3   :  { %v2537_v30 = vpop.permute.xlu0 %2536  ;;  %v2544_v36 = vunpack.i.h.bf16 %v2542_v22  ;;  %v2543_v6 = vunpack.i.l.bf16 %v2542_v22 }
  0xd4   :  { %v2539_v46 = vunpack.i.h.bf16 %v2537_v30  ;;  %v2538_v28 = vunpack.i.l.bf16 %v2537_v30  ;;  %v1169_v30 = vunpack.c.l.bf16 %v3861_v4 }
  0xd5   :  { %v496_v38 = vsel %vm489_vm5, %v487_v5, %v2543_v6  ;;  %v497_v45 = vsel %vm489_vm5, %v488_v61, %v2544_v36 }
  0xd6   :  { %v2552_v41 = vpop.permute.xlu1 %2551  ;;  %v494_v9 = vsel %vm489_vm5, %v485_v1, %v2538_v28  ;;  %v495_v33 = vsel %vm489_vm5, %v486_v56, %v2539_v46 }
  0xd7   :  { %v2554_v13 = vunpack.i.h.bf16 %v2552_v41  ;;  %v2553_v47 = vunpack.i.l.bf16 %v2552_v41  ;;  %v2547_v23 = vpop.permute.xlu0 %2546 }
  0xd8   :  { %v2549_v63 = vunpack.i.h.bf16 %v2547_v23  ;;  %v2548_v31 = vunpack.i.l.bf16 %v2547_v23 }
  0xd9   :  { %v505_v60 = vsel %vm498_vm6, %v496_v38, %v2553_v47  ;;  %v506_v43 = vsel %vm498_vm6, %v497_v45, %v2554_v13 }
  0xda   :  { %v503_v48 = vsel %vm498_vm6, %v494_v9, %v2548_v31  ;;  %v504_v37 = vsel %vm498_vm6, %v495_v33, %v2549_v63  ;;  %v2562_v57 = vpop.permute.xlu1 %2561  ;;  %v2046_v27 = vcombine.low %v505_v60, %v506_v43 }
  0xdb   :  { %v2557_v44 = vpop.permute.xlu0 %2556  ;;  %v2044_v54 = vcombine.low %v503_v48, %v504_v37  ;;  %v2564_v34 = vunpack.i.h.bf16 %v2562_v57  ;;  %v2563_v35 = vunpack.i.l.bf16 %v2562_v57 }
  0xdc   :  { %v2559_v24 = vunpack.i.h.bf16 %v2557_v44  ;;  %v2558_v22 = vunpack.i.l.bf16 %v2557_v44 }
  0xdd   :  { %v541_v55 = vpack.c.bf16 %v2046_v27, %v2044_v54  ;;  %v1408_v46 = vsel %vm444_vm0, %v1168_v15, %v2564_v34  ;;  %v1407_v28 = vsel %vm444_vm0, %v1167_v20, %v2563_v35 }
  0xde   :  { %v2572_v17 = vpop.permute.xlu1 %2571  ;;  %v1406_v58 = vsel %vm444_vm0, %v1166_v11, %v2559_v24  ;;  %v1405_v5 = vsel %vm444_vm0, %v1165_v51, %v2558_v22 }
  0xdf   :  { %v3830_v18 = vpop.permute.xlu0 %2566  ;;  %1107 = vmatmul.mubr.bf16.gmra.mxu1 %v541_v55  ;;  %v2574_v21 = vunpack.i.h.bf16 %v2572_v17  ;;  %v2573_v29 = vunpack.i.l.bf16 %v2572_v17 }
  0xe0   :  { %v2569_v41 = vunpack.i.h.bf16 %v3830_v18  ;;  %v2568_v1 = vunpack.i.l.bf16 %v3830_v18 }
  0xe1   :  { %v1412_v61 = vsel %vm444_vm0, %v1172_v7, %v2574_v21  ;;  %v1411_v56 = vsel %vm444_vm0, %v1171_v10, %v2573_v29 }
  0xe2   :  { %v2582_v3 = vpop.permute.xlu1 %2581  ;;  %v1410_v51 = vsel %vm444_vm0, %v1170_v50, %v2569_v41  ;;  %v1409_v29 = vsel %vm444_vm0, %v1169_v30, %v2568_v1 }
  0xe3   :  { %v2577_v8 = vpop.permute.xlu0 %2576  ;;  %v2584_v36 = vunpack.i.h.bf16 %v2582_v3  ;;  %v2583_v6 = vunpack.i.l.bf16 %v2582_v3 }
  0xe4   :  { %v2578_v52 = vunpack.i.l.bf16 %v2577_v8  ;;  %v2579_v59 = vunpack.i.h.bf16 %v2577_v8 }
  0xe5   :  { %v1415_v45 = vsel %vm453_vm1, %v1407_v28, %v2583_v6  ;;  %v1416_v63 = vsel %vm453_vm1, %v1408_v46, %v2584_v36 }
  0xe6   :  { %v3832_v32 = vpop.permute.xlu1 %2591  ;;  %v1413_v31 = vsel %vm453_vm1, %v1405_v5, %v2578_v52  ;;  %v1414_v60 = vsel %vm453_vm1, %v1406_v58, %v2579_v59 }
  0xe7   :  { %v3834_v25 = vpop.permute.xlu0 %2586  ;;  %v2594_v43 = vunpack.i.h.bf16 %v3832_v32  ;;  %v2593_v57 = vunpack.i.l.bf16 %v3832_v32 }
  0xe8   :  { %v2589_v27 = vunpack.i.h.bf16 %v3834_v25  ;;  %v2588_v55 = vunpack.i.l.bf16 %v3834_v25 }
  0xe9   :  { %v1420_v6 = vsel %vm453_vm1, %v1412_v61, %v2594_v43 }
  0xea   :  { %v2602_v40 = vpop.permute.xlu1 %2601  ;;  %v1418_v46 = vsel %vm453_vm1, %v1410_v51, %v2589_v27  ;;  %v2198_v27 = vld [vmem:[%s4038_s0 + $0x9c] sm:$0x3] }
  0xeb   :  { %v3836_v2 = vpop.permute.xlu0 %2596  ;;  %v2604_v13 = vunpack.i.h.bf16 %v2602_v40  ;;  %v2603_v47 = vunpack.i.l.bf16 %v2602_v40 }
  0xec   :  { %v2598_v23 = vunpack.i.l.bf16 %v3836_v2  ;;  %v2599_v9 = vunpack.i.h.bf16 %v3836_v2 }
  0xed   :  { %v1423_v17 = vsel %vm462_vm2, %v1415_v45, %v2603_v47  ;;  %v1424_v18 = vsel %vm462_vm2, %v1416_v63, %v2604_v13 }
  0xee   :  { %v3853_v19 = vpop.permute.xlu1 %2611  ;;  %v1421_v3 = vsel %vm462_vm2, %v1413_v31, %v2598_v23  ;;  %v1422_v40 = vsel %vm462_vm2, %v1414_v60, %v2599_v9 }
  0xef   :  { %v3863_v16 = vpop.permute.xlu0 %2606  ;;  %v2614_v2 = vunpack.i.h.bf16 %v3853_v19  ;;  %v2613_v34 = vunpack.i.l.bf16 %v3853_v19  ;;  %v1419_v19 = vsel %vm453_vm1, %v1411_v56, %v2593_v57 }
  0xf0   :  { %v2609_v22 = vunpack.i.h.bf16 %v3863_v16  ;;  %v2608_v7 = vunpack.i.l.bf16 %v3863_v16  ;;  %v1417_v16 = vsel %vm453_vm1, %v1409_v29, %v2588_v55 }
  0xf1   :  { %v1427_v28 = vsel %vm462_vm2, %v1419_v19, %v2613_v34  ;;  %v1428_v30 = vsel %vm462_vm2, %v1420_v6, %v2614_v2  ;;  %v1608_v2 = vunpack.c.l.bf16 %v2198_v27 }
  0xf2   :  { %v2622_v49 = vpop.permute.xlu1 %2621  ;;  %v1425_v59 = vsel %vm462_vm2, %v1417_v16, %v2608_v7  ;;  %v1426_v5 = vsel %vm462_vm2, %v1418_v46, %v2609_v22 }
  0xf3   :  { %v2617_v62 = vpop.permute.xlu0 %2616  ;;  %v2624_v48 = vunpack.i.h.bf16 %v2622_v49  ;;  %v2623_v37 = vunpack.i.l.bf16 %v2622_v49 }
  0xf4   :  { %v2619_v44 = vunpack.i.h.bf16 %v2617_v62  ;;  %v2618_v54 = vunpack.i.l.bf16 %v2617_v62 }
  0xf5   :  { %v1431_v42 = vsel %vm471_vm3, %v1423_v17, %v2623_v37  ;;  %v1432_v39 = vsel %vm471_vm3, %v1424_v18, %v2624_v48  ;;  %v2197_v48 = vld [vmem:[%s4038_s0 + $0x98] sm:$0x3]  ;;  %v2201_v17 = vld [vmem:[%s4038_s0 + $0xb0] sm:$0x3]  ;;  %v2202_v18 = vld [vmem:[%s4038_s0 + $0xb4] sm:$0x3] }
  0xf6   :  { %v3881_v38 = vpop.permute.xlu1 %2631  ;;  %v1429_v20 = vsel %vm471_vm3, %v1421_v3, %v2618_v54  ;;  %v1430_v15 = vsel %vm471_vm3, %v1422_v40, %v2619_v44  ;;  %v2195_v44 = vld [vmem:[%s4038_s0 + $0x90] sm:$0x3]  ;;  %v2196_v54 = vld [vmem:[%s4038_s0 + $0x94] sm:$0x3]  ;;  %v2200_v3 = vld [vmem:[%s4038_s0 + $0xac] sm:$0x3]  ;;  %v1607_v40 = vunpack.c.l.bf16 %v2197_v48 }
  0xf7   :  { %v3887_v33 = vpop.permute.xlu0 %2626  ;;  %v2634_v49 = vunpack.i.h.bf16 %v3881_v38  ;;  %v2633_v36 = vunpack.i.l.bf16 %v3881_v38  ;;  %v1610_v34 = vunpack.c.l.bf16 %v2200_v3 }
  0xf8   :  { %v2629_v52 = vunpack.i.h.bf16 %v3887_v33  ;;  %v2628_v50 = vunpack.i.l.bf16 %v3887_v33 }
  0xf9   :  { %v1435_v56 = vsel %vm471_vm3, %v1427_v28, %v2633_v36  ;;  %v1436_v13 = vsel %vm471_vm3, %v1428_v30, %v2634_v49 }
  0xfa   :  { %v2642_v8 = vpop.permute.xlu1 %2641  ;;  %v1433_v38 = vsel %vm471_vm3, %v1425_v59, %v2628_v50  ;;  %v1434_v45 = vsel %vm471_vm3, %v1426_v5, %v2629_v52 }
  0xfb   :  { %v2644_v12 = vunpack.i.h.bf16 %v2642_v8  ;;  %v2643_v14 = vunpack.i.l.bf16 %v2642_v8  ;;  %v2637_v32 = vpop.permute.xlu0 %2636 }
  0xfc   :  { %v2639_v53 = vunpack.i.h.bf16 %v2637_v32  ;;  %v2638_v25 = vunpack.i.l.bf16 %v2637_v32 }
  0xfd   :  { %v1439_v26 = vsel %vm480_vm4, %v1431_v42, %v2643_v14  ;;  %v1440_v4 = vsel %vm480_vm4, %v1432_v39, %v2644_v12  ;;  %v1605_v12 = vunpack.c.l.bf16 %v2195_v44  ;;  %v1606_v14 = vunpack.c.l.bf16 %v2196_v54 }
  0xfe   :  { %v1454_v35 = vcombine.low %v1439_v26, %v1440_v4  ;;  %v1437_v11 = vsel %vm480_vm4, %v1429_v20, %v2638_v25  ;;  %v1438_v24 = vsel %vm480_vm4, %v1430_v15, %v2639_v53  ;;  %v3908_v0 = vpop.permute.xlu1 %2651  ;;  %v1611_v25 = vunpack.c.l.bf16 %v2201_v17  ;;  %v2199_v4 = vld [vmem:[%s4038_s0 + $0xa8] sm:$0x3] }
  0xff   :  { %v1453_v21 = vcombine.low %v1437_v11, %v1438_v24  ;;  %v3913_v10 = vpop.permute.xlu0 %2646  ;;  %v2654_v42 = vunpack.i.h.bf16 %v3908_v0  ;;  %v2653_v39 = vunpack.i.l.bf16 %v3908_v0  ;;  %v1612_v15 = vunpack.c.l.bf16 %v2202_v18 }
 0x100   :  { %v2649_v53 = vunpack.i.h.bf16 %v3913_v10  ;;  %v2648_v20 = vunpack.i.l.bf16 %v3913_v10  ;;  %v1609_v19 = vunpack.c.l.bf16 %v2199_v4 }
 0x101   :  { %v1461_v62 = vpack.c.bf16 %v1454_v35, %v1453_v21  ;;  %v1752_v0 = vsel %vm444_vm0, %v1608_v2, %v2654_v42  ;;  %v1751_v29 = vsel %vm444_vm0, %v1607_v40, %v2653_v39 }
 0x102   :  { %v2662_v58 = vpop.permute.xlu1 %2661  ;;  %v1750_v10 = vsel %vm444_vm0, %v1606_v14, %v2649_v53  ;;  %v1749_v49 = vsel %vm444_vm0, %v1605_v12, %v2648_v20 }
 0x103   :  { %v2664_v41 = vunpack.i.h.bf16 %v2662_v58  ;;  %v2663_v61 = vunpack.i.l.bf16 %v2662_v58  ;;  %v2657_v1 = vpop.permute.xlu0 %2656  ;;  %2291 = vmatprep.mubr.msk.bf16.mxu0 %vm489_vm5, %v1461_v62 }
 0x104   :  { %v2659_v47 = vunpack.i.h.bf16 %v2657_v1  ;;  %v2658_v23 = vunpack.i.l.bf16 %v2657_v1 }
 0x105   :  { %v1443_v63 = vsel %vm480_vm4, %v1435_v56, %v2663_v61  ;;  %v1444_v31 = vsel %vm480_vm4, %v1436_v13, %v2664_v41 }
 0x106   :  { %v1456_v9 = vcombine.low %v1443_v63, %v1444_v31  ;;  %v1441_v33 = vsel %vm480_vm4, %v1433_v38, %v2658_v23  ;;  %v1442_v60 = vsel %vm480_vm4, %v1434_v45, %v2659_v47  ;;  %v2672_v43 = vpop.permute.xlu1 %2671 }
 0x107   :  { %v1455_v37 = vcombine.low %v1441_v33, %v1442_v60  ;;  %v2667_v57 = vpop.permute.xlu0 %2666  ;;  %v2674_v26 = vunpack.i.h.bf16 %v2672_v43  ;;  %v2673_v35 = vunpack.i.l.bf16 %v2672_v43 }
 0x108   :  { %v2669_v11 = vunpack.i.h.bf16 %v2667_v57  ;;  %v2668_v6 = vunpack.i.l.bf16 %v2667_v57 }
 0x109   :  { %v1462_v55 = vpack.c.bf16 %v1456_v9, %v1455_v37  ;;  %v1756_v36 = vsel %vm444_vm0, %v1612_v15, %v2674_v26  ;;  %v1755_v50 = vsel %vm444_vm0, %v1611_v25, %v2673_v35 }
 0x10a   :  { %v2682_v8 = vpop.permute.xlu1 %2681  ;;  %v1754_v62 = vsel %vm444_vm0, %v1610_v34, %v2669_v11  ;;  %v1753_v63 = vsel %vm444_vm0, %v1609_v19, %v2668_v6 }
 0x10b   :  { %v2677_v32 = vpop.permute.xlu0 %2676  ;;  %2292 = vmatmul.mubr.msk.bf16.vlgmr.msra.gmra.mxu0 %vm489_vm5, %v1462_v55  ;;  %v2684_v24 = vunpack.i.h.bf16 %v2682_v8  ;;  %v2683_v51 = vunpack.i.l.bf16 %v2682_v8 }
 0x10c   :  { %v2678_v7 = vunpack.i.l.bf16 %v2677_v32  ;;  %v2679_v52 = vunpack.i.h.bf16 %v2677_v32 }
 0x10d   :  { %v1759_v16 = vsel %vm453_vm1, %v1751_v29, %v2683_v51  ;;  %v1760_v46 = vsel %vm453_vm1, %v1752_v0, %v2684_v24 }
 0x10e   :  { %v2692_v22 = vpop.permute.xlu1 %2691  ;;  %v1757_v30 = vsel %vm453_vm1, %v1749_v49, %v2678_v7  ;;  %v1758_v47 = vsel %vm453_vm1, %v1750_v10, %v2679_v52 }
 0x10f   :  { %v2687_v21 = vpop.permute.xlu0 %2686  ;;  %v2693_v58 = vunpack.i.l.bf16 %v2692_v22  ;;  %v2694_v61 = vunpack.i.h.bf16 %v2692_v22 }
 0x110   :  { %v2688_v1 = vunpack.i.l.bf16 %v2687_v21  ;;  %v2689_v23 = vunpack.i.h.bf16 %v2687_v21 }
 0x111   :  { %v1763_v43 = vsel %vm453_vm1, %v1755_v50, %v2693_v58  ;;  %v1764_v44 = vsel %vm453_vm1, %v1756_v36, %v2694_v61 }
 0x112   :  { %v2702_v28 = vpop.permute.xlu1 %2701  ;;  %v1761_v54 = vsel %vm453_vm1, %v1753_v63, %v2688_v1  ;;  %v1762_v18 = vsel %vm453_vm1, %v1754_v62, %v2689_v23 }
 0x113   :  { %v2704_v59 = vunpack.i.h.bf16 %v2702_v28  ;;  %v2703_v5 = vunpack.i.l.bf16 %v2702_v28  ;;  %v2697_v41 = vpop.permute.xlu0 %2696 }
 0x114   :  { %v2699_v56 = vunpack.i.h.bf16 %v2697_v41  ;;  %v2698_v13 = vunpack.i.l.bf16 %v2697_v41 }
 0x115   :  { %v1767_v38 = vsel %vm462_vm2, %v1759_v16, %v2703_v5  ;;  %v1768_v45 = vsel %vm462_vm2, %v1760_v46, %v2704_v59 }
 0x116   :  { %v1782_v31 = vcombine.low %v1767_v38, %v1768_v45  ;;  %v1765_v9 = vsel %vm462_vm2, %v1757_v30, %v2698_v13  ;;  %v1766_v33 = vsel %vm462_vm2, %v1758_v47, %v2699_v56  ;;  %v2712_v60 = vpop.permute.xlu1 %2711 }
 0x117   :  { %v1781_v48 = vcombine.low %v1765_v9, %v1766_v33  ;;  %v2714_v37 = vunpack.i.h.bf16 %v2712_v60  ;;  %v2713_v57 = vunpack.i.l.bf16 %v2712_v60  ;;  %v2707_v27 = vpop.permute.xlu0 %2706 }
 0x118   :  { %v2709_v55 = vunpack.i.h.bf16 %v2707_v27  ;;  %v2708_v17 = vunpack.i.l.bf16 %v2707_v27 }
 0x119   :  { %v1771_v3 = vsel %vm462_vm2, %v1763_v43, %v2713_v57  ;;  %v1772_v8 = vsel %vm462_vm2, %v1764_v44, %v2714_v37  ;;  %v1789_v40 = vpack.c.bf16 %v1782_v31, %v1781_v48 }
 0x11a   :  { %v1784_v2 = vcombine.low %v1771_v3, %v1772_v8  ;;  %v1769_v12 = vsel %vm462_vm2, %v1761_v54, %v2708_v17  ;;  %v1770_v14 = vsel %vm462_vm2, %v1762_v18, %v2709_v55 }
 0x11b   :  { %v1783_v32 = vcombine.low %v1769_v12, %v1770_v14  ;;  %2303 = vmatprep.mubr.msk.bf16.mxu1 %vm471_vm3, %v1789_v40 }
 0x11d   :  { %v1790_v42 = vpack.c.bf16 %v1784_v2, %v1783_v32 }
 0x11f   :  { %2304 = vmatmul.mubr.msk.bf16.vlgmr.msra.gmra.mxu1 %vm471_vm3, %v1790_v42 }
 0x167   :  { %v2277_v35 = vpop.f32.mrf.mxu0 }
 0x169   :  { %v991_v11 = vpop.f32.mrf.mxu0 }
 0x16b   :  { %v2278_v24 = vpop.f32.mrf.mxu0 }
 0x16d   :  { %v994_v51 = vpop.f32.mrf.mxu0 }
 0x183   :  { %v1100_v39 = vpop.f32.mrf.mxu1 }
 0x184   :  { %v1101_v29 = vadd.f32 %v1100_v39, %v991_v11 }
 0x185   :  { %v1102_v53 = vpop.f32.mrf.mxu1 }
 0x187   :  { %v1103_v25 = vpop.f32.mrf.mxu1 }
 0x188   :  { %v1104_v49 = vadd.f32 %v1103_v25, %v994_v51 }
 0x189   :  { %v1105_v20 = vpop.f32.mrf.mxu1 }
 0x19f   :  { %v1108_v15 = vpop.f32.mrf.mxu1 }
 0x1a0   :  { %v1109_v36 = vadd.f32 %v2277_v35, %v1108_v15 }
 0x1a1   :  { %v1110_v26 = vpop.f32.mrf.mxu1 }
 0x1a2   :  { %v1925_v26 = vlaneseq }
 0x1a3   :  { %v1111_v4 = vpop.f32.mrf.mxu1 }
 0x1a4   :  { %v1112_v50 = vadd.f32 %v2278_v24, %v1111_v4  ;;  %v1926_v4 = vshrl.u32 %v1925_v26, 7 }
 0x1a5   :  { %v1113_v34 = vpop.f32.mrf.mxu1 }
 0x1a6   :  { %v1920_v34 = vld [vmem:[%s4040_s2] sm:$0x1]  ;;  %v1927_v35 = vsub.s32 0, %v1926_v4 }
 0x1cb   :  { %v2293_v22 = vpop.f32.mrf.mxu0 }
 0x1cc   :  { %v1569_v62 = vadd.f32 %v2293_v22, %v1109_v36  ;;  %v1934_v22 = vld [vmem:[%s4041_s3] sm:$0x1] }
 0x1cd   :  { %v1552_v7 = vpop.f32.mrf.mxu0 }
 0x1ce   :  { %v1567_v6 = vadd.f32 %v1552_v7, %v1101_v29 }
 0x1cf   :  { %v2294_v21 = vpop.f32.mrf.mxu0 }
 0x1d0   :  { %v1570_v30 = vadd.f32 %v2294_v21, %v1112_v50 }
 0x1d1   :  { %v1555_v10 = vpop.f32.mrf.mxu0 }
 0x1d2   :  { %v1568_v16 = vadd.f32 %v1555_v10, %v1104_v49 }
 0x1df   :  { %v2305_v0 = vpop.f32.mrf.mxu1 }
 0x1e0   :  { %v1881_v58 = vadd.f32 %v2305_v0, %v1569_v62 }
 0x1e1   :  { %v1864_v19 = vpop.f32.mrf.mxu1 }
 0x1e2   :  { %v1879_v46 = vadd.f32 %v1864_v19, %v1567_v6  ;;  %v1886_v56 = vsel %vm444_vm0, %v1881_v58, 0.0 }
 0x1e3   :  { %v2306_v52 = vpop.f32.mrf.mxu1 }
 0x1e4   :  { %v1883_v5 = vsel %vm444_vm0, %v1879_v46, 0.0  ;;  %v1882_v41 = vadd.f32 %v2306_v52, %v1570_v30 }
 0x1e5   :  { %v1867_v28 = vpop.f32.mrf.mxu1 }
 0x1e6   :  { %v1880_v59 = vadd.f32 %v1867_v28, %v1568_v16  ;;  %v1888_v47 = vsel %vm444_vm0, %v1882_v41, 0.0 }
 0x1e8   :  { %v1884_v61 = vsel %vm444_vm0, %v1880_v59, 0.0 }
 0x1e9   :  { %v1885_v1 = vadd.f32 %v1884_v61, %v1883_v5 }
 0x1eb   :  { %v1887_v13 = vadd.f32 %v1886_v56, %v1885_v1 }
 0x1ed   :  { %v1889_v23 = vadd.f32 %v1888_v47, %v1887_v13 }
 0x1ef   :  { %v1890_v38 = vrot.slane %v1889_v23, 4 }
 0x1f1   :  { %v1891_v45 = vadd.f32 %v1890_v38, %v1889_v23 }
 0x1f3   :  { %v1892_v63 = vrot.slane %v1891_v45, 2 }
 0x1f5   :  { %v1893_v31 = vadd.f32 %v1892_v63, %v1891_v45 }
 0x1f7   :  { %v1894_v9 = vrot.slane %v1893_v31, 1 }
 0x1f9   :  { %v1895_v33 = vadd.f32 %v1894_v9, %v1893_v31 }
 0x1fb   :  { %v1897_v60 = vmul.f32 0.03125, %v1895_v33 }
 0x1fd   :  { %v1898_v43 = vsub.f32 %v1879_v46, %v1897_v60  ;;  %v1899_v48 = vsub.f32 %v1880_v59, %v1897_v60  ;;  %v1900_v37 = vsub.f32 %v1881_v58, %v1897_v60  ;;  %v1901_v57 = vsub.f32 %v1882_v41, %v1897_v60 }
 0x1ff   :  { %v1902_v27 = vmul.f32 %v1898_v43, %v1898_v43  ;;  %v1903_v44 = vmul.f32 %v1899_v48, %v1899_v48  ;;  %v1904_v54 = vmul.f32 %v1900_v37, %v1900_v37  ;;  %v1905_v55 = vmul.f32 %v1901_v57, %v1901_v57 }
 0x201   :  { %v1906_v17 = vsel %vm444_vm0, %v1902_v27, 0.0  ;;  %v1907_v18 = vsel %vm444_vm0, %v1903_v44, 0.0  ;;  %v1909_v8 = vsel %vm444_vm0, %v1904_v54, 0.0  ;;  %v1911_v2 = vsel %vm444_vm0, %v1905_v55, 0.0 }
 0x202   :  { %v1908_v3 = vadd.f32 %v1907_v18, %v1906_v17 }
 0x204   :  { %v1910_v40 = vadd.f32 %v1909_v8, %v1908_v3 }
 0x206   :  { %v1912_v12 = vadd.f32 %v1911_v2, %v1910_v40 }
 0x208   :  { %v1913_v14 = vrot.slane %v1912_v12, 4 }
 0x20a   :  { %v1914_v32 = vadd.f32 %v1913_v14, %v1912_v12 }
 0x20c   :  { %v1915_v42 = vrot.slane %v1914_v32, 2 }
 0x20e   :  { %v1916_v39 = vadd.f32 %v1915_v42, %v1914_v32 }
 0x210   :  { %v1917_v53 = vrot.slane %v1916_v39, 1 }
 0x212   :  { %v1918_v25 = vadd.f32 %v1917_v53, %v1916_v39 }
 0x214   :  { %v1919_v20 = vmul.f32 0.03125, %v1918_v25 }
 0x216   :  { %v1921_v15 = vadd.f32 1e-05, %v1919_v20 }
 0x218   :  { %2740 = vrsqrt.f32 %v1921_v15 }
 0x225   :  { %v2741_v11 = vpop.eup %2740 }
 0x226   :  { %v1923_v24 = vmul.f32 %v2741_v11, %v1920_v34 }
 0x228   :  { %v1928_v51 = vrot.slane %v1923_v24, %v1927_v35  ;;  %v1935_v7 = vmul.f32 %v1923_v24, %v1897_v60 }
 0x22a   :  { %v1936_v21 = vsub.f32 %v1934_v22, %v1935_v7  ;;  %v1930_v0 = vmul.f32 %v1928_v51, %v1879_v46  ;;  %v1931_v29 = vmul.f32 %v1928_v51, %v1880_v59  ;;  %v1932_v10 = vmul.f32 %v1928_v51, %v1881_v58 }
 0x22b   :  { %v1933_v19 = vmul.f32 %v1928_v51, %v1882_v41 }
 0x22c   :  { %v1941_v49 = vrot.slane %v1936_v21, %v1927_v35 }
 0x22e   :  { %v1943_v36 = vadd.f32 %v1941_v49, %v1930_v0  ;;  %v1944_v6 = vadd.f32 %v1941_v49, %v1931_v29  ;;  %v1945_v52 = vadd.f32 %v1941_v49, %v1932_v10  ;;  %v1946_v50 = vadd.f32 %v1941_v49, %v1933_v19 }
 0x230   :  { %vm1947_vm7 = vcmp.ge.f32.partialorder %v1943_v36, 0.0  ;;  %vm1948_vm8 = vcmp.ge.f32.partialorder %v1944_v6, 0.0  ;;  %vm1949_vm9 = vcmp.ge.f32.partialorder %v1945_v52, 0.0  ;;  %vm1950_vm10 = vcmp.ge.f32.partialorder %v1946_v50, 0.0 }
 0x231   :  { %v1951_v62 = vmul.f32 0.2, %v1943_v36  ;;  %v1952_v16 = vmul.f32 0.2, %v1944_v6  ;;  %v1953_v28 = vmul.f32 0.2, %v1945_v52 }
 0x232   :  { %v1954_v30 = vmul.f32 0.2, %v1946_v50 }
 0x233   :  { %v1955_v5 = vsel %vm1947_vm7, %v1943_v36, %v1951_v62  ;;  %v1956_v61 = vsel %vm1948_vm8, %v1944_v6, %v1952_v16  ;;  %v1957_v1 = vsel %vm1949_vm9, %v1945_v52, %v1953_v28 }
 0x234   :  { %v1958_v46 = vsel %vm1950_vm10, %v1946_v50, %v1954_v30  ;;  %v1963_v58 = vcombine.high %v1955_v5, %v1955_v5  ;;  %v1964_v59 = vcombine.high %v1956_v61, %v1956_v61  ;;  %v1965_v41 = vcombine.high %v1957_v1, %v1957_v1 }
 0x235   :  { %v1966_v56 = vcombine.high %v1958_v46, %v1958_v46  ;;  %v1971_v13 = vpack.c.bf16 %v1955_v5, %v1955_v5  ;;  %v1973_v47 = vpack.c.bf16 %v1956_v61, %v1956_v61  ;;  %v1975_v23 = vpack.c.bf16 %v1957_v1, %v1957_v1 }
 0x236   :  { %v1972_v38 = vpack.c.bf16 %v1963_v58, %v1963_v58  ;;  %v1974_v45 = vpack.c.bf16 %v1964_v59, %v1964_v59  ;;  %v1976_v63 = vpack.c.bf16 %v1965_v41, %v1965_v41  ;;  %v1977_v31 = vpack.c.bf16 %v1958_v46, %v1958_v46 }
 0x237   :  { %v1978_v9 = vpack.c.bf16 %v1966_v56, %v1966_v56  ;;  %1980 = vst.msk [vmem:[%s4042_s4] sm:$0x3] %vm1979_vm11, %v1971_v13  ;;  %1982 = vst.msk [vmem:[%s4042_s4 + $0x4] sm:$0x3] %vm1979_vm11, %v1973_v47 }
 0x238   :  { %1984 = vst.msk [vmem:[%s4042_s4 + $0x8] sm:$0x3] %vm1979_vm11, %v1975_v23  ;;  %1981 = vst.msk [vmem:[%s4042_s4 + $0x2] sm:$0x3] %vm1979_vm11, %v1972_v38 }
 0x239   :  { %1983 = vst.msk [vmem:[%s4042_s4 + $0x6] sm:$0x3] %vm1979_vm11, %v1974_v45  ;;  %1985 = vst.msk [vmem:[%s4042_s4 + $0xa] sm:$0x3] %vm1979_vm11, %v1976_v63 }
 0x23a   :  { %1986 = vst.msk [vmem:[%s4042_s4 + $0xc] sm:$0x3] %vm1979_vm11, %v1977_v31  ;;  %1987 = vst.msk [vmem:[%s4042_s4 + $0xe] sm:$0x3] %vm1979_vm11, %v1978_v9 }

// kernel: discriminator_forward.9
= control target key start
LH: loop header
LB: loop body
LE: loop exit
PB: predicated region body
PF: predicated region fallthrough
CT: control target
= control target key end

     0   :  { %s2205_s17 = smov 32   ;;  %s2206_s14 = smov 64   ;;  %vm211_vm0 = vcmask 261120   ;;  %vm216_vm1 = vcmask 523264   ;;  %vm221_vm2 = vcmask 785408   ;;  %vm626_vm3 = vcmask 1040384   ;;  %s2982_s0 = inlined_call_operand.vmem [shape: bf16[1,2,6,6,32], index: 0, kind: input, shape index: {}]   ;;  %s2983_s1 = inlined_call_operand.vmem [shape: bf16[4,256,32], index: 1, kind: input, shape index: {}]   ;;  %s2984_s2 = inlined_call_operand.vmem [shape: f32[1,32], index: 2, kind: input, shape index: {}]   ;;  %s2985_s3 = inlined_call_operand.vmem [shape: f32[1,32], index: 3, kind: input, shape index: {}]   ;;  %s2986_s4 = inlined_call_operand.vmem [shape: bf16[2,2,2,32], index: 4, kind: output, shape index: {}]  }
   0x1   :  { %v1708_v0 = vld [vmem:[%s2982_s0 + $0x8] sm:$0x6]  ;;  %v1709_v1 = vld [vmem:[%s2982_s0 + $0xc] sm:$0x6]  ;;  %v1692_v2 = vld [vmem:[%s2982_s0 + $0x4] sm:$0x4] }
   0x2   :  { %v386_v3 = vunpack.c.l.bf16 %v1708_v0  ;;  %v387_v4 = vunpack.c.l.bf16 %v1709_v1  ;;  %v1693_v5 = vld [vmem:[%s2982_s0 + $0x8] sm:$0x4]  ;;  %v370_v6 = vunpack.c.l.bf16 %v1692_v2  ;;  %v1710_v7 = vld [vmem:[%s2982_s0 + $0x20] sm:$0x6]  ;;  %v1711_v8 = vld [vmem:[%s2982_s0 + $0x24] sm:$0x6] }
   0x3   :  { %v371_v9 = vunpack.c.l.bf16 %v1693_v5  ;;  %v388_v10 = vunpack.c.l.bf16 %v1710_v7  ;;  %v389_v11 = vunpack.c.l.bf16 %v1711_v8  ;;  %v1694_v12 = vld [vmem:[%s2982_s0 + $0x1c] sm:$0x4]  ;;  %v1695_v13 = vld [vmem:[%s2982_s0 + $0x20] sm:$0x4]  ;;  %v1698_v14 = vld [vmem:[%s2982_s0 + $0x20] sm:$0x1] }
   0x4   :  { %v1973_v15 = vpack.i.bf16 %v387_v4, %v386_v3  ;;  %v402_v16 = vrot.slane %v370_v6, 1  ;;  %v372_v17 = vunpack.c.l.bf16 %v1694_v12  ;;  %v373_v18 = vunpack.c.l.bf16 %v1695_v13  ;;  %v1699_v19 = vld [vmem:[%s2982_s0 + $0x24] sm:$0x1]  ;;  %v1696_v20 = vld [vmem:[%s2982_s0 + $0x8] sm:$0x1]  ;;  %v2153_v27 = vld [vmem:[%s2983_s1 + $0xf8] sm:$0xff]  }
   0x5   :  { %v403_v21 = vrot.slane %v371_v9, 1  ;;  %v1978_v22 = vpack.i.bf16 %v389_v11, %v388_v10  ;;  %v376_v23 = vunpack.c.l.bf16 %v1698_v14  ;;  %v377_v24 = vunpack.c.l.bf16 %v1699_v19  ;;  %v1697_v25 = vld [vmem:[%s2982_s0 + $0xc] sm:$0x1]  ;;  %v1714_v26 = vld [vmem:[%s2982_s0 + $0x20] sm:$0x4]  ;;  %1889 = vmatprep.subr.bf16.mxu0 %v2153_v27  ;;  %v2154_v50 = vld [vmem:[%s2983_s1 + $0xb8] sm:$0xff]  }
   0x6   :  { %1974 = vrot.lane.b32.xlu1 %v1973_v15, %s2205_s17  ;;  %v404_v28 = vrot.slane %v372_v17, 1  ;;  %v405_v29 = vrot.slane %v373_v18, 1  ;;  %v374_v30 = vunpack.c.l.bf16 %v1696_v20  ;;  %v375_v31 = vunpack.c.l.bf16 %v1697_v25  ;;  %v1715_v32 = vld [vmem:[%s2982_s0 + $0x24] sm:$0x4]  ;;  %v1712_v33 = vld [vmem:[%s2982_s0 + $0x8] sm:$0x4]  ;;  %1890 = vmatpush3.bf16.msra.mxu0 %v2154_v50 }
   0x7   :  { %v1983_v34 = vpack.i.bf16 %v403_v21, %v402_v16  ;;  %v424_v35 = vrot.slane %v376_v23, 5  ;;  %v425_v36 = vrot.slane %v377_v24, 5  ;;  %v392_v37 = vunpack.c.l.bf16 %v1714_v26  ;;  %v1713_v38 = vld [vmem:[%s2982_s0 + $0xc] sm:$0x4]  ;;  %v1702_v39 = vld [vmem:[%s2982_s0 + $0x20] sm:$0x3] }
   0x8   :  { %v422_v40 = vrot.slane %v374_v30, 5  ;;  %v423_v41 = vrot.slane %v375_v31, 5  ;;  %v393_v42 = vunpack.c.l.bf16 %v1715_v32  ;;  %v1703_v43 = vld [vmem:[%s2982_s0 + $0x24] sm:$0x3]  ;;  %v1988_v44 = vpack.i.bf16 %v405_v29, %v404_v28  ;;  %v1700_v48 = vld [vmem:[%s2982_s0 + $0x8] sm:$0x3] }
   0x9   :  { %1984 = vrot.lane.b32.xlu0 %v1983_v34, %s2205_s17  ;;  %v1998_v45 = vpack.i.bf16 %v425_v36, %v424_v35  ;;  %v390_v46 = vunpack.c.l.bf16 %v1712_v33  ;;  %v391_v47 = vunpack.c.l.bf16 %v1713_v38  ;;  %v1701_v49 = vld [vmem:[%s2982_s0 + $0xc] sm:$0x3]  ;;  %v492_v51 = vrot.slane %v392_v37, 1  ;;  %v2155_v55 = vld [vmem:[%s2983_s1 + $0xf0] sm:$0xff]   ;;  %v1718_v56 = vld [vmem:[%s2982_s0 + $0x24] sm:$0x1] }
   0xa   :  { %1979 = vrot.lane.b32.xlu1 %v1978_v22, %s2205_s17  ;;  %v493_v52 = vrot.slane %v393_v42, 1  ;;  %v380_v53 = vunpack.c.l.bf16 %v1702_v39  ;;  %v381_v54 = vunpack.c.l.bf16 %v1703_v43  ;;  %v1719_v57 = vld [vmem:[%s2982_s0 + $0x28] sm:$0x1]  ;;  %v1993_v58 = vpack.i.bf16 %v423_v41, %v422_v40  ;;  %1891 = vmatprep.subr.bf16.mxu0 %v2155_v55  ;;  %v1716_v4 = vld [vmem:[%s2982_s0 + $0xc] sm:$0x1]  ;;  %v2156_v6 = vld [vmem:[%s2983_s1 + $0xb0] sm:$0xff]  }
   0xb   :  { %v378_v59 = vunpack.c.l.bf16 %v1700_v48  ;;  %v379_v60 = vunpack.c.l.bf16 %v1701_v49  ;;  %v490_v61 = vrot.slane %v390_v46, 1  ;;  %v491_v62 = vrot.slane %v391_v47, 1  ;;  %v1717_v5 = vld [vmem:[%s2982_s0 + $0x10] sm:$0x1]  ;;  %v1794_v7 = vld [vmem:[%s2982_s0 + $0x24] sm:$0x2]  ;;  %1892 = vmatpush3.bf16.msra.mxu0 %v2156_v6 }
   0xc   :  { %v444_v63 = vrot.slane %v380_v53, 6  ;;  %v445_v0 = vrot.slane %v381_v54, 6  ;;  %v2008_v1 = vpack.i.bf16 %v493_v52, %v492_v51  ;;  %v396_v2 = vunpack.c.l.bf16 %v1718_v56  ;;  %v1795_v8 = vld [vmem:[%s2982_s0 + $0x28] sm:$0x2]  ;;  %v1792_v20 = vld [vmem:[%s2982_s0 + $0xc] sm:$0x2] }
   0xd   :  { %1989 = vrot.lane.b32.xlu0 %v1988_v44, %s2205_s17  ;;  %v397_v3 = vunpack.c.l.bf16 %v1719_v57  ;;  %v2157_v9 = vld [vmem:[%s2983_s1 + $0xe8] sm:$0xff]   ;;  %v442_v10 = vrot.slane %v378_v59, 6  ;;  %v443_v11 = vrot.slane %v379_v60, 6  ;;  %v2003_v12 = vpack.i.bf16 %v491_v62, %v490_v61  ;;  %v1793_v21 = vld [vmem:[%s2982_s0 + $0x10] sm:$0x2]  ;;  %s2207_s10 = smov 96  }
   0xe   :  { %1999 = vrot.lane.b32.xlu1 %v1998_v45, %s2206_s14  ;;  %v2018_v13 = vpack.i.bf16 %v445_v0, %v444_v63  ;;  %v394_v14 = vunpack.c.l.bf16 %v1716_v4  ;;  %v395_v15 = vunpack.c.l.bf16 %v1717_v5  ;;  %1893 = vmatprep.subr.bf16.mxu0 %v2157_v9  ;;  %v512_v16 = vrot.slane %v396_v2, 5  ;;  %v1810_v27 = vld [vmem:[%s2982_s0 + $0x28] sm:$0x3]  ;;  %v1811_v32 = vld [vmem:[%s2982_s0 + $0x2c] sm:$0x3]  ;;  %v2159_v47 = vld [vmem:[%s2983_s1 + $0xe0] sm:$0xff]  }
   0xf   :  { %v513_v17 = vrot.slane %v397_v3, 5  ;;  %v1015_v18 = vunpack.c.l.bf16 %v1794_v7  ;;  %v1016_v19 = vunpack.c.l.bf16 %v1795_v8  ;;  %v2013_v22 = vpack.i.bf16 %v443_v11, %v442_v10  ;;  %v2158_v28 = vld [vmem:[%s2983_s1 + $0xa8] sm:$0xff]   ;;  %v1798_v33 = vld [vmem:[%s2982_s0 + $0x24] sm:$0x6]  ;;  %v1797_v41 = vld [vmem:[%s2982_s0 + $0x10] sm:$0x6] }
  0x10   :  { %v510_v23 = vrot.slane %v394_v14, 5  ;;  %v511_v24 = vrot.slane %v395_v15, 5  ;;  %v1013_v25 = vunpack.c.l.bf16 %v1792_v20  ;;  %v1014_v26 = vunpack.c.l.bf16 %v1793_v21  ;;  %v1799_v34 = vld [vmem:[%s2982_s0 + $0x28] sm:$0x6]  ;;  %1894 = vmatpush3.bf16.msra.mxu0 %v2158_v28  ;;  %v1796_v40 = vld [vmem:[%s2982_s0 + $0xc] sm:$0x6] }
  0x11   :  { %1994 = vrot.lane.b32.xlu0 %v1993_v58, %s2206_s14  ;;  %v2028_v29 = vpack.i.bf16 %v513_v17, %v512_v16  ;;  %v1047_v30 = vrot.slane %v1015_v18, 1  ;;  %v1048_v31 = vrot.slane %v1016_v19, 1  ;;  %v1031_v35 = vunpack.c.l.bf16 %v1810_v27  ;;  %v1808_v43 = vld [vmem:[%s2982_s0 + $0x10] sm:$0x3]  ;;  %v1809_v44 = vld [vmem:[%s2982_s0 + $0x14] sm:$0x3]  ;;  %1895 = vmatprep.subr.bf16.mxu0 %v2159_v47 }
  0x12   :  { %2009 = vrot.lane.b32.xlu1 %v2008_v1, %s2206_s14  ;;  %v2023_v36 = vpack.i.bf16 %v511_v24, %v510_v23  ;;  %v1045_v37 = vrot.slane %v1013_v25, 1  ;;  %v1046_v38 = vrot.slane %v1014_v26, 1  ;;  %v1032_v39 = vunpack.c.l.bf16 %v1811_v32  ;;  %v1814_v48 = vld [vmem:[%s2982_s0 + $0x28] sm:$0x2]  ;;  %v1815_v49 = vld [vmem:[%s2982_s0 + $0x2c] sm:$0x2] }
  0x13   :  { %v2038_v42 = vpack.i.bf16 %v1048_v31, %v1047_v30  ;;  %v1019_v45 = vunpack.c.l.bf16 %v1798_v33  ;;  %v1020_v46 = vunpack.c.l.bf16 %v1799_v34  ;;  %v2160_v50 = vld [vmem:[%s2983_s1 + $0xa0] sm:$0xff]   ;;  %v1017_v51 = vunpack.c.l.bf16 %v1796_v40  ;;  %v1812_v57 = vld [vmem:[%s2982_s0 + $0x10] sm:$0x2]  ;;  %v1813_v58 = vld [vmem:[%s2982_s0 + $0x14] sm:$0x2] }
  0x14   :  { %v1018_v52 = vunpack.c.l.bf16 %v1797_v41  ;;  %v2033_v53 = vpack.i.bf16 %v1046_v38, %v1045_v37  ;;  %v2048_v54 = vpack.i.bf16 %v1032_v39, %v1031_v35  ;;  %v1029_v55 = vunpack.c.l.bf16 %v1808_v43  ;;  %v1802_v59 = vld [vmem:[%s2982_s0 + $0x24] sm:$0x4]  ;;  %1896 = vmatpush3.bf16.msra.mxu0 %v2160_v50  ;;  %v1803_v0 = vld [vmem:[%s2982_s0 + $0x28] sm:$0x4]  ;;  %v2161_v1 = vld [vmem:[%s2983_s1 + $0xd8] sm:$0xff]  }
  0x15   :  { %2004 = vrot.lane.b32.xlu0 %v2003_v12, %s2206_s14  ;;  %v1030_v56 = vunpack.c.l.bf16 %v1809_v44  ;;  %v1067_v60 = vrot.slane %v1019_v45, 2  ;;  %v1068_v61 = vrot.slane %v1020_v46, 2  ;;  %v1035_v62 = vunpack.c.l.bf16 %v1814_v48  ;;  %1897 = vmatprep.subr.bf16.mxu0 %v2161_v1  ;;  %v1800_v9 = vld [vmem:[%s2982_s0 + $0xc] sm:$0x4]  ;;  %v1818_v14 = vld [vmem:[%s2982_s0 + $0x28] sm:$0x6] }
  0x16   :  { %2019 = vrot.lane.b32.xlu1 %v2018_v13, %s2207_s10  ;;  %v1036_v63 = vunpack.c.l.bf16 %v1815_v49  ;;  %v1065_v2 = vrot.slane %v1017_v51, 2  ;;  %v1066_v3 = vrot.slane %v1018_v52, 2  ;;  %v1033_v4 = vunpack.c.l.bf16 %v1812_v57  ;;  %v1801_v13 = vld [vmem:[%s2982_s0 + $0x10] sm:$0x4]  ;;  %v1819_v15 = vld [vmem:[%s2982_s0 + $0x2c] sm:$0x6] }
  0x17   :  { %v2043_v5 = vpack.i.bf16 %v1030_v56, %v1029_v55  ;;  %v1034_v6 = vunpack.c.l.bf16 %v1813_v58  ;;  %v1023_v7 = vunpack.c.l.bf16 %v1802_v59  ;;  %v1024_v8 = vunpack.c.l.bf16 %v1803_v0  ;;  %v2162_v16 = vld [vmem:[%s2983_s1 + $0x98] sm:$0xff]   ;;  %v1816_v20 = vld [vmem:[%s2982_s0 + $0x10] sm:$0x6]  ;;  %v1817_v21 = vld [vmem:[%s2982_s0 + $0x14] sm:$0x6] }
  0x18   :  { %v2058_v10 = vpack.i.bf16 %v1068_v61, %v1067_v60  ;;  %v1135_v11 = vrot.slane %v1035_v62, 1  ;;  %v1136_v12 = vrot.slane %v1036_v63, 1  ;;  %v2053_v17 = vpack.i.bf16 %v1066_v3, %v1065_v2  ;;  %1898 = vmatpush3.bf16.msra.mxu0 %v2162_v16  ;;  %v25_v30 = vld [vmem:[%s2982_s0 + $0x1c] sm:$0x3]  ;;  %v22_v33 = vld [vmem:[%s2982_s0] sm:$0x3] }
  0x19   :  { %2014 = vrot.lane.b32.xlu0 %v2013_v22, %s2207_s10  ;;  %v1133_v18 = vrot.slane %v1033_v4, 1  ;;  %v1021_v19 = vunpack.c.l.bf16 %v1800_v9  ;;  %v1134_v22 = vrot.slane %v1034_v6, 1  ;;  %v1087_v23 = vrot.slane %v1023_v7, 3  ;;  %v23_v34 = vld [vmem:[%s2982_s0 + $0x4] sm:$0x3]  ;;  %v2163_v35 = vld [vmem:[%s2983_s1 + $0xd0] sm:$0xff]  }
  0x1a   :  { %2029 = vrot.lane.b32.xlu1 %v2028_v29, %s2207_s10  ;;  %v1088_v24 = vrot.slane %v1024_v8, 3  ;;  %v1022_v25 = vunpack.c.l.bf16 %v1801_v13  ;;  %v2068_v26 = vpack.i.bf16 %v1136_v12, %v1135_v11  ;;  %v1039_v27 = vunpack.c.l.bf16 %v1818_v14  ;;  %v24_v29 = vld [vmem:[%s2982_s0 + $0x18] sm:$0x3]  ;;  %v2164_v40 = vld [vmem:[%s2983_s1 + $0x90] sm:$0xff]   ;;  %1899 = vmatprep.subr.bf16.mxu0 %v2163_v35  ;;  %v2165_v46 = vld [vmem:[%s2983_s1 + $0xc8] sm:$0xff]  }
  0x1b   :  { %v1040_v28 = vunpack.c.l.bf16 %v1819_v15  ;;  %v1085_v31 = vrot.slane %v1021_v19, 3  ;;  %v1037_v32 = vunpack.c.l.bf16 %v1816_v20  ;;  %v1038_v39 = vunpack.c.l.bf16 %v1817_v21  ;;  %v1678_v51 = vld [vmem:[%s2982_s0 + $0x1c] sm:$0x1]  ;;  %v1679_v55 = vld [vmem:[%s2982_s0 + $0x20] sm:$0x1]  ;;  %v2166_v60 = vld [vmem:[%s2983_s1 + $0x88] sm:$0xff]  }
  0x1c   :  { %v2078_v37 = vpack.i.bf16 %v1088_v24, %v1087_v23  ;;  %v1086_v38 = vrot.slane %v1022_v25, 3  ;;  %v1155_v41 = vrot.slane %v1039_v27, 2  ;;  %v57_v43 = vunpack.c.l.bf16 %v24_v29  ;;  %1900 = vmatpush3.bf16.msra.mxu0 %v2164_v40  ;;  %v1676_v56 = vld [vmem:[%s2982_s0 + $0x4] sm:$0x1]  ;;  %v1677_v57 = vld [vmem:[%s2982_s0 + $0x8] sm:$0x1] }
  0x1d   :  { %2024 = vrot.lane.b32.xlu0 %v2023_v36, %s2207_s10  ;;  %v2063_v36 = vpack.i.bf16 %v1134_v22, %v1133_v18  ;;  %v58_v44 = vunpack.c.l.bf16 %v25_v30  ;;  %v1153_v45 = vrot.slane %v1037_v32, 2  ;;  %v1154_v48 = vrot.slane %v1038_v39, 2  ;;  %1901 = vmatprep.subr.bf16.mxu0 %v2165_v46  ;;  %v28_v58 = vld [vmem:[%s2982_s0 + $0x18] sm:$0x2]  ;;  %v29_v59 = vld [vmem:[%s2982_s0 + $0x1c] sm:$0x2] }
  0x1e   :  { %2039 = vrot.lane.b32.xlu1 %v2038_v42, %s2205_s17  ;;  %v1156_v42 = vrot.slane %v1040_v28, 2  ;;  %v2073_v47 = vpack.i.bf16 %v1086_v38, %v1085_v31  ;;  %v55_v49 = vunpack.c.l.bf16 %v22_v33  ;;  %v56_v50 = vunpack.c.l.bf16 %v23_v34  ;;  %v26_v62 = vld [vmem:[%s2982_s0] sm:$0x2]  ;;  %v27_v63 = vld [vmem:[%s2982_s0 + $0x4] sm:$0x2]  ;;  %v2169_v34 = vld [vmem:[%s2983_s1 + $0x178] sm:$0xff]  }
  0x1f   :  { %v73_v61 = vunpack.c.l.bf16 %v1678_v51  ;;  %v2167_v0 = vld [vmem:[%s2983_s1 + $0xc0] sm:$0xff]   ;;  %v2083_v1 = vpack.i.bf16 %v1154_v48, %v1153_v45  ;;  %v74_v4 = vunpack.c.l.bf16 %v1679_v55  ;;  %v61_v6 = vunpack.c.l.bf16 %v28_v58  ;;  %v1682_v8 = vld [vmem:[%s2982_s0 + $0x1c] sm:$0x3]  ;;  %v1681_v12 = vld [vmem:[%s2982_s0 + $0x8] sm:$0x3] }
  0x20   :  { %v2088_v52 = vpack.i.bf16 %v1156_v42, %v1155_v41  ;;  %v87_v2 = vrot.slane %v55_v49, 1  ;;  %v88_v3 = vrot.slane %v56_v50, 1  ;;  %1902 = vmatpush3.bf16.msra.mxu0 %v2166_v60  ;;  %v62_v7 = vunpack.c.l.bf16 %v29_v59  ;;  %v1683_v9 = vld [vmem:[%s2982_s0 + $0x20] sm:$0x3]  ;;  %v1680_v11 = vld [vmem:[%s2982_s0 + $0x4] sm:$0x3] }
  0x21   :  { %2034 = vrot.lane.b32.xlu0 %v2033_v53, %s2205_s17  ;;  %v89_v53 = vrot.slane %v57_v43, 1  ;;  %1903 = vmatprep.subr.bf16.mxu0 %v2167_v0  ;;  %v71_v13 = vunpack.c.l.bf16 %v1676_v56  ;;  %v72_v14 = vunpack.c.l.bf16 %v1677_v57  ;;  %v32_v15 = vld [vmem:[%s2982_s0 + $0x18] sm:$0x6]  ;;  %v59_v18 = vunpack.c.l.bf16 %v26_v62  ;;  %v33_v20 = vld [vmem:[%s2982_s0 + $0x1c] sm:$0x6] }
  0x22   :  { %2049 = vrot.lane.b32.xlu1 %v2048_v54, %s2205_s17  ;;  %v90_v54 = vrot.slane %v58_v44, 1  ;;  %v2093_v16 = vpack.i.bf16 %v88_v3, %v87_v2  ;;  %v60_v19 = vunpack.c.l.bf16 %v27_v63  ;;  %v109_v21 = vrot.slane %v61_v6, 2  ;;  %v30_v27 = vld [vmem:[%s2982_s0] sm:$0x6]  ;;  %v31_v28 = vld [vmem:[%s2982_s0 + $0x4] sm:$0x6] }
  0x23   :  { %v110_v22 = vrot.slane %v62_v7, 2  ;;  %v77_v23 = vunpack.c.l.bf16 %v1682_v8  ;;  %v78_v24 = vunpack.c.l.bf16 %v1683_v9  ;;  %v75_v25 = vunpack.c.l.bf16 %v1680_v11  ;;  %v1686_v33 = vld [vmem:[%s2982_s0 + $0x1c] sm:$0x2]  ;;  %v1687_v39 = vld [vmem:[%s2982_s0 + $0x20] sm:$0x2]  ;;  %v2179_v2 = vld [vmem:[%s2983_s1 + $0x70] sm:$0xff]  }
  0x24   :  { %v2103_v29 = vpack.i.bf16 %v72_v14, %v71_v13  ;;  %v107_v30 = vrot.slane %v59_v18, 2  ;;  %v108_v31 = vrot.slane %v60_v19, 2  ;;  %v65_v32 = vunpack.c.l.bf16 %v32_v15  ;;  %v1684_v46 = vld [vmem:[%s2982_s0 + $0x4] sm:$0x2]  ;;  %v1685_v51 = vld [vmem:[%s2982_s0 + $0x8] sm:$0x2] }
  0x25   :  { %2044 = vrot.lane.b32.xlu0 %v2043_v5, %s2205_s17  ;;  %v2098_v5 = vpack.i.bf16 %v90_v54, %v89_v53  ;;  %v2118_v35 = vpack.i.bf16 %v110_v22, %v109_v21  ;;  %v66_v38 = vunpack.c.l.bf16 %v33_v20  ;;  %v175_v40 = vrot.slane %v75_v25, 1  ;;  %v2175_v60 = vld [vmem:[%s2983_s1 + $0x78] sm:$0xff]   ;;  %v2180_v3 = vld [vmem:[%s2983_s1 + $0x30] sm:$0xff]   ;;  %v2184_v6 = vld [vmem:[%s2983_s1 + $0x28] sm:$0xff]  }
  0x26   :  { %2059 = vrot.lane.b32.xlu1 %v2058_v10, %s2206_s14  ;;  %v2168_v10 = vld [vmem:[%s2983_s1 + $0x80] sm:$0xff]   ;;  %v2113_v42 = vpack.i.bf16 %v108_v31, %v107_v30  ;;  %v129_v43 = vrot.slane %v65_v32, 3  ;;  %v63_v44 = vunpack.c.l.bf16 %v30_v27  ;;  %v64_v45 = vunpack.c.l.bf16 %v31_v28  ;;  %1911 = vmatprep.subr.bf16.mxu1 %v2175_v60  ;;  %v2191_v9 = vld [vmem:[%s2983_s1 + $0x58] sm:$0xff]   ;;  %v2195_v11 = vld [vmem:[%s2983_s1 + $0x50] sm:$0xff]  }
  0x27   :  { %1904 = vmatpush3.bf16.msra.mxu0 %v2168_v10  ;;  %v130_v48 = vrot.slane %v66_v38, 3  ;;  %v81_v49 = vunpack.c.l.bf16 %v1686_v33  ;;  %v82_v50 = vunpack.c.l.bf16 %v1687_v39  ;;  %v79_v55 = vunpack.c.l.bf16 %v1684_v46  ;;  %v2187_v7 = vld [vmem:[%s2983_s1 + $0x60] sm:$0xff]   ;;  %v2192_v10 = vld [vmem:[%s2983_s1 + $0x18] sm:$0xff]   ;;  %v2197_v13 = vld [vmem:[%s2983_s1 + $0x48] sm:$0xff]  }
  0x28   :  { %1933 = vmatprep.subr.bf16.mxu0 %v2169_v34  ;;  %v127_v53 = vrot.slane %v63_v44, 3  ;;  %v128_v54 = vrot.slane %v64_v45, 3  ;;  %v80_v56 = vunpack.c.l.bf16 %v1685_v51  ;;  %v2188_v8 = vld [vmem:[%s2983_s1 + $0x20] sm:$0xff]   ;;  %v2198_v14 = vld [vmem:[%s2983_s1 + $0x8] sm:$0xff]   ;;  %v1690_v31 = vld [vmem:[%s2982_s0 + $0x1c] sm:$0x6] }
  0x29   :  { %2054 = vrot.lane.b32.xlu0 %v2053_v17, %s2206_s14  ;;  %v2108_v17 = vpack.i.bf16 %v74_v4, %v73_v61  ;;  %v2138_v57 = vpack.i.bf16 %v130_v48, %v129_v43  ;;  %v197_v58 = vrot.slane %v81_v49, 2  ;;  %v198_v59 = vrot.slane %v82_v50, 2  ;;  %v2176_v61 = vld [vmem:[%s2983_s1 + $0x38] sm:$0xff]   ;;  %v2199_v15 = vld [vmem:[%s2983_s1 + $0x40] sm:$0xff]   ;;  %v1704_v19 = vld [vmem:[%s2982_s0 + $0x8] sm:$0x2] }
  0x2a   :  { %2069 = vrot.lane.b32.xlu1 %v2068_v26, %s2206_s14  ;;  %v76_v26 = vunpack.c.l.bf16 %v1681_v12  ;;  %v2133_v62 = vpack.i.bf16 %v128_v54, %v127_v53  ;;  %v195_v63 = vrot.slane %v79_v55, 2  ;;  %v196_v0 = vrot.slane %v80_v56, 2  ;;  %1912 = vmatpush3.bf16.msra.mxu1 %v2176_v61  ;;  %v2196_v12 = vld [vmem:[%s2983_s1 + $0x10] sm:$0xff]   ;;  %v1705_v20 = vld [vmem:[%s2982_s0 + $0xc] sm:$0x2] }
  0x2b   :  { %1913 = vmatprep.subr.bf16.mxu1 %v2179_v2  ;;  %v383_v25 = vunpack.c.l.bf16 %v1705_v20  ;;  %v2610_v27 = vld [vmem:[%s2982_s0 + $0x4] sm:$0x6]  ;;  %v2615_v28 = vld [vmem:[%s2982_s0 + $0x8] sm:$0x6]  ;;  %v1691_v32 = vld [vmem:[%s2982_s0 + $0x20] sm:$0x6]  ;;  %v368_v44 = vunpack.c.l.bf16 %v1690_v31 }
  0x2c   :  { %v176_v41 = vrot.slane %v76_v26, 1  ;;  %v2143_v4 = vpack.i.bf16 %v196_v0, %v195_v63  ;;  %v1707_v26 = vld [vmem:[%s2982_s0 + $0x24] sm:$0x2]  ;;  %v2209_v33 = vmov 1983009808   ;;  %v367_v43 = vunpack.c.l.bf16 %v2615_v28 }
  0x2d   :  { %2064 = vrot.lane.b32.xlu0 %v2063_v36, %s2206_s14  ;;  %v177_v36 = vrot.slane %v77_v23, 1  ;;  %v1706_v23 = vld [vmem:[%s2982_s0 + $0x20] sm:$0x2]  ;;  %v248_v34 = vunpack.c.l.s4 %v2209_v33  ;;  %v463_v39 = vrot.slane %v383_v25, 7  ;;  %v369_v45 = vunpack.c.l.bf16 %v1691_v32  ;;  %v2640_v46 = vld [vmem:[%s2982_s0 + $0xc] sm:$0x3] }
  0x2e   :  { %2079 = vrot.lane.b32.xlu1 %v2078_v37, %s2207_s10  ;;  %v178_v37 = vrot.slane %v78_v24, 1  ;;  %1914 = vmatpush3.bf16.msra.mxu1 %v2180_v3  ;;  %v382_v24 = vunpack.c.l.bf16 %v1704_v19  ;;  %v1806_v48 = vld [vmem:[%s2982_s0 + $0x28] sm:$0x1]  ;;  %v2657_v53 = vld [vmem:[%s2982_s0 + $0x2c] sm:$0x1]  ;;  %v1009_v61 = vunpack.c.l.bf16 %v2640_v46  ;;  %vm627_vm4 = vcmask 1042434  }
  0x2f   :  { %v249_v51 = vunpack.c.0.s8 %v248_v34  ;;  %v1028_v2 = vunpack.c.l.bf16 %v2657_v53  ;;  %v2674_v3 = vld [vmem:[%s2982_s0 + $0x14] sm:$0x1]  ;;  %vm629_vm5 = vcmask 1044484   ;;  %vm628_vm6 = vmor %vm626_vm3, %vm627_vm4  ;;  %vm631_vm8 = vcmask 1046534  }
  0x30   :  { %v462_v38 = vrot.slane %v382_v24, 7  ;;  %vm630_vm7 = vmor %vm628_vm6, %vm629_vm5  ;;  %vm2211_vm10 = vmmov 0   ;;  %vm1667_vm12 = vcmask 253952  }
  0x31   :  { %2074 = vrot.lane.b32.xlu0 %v2073_v47, %s2207_s10  ;;  %v2128_v47 = vpack.i.bf16 %v178_v37, %v177_v36  ;;  %v385_v36 = vunpack.c.l.bf16 %v1707_v26  ;;  %vm2738_vm9 = vmor %vm630_vm7, %vm631_vm8 }
  0x32   :  { %2089 = vrot.lane.b32.xlu1 %v2088_v52, %s2207_s10  ;;  %v2123_v52 = vpack.i.bf16 %v176_v41, %v175_v40  ;;  %v2628_v40 = vld [vmem:[%s2982_s0 + $0x24] sm:$0x3]  ;;  %v2633_v41 = vld [vmem:[%s2982_s0 + $0x28] sm:$0x3] }
  0x33   :  { %v465_v54 = vrot.slane %v385_v36, 7  ;;  %v1011_v56 = vunpack.c.l.bf16 %v2628_v40 }
  0x35   :  { %2084 = vrot.lane.b32.xlu0 %v2083_v1, %s2207_s10  ;;  %v2148_v1 = vpack.i.bf16 %v198_v59, %v197_v58  ;;  %v2664_v58 = vld [vmem:[%s2982_s0 + $0x10] sm:$0x1] }
  0x36   :  { %2099 = vrot.lane.b32.xlu1 %v2098_v5, %s2205_s17  ;;  %v2183_v5 = vld [vmem:[%s2983_s1 + $0x68] sm:$0xff]  }
  0x37   :  { %1915 = vmatprep.subr.bf16.mxu1 %v2183_v5 }
  0x38   :  { %1916 = vmatpush3.bf16.msra.mxu1 %v2184_v6 }
  0x39   :  { %2094 = vrot.lane.b32.xlu0 %v2093_v16, %s2205_s17  ;;  %1917 = vmatprep.subr.bf16.mxu1 %v2187_v7  ;;  %v2200_v16 = vld [vmem:[%s2983_s1] sm:$0xff]  }
  0x3a   :  { %2109 = vrot.lane.b32.xlu1 %v2108_v17, %s2205_s17  ;;  %v2208_v17 = vmov 0.0  }
  0x3c   :  { %1918 = vmatpush3.bf16.msra.mxu1 %v2188_v8  ;;  %v1025_v8 = vunpack.c.l.bf16 %v2664_v58 }
  0x3d   :  { %2104 = vrot.lane.b32.xlu0 %v2103_v29, %s2205_s17  ;;  %1919 = vmatprep.subr.bf16.mxu1 %v2191_v9  ;;  %v384_v29 = vunpack.c.l.bf16 %v1706_v23 }
  0x3e   :  { %2119 = vrot.lane.b32.xlu1 %v2118_v35, %s2206_s14  ;;  %v250_v35 = vlaneseq }
  0x3f   :  { %v464_v49 = vrot.slane %v384_v29, 7 }
  0x40   :  { %1920 = vmatpush3.bf16.msra.mxu1 %v2192_v10 }
  0x41   :  { %2114 = vrot.lane.b32.xlu0 %v2113_v42, %s2206_s14  ;;  %1921 = vmatprep.subr.bf16.mxu1 %v2195_v11  ;;  %v366_v42 = vunpack.c.l.bf16 %v2610_v27 }
  0x42   :  { %2129 = vrot.lane.b32.xlu1 %v2128_v47, %s2206_s14  ;;  %v2645_v47 = vld [vmem:[%s2982_s0 + $0x10] sm:$0x3] }
  0x44   :  { %1922 = vmatpush3.bf16.msra.mxu1 %v2196_v12 }
  0x45   :  { %2124 = vrot.lane.b32.xlu0 %v2123_v52, %s2206_s14  ;;  %1923 = vmatprep.subr.bf16.mxu1 %v2197_v13  ;;  %v2652_v52 = vshrl.u32 %v250_v35, 7 }
  0x46   :  { %2139 = vrot.lane.b32.xlu1 %v2138_v57, %s2207_s10  ;;  %v1012_v57 = vunpack.c.l.bf16 %v2633_v41 }
  0x47   :  { %v2679_v7 = vsub.s32 %v249_v51, %v2652_v52 }
  0x48   :  { %1924 = vmatpush3.bf16.msra.mxu1 %v2198_v14 }
  0x49   :  { %2134 = vrot.lane.b32.xlu0 %v2133_v62, %s2207_s10  ;;  %1925 = vmatprep.subr.bf16.mxu1 %v2199_v15  ;;  %v1027_v62 = vunpack.c.l.bf16 %v1806_v48 }
  0x4a   :  { %2149 = vrot.lane.b32.xlu1 %v2148_v1, %s2207_s10  ;;  %v1010_v1 = vunpack.c.l.bf16 %v2645_v47 }
  0x4c   :  { %1926 = vmatpush3.bf16.msra.mxu1 %v2200_v16  ;;  %v2688_v16 = vrot.slane %v1027_v62, 7 }
  0x4d   :  { %2144 = vrot.lane.b32.xlu0 %v2143_v4, %s2207_s10  ;;  %1958 = vmatprep.subr.bf16.mxu1 %v2208_v17 }
  0x78   :  { %v2589_v18 = vpop.permute.xlu1 %1974 }
  0x79   :  { %v1977_v63 = vunpack.i.h.bf16 %v2589_v18  ;;  %v1976_v0 = vunpack.i.l.bf16 %v2589_v18  ;;  %v1026_v18 = vunpack.c.l.bf16 %v2674_v3 }
  0x7b   :  { %v2597_v21 = vpop.permute.xlu0 %1984  ;;  %v538_v19 = vsel %vm211_vm0, %v462_v38, %v1976_v0  ;;  %v539_v20 = vsel %vm211_vm0, %v463_v39, %v1977_v63 }
  0x7c   :  { %v2599_v22 = vpop.permute.xlu1 %1979  ;;  %v1987_v4 = vunpack.i.h.bf16 %v2597_v21  ;;  %v1986_v5 = vunpack.i.l.bf16 %v2597_v21 }
  0x7d   :  { %v1982_v9 = vunpack.i.h.bf16 %v2599_v22  ;;  %v1981_v10 = vunpack.i.l.bf16 %v2599_v22 }
  0x7e   :  { %v526_v22 = vsel %vm211_vm0, %v366_v42, %v1986_v5  ;;  %v527_v24 = vsel %vm211_vm0, %v367_v43, %v1987_v4 }
  0x7f   :  { %v1990_v30 = vpop.permute.xlu0 %1989  ;;  %v540_v28 = vsel %vm211_vm0, %v464_v49, %v1981_v10  ;;  %v541_v29 = vsel %vm211_vm0, %v465_v54, %v1982_v9 }
  0x80   :  { %v2623_v37 = vpop.permute.xlu1 %1999  ;;  %v1992_v59 = vunpack.i.h.bf16 %v1990_v30  ;;  %v1991_v60 = vunpack.i.l.bf16 %v1990_v30 }
  0x81   :  { %v2002_v11 = vunpack.i.h.bf16 %v2623_v37  ;;  %v2001_v12 = vunpack.i.l.bf16 %v2623_v37 }
  0x82   :  { %v528_v14 = vsel %vm211_vm0, %v368_v44, %v1991_v60  ;;  %v529_v15 = vsel %vm211_vm0, %v369_v45, %v1992_v59 }
  0x83   :  { %v2650_v50 = vpop.permute.xlu0 %1994  ;;  %v532_v30 = vsel %vm216_vm1, %v528_v14, %v2001_v12  ;;  %v533_v31 = vsel %vm216_vm1, %v529_v15, %v2002_v11 }
  0x84   :  { %v2010_v55 = vpop.permute.xlu1 %2009  ;;  %v1997_v33 = vunpack.i.h.bf16 %v2650_v50  ;;  %v1996_v34 = vunpack.i.l.bf16 %v2650_v50 }
  0x85   :  { %v2012_v21 = vunpack.i.h.bf16 %v2010_v55  ;;  %v2011_v23 = vunpack.i.l.bf16 %v2010_v55 }
  0x86   :  { %v530_v60 = vsel %vm216_vm1, %v526_v22, %v1996_v34  ;;  %v531_v62 = vsel %vm216_vm1, %v527_v24, %v1997_v33 }
  0x87   :  { %v2005_v6 = vpop.permute.xlu0 %2004  ;;  %v545_v37 = vsel %vm216_vm1, %v541_v29, %v2012_v21  ;;  %v544_v38 = vsel %vm216_vm1, %v540_v28, %v2011_v23  ;;  %v1108_v29 = vrot.slane %v1028_v2, 7 }
  0x88   :  { %v2020_v13 = vpop.permute.xlu1 %2019  ;;  %v2007_v39 = vunpack.i.h.bf16 %v2005_v6  ;;  %v2006_v42 = vunpack.i.l.bf16 %v2005_v6 }
  0x89   :  { %v2022_v25 = vunpack.i.h.bf16 %v2020_v13  ;;  %v2021_v26 = vunpack.i.l.bf16 %v2020_v13 }
  0x8a   :  { %v543_v4 = vsel %vm216_vm1, %v539_v20, %v2007_v39  ;;  %v542_v5 = vsel %vm216_vm1, %v538_v19, %v2006_v42 }
  0x8b   :  { %v2015_v27 = vpop.permute.xlu0 %2014  ;;  %v536_v43 = vsel %vm221_vm2, %v532_v30, %v2021_v26  ;;  %v537_v44 = vsel %vm221_vm2, %v533_v31, %v2022_v25  ;;  %v1105_v30 = vrot.slane %v1025_v8, 7 }
  0x8c   :  { %v2030_v32 = vpop.permute.xlu1 %2029  ;;  %v2017_v51 = vunpack.i.h.bf16 %v2015_v27  ;;  %v2016_v50 = vunpack.i.l.bf16 %v2015_v27 }
  0x8d   :  { %v2032_v35 = vunpack.i.h.bf16 %v2030_v32  ;;  %v2031_v36 = vunpack.i.l.bf16 %v2030_v32 }
  0x8e   :  { %v534_v15 = vsel %vm221_vm2, %v530_v60, %v2016_v50  ;;  %v535_v21 = vsel %vm221_vm2, %v531_v62, %v2017_v51 }
  0x8f   :  { %v548_v45 = vsel %vm221_vm2, %v544_v38, %v2031_v36  ;;  %v549_v48 = vsel %vm221_vm2, %v545_v37, %v2032_v35  ;;  %v2025_v49 = vpop.permute.xlu0 %2024  ;;  %v1106_v38 = vrot.slane %v1026_v18, 7  ;;  %v2182_v18 = vld [vmem:[%s2983_s1 + $0x118] sm:$0xff]  }
  0x90   :  { %v592_v54 = vcombine.low %v536_v43, %v548_v45  ;;  %v609_v55 = vcombine.low %v537_v44, %v549_v48  ;;  %v2040_v59 = vpop.permute.xlu1 %2039  ;;  %v2027_v63 = vunpack.i.h.bf16 %v2025_v49  ;;  %v2026_v0 = vunpack.i.l.bf16 %v2025_v49 }
  0x91   :  { %v593_v6 = vcombine.high %v536_v43, %v548_v45  ;;  %v610_v9 = vcombine.high %v537_v44, %v549_v48  ;;  %v2042_v23 = vunpack.i.h.bf16 %v2040_v59  ;;  %v2041_v22 = vunpack.i.l.bf16 %v2040_v59 }
  0x92   :  { %v600_v10 = vrot.slane %v592_v54, %v2679_v7  ;;  %v617_v11 = vrot.slane %v609_v55, %v2679_v7  ;;  %v546_v12 = vsel %vm221_vm2, %v542_v5, %v2026_v0  ;;  %v547_v13 = vsel %vm221_vm2, %v543_v4, %v2027_v63 }
  0x93   :  { %v2035_v14 = vpop.permute.xlu0 %2034  ;;  %v558_v24 = vcombine.low %v534_v15, %v546_v12  ;;  %v559_v19 = vcombine.high %v534_v15, %v546_v12  ;;  %v575_v25 = vcombine.low %v535_v21, %v547_v13  ;;  %v576_v26 = vcombine.high %v535_v21, %v547_v13 }
  0x94   :  { %v2050_v20 = vpop.permute.xlu1 %2049  ;;  %v607_v27 = vrot.slane %v593_v6, %v2679_v7  ;;  %v624_v28 = vrot.slane %v610_v9, %v2679_v7  ;;  %v608_v31 = vcombine.high %v600_v10, %v600_v10  ;;  %v625_v32 = vcombine.high %v617_v11, %v617_v11 }
  0x95   :  { %v566_v33 = vrot.slane %v558_v24, %v2679_v7  ;;  %v583_v34 = vrot.slane %v575_v25, %v2679_v7  ;;  %v573_v36 = vrot.slane %v559_v19, %v2679_v7  ;;  %v590_v37 = vrot.slane %v576_v26, %v2679_v7 }
  0x96   :  { %v1172_v2 = vsel %vm211_vm0, %v1012_v57, %v2042_v23  ;;  %v1171_v8 = vsel %vm211_vm0, %v1011_v56, %v2041_v22  ;;  %v643_v42 = vrot.slane %v607_v27, 7  ;;  %v647_v43 = vrot.slane %v624_v28, 7 }
  0x97   :  { %v2045_v35 = vpop.permute.xlu0 %2044  ;;  %v574_v53 = vcombine.high %v566_v33, %v566_v33  ;;  %v591_v58 = vcombine.high %v583_v34, %v583_v34  ;;  %v2037_v44 = vunpack.i.h.bf16 %v2035_v14  ;;  %v2036_v45 = vunpack.i.l.bf16 %v2035_v14 }
  0x98   :  { %v2060_v39 = vpop.permute.xlu1 %2059  ;;  %v1722_v51 = vrot.slane %v608_v31, 9  ;;  %v1723_v50 = vrot.slane %v625_v32, 9  ;;  %v635_v41 = vrot.slane %v573_v36, 7  ;;  %v639_v54 = vrot.slane %v590_v37, 7 }
  0x99   :  { %v1720_v48 = vrot.slane %v574_v53, 9  ;;  %v1721_v49 = vrot.slane %v591_v58, 9  ;;  %v2052_v57 = vunpack.i.h.bf16 %v2050_v20  ;;  %v2051_v55 = vunpack.i.l.bf16 %v2050_v20 }
  0x9a   :  { %v2047_v59 = vunpack.i.h.bf16 %v2045_v35  ;;  %v2046_v56 = vunpack.i.l.bf16 %v2045_v35  ;;  %v2062_v60 = vunpack.i.h.bf16 %v2060_v39  ;;  %v2061_v62 = vunpack.i.l.bf16 %v2060_v39 }
  0x9b   :  { %v2055_v3 = vpop.permute.xlu0 %2054  ;;  %v636_v63 = vsel %vm2738_vm9, %v1720_v48, %v635_v41  ;;  %v640_v0 = vsel %vm2738_vm9, %v1721_v49, %v639_v54  ;;  %v644_v4 = vsel %vm2738_vm9, %v1722_v51, %v643_v42  ;;  %v648_v5 = vsel %vm2738_vm9, %v1723_v50, %v647_v43  ;;  %v36_v54 = vld [vmem:[%s2982_s0 + $0x18] sm:$0x4] }
  0x9c   :  { %v2070_v40 = vpop.permute.xlu1 %2069  ;;  %v1170_v6 = vsel %vm211_vm0, %v1010_v1, %v2037_v44  ;;  %v1169_v9 = vsel %vm211_vm0, %v1009_v61, %v2036_v45  ;;  %v2057_v10 = vunpack.i.h.bf16 %v2055_v3  ;;  %v2056_v11 = vunpack.i.l.bf16 %v2055_v3  ;;  %v2171_v3 = vld [vmem:[%s2983_s1 + $0x170] sm:$0xff]  }
  0x9d   :  { %v1184_v13 = vsel %vm211_vm0, %v1108_v29, %v2052_v57  ;;  %v1183_v14 = vsel %vm211_vm0, %v2688_v16, %v2051_v55  ;;  %v649_v21 = vcombine.low %v636_v63, %v640_v0  ;;  %v650_v23 = vcombine.low %v644_v4, %v648_v5  ;;  %v2172_v4 = vld [vmem:[%s2983_s1 + $0x130] sm:$0xff]   ;;  %v2803_v5 = vld [vmem:[%s2982_s0 + $0x1c] sm:$0x1] }
  0x9e   :  { %v1182_v22 = vsel %vm211_vm0, %v1106_v38, %v2047_v59  ;;  %v1181_v47 = vsel %vm211_vm0, %v1105_v30, %v2046_v56  ;;  %v1175_v1 = vsel %vm216_vm1, %v1171_v8, %v2061_v62  ;;  %v1176_v46 = vsel %vm216_vm1, %v1172_v2, %v2062_v60  ;;  %v2170_v2 = vld [vmem:[%s2983_s1 + $0x138] sm:$0xff]  }
  0x9f   :  { %v2065_v12 = vpop.permute.xlu0 %2064  ;;  %v2072_v61 = vunpack.i.h.bf16 %v2070_v40  ;;  %v2071_v20 = vunpack.i.l.bf16 %v2070_v40  ;;  %v657_v24 = vrot.slane %v649_v21, %v2679_v7  ;;  %v664_v19 = vrot.slane %v650_v23, %v2679_v7  ;;  %v2791_v56 = vld [vmem:[%s2982_s0 + $0x18] sm:$0x1] }
  0xa0   :  { %v2080_v15 = vpop.permute.xlu1 %2079  ;;  %v1173_v25 = vsel %vm216_vm1, %v1169_v9, %v2056_v11  ;;  %v1174_v16 = vsel %vm216_vm1, %v1170_v6, %v2057_v10  ;;  %v2067_v29 = vunpack.i.h.bf16 %v2065_v12  ;;  %v2066_v31 = vunpack.i.l.bf16 %v2065_v12  ;;  %v2808_v6 = vld [vmem:[%s2982_s0] sm:$0x1]  ;;  %v2815_v12 = vld [vmem:[%s2982_s0 + $0x4] sm:$0x1] }
  0xa1   :  { %v2082_v26 = vunpack.i.h.bf16 %v2080_v15  ;;  %v2081_v27 = vunpack.i.l.bf16 %v2080_v15  ;;  %v666_v30 = vcombine.high %v657_v24, %v664_v19  ;;  %v665_v33 = vcombine.low %v657_v24, %v664_v19  ;;  %v34_v24 = vld [vmem:[%s2982_s0] sm:$0x4]  ;;  %v35_v19 = vld [vmem:[%s2982_s0 + $0x4] sm:$0x4] }
  0xa2   :  { %v1187_v38 = vsel %vm216_vm1, %v1183_v14, %v2071_v20  ;;  %v1188_v39 = vsel %vm216_vm1, %v1184_v13, %v2072_v61  ;;  %v1185_v57 = vsel %vm216_vm1, %v1181_v47, %v2066_v31  ;;  %v1186_v55 = vsel %vm216_vm1, %v1182_v22, %v2067_v29  ;;  %v2173_v13 = vld [vmem:[%s2983_s1 + $0x168] sm:$0xff]   ;;  %v37_v22 = vld [vmem:[%s2982_s0 + $0x1c] sm:$0x4] }
  0xa3   :  { %v2075_v28 = vpop.permute.xlu0 %2074  ;;  %v670_v53 = vpack.c.bf16 %v666_v30, %v666_v30  ;;  %v669_v58 = vpack.c.bf16 %v665_v33, %v665_v33  ;;  %v1179_v8 = vsel %vm221_vm2, %v1175_v1, %v2081_v27  ;;  %v1180_v42 = vsel %vm221_vm2, %v1176_v46, %v2082_v26  ;;  %v2174_v27 = vld [vmem:[%s2983_s1 + $0x128] sm:$0xff]  }
  0xa4   :  { %v2090_v32 = vpop.permute.xlu1 %2089  ;;  %v2077_v34 = vunpack.i.h.bf16 %v2075_v28  ;;  %v2076_v35 = vunpack.i.l.bf16 %v2075_v28  ;;  %v69_v14 = vunpack.c.l.bf16 %v36_v54  ;;  %v53_v23 = vunpack.c.l.bf16 %v2791_v56  ;;  %v2181_v54 = vld [vmem:[%s2983_s1 + $0x158] sm:$0xff]  }
  0xa5   :  { %v2092_v36 = vunpack.i.h.bf16 %v2090_v32  ;;  %v2091_v37 = vunpack.i.l.bf16 %v2090_v32  ;;  %832 = vmatprep.mubr.bf16.mxu0 %v670_v53  ;;  %v54_v61 = vunpack.c.l.bf16 %v2803_v5  ;;  %v51_v20 = vunpack.c.l.bf16 %v2808_v6 }
  0xa6   :  { %v1177_v40 = vsel %vm221_vm2, %v1173_v25, %v2076_v35  ;;  %v1178_v59 = vsel %vm221_vm2, %v1174_v16, %v2077_v34  ;;  %833 = vmatmul.mubr.bf16.vlgmr.msra.gmra.mxu0 %v669_v58  ;;  %v52_v26 = vunpack.c.l.bf16 %v2815_v12  ;;  %v2210_v28 = vmov 1966171168   ;;  %v2177_v35 = vld [vmem:[%s2983_s1 + $0x160] sm:$0xff]  }
  0xa7   :  { %v1191_v43 = vsel %vm221_vm2, %v1187_v38, %v2091_v37  ;;  %v1192_v44 = vsel %vm221_vm2, %v1188_v39, %v2092_v36  ;;  %v2085_v45 = vpop.permute.xlu0 %2084  ;;  %1934 = vmatpush3.bf16.msra.mxu0 %v2170_v2  ;;  %v1461_v29 = vunpack.c.l.s4 %v2210_v28  ;;  %v70_v32 = vunpack.c.l.bf16 %v37_v22 }
  0xa8   :  { %v1219_v48 = vcombine.low %v1179_v8, %v1191_v43  ;;  %v1228_v49 = vcombine.low %v1180_v42, %v1192_v44  ;;  %v2087_v51 = vunpack.i.h.bf16 %v2085_v45  ;;  %v2086_v50 = vunpack.i.l.bf16 %v2085_v45  ;;  %v2779_v41 = vpop.permute.xlu1 %2099  ;;  %1935 = vmatprep.subr.bf16.mxu0 %v2171_v3  ;;  %v2178_v44 = vld [vmem:[%s2983_s1 + $0x120] sm:$0xff]  }
  0xa9   :  { %v149_v33 = vrot.slane %v69_v14, 4  ;;  %v67_v38 = vunpack.c.l.bf16 %v34_v24  ;;  %v68_v39 = vunpack.c.l.bf16 %v35_v19  ;;  %v2101_v43 = vunpack.i.l.bf16 %v2779_v41 }
  0xaa   :  { %v1226_v60 = vrot.slane %v1219_v48, %v2679_v7  ;;  %v1235_v62 = vrot.slane %v1228_v49, %v2679_v7  ;;  %v1189_v63 = vsel %vm221_vm2, %v1185_v57, %v2086_v50  ;;  %v1190_v0 = vsel %vm221_vm2, %v1186_v55, %v2087_v51 }
  0xab   :  { %v1201_v9 = vcombine.low %v1177_v40, %v1189_v63  ;;  %v1210_v10 = vcombine.low %v1178_v59, %v1190_v0  ;;  %v2810_v11 = vpop.permute.xlu0 %2094  ;;  %1936 = vmatpush3.bf16.msra.mxu0 %v2172_v4  ;;  %v1462_v48 = vunpack.c.0.s8 %v1461_v29  ;;  %v2102_v49 = vunpack.i.h.bf16 %v2779_v41 }
  0xac   :  { %v1227_v15 = vcombine.high %v1226_v60, %v1226_v60  ;;  %v1236_v21 = vcombine.high %v1235_v62, %v1235_v62  ;;  %v2824_v47 = vpop.permute.xlu1 %2109  ;;  %1937 = vmatprep.subr.bf16.mxu0 %v2173_v13  ;;  %v1822_v36 = vrot.slane %v1226_v60, 9  ;;  %v1823_v37 = vrot.slane %v1235_v62, 9  ;;  %v2185_v13 = vld [vmem:[%s2983_s1 + $0x150] sm:$0xff]  }
  0xad   :  { %v1208_v1 = vrot.slane %v1201_v9, %v2679_v7  ;;  %v1217_v46 = vrot.slane %v1210_v10, %v2679_v7  ;;  %v150_v51 = vrot.slane %v70_v32, 4  ;;  %v2097_v40 = vunpack.i.h.bf16 %v2810_v11  ;;  %v2189_v32 = vld [vmem:[%s2983_s1 + $0x148] sm:$0xff]  }
  0xae   :  { %v1247_v25 = vrot.slane %v1227_v15, 7  ;;  %v1251_v16 = vrot.slane %v1236_v21, 7  ;;  %v2096_v59 = vunpack.i.l.bf16 %v2810_v11  ;;  %v2112_v56 = vunpack.i.h.bf16 %v2824_v47 }
  0xaf   :  { %v1209_v31 = vcombine.high %v1208_v1, %v1208_v1  ;;  %v1218_v30 = vcombine.high %v1217_v46, %v1217_v46  ;;  %v2105_v34 = vpop.permute.xlu0 %2104  ;;  %v1820_v58 = vrot.slane %v1208_v1, 9  ;;  %v1821_v8 = vrot.slane %v1217_v46, 9  ;;  %1938 = vmatpush3.bf16.msra.mxu0 %v2174_v27 }
  0xb0   :  { %v2843_v53 = vpop.permute.xlu1 %2119  ;;  %v1248_v45 = vsel %vm2738_vm9, %v1822_v36, %v1247_v25  ;;  %v1252_v3 = vsel %vm2738_vm9, %v1823_v37, %v1251_v16  ;;  %1939 = vmatprep.subr.bf16.mxu0 %v2177_v35  ;;  %v148_v41 = vrot.slane %v68_v39, 4  ;;  %v2111_v62 = vunpack.i.l.bf16 %v2824_v47 }
  0xb1   :  { %v1239_v2 = vrot.slane %v1209_v31, 7  ;;  %v1243_v42 = vrot.slane %v1218_v30, 7  ;;  %v2107_v63 = vunpack.i.h.bf16 %v2105_v34  ;;  %v1254_v4 = vcombine.low %v1248_v45, %v1252_v3  ;;  %v2190_v45 = vld [vmem:[%s2983_s1 + $0x108] sm:$0xff]  }
  0xb2   :  { %v214_v5 = vsel %vm211_vm0, %v53_v23, %v2101_v43  ;;  %v147_v6 = vrot.slane %v67_v38, 4  ;;  %v2870_v9 = vsub.s32 %v1462_v48, %v2652_v52  ;;  %v215_v10 = vsel %vm211_vm0, %v54_v61, %v2102_v49 }
  0xb3   :  { %v2115_v50 = vpop.permute.xlu0 %2114  ;;  %v1240_v57 = vsel %vm2738_vm9, %v1820_v58, %v1239_v2  ;;  %v1244_v55 = vsel %vm2738_vm9, %v1821_v8, %v1243_v42  ;;  %1940 = vmatpush3.bf16.msra.mxu0 %v2178_v44  ;;  %v2106_v11 = vunpack.i.l.bf16 %v2105_v34  ;;  %v2880_v15 = vrot.slane %v1254_v4, %v2679_v7 }
  0xb4   :  { %v2130_v60 = vpop.permute.xlu1 %2129  ;;  %v1253_v0 = vcombine.low %v1240_v57, %v1244_v55  ;;  %1941 = vmatprep.subr.bf16.mxu0 %v2181_v54  ;;  %v212_v21 = vsel %vm211_vm0, %v51_v20, %v2096_v59  ;;  %v213_v23 = vsel %vm211_vm0, %v52_v26, %v2097_v40  ;;  %v2122_v22 = vunpack.i.h.bf16 %v2843_v53  ;;  %v2186_v26 = vld [vmem:[%s2983_s1 + $0x110] sm:$0xff]   ;;  %v2193_v54 = vld [vmem:[%s2983_s1 + $0x140] sm:$0xff]  }
  0xb5   :  { %v2121_v47 = vunpack.i.l.bf16 %v2843_v53  ;;  %v229_v46 = vsel %vm211_vm0, %v150_v51, %v2112_v56  ;;  %v228_v61 = vsel %vm211_vm0, %v149_v33, %v2111_v62  ;;  %v227_v24 = vsel %vm211_vm0, %v148_v41, %v2107_v63  ;;  %v1876_v57 = vld.sshfl [vmem:[%s2982_s0 + $0x10] sm:$0x2 pattern:$0x75316420] }
  0xb6   :  { %v2877_v14 = vrot.slane %v1253_v0, %v2679_v7  ;;  %v2117_v25 = vunpack.i.h.bf16 %v2115_v50  ;;  %v2116_v16 = vunpack.i.l.bf16 %v2115_v50  ;;  %v2132_v20 = vunpack.i.h.bf16 %v2130_v60  ;;  %v1877_v55 = vld.sshfl [vmem:[%s2982_s0 + $0x14] sm:$0x2 pattern:$0x75316420] }
  0xb7   :  { %v2125_v12 = vpop.permute.xlu0 %2124  ;;  %1942 = vmatpush3.bf16.msra.mxu0 %v2182_v18  ;;  %v2131_v27 = vunpack.i.l.bf16 %v2130_v60  ;;  %v226_v28 = vsel %vm211_vm0, %v147_v6, %v2106_v11  ;;  %v219_v34 = vsel %vm216_vm1, %v214_v5, %v2121_v47  ;;  %v220_v35 = vsel %vm216_vm1, %v215_v10, %v2122_v22  ;;  %v1878_v60 = vld.sshfl [vmem:[%s2982_s0 + $0x28] sm:$0x2 pattern:$0x75316420]  ;;  %v2194_v10 = vld [vmem:[%s2983_s1 + $0x100] sm:$0xff]  }
  0xb8   :  { %v2140_v1 = vpop.permute.xlu1 %2139  ;;  %v1270_v19 = vcombine.high %v2877_v14, %v2880_v15  ;;  %1943 = vmatprep.subr.bf16.mxu0 %v2185_v13  ;;  %v2127_v36 = vunpack.i.h.bf16 %v2125_v12  ;;  %v2126_v37 = vunpack.i.l.bf16 %v2125_v12  ;;  %v217_v8 = vsel %vm216_vm1, %v212_v21, %v2116_v16  ;;  %v1879_v5 = vld.sshfl [vmem:[%s2982_s0 + $0x2c] sm:$0x2 pattern:$0x75316420] }
  0xb9   :  { %v2142_v29 = vunpack.i.h.bf16 %v2140_v1  ;;  %v2141_v31 = vunpack.i.l.bf16 %v2140_v1  ;;  %v218_v42 = vsel %vm216_vm1, %v213_v23, %v2117_v25  ;;  %v232_v43 = vsel %vm216_vm1, %v228_v61, %v2131_v27 }
  0xba   :  { %v1274_v33 = vpack.c.bf16 %v1270_v19, %v1270_v19  ;;  %v233_v44 = vsel %vm216_vm1, %v229_v46, %v2132_v20  ;;  %v230_v62 = vsel %vm216_vm1, %v226_v28, %v2126_v37  ;;  %v231_v63 = vsel %vm216_vm1, %v227_v24, %v2127_v36 }
  0xbb   :  { %v2135_v30 = vpop.permute.xlu0 %2134  ;;  %1944 = vmatpush3.bf16.msra.mxu0 %v2186_v26  ;;  %v224_v3 = vsel %vm221_vm2, %v219_v34, %v2141_v31  ;;  %v225_v48 = vsel %vm221_vm2, %v220_v35, %v2142_v29  ;;  %v1269_v23 = vcombine.low %v2877_v14, %v2880_v15  ;;  %v1466_v22 = vrot.slane %v1876_v57, %v2870_v9  ;;  %v2202_v35 = vld [vmem:[%s2983_s1 + $0x180] sm:$0xff]  }
  0xbc   :  { %v2150_v38 = vpop.permute.xlu1 %2149  ;;  %v2137_v39 = vunpack.i.h.bf16 %v2135_v30  ;;  %v2136_v53 = vunpack.i.l.bf16 %v2135_v30  ;;  %1436 = vmatprep.mubr.bf16.mxu0 %v1274_v33  ;;  %1945 = vmatprep.subr.bf16.mxu0 %v2189_v32  ;;  %v1481_v47 = vrot.slane %v1877_v55, %v2870_v9  ;;  %v1496_v1 = vrot.slane %v1878_v60, %v2870_v9  ;;  %v2201_v33 = vld [vmem:[%s2983_s1 + $0x188] sm:$0xff]  }
  0xbd   :  { %v2152_v58 = vunpack.i.h.bf16 %v2150_v38  ;;  %v2151_v2 = vunpack.i.l.bf16 %v2150_v38  ;;  %v1511_v46 = vrot.slane %v1879_v5, %v2870_v9  ;;  %v1273_v25 = vpack.c.bf16 %v1269_v23, %v1269_v23 }
  0xbe   :  { %v222_v0 = vsel %vm221_vm2, %v217_v8, %v2136_v53  ;;  %v223_v4 = vsel %vm221_vm2, %v218_v42, %v2137_v39  ;;  %v1884_v20 = vcombine.high %v1466_v22, %v1481_v47 }
  0xbf   :  { %v236_v49 = vsel %vm221_vm2, %v232_v43, %v2151_v2  ;;  %v237_v51 = vsel %vm221_vm2, %v233_v44, %v2152_v58  ;;  %v2145_v50 = vpop.permute.xlu0 %2144  ;;  %1946 = vmatpush3.bf16.msra.mxu0 %v2190_v45  ;;  %v1885_v27 = vcombine.high %v1496_v1, %v1511_v46  ;;  %v1617_v1 = vld [vmem:[%s2984_s2] sm:$0x1]  ;;  %v1624_v46 = vsub.s32 0, %v2652_v52 }
  0xc0   :  { %v262_v40 = vcombine.low %v224_v3, %v236_v49  ;;  %v270_v59 = vcombine.low %v225_v48, %v237_v51  ;;  %v2147_v56 = vunpack.i.h.bf16 %v2145_v50  ;;  %v2146_v41 = vunpack.i.l.bf16 %v2145_v50  ;;  %1947 = vmatprep.subr.bf16.mxu0 %v2193_v54 }
  0xc1   :  { %v1526_v29 = vrot.slane %v1884_v20, %v2870_v9  ;;  %v1533_v31 = vrot.slane %v1885_v27, %v2870_v9 }
  0xc2   :  { %v234_v6 = vsel %vm221_vm2, %v230_v62, %v2146_v41  ;;  %v235_v18 = vsel %vm221_vm2, %v231_v63, %v2147_v56  ;;  %v269_v11 = vrot.slane %v262_v40, %v2679_v7  ;;  %v277_v12 = vrot.slane %v270_v59, %v2679_v7 }
  0xc3   :  { %v246_v13 = vcombine.low %v222_v0, %v234_v6  ;;  %v254_v21 = vcombine.low %v223_v4, %v235_v18  ;;  %1948 = vmatpush3.bf16.msra.mxu0 %v2194_v10  ;;  %v1534_v34 = vcombine.low %v1526_v29, %v1533_v31 }
  0xc4   :  { %v279_v19 = vcombine.low %v269_v11, %v277_v12 }
  0xc5   :  { %v253_v61 = vrot.slane %v246_v13, %v2679_v7  ;;  %v261_v24 = vrot.slane %v254_v21, %v2679_v7  ;;  %v1541_v36 = vrot.slane %v1534_v34, %v2870_v9 }
  0xc6   :  { %1437 = vmatmul.mubr.bf16.vlgmr.msra.gmra.mxu0 %v1273_v25  ;;  %v293_v15 = vrot.slane %v279_v19, %v2679_v7  ;;  %v1628_v19 = vld [vmem:[%s2985_s3] sm:$0x1] }
  0xc7   :  { %v278_v16 = vcombine.low %v253_v61, %v261_v24 }
  0xc9   :  { %v286_v14 = vrot.slane %v278_v16, %v2679_v7 }
  0xcb   :  { %v295_v26 = vcombine.high %v286_v14, %v293_v15  ;;  %v294_v28 = vcombine.low %v286_v14, %v293_v15 }
  0xcd   :  { %v299_v30 = vpack.c.bf16 %v295_v26, %v295_v26  ;;  %v298_v32 = vpack.c.bf16 %v294_v28, %v294_v28 }
  0xcf   :  { %968 = vmatprep.mubr.bf16.mxu1 %v299_v30 }
  0xd0   :  { %969 = vmatmul.mubr.bf16.vlgmr.msra.gmra.mxu1 %v298_v32 }
  0xd1   :  { %1959 = vmatpush3.bf16.msra.mxu1 %v2201_v33  ;;  %1962 = vmatprep.mubr.msk.bf16.mxu1 %vm2211_vm10, %v2208_v17 }
  0xd2   :  { %1960 = vmatprep.subr.bf16.mxu1 %v2208_v17 }
  0xd5   :  { %1961 = vmatpush3.bf16.msra.mxu1 %v2202_v35 }
  0xd8   :  { %1963 = vmatmul.mubr.msk.bf16.vlgmr.msra.gmra.mxu1 %vm211_vm0, %v1541_v36 }
 0x166   :  { %v1905_v37 = vpop.f32.mrf.mxu0 }
 0x168   :  { %v1906_v38 = vpop.f32.mrf.mxu0 }
 0x169   :  { %v1907_v45 = vadd.f32 %v1906_v38, %v1905_v37 }
 0x16a   :  { %v1908_v39 = vpop.f32.mrf.mxu0 }
 0x16c   :  { %v1909_v53 = vpop.f32.mrf.mxu0 }
 0x186   :  { %v1949_v58 = vpop.f32.mrf.mxu0 }
 0x188   :  { %v1950_v2 = vpop.f32.mrf.mxu0 }
 0x189   :  { %v1951_v49 = vadd.f32 %v1950_v2, %v1949_v58 }
 0x18a   :  { %v1952_v8 = vpop.f32.mrf.mxu0 }
 0x18c   :  { %v1953_v42 = vpop.f32.mrf.mxu0 }
 0x190   :  { %v1927_v43 = vpop.f32.mrf.mxu1 }
 0x192   :  { %v1928_v44 = vpop.f32.mrf.mxu1 }
 0x193   :  { %v1929_v3 = vadd.f32 %v1928_v44, %v1927_v43 }
 0x194   :  { %v1930_v48 = vpop.f32.mrf.mxu1 }
 0x195   :  { %v971_v17 = vadd.f32 %v1929_v3, %v1907_v45 }
 0x196   :  { %v1931_v51 = vpop.f32.mrf.mxu1 }
 0x197   :  { %v1444_v9 = vadd.f32 %v1951_v49, %v971_v17 }
 0x198   :  { %v1591_v50 = vpop.f32.mrf.mxu1 }
 0x199   :  { %v1597_v54 = vadd.f32 %v1591_v50, %v1444_v9 }
 0x19a   :  { %v1964_v57 = vpop.f32.mrf.mxu1 }
 0x19b   :  { %v1598_v55 = vsel %vm211_vm0, %v1597_v54, 0.0 }
 0x19c   :  { %v1599_v40 = vrot.slane %v1598_v55, 4  ;;  %v1594_v59 = vpop.f32.mrf.mxu1 }
 0x19e   :  { %v1600_v56 = vadd.f32 %v1599_v40, %v1598_v55  ;;  %v1965_v41 = vpop.f32.mrf.mxu1 }
 0x1a0   :  { %v1601_v60 = vrot.slane %v1600_v56, 2 }
 0x1a2   :  { %v1602_v62 = vadd.f32 %v1601_v60, %v1600_v56 }
 0x1a4   :  { %v1603_v63 = vrot.slane %v1602_v62, 1 }
 0x1a6   :  { %v1604_v0 = vadd.f32 %v1603_v63, %v1602_v62 }
 0x1a8   :  { %v1606_v4 = vmul.f32 0.125, %v1604_v0 }
 0x1aa   :  { %v1607_v5 = vsub.f32 %v1597_v54, %v1606_v4 }
 0x1ac   :  { %v1608_v6 = vmul.f32 %v1607_v5, %v1607_v5 }
 0x1ae   :  { %v1609_v18 = vsel %vm211_vm0, %v1608_v6, 0.0 }
 0x1af   :  { %v1610_v10 = vrot.slane %v1609_v18, 4 }
 0x1b1   :  { %v1611_v11 = vadd.f32 %v1610_v10, %v1609_v18 }
 0x1b3   :  { %v1612_v12 = vrot.slane %v1611_v11, 2 }
 0x1b5   :  { %v1613_v13 = vadd.f32 %v1612_v12, %v1611_v11 }
 0x1b7   :  { %v1614_v21 = vrot.slane %v1613_v13, 1 }
 0x1b9   :  { %v1615_v23 = vadd.f32 %v1614_v21, %v1613_v13 }
 0x1bb   :  { %v1616_v22 = vmul.f32 0.125, %v1615_v23 }
 0x1bd   :  { %v1618_v47 = vadd.f32 1e-05, %v1616_v22 }
 0x1bf   :  { %2203 = vrsqrt.f32 %v1618_v47 }
 0x1cc   :  { %v2204_v61 = vpop.eup %2203 }
 0x1cd   :  { %v1620_v24 = vmul.f32 %v2204_v61, %v1617_v1 }
 0x1cf   :  { %v1625_v25 = vrot.slane %v1620_v24, %v1624_v46  ;;  %v1629_v16 = vmul.f32 %v1620_v24, %v1606_v4 }
 0x1d1   :  { %v1630_v20 = vsub.f32 %v1628_v19, %v1629_v16  ;;  %v1627_v27 = vmul.f32 %v1625_v25, %v1597_v54 }
 0x1d3   :  { %v1635_v14 = vrot.slane %v1630_v20, %v1624_v46 }
 0x1d5   :  { %v1637_v15 = vadd.f32 %v1635_v14, %v1627_v27 }
 0x1d7   :  { %vm1638_vm11 = vcmp.ge.f32.partialorder %v1637_v15, 0.0  ;;  %v1639_v26 = vmul.f32 0.2, %v1637_v15 }
 0x1d9   :  { %v1640_v28 = vsel %vm1638_vm11, %v1637_v15, %v1639_v26 }
 0x1da   :  { %v1642_v29 = vcombine.high %v1640_v28, %v1640_v28  ;;  %v1649_v31 = vrot.slane %v1640_v28, %v2679_v7 }
 0x1dc   :  { %v1656_v52 = vrot.slane %v1642_v29, %v2679_v7  ;;  %v1657_v30 = vcombine.high %v1649_v31, %v1649_v31  ;;  %v1663_v32 = vpack.c.bf16 %v1649_v31, %v1649_v31 }
 0x1de   :  { %v1658_v33 = vcombine.high %v1656_v52, %v1656_v52  ;;  %v1664_v34 = vpack.c.bf16 %v1657_v30, %v1657_v30  ;;  %v1665_v35 = vpack.c.bf16 %v1656_v52, %v1656_v52  ;;  %1668 = vst.msk [vmem:[%s2986_s4] sm:$0x1] %vm1667_vm12, %v1663_v32 }
 0x1e0   :  { %v1666_v36 = vpack.c.bf16 %v1658_v33, %v1658_v33  ;;  %1669 = vst.msk [vmem:[%s2986_s4 + $0x1] sm:$0x1] %vm1667_vm12, %v1664_v34  ;;  %1670 = vst.msk [vmem:[%s2986_s4 + $0x2] sm:$0x1] %vm1667_vm12, %v1665_v35 }
 0x1e2   :  { %1671 = vst.msk [vmem:[%s2986_s4 + $0x3] sm:$0x1] %vm1667_vm12, %v1666_v36 }

// kernel: discriminator_forward.11
= control target key start
LH: loop header
LB: loop body
LE: loop exit
PB: predicated region body
PF: predicated region fallthrough
CT: control target
= control target key end

     0   :  { %v193_v0 = vmov 0.0   ;;  %vm194_vm0 = vmmov 0   ;;  %s248_s1 = inlined_call_operand.vmem [shape: bf16[128,128], index: 1, kind: input, shape index: {}]   ;;  %s249_s0 = inlined_call_operand.vmem [shape: bf16[2,128], index: 0, kind: input, shape index: {}]   ;;  %s250_s2 = inlined_call_operand.vmem [shape: f32[1,128], index: 2, kind: input, shape index: {}]   ;;  %s251_s3 = inlined_call_operand.vmem [shape: f32[2,128], index: 3, kind: output, shape index: {}]  }
   0x1   :  { %163 = vmatprep.subr.bf16.mxu0 %v193_v0  ;;  %19 = vst [vmem:[#allocation2] sm:$0x3] %v193_v0  ;;  %v185_v1 = vld [vmem:[%s248_s1 + $0x38] sm:$0xff]   ;;  %179 = vmatprep.mubr.msk.bf16.mxu0 %vm194_vm0, %v193_v0  ;;  %v186_v2 = vld [vmem:[%s248_s1 + $0x30] sm:$0xff]   ;;  %v187_v3 = vld [vmem:[%s248_s1 + $0x28] sm:$0xff]  }
   0x2   :  { %164 = vmatpush3.bf16.msra.mxu0 %v185_v1  ;;  %v188_v4 = vld [vmem:[%s248_s1 + $0x20] sm:$0xff]   ;;  %v189_v5 = vld [vmem:[%s248_s1 + $0x18] sm:$0xff]   ;;  %v190_v6 = vld [vmem:[%s248_s1 + $0x10] sm:$0xff]  }
   0x3   :  { %165 = vmatprep.subr.bf16.mxu0 %v193_v0  ;;  %v191_v7 = vld [vmem:[%s248_s1 + $0x8] sm:$0xff]   ;;  %v192_v8 = vld [vmem:[%s248_s1] sm:$0xff]  }
   0x4   :  { %v21_v9 = vld [vmem:[%s249_s0] sm:$0x1] }
   0x5   :  { %v153_v16 = vld [vmem:[%s250_s2] ss:$0 sm:$0xff] }
   0x6   :  { %166 = vmatpush3.bf16.msra.mxu0 %v186_v2 }
   0x7   :  { %167 = vmatprep.subr.bf16.mxu0 %v193_v0 }
   0x8   :  { %v20_v10 = vld [vmem:[#allocation2] sm:$0x3] }
   0xa   :  { %168 = vmatpush3.bf16.msra.mxu0 %v187_v3 }
   0xb   :  { %169 = vmatprep.subr.bf16.mxu0 %v193_v0 }
   0xe   :  { %170 = vmatpush3.bf16.msra.mxu0 %v188_v4 }
   0xf   :  { %171 = vmatprep.subr.bf16.mxu0 %v193_v0 }
  0x12   :  { %172 = vmatpush3.bf16.msra.mxu0 %v189_v5 }
  0x13   :  { %173 = vmatprep.subr.bf16.mxu0 %v193_v0 }
  0x16   :  { %174 = vmatpush3.bf16.msra.mxu0 %v190_v6 }
  0x17   :  { %175 = vmatprep.subr.bf16.mxu0 %v193_v0 }
  0x1a   :  { %176 = vmatpush3.bf16.msra.mxu0 %v191_v7 }
  0x1b   :  { %177 = vmatprep.subr.bf16.mxu0 %v193_v0 }
  0x1e   :  { %178 = vmatpush3.bf16.msra.mxu0 %v192_v8 }
  0x21   :  { %180 = vmatmul.mubr.bf16.vlgmr.msra.gmra.mxu0 %v21_v9 }
  0xe1   :  { %v120_v11 = vpop.f32.mrf.mxu0 }
  0xe2   :  { %v126_v12 = vadd.f32 %v120_v11, %v20_v10 }
  0xe3   :  { %v181_v13 = vpop.f32.mrf.mxu0 }
  0xe4   :  { %127 = vst [vmem:[#allocation2] sm:$0x3] %v126_v12 }
  0xe5   :  { %v123_v14 = vpop.f32.mrf.mxu0 }
  0xe7   :  { %v182_v15 = vpop.f32.mrf.mxu0 }
  0xeb   :  { %v131_v17 = vld [vmem:[#allocation2] sm:$0x3] }
  0xec   :  { %v139_v18 = vadd.f32 %v153_v16, %v131_v17 }
  0xee   :  { %140 = vst [vmem:[%s251_s3] sm:$0x3] %v139_v18 }

// kernel: discriminator_forward.10
= control target key start
LH: loop header
LB: loop body
LE: loop exit
PB: predicated region body
PF: predicated region fallthrough
CT: control target
= control target key end

     0   :  { %s1781_s12 = smov 0   ;;  %s2124_s0 = inlined_call_operand.vmem [shape: bf16[1,2,6,6,32], index: 0, kind: input, shape index: {}]   ;;  %s2125_s1 = inlined_call_operand.vmem [shape: bf16[4,256,16], index: 1, kind: input, shape index: {}]   ;;  %s2126_s2 = inlined_call_operand.vmem [shape: f32[1,16], index: 2, kind: input, shape index: {}]   ;;  %s2127_s3 = inlined_call_operand.vmem [shape: bf16[2,2,2,16], index: 3, kind: output, shape index: {}]  }
   0x1 LB: > { %s1337_s13 = sadd.s32 4294967295, %s1752_s12   ;;  %p1341_p0 = scmp.ge.s32.totalorder %s1752_s12, 1  ;;  %s1752_s12 = sphi %s1781_s12, %s13_s12  }
   0x2   : > { %p137_p1 = scmp.lt.s32.totalorder %s1752_s12, 3 }
   0x4   : > { %p138_p2 = pnand %p1341_p0, %p137_p1 }
   0x5   : > { %p160_p3 = scmp.lt.s32.totalorder (!%p138_p2), %s1337_s13, 1  ;;  %s1754_s5 = smov (!%p138_p2), 32  }
   0x6   : > { %141 = sbr.rel (%p138_p2) target bundleno = 409 (0x199), region = 32  ;;  %s1755_s10 = smov (!%p138_p2), 64  }
   0x7   : > { %s1756_s17 = smov (!%p138_p2), 96  }
   0xb   : > { %v1696_v0 = vld [vmem:[%s2125_s1 + $0xf8] sm:$0xff]   ;;  %s2135_s13 = smov (!%p160_p3, %s1337_s13), 1  ;;  %v1698_v2 = vld [vmem:[%s2125_s1 + $0xf0] sm:$0xff]   ;;  %v1700_v4 = vld [vmem:[%s2125_s1 + $0xe8] sm:$0xff]   ;;  %vm267_vm0 = vcmask 261120   ;;  %vm270_vm1 = vcmask 523264  }
   0xc   : > { %v1697_v1 = vld [vmem:[%s2125_s1 + $0xb8] sm:$0xff]   ;;  %1513 = vmatprep.subr.bf16.mxu0 %v1696_v0  ;;  %s1590_s20 = smul.u32 24, %s2135_s13  ;;  %v1699_v3 = vld [vmem:[%s2125_s1 + $0xb0] sm:$0xff]   ;;  %v1701_v5 = vld [vmem:[%s2125_s1 + $0xa8] sm:$0xff]   ;;  %vm273_vm2 = vcmask 785408   ;;  %vm495_vm3 = vcmask 1040384  }
   0xd   : > { %1514 = vmatpush3.bf16.msra.mxu0 %v1697_v1  ;;  %v1702_v27 = vld [vmem:[%s2125_s1 + $0xe0] sm:$0xff]   ;;  %v1704_v44 = vld [vmem:[%s2125_s1 + $0xd8] sm:$0xff]   ;;  %vm496_vm4 = vcmask 1042434   ;;  %vm498_vm5 = vcmask 1044484   ;;  %vm500_vm6 = vcmask 1046534   ;;  %vm1760_vm10 = vmmov 0  }
   0xe   : > { %1515 = vmatprep.subr.bf16.mxu0 %v1698_v2  ;;  %s1810_s27 = scalar_lea.vmem %s2124_s0, %s1590_s20  ;;  %v1703_v37 = vld [vmem:[%s2125_s1 + $0xa0] sm:$0xff]   ;;  %v1705_v60 = vld [vmem:[%s2125_s1 + $0x98] sm:$0xff]   ;;  %vm1989_vm7 = vmor %vm495_vm3, %vm496_vm4  ;;  %s1343_s26 = sshll.u32 %s2135_s13, 1  ;;  %vm1281_vm11 = vcmask 122880  }
   0xf   : > { %v1360_v6 = vld [vmem:[%s1810_s27 + $0x8] sm:$0x6]  ;;  %v1361_v7 = vld [vmem:[%s1810_s27 + $0xc] sm:$0x6]  ;;  %v1354_v8 = vld [vmem:[%s1810_s27 + $0x8] sm:$0x1] }
  0x10   : > { %v375_v9 = vunpack.c.l.bf16 %v1360_v6  ;;  %v376_v10 = vunpack.c.l.bf16 %v1361_v7  ;;  %v1355_v11 = vld [vmem:[%s1810_s27 + $0xc] sm:$0x1]  ;;  %v369_v12 = vunpack.c.l.bf16 %v1354_v8  ;;  %v1352_v13 = vld [vmem:[%s1810_s27 + $0x4] sm:$0x4]  ;;  %v1353_v14 = vld [vmem:[%s1810_s27 + $0x8] sm:$0x4] }
  0x11   : > { %1516 = vmatpush3.bf16.msra.mxu0 %v1699_v3  ;;  %v370_v15 = vunpack.c.l.bf16 %v1355_v11  ;;  %v367_v16 = vunpack.c.l.bf16 %v1352_v13  ;;  %v368_v17 = vunpack.c.l.bf16 %v1353_v14  ;;  %v1362_v18 = vld [vmem:[%s1810_s27 + $0x8] sm:$0x4]  ;;  %v1363_v19 = vld [vmem:[%s1810_s27 + $0xc] sm:$0x4]  ;;  %v1356_v20 = vld [vmem:[%s1810_s27 + $0x8] sm:$0x3] }
  0x12   : > { %1517 = vmatprep.subr.bf16.mxu0 %v1700_v4  ;;  %v1606_v21 = vpack.i.bf16 %v376_v10, %v375_v9  ;;  %v393_v22 = vrot.slane %v369_v12, 5  ;;  %v377_v23 = vunpack.c.l.bf16 %v1362_v18  ;;  %v378_v24 = vunpack.c.l.bf16 %v1363_v19  ;;  %v1357_v25 = vld [vmem:[%s1810_s27 + $0xc] sm:$0x3]  ;;  %v1365_v32 = vld [vmem:[%s1810_s27 + $0x10] sm:$0x1]  ;;  %v1707_v14 = vld [vmem:[%s2125_s1 + $0x78] sm:$0xff]  }
  0x13   : > { %v1364_v26 = vld [vmem:[%s1810_s27 + $0xc] sm:$0x1]  ;;  %v394_v28 = vrot.slane %v370_v15, 5  ;;  %v383_v29 = vrot.slane %v367_v16, 1  ;;  %v384_v30 = vrot.slane %v368_v17, 1  ;;  %v371_v31 = vunpack.c.l.bf16 %v1356_v20  ;;  %v1706_v3 = vld [vmem:[%s2125_s1 + $0xd0] sm:$0xff]   ;;  %1535 = vmatprep.subr.bf16.mxu1 %v1707_v14  ;;  %vm2002_vm8 = vmor %vm1989_vm7, %vm498_vm5 }
  0x14   : > { %1607 = vrot.lane.b32.xlu0 %v1606_v21, %s1754_s5  ;;  %v427_v33 = vrot.slane %v377_v23, 1  ;;  %v428_v34 = vrot.slane %v378_v24, 1  ;;  %v372_v35 = vunpack.c.l.bf16 %v1357_v25  ;;  %v379_v36 = vunpack.c.l.bf16 %v1364_v26  ;;  %v1434_v42 = vld [vmem:[%s1810_s27 + $0xc] sm:$0x2]  ;;  %v1435_v43 = vld [vmem:[%s1810_s27 + $0x10] sm:$0x2]  ;;  %vm2015_vm9 = vmor %vm2002_vm8, %vm500_vm6 }
  0x15   : > { %1518 = vmatpush3.bf16.msra.mxu0 %v1701_v5  ;;  %v1616_v38 = vpack.i.bf16 %v394_v28, %v393_v22  ;;  %v1611_v39 = vpack.i.bf16 %v384_v30, %v383_v29  ;;  %v403_v40 = vrot.slane %v371_v31, 6  ;;  %v380_v41 = vunpack.c.l.bf16 %v1365_v32  ;;  %v1442_v47 = vld [vmem:[%s1810_s27 + $0x10] sm:$0x3]  ;;  %v1445_v49 = vld [vmem:[%s1810_s27 + $0x14] sm:$0x2]  ;;  %v1709_v21 = vld [vmem:[%s2125_s1 + $0x38] sm:$0xff]  }
  0x16   : > { %1519 = vmatprep.subr.bf16.mxu0 %v1702_v27  ;;  %v1621_v45 = vpack.i.bf16 %v428_v34, %v427_v33  ;;  %v404_v46 = vrot.slane %v372_v35, 6  ;;  %v1444_v48 = vld [vmem:[%s1810_s27 + $0x10] sm:$0x2]  ;;  %v437_v50 = vrot.slane %v379_v36, 5  ;;  %v847_v52 = vunpack.c.l.bf16 %v1434_v42  ;;  %v1436_v54 = vld [vmem:[%s1810_s27 + $0xc] sm:$0x6]  ;;  %1536 = vmatpush3.bf16.msra.mxu1 %v1709_v21 }
  0x17   : > { %1617 = vrot.lane.b32.xlu1 %v1616_v38, %s1755_s10  ;;  %v438_v51 = vrot.slane %v380_v41, 5  ;;  %v848_v53 = vunpack.c.l.bf16 %v1435_v43  ;;  %v1437_v55 = vld [vmem:[%s1810_s27 + $0x10] sm:$0x6]  ;;  %v1443_v57 = vld [vmem:[%s1810_s27 + $0x14] sm:$0x3]  ;;  %v849_v58 = vunpack.c.l.bf16 %v1436_v54  ;;  %v857_v0 = vunpack.c.l.bf16 %v1444_v48  ;;  %v1710_v38 = vld [vmem:[%s2125_s1 + $0xc8] sm:$0xff]  }
  0x18   : > { %1612 = vrot.lane.b32.xlu0 %v1611_v39, %s1754_s5  ;;  %v1626_v56 = vpack.i.bf16 %v404_v46, %v403_v40  ;;  %v1438_v59 = vld [vmem:[%s1810_s27 + $0xc] sm:$0x4]  ;;  %v863_v61 = vrot.slane %v847_v52, 1  ;;  %v1439_v63 = vld [vmem:[%s1810_s27 + $0x10] sm:$0x4]  ;;  %v858_v1 = vunpack.c.l.bf16 %v1445_v49  ;;  %v850_v2 = vunpack.c.l.bf16 %v1437_v55  ;;  %v1718_v14 = vld [vmem:[%s2125_s1 + $0x60] sm:$0xff]  }
  0x19   : > { %1520 = vmatpush3.bf16.msra.mxu0 %v1703_v37  ;;  %v864_v62 = vrot.slane %v848_v53, 1  ;;  %v1631_v4 = vpack.i.bf16 %v438_v51, %v437_v50  ;;  %v855_v5 = vunpack.c.l.bf16 %v1442_v47  ;;  %v856_v6 = vunpack.c.l.bf16 %v1443_v57  ;;  %v1446_v7 = vld [vmem:[%s1810_s27 + $0x10] sm:$0x6]  ;;  %v1447_v12 = vld [vmem:[%s1810_s27 + $0x14] sm:$0x6]  ;;  %v1730_v21 = vld [vmem:[%s2125_s1 + $0x48] sm:$0xff]  }
  0x1a   : > { %1521 = vmatprep.subr.bf16.mxu0 %v1704_v44  ;;  %v851_v8 = vunpack.c.l.bf16 %v1438_v59  ;;  %v873_v10 = vrot.slane %v849_v58, 2  ;;  %v874_v11 = vrot.slane %v850_v2, 2  ;;  %v852_v13 = vunpack.c.l.bf16 %v1439_v63  ;;  %v172_v15 = vld [vmem:[%s1810_s27] sm:$0x3]  ;;  %v173_v16 = vld [vmem:[%s1810_s27 + $0x4] sm:$0x3] }
  0x1b   : > { %1622 = vrot.lane.b32.xlu1 %v1621_v45, %s1755_s10  ;;  %v1641_v9 = vpack.i.bf16 %v864_v62, %v863_v61  ;;  %v1708_v17 = vld [vmem:[%s2125_s1 + $0x90] sm:$0xff]   ;;  %v907_v18 = vrot.slane %v857_v0, 1  ;;  %v908_v19 = vrot.slane %v858_v1, 1  ;;  %v859_v20 = vunpack.c.l.bf16 %v1446_v7  ;;  %v1346_v25 = vld [vmem:[%s1810_s27 + $0x4] sm:$0x3]  ;;  %v1715_v2 = vld [vmem:[%s2125_s1 + $0x68] sm:$0xff]  }
  0x1c   : > { %1627 = vrot.lane.b32.xlu0 %v1626_v56, %s1756_s17  ;;  %v1636_v22 = vpack.i.bf16 %v856_v6, %v855_v5  ;;  %v860_v23 = vunpack.c.l.bf16 %v1447_v12  ;;  %v883_v24 = vrot.slane %v851_v8, 3  ;;  %v1347_v26 = vld [vmem:[%s1810_s27 + $0x8] sm:$0x3]  ;;  %v1646_v27 = vpack.i.bf16 %v874_v11, %v873_v10  ;;  %v174_v31 = vld [vmem:[%s1810_s27] sm:$0x2]  ;;  %v1711_v49 = vld [vmem:[%s2125_s1 + $0x70] sm:$0xff]  }
  0x1d   : > { %1522 = vmatpush3.bf16.msra.mxu0 %v1705_v60  ;;  %v884_v28 = vrot.slane %v852_v13, 3  ;;  %v189_v29 = vunpack.c.l.bf16 %v172_v15  ;;  %v190_v30 = vunpack.c.l.bf16 %v173_v16  ;;  %v175_v32 = vld [vmem:[%s1810_s27 + $0x4] sm:$0x2]  ;;  %v1344_v33 = vld [vmem:[%s1810_s27 + $0x4] sm:$0x1]  ;;  %v1651_v35 = vpack.i.bf16 %v908_v19, %v907_v18  ;;  %v1712_v56 = vld [vmem:[%s2125_s1 + $0x88] sm:$0xff]   ;;  %1537 = vmatprep.subr.bf16.mxu1 %v1711_v49 }
  0x1e   : > { %1523 = vmatprep.subr.bf16.mxu0 %v1706_v3  ;;  %v176_v34 = vld [vmem:[%s1810_s27] sm:$0x6]  ;;  %v917_v36 = vrot.slane %v859_v20, 2  ;;  %v199_v37 = vunpack.c.l.bf16 %v1346_v25  ;;  %v918_v39 = vrot.slane %v860_v23, 2  ;;  %v1345_v40 = vld [vmem:[%s1810_s27 + $0x8] sm:$0x1]  ;;  %v200_v41 = vunpack.c.l.bf16 %v1347_v26 }
  0x1f   : > { %1632 = vrot.lane.b32.xlu1 %v1631_v4, %s1756_s17  ;;  %v191_v42 = vunpack.c.l.bf16 %v174_v31  ;;  %v192_v43 = vunpack.c.l.bf16 %v175_v32  ;;  %v177_v44 = vld [vmem:[%s1810_s27 + $0x4] sm:$0x6]  ;;  %v1656_v45 = vpack.i.bf16 %v884_v28, %v883_v24  ;;  %v205_v46 = vrot.slane %v189_v29, 1  ;;  %v1349_v54 = vld [vmem:[%s1810_s27 + $0x8] sm:$0x2]  ;;  %v1713_v61 = vld [vmem:[%s2125_s1 + $0x30] sm:$0xff]  }
  0x20   : > { %1642 = vrot.lane.b32.xlu0 %v1641_v9, %s1754_s5  ;;  %v206_v47 = vrot.slane %v190_v30, 1  ;;  %v193_v48 = vunpack.c.l.bf16 %v176_v34  ;;  %v197_v50 = vunpack.c.l.bf16 %v1344_v33  ;;  %v198_v51 = vunpack.c.l.bf16 %v1345_v40  ;;  %v1348_v53 = vld [vmem:[%s1810_s27 + $0x4] sm:$0x2]  ;;  %1538 = vmatpush3.bf16.msra.mxu1 %v1713_v61  ;;  %v1717_v12 = vld [vmem:[%s2125_s1 + $0x28] sm:$0xff]   ;;  %v1719_v15 = vld [vmem:[%s2125_s1 + $0x178] sm:$0xff]  }
  0x21   : > { %1524 = vmatpush3.bf16.msra.mxu0 %v1708_v17  ;;  %v249_v52 = vrot.slane %v199_v37, 1  ;;  %v194_v55 = vunpack.c.l.bf16 %v177_v44  ;;  %v1661_v57 = vpack.i.bf16 %v918_v39, %v917_v36  ;;  %v250_v58 = vrot.slane %v200_v41, 1  ;;  %v1714_v0 = vld [vmem:[%s2125_s1 + $0xc0] sm:$0xff]   ;;  %1539 = vmatprep.subr.bf16.mxu1 %v1715_v2  ;;  %v1722_v17 = vld [vmem:[%s2125_s1 + $0x58] sm:$0xff]   ;;  %v1726_v19 = vld [vmem:[%s2125_s1 + $0x50] sm:$0xff]  }
  0x22   : > { %1525 = vmatprep.subr.bf16.mxu0 %v1710_v38  ;;  %v215_v59 = vrot.slane %v191_v42, 2  ;;  %v216_v60 = vrot.slane %v192_v43, 2  ;;  %v1666_v62 = vpack.i.bf16 %v206_v47, %v205_v46  ;;  %v225_v63 = vrot.slane %v193_v48, 3  ;;  %v1716_v11 = vld [vmem:[%s2125_s1 + $0x80] sm:$0xff]   ;;  %v1724_v18 = vld [vmem:[%s2125_s1 + $0x18] sm:$0xff]   ;;  %v1728_v20 = vld [vmem:[%s2125_s1 + $0x10] sm:$0xff]  }
  0x23   : > { %1637 = vrot.lane.b32.xlu1 %v1636_v22, %s1754_s5  ;;  %v226_v1 = vrot.slane %v194_v55, 3  ;;  %v1671_v3 = vpack.i.bf16 %v198_v51, %v197_v50  ;;  %v201_v4 = vunpack.c.l.bf16 %v1348_v53  ;;  %v202_v5 = vunpack.c.l.bf16 %v1349_v54  ;;  %v1720_v16 = vld [vmem:[%s2125_s1 + $0x20] sm:$0xff]   ;;  %v1732_v22 = vld [vmem:[%s2125_s1 + $0x8] sm:$0xff]   ;;  %v1440_v31 = vld [vmem:[%s1810_s27 + $0x10] sm:$0x1] }
  0x24   : > { %1647 = vrot.lane.b32.xlu0 %v1646_v27, %s1755_s10  ;;  %v1676_v6 = vpack.i.bf16 %v216_v60, %v215_v59  ;;  %v1681_v7 = vpack.i.bf16 %v250_v58, %v249_v52  ;;  %1540 = vmatpush3.bf16.msra.mxu1 %v1717_v12  ;;  %v1734_v23 = vld [vmem:[%s2125_s1 + $0x40] sm:$0xff]   ;;  %v1757_v25 = vmov 0.0   ;;  %v1358_v26 = vld [vmem:[%s1810_s27 + $0x8] sm:$0x2]  ;;  %v1359_v27 = vld [vmem:[%s1810_s27 + $0xc] sm:$0x2]  ;;  %v290_v30 = vlaneseq }
  0x25   : > { %1526 = vmatpush3.bf16.msra.mxu0 %v1712_v56  ;;  %v259_v8 = vrot.slane %v201_v4, 2  ;;  %v260_v9 = vrot.slane %v202_v5, 2  ;;  %v1686_v10 = vpack.i.bf16 %v226_v1, %v225_v63  ;;  %1541 = vmatprep.subr.bf16.mxu1 %v1718_v14  ;;  %v1736_v24 = vld [vmem:[%s2125_s1] sm:$0xff]   ;;  %v1758_v28 = vmov 1983009808  }
  0x26   : > { %1527 = vmatprep.subr.bf16.mxu0 %v1714_v0  ;;  %v288_v29 = vunpack.c.l.s4 %v1758_v28  ;;  %v1441_v33 = vld [vmem:[%s1810_s27 + $0x14] sm:$0x1]  ;;  %v373_v34 = vunpack.c.l.bf16 %v1358_v26  ;;  %v1350_v36 = vld [vmem:[%s1810_s27 + $0x4] sm:$0x6]  ;;  %v1351_v37 = vld [vmem:[%s1810_s27 + $0x8] sm:$0x6]  ;;  %v853_v38 = vunpack.c.l.bf16 %v1440_v31 }
  0x27   : > { %1652 = vrot.lane.b32.xlu1 %v1651_v35, %s1755_s10  ;;  %v1691_v13 = vpack.i.bf16 %v260_v9, %v259_v8  ;;  %v374_v35 = vunpack.c.l.bf16 %v1359_v27  ;;  %v1957_v41 = vshrl.u32 %v290_v30, 7  ;;  %v854_v42 = vunpack.c.l.bf16 %v1441_v33  ;;  %v1960_v43 = vld [vmem:[%s1810_s27 + $0xc] sm:$0x3]  ;;  %v1433_v44 = vld [vmem:[%s1810_s27 + $0x10] sm:$0x3] }
  0x28   : > { %1657 = vrot.lane.b32.xlu0 %v1656_v45, %s1756_s17  ;;  %1542 = vmatpush3.bf16.msra.mxu1 %v1720_v16  ;;  %v289_v40 = vunpack.c.0.s8 %v288_v29  ;;  %v365_v46 = vunpack.c.l.bf16 %v1350_v36  ;;  %v366_v47 = vunpack.c.l.bf16 %v1351_v37  ;;  %v413_v48 = vrot.slane %v373_v34, 7  ;;  %v1964_v52 = vld [vmem:[%s1810_s27] sm:$0x4]  ;;  %v1967_v53 = vld [vmem:[%s1810_s27 + $0x4] sm:$0x4] }
  0x29   : > { %1528 = vmatpush3.bf16.msra.mxu0 %v1716_v11  ;;  %1543 = vmatprep.subr.bf16.mxu1 %v1722_v17  ;;  %v414_v49 = vrot.slane %v374_v35, 7  ;;  %v893_v54 = vrot.slane %v853_v38, 7  ;;  %v845_v55 = vunpack.c.l.bf16 %v1960_v43  ;;  %v846_v56 = vunpack.c.l.bf16 %v1433_v44 }
  0x2a   : > { %1557 = vmatprep.subr.bf16.mxu0 %v1719_v15  ;;  %v1971_v60 = vsub.s32 %v289_v40, %v1957_v41  ;;  %v894_v61 = vrot.slane %v854_v42, 7  ;;  %v195_v63 = vunpack.c.l.bf16 %v1964_v52  ;;  %v196_v0 = vunpack.c.l.bf16 %v1967_v53  ;;  %v1721_v42 = vld [vmem:[%s2125_s1 + $0x138] sm:$0xff]  }
  0x2b   : > { %1662 = vrot.lane.b32.xlu1 %v1661_v57, %s1756_s17 }
  0x2c   : > { %1667 = vrot.lane.b32.xlu0 %v1666_v62, %s1754_s5  ;;  %1544 = vmatpush3.bf16.msra.mxu1 %v1724_v18 }
  0x2d   : > { %1545 = vmatprep.subr.bf16.mxu1 %v1726_v19 }
  0x2f   : > { %1672 = vrot.lane.b32.xlu1 %v1671_v3, %s1754_s5 }
  0x30   : > { %1677 = vrot.lane.b32.xlu0 %v1676_v6, %s1755_s10  ;;  %1546 = vmatpush3.bf16.msra.mxu1 %v1728_v20 }
  0x31   : > { %1547 = vmatprep.subr.bf16.mxu1 %v1730_v21 }
  0x33   : > { %1682 = vrot.lane.b32.xlu1 %v1681_v7, %s1755_s10 }
  0x34   : > { %1687 = vrot.lane.b32.xlu0 %v1686_v10, %s1756_s17  ;;  %1548 = vmatpush3.bf16.msra.mxu1 %v1732_v22 }
  0x35   : > { %1549 = vmatprep.subr.bf16.mxu1 %v1734_v23 }
  0x37   : > { %1692 = vrot.lane.b32.xlu1 %v1691_v13, %s1756_s17  ;;  %s168_s17 = scalar_lea.vmem %s2127_s3, %s1343_s26 }
  0x38   : > { %1550 = vmatpush3.bf16.msra.mxu1 %v1736_v24 }
  0x39   : > { %1582 = vmatprep.subr.bf16.mxu1 %v1757_v25 }
  0x86   : > { %v1608_v32 = vpop.permute.xlu0 %1607 }
  0x87   : > { %v1610_v57 = vunpack.i.h.bf16 %v1608_v32  ;;  %v1609_v58 = vunpack.i.l.bf16 %v1608_v32 }
  0x89   : > { %v1618_v39 = vpop.permute.xlu1 %1617  ;;  %v451_v9 = vsel %vm267_vm0, %v413_v48, %v1609_v58  ;;  %v452_v10 = vsel %vm267_vm0, %v414_v49, %v1610_v57 }
  0x8a   : > { %v1613_v45 = vpop.permute.xlu0 %1612  ;;  %v1620_v5 = vunpack.i.h.bf16 %v1618_v39  ;;  %v1619_v6 = vunpack.i.l.bf16 %v1618_v39 }
  0x8b   : > { %v1615_v50 = vunpack.i.h.bf16 %v1613_v45  ;;  %v1614_v51 = vunpack.i.l.bf16 %v1613_v45 }
  0x8d   : > { %v1623_v59 = vpop.permute.xlu1 %1622  ;;  %v445_v1 = vsel %vm267_vm0, %v365_v46, %v1614_v51  ;;  %v446_v2 = vsel %vm267_vm0, %v366_v47, %v1615_v50 }
  0x8e   : > { %v1628_v62 = vpop.permute.xlu0 %1627  ;;  %v1625_v3 = vunpack.i.h.bf16 %v1623_v59  ;;  %v1624_v4 = vunpack.i.l.bf16 %v1623_v59  ;;  %v447_v12 = vsel %vm270_vm1, %v445_v1, %v1619_v6  ;;  %v448_v13 = vsel %vm270_vm1, %v446_v2, %v1620_v5 }
  0x8f   : > { %v1630_v7 = vunpack.i.h.bf16 %v1628_v62  ;;  %v1629_v8 = vunpack.i.l.bf16 %v1628_v62 }
  0x90   : > { %v454_v17 = vsel %vm270_vm1, %v452_v10, %v1625_v3  ;;  %v453_v18 = vsel %vm270_vm1, %v451_v9, %v1624_v4 }
  0x91   : > { %v1633_v11 = vpop.permute.xlu1 %1632  ;;  %v449_v21 = vsel %vm273_vm2, %v447_v12, %v1629_v8  ;;  %v450_v22 = vsel %vm273_vm2, %v448_v13, %v1630_v7 }
  0x92   : > { %v1635_v14 = vunpack.i.h.bf16 %v1633_v11  ;;  %v1634_v15 = vunpack.i.l.bf16 %v1633_v11  ;;  %v1643_v16 = vpop.permute.xlu0 %1642 }
  0x93   : > { %v1645_v19 = vunpack.i.h.bf16 %v1643_v16  ;;  %v1644_v20 = vunpack.i.l.bf16 %v1643_v16 }
  0x94   : > { %v455_v23 = vsel %vm273_vm2, %v453_v18, %v1634_v15  ;;  %v456_v24 = vsel %vm273_vm2, %v454_v17, %v1635_v14  ;;  %v235_v18 = vrot.slane %v195_v63, 4 }
  0x95   : > { %v461_v27 = vcombine.low %v449_v21, %v455_v23  ;;  %v462_v28 = vcombine.high %v449_v21, %v455_v23  ;;  %v478_v29 = vcombine.low %v450_v22, %v456_v24  ;;  %v479_v30 = vcombine.high %v450_v22, %v456_v24  ;;  %v1638_v31 = vpop.permute.xlu1 %1637 }
  0x96   : > { %v1640_v32 = vunpack.i.h.bf16 %v1638_v31  ;;  %v1639_v33 = vunpack.i.l.bf16 %v1638_v31  ;;  %v926_v34 = vsel %vm267_vm0, %v846_v56, %v1645_v19  ;;  %v925_v35 = vsel %vm267_vm0, %v845_v55, %v1644_v20  ;;  %v1648_v36 = vpop.permute.xlu0 %1647  ;;  %v170_v55 = vld [vmem:[%s1810_s27] sm:$0x1]  ;;  %v171_v56 = vld [vmem:[%s1810_s27 + $0x4] sm:$0x1] }
  0x97   : > { %v469_v37 = vrot.slane %v461_v27, %v1971_v60  ;;  %v476_v38 = vrot.slane %v462_v28, %v1971_v60  ;;  %v486_v39 = vrot.slane %v478_v29, %v1971_v60  ;;  %v493_v40 = vrot.slane %v479_v30, %v1971_v60 }
  0x98   : > { %v932_v43 = vsel %vm267_vm0, %v894_v61, %v1640_v32  ;;  %v931_v44 = vsel %vm267_vm0, %v893_v54, %v1639_v33  ;;  %v1650_v45 = vunpack.i.h.bf16 %v1648_v36  ;;  %v1649_v46 = vunpack.i.l.bf16 %v1648_v36 }
  0x99   : > { %v477_v47 = vcombine.high %v469_v37, %v469_v37  ;;  %v494_v48 = vcombine.high %v486_v39, %v486_v39  ;;  %v504_v49 = vrot.slane %v476_v38, 7  ;;  %v508_v50 = vrot.slane %v493_v40, 7  ;;  %v1653_v51 = vpop.permute.xlu1 %1652 }
  0x9a   : > { %v1655_v57 = vunpack.i.h.bf16 %v1653_v51  ;;  %v1654_v58 = vunpack.i.l.bf16 %v1653_v51  ;;  %v927_v59 = vsel %vm270_vm1, %v925_v35, %v1649_v46  ;;  %v928_v62 = vsel %vm270_vm1, %v926_v34, %v1650_v45  ;;  %v1658_v1 = vpop.permute.xlu0 %1657 }
  0x9b   : > { %v1660_v61 = vunpack.i.h.bf16 %v1658_v1  ;;  %v1659_v2 = vunpack.i.l.bf16 %v1658_v1  ;;  %v1366_v3 = vrot.slane %v477_v47, 9  ;;  %v1367_v4 = vrot.slane %v494_v48, 9  ;;  %v1723_v48 = vld [vmem:[%s2125_s1 + $0x170] sm:$0xff]  }
  0x9c   : > { %v933_v5 = vsel %vm270_vm1, %v931_v44, %v1654_v58  ;;  %v187_v6 = vunpack.c.l.bf16 %v170_v55  ;;  %v188_v7 = vunpack.c.l.bf16 %v171_v56  ;;  %v934_v8 = vsel %vm270_vm1, %v932_v43, %v1655_v57 }
  0x9d   : > { %v1663_v9 = vpop.permute.xlu1 %1662  ;;  %v929_v10 = vsel %vm273_vm2, %v927_v59, %v1659_v2  ;;  %v505_v11 = vsel %vm2015_vm9, %v1366_v3, %v504_v49  ;;  %v509_v12 = vsel %vm2015_vm9, %v1367_v4, %v508_v50  ;;  %v930_v15 = vsel %vm273_vm2, %v928_v62, %v1660_v61  ;;  %v1725_v61 = vld [vmem:[%s2125_s1 + $0x130] sm:$0xff]  }
  0x9e   : > { %v1665_v13 = vunpack.i.h.bf16 %v1663_v9  ;;  %v1664_v14 = vunpack.i.l.bf16 %v1663_v9  ;;  %v1668_v16 = vpop.permute.xlu0 %1667  ;;  %v510_v17 = vcombine.low %v505_v11, %v509_v12  ;;  %v236_v23 = vrot.slane %v196_v0, 4 }
  0x9f   : > { %v1670_v19 = vunpack.i.h.bf16 %v1668_v16  ;;  %v1669_v20 = vunpack.i.l.bf16 %v1668_v16  ;;  %v1759_v30 = vmov 1966171168  }
  0xa0   : > { %v935_v21 = vsel %vm273_vm2, %v933_v5, %v1664_v14  ;;  %v936_v22 = vsel %vm273_vm2, %v934_v8, %v1665_v13  ;;  %v517_v24 = vrot.slane %v510_v17, %v1971_v60  ;;  %v1162_v31 = vunpack.c.l.s4 %v1759_v30 }
  0xa1   : > { %v941_v26 = vcombine.low %v929_v10, %v935_v21  ;;  %v950_v27 = vcombine.low %v930_v15, %v936_v22  ;;  %v1673_v28 = vpop.permute.xlu1 %1672  ;;  %v268_v29 = vsel %vm267_vm0, %v187_v6, %v1669_v20  ;;  %v269_v32 = vsel %vm267_vm0, %v188_v7, %v1670_v19  ;;  %v1727_v6 = vld [vmem:[%s2125_s1 + $0x168] sm:$0xff]   ;;  %v1500_v20 = vld.sshfl [vmem:[%s1810_s27 + $0x10] sm:$0x2 pattern:$0x75316420] }
  0xa2   : > { %v1675_v52 = vunpack.i.h.bf16 %v1673_v28  ;;  %v1674_v63 = vunpack.i.l.bf16 %v1673_v28  ;;  %v1678_v33 = vpop.permute.xlu0 %1677  ;;  %v518_v34 = vcombine.high %v517_v24, %v517_v24  ;;  %v521_v40 = vpack.c.bf16 %v517_v24, %v517_v24  ;;  %v1729_v15 = vld [vmem:[%s2125_s1 + $0x128] sm:$0xff]   ;;  %v1501_v24 = vld.sshfl [vmem:[%s1810_s27 + $0x14] sm:$0x2 pattern:$0x75316420]  ;;  %v1735_v28 = vld [vmem:[%s2125_s1 + $0x158] sm:$0xff]  }
  0xa3   : > { %v948_v35 = vrot.slane %v941_v26, %v1971_v60  ;;  %v957_v53 = vrot.slane %v950_v27, %v1971_v60  ;;  %v1680_v0 = vunpack.i.h.bf16 %v1678_v33  ;;  %v1679_v36 = vunpack.i.l.bf16 %v1678_v33  ;;  %v1733_v26 = vld [vmem:[%s2125_s1 + $0x120] sm:$0xff]  }
  0xa4   : > { %v276_v37 = vsel %vm267_vm0, %v235_v18, %v1674_v63  ;;  %v277_v38 = vsel %vm267_vm0, %v236_v23, %v1675_v52  ;;  %v522_v39 = vpack.c.bf16 %v518_v34, %v518_v34  ;;  %v1163_v2 = vunpack.c.0.s8 %v1162_v31  ;;  %v1731_v18 = vld [vmem:[%s2125_s1 + $0x160] sm:$0xff]   ;;  %v1737_v52 = vld [vmem:[%s2125_s1 + $0x118] sm:$0xff]  }
  0xa5   : > { %v949_v43 = vcombine.high %v948_v35, %v948_v35  ;;  %v958_v44 = vcombine.high %v957_v53, %v957_v53  ;;  %v1448_v45 = vrot.slane %v948_v35, 9  ;;  %v1449_v46 = vrot.slane %v957_v53, 9  ;;  %v1683_v47 = vpop.permute.xlu1 %1682  ;;  %v1742_v53 = vld [vmem:[%s2125_s1 + $0x188] sm:$0xff]  }
  0xa6   : > { %v1685_v49 = vunpack.i.h.bf16 %v1683_v47  ;;  %v1684_v50 = vunpack.i.l.bf16 %v1683_v47  ;;  %v271_v51 = vsel %vm270_vm1, %v268_v29, %v1679_v36  ;;  %v272_v55 = vsel %vm270_vm1, %v269_v32, %v1680_v0  ;;  %684 = vmatprep.mubr.bf16.mxu0 %v522_v39  ;;  %v1688_v56 = vpop.permute.xlu0 %1687  ;;  %v1738_v32 = vld [vmem:[%s2125_s1 + $0x150] sm:$0xff]   ;;  %v1740_v36 = vld [vmem:[%s2125_s1 + $0x148] sm:$0xff]  }
  0xa7   : > { %v961_v57 = vrot.slane %v949_v43, 7  ;;  %v965_v58 = vrot.slane %v958_v44, 7  ;;  %685 = vmatmul.mubr.bf16.vlgmr.msra.gmra.mxu0 %v521_v40  ;;  %v1690_v59 = vunpack.i.h.bf16 %v1688_v56  ;;  %v1689_v62 = vunpack.i.l.bf16 %v1688_v56  ;;  %v1739_v0 = vld [vmem:[%s2125_s1 + $0x110] sm:$0xff]   ;;  %v1741_v39 = vld [vmem:[%s2125_s1 + $0x108] sm:$0xff]   ;;  %v1743_v40 = vld [vmem:[%s2125_s1 + $0x140] sm:$0xff]  }
  0xa8   : > { %v278_v1 = vsel %vm270_vm1, %v276_v37, %v1684_v50  ;;  %1558 = vmatpush3.bf16.msra.mxu0 %v1721_v42  ;;  %v279_v3 = vsel %vm270_vm1, %v277_v38, %v1685_v49  ;;  %v1166_v21 = vsub.s32 %v1163_v2, %v1957_v41  ;;  %v1745_v38 = vld [vmem:[%s2125_s1 + $0x180] sm:$0xff]  }
  0xa9   : > { %v1693_v4 = vpop.permute.xlu1 %1692  ;;  %v274_v5 = vsel %vm273_vm2, %v271_v51, %v1689_v62  ;;  %1559 = vmatprep.subr.bf16.mxu0 %v1723_v48  ;;  %v962_v7 = vsel %vm2015_vm9, %v1448_v45, %v961_v57  ;;  %v966_v8 = vsel %vm2015_vm9, %v1449_v46, %v965_v58  ;;  %v275_v11 = vsel %vm273_vm2, %v272_v55, %v1690_v59  ;;  %v1744_v43 = vld [vmem:[%s2125_s1 + $0x100] sm:$0xff]  }
  0xaa   : > { %v1695_v9 = vunpack.i.h.bf16 %v1693_v4  ;;  %v1694_v10 = vunpack.i.l.bf16 %v1693_v4  ;;  %v967_v12 = vcombine.low %v962_v7, %v966_v8  ;;  %v1167_v30 = vrot.slane %v1500_v20, %v1166_v21 }
  0xab   : > { %v1182_v41 = vrot.slane %v1501_v24, %v1166_v21 }
  0xac   : > { %v280_v13 = vsel %vm273_vm2, %v278_v1, %v1694_v10  ;;  %v281_v14 = vsel %vm273_vm2, %v279_v3, %v1695_v9  ;;  %1560 = vmatpush3.bf16.msra.mxu0 %v1725_v61  ;;  %v974_v16 = vrot.slane %v967_v12, %v1971_v60 }
  0xad   : > { %v286_v54 = vcombine.low %v274_v5, %v280_v13  ;;  %v294_v17 = vcombine.low %v275_v11, %v281_v14  ;;  %1561 = vmatprep.subr.bf16.mxu0 %v1727_v6  ;;  %v1506_v34 = vcombine.high %v1167_v30, %v1182_v41  ;;  %v1510_v6 = vld [vmem:[%s2126_s2] ss:$0 sm:$0xff] }
  0xae   : > { %v975_v19 = vcombine.high %v974_v16, %v974_v16  ;;  %v978_v44 = vpack.c.bf16 %v974_v16, %v974_v16 }
  0xaf   : > { %v293_v22 = vrot.slane %v286_v54, %v1971_v60  ;;  %v301_v23 = vrot.slane %v294_v17, %v1971_v60  ;;  %v1196_v37 = vrot.slane %v1506_v34, %v1166_v21 }
  0xb0   : > { %1562 = vmatpush3.bf16.msra.mxu0 %v1729_v15  ;;  %v979_v27 = vpack.c.bf16 %v975_v19, %v975_v19 }
  0xb1   : > { %1563 = vmatprep.subr.bf16.mxu0 %v1731_v18  ;;  %v302_v29 = vcombine.low %v293_v22, %v301_v23  ;;  %v1203_v42 = vrot.slane %v1196_v37, %v1166_v21 }
  0xb2   : > { %1141 = vmatprep.mubr.bf16.mxu0 %v979_v27 }
  0xb3   : > { %v309_v31 = vrot.slane %v302_v29, %v1971_v60 }
  0xb4   : > { %1564 = vmatpush3.bf16.msra.mxu0 %v1733_v26 }
  0xb5   : > { %1565 = vmatprep.subr.bf16.mxu0 %v1735_v28  ;;  %v310_v63 = vcombine.high %v309_v31, %v309_v31  ;;  %v313_v33 = vpack.c.bf16 %v309_v31, %v309_v31 }
  0xb7   : > { %v314_v35 = vpack.c.bf16 %v310_v63, %v310_v63 }
  0xb8   : > { %1566 = vmatpush3.bf16.msra.mxu0 %v1737_v52 }
  0xb9   : > { %820 = vmatprep.mubr.bf16.mxu1 %v314_v35  ;;  %1567 = vmatprep.subr.bf16.mxu0 %v1738_v32 }
  0xba   : > { %821 = vmatmul.mubr.bf16.vlgmr.msra.gmra.mxu1 %v313_v33 }
  0xbb   : > { %1583 = vmatpush3.bf16.msra.mxu1 %v1742_v53  ;;  %1586 = vmatprep.mubr.msk.bf16.mxu1 %vm1760_vm10, %v1757_v25 }
  0xbc   : > { %1568 = vmatpush3.bf16.msra.mxu0 %v1739_v0  ;;  %1584 = vmatprep.subr.bf16.mxu1 %v1757_v25 }
  0xbd   : > { %1569 = vmatprep.subr.bf16.mxu0 %v1740_v36 }
  0xbf   : > { %1585 = vmatpush3.bf16.msra.mxu1 %v1745_v38 }
  0xc0   : > { %1570 = vmatpush3.bf16.msra.mxu0 %v1741_v39 }
  0xc1   : > { %1571 = vmatprep.subr.bf16.mxu0 %v1743_v40 }
  0xc2   : > { %1587 = vmatmul.mubr.msk.bf16.vlgmr.msra.gmra.mxu1 %vm267_vm0, %v1203_v42 }
  0xc4   : > { %1572 = vmatpush3.bf16.msra.mxu0 %v1744_v43 }
  0xc7   : > { %1142 = vmatmul.mubr.bf16.vlgmr.msra.gmra.mxu0 %v978_v44 }
 0x167   : > { %v1529_v45 = vpop.f32.mrf.mxu0 }
 0x169   : > { %v1530_v25 = vpop.f32.mrf.mxu0 }
 0x16a   : > { %v1531_v62 = vadd.f32 %v1530_v25, %v1529_v45 }
 0x16b   : > { %v1532_v46 = vpop.f32.mrf.mxu0 }
 0x16d   : > { %v1533_v47 = vpop.f32.mrf.mxu0 }
 0x17a   : > { %v1551_v48 = vpop.f32.mrf.mxu1 }
 0x17c   : > { %v1552_v49 = vpop.f32.mrf.mxu1 }
 0x17d   : > { %v1553_v57 = vadd.f32 %v1552_v49, %v1551_v48 }
 0x17e   : > { %v1554_v50 = vpop.f32.mrf.mxu1 }
 0x17f   : > { %v823_v2 = vadd.f32 %v1553_v57, %v1531_v62 }
 0x180   : > { %v1555_v51 = vpop.f32.mrf.mxu1 }
 0x182   : > { %v1253_v55 = vpop.f32.mrf.mxu1 }
 0x184   : > { %v1588_v56 = vpop.f32.mrf.mxu1 }
 0x186   : > { %v1256_v58 = vpop.f32.mrf.mxu1 }
 0x187   : > { %v1573_v59 = vpop.f32.mrf.mxu0 }
 0x188   : > { %v1589_v1 = vpop.f32.mrf.mxu1 }
 0x189   : > { %v1574_v61 = vpop.f32.mrf.mxu0 }
 0x18a   : > { %v1575_v3 = vadd.f32 %v1574_v61, %v1573_v59 }
 0x18b   : > { %v1576_v4 = vpop.f32.mrf.mxu0 }
 0x18c   : > { %v1149_v5 = vadd.f32 %v1575_v3, %v823_v2 }
 0x18d   : > { %v1577_v7 = vpop.f32.mrf.mxu0 }
 0x18e   : > { %v1259_v8 = vadd.f32 %v1253_v55, %v1149_v5 }
 0x190   : > { %v1267_v9 = vadd.f32 %v1510_v6, %v1259_v8 }
 0x192   : > { %v1275_v10 = vrot.slane %v1267_v9, %v1971_v60 }
 0x194   : > { %v1276_v11 = vcombine.high %v1275_v10, %v1275_v10  ;;  %v1279_v12 = vpack.c.bf16 %v1275_v10, %v1275_v10 }
 0x196   : > { %v1280_v13 = vpack.c.bf16 %v1276_v11, %v1276_v11  ;;  %1282 = vst.msk [vmem:[%s168_s17] sm:$0x1] %vm1281_vm11, %v1279_v12 }
 0x198   : > { %1283 = vst.msk [vmem:[%s168_s17 + $0x1] sm:$0x1] %vm1281_vm11, %v1280_v13 }
 0x199 PF: > { %s13_s12 = sadd.s32 1, %s1752_s12  }
 0x19a   : > { %p10_p4 = scmp.ge.s32.totalorder %s13_s12, 4  }
 0x19c   :  { %12 = sbr.rel (!%p10_p4) target bundleno = 1 (0x1), region = 69 }

</bundles_post_ra>
